<compile_context>
chip_gen: v7x
topology: tpu7x:2x2x1
jax: 0.10.0
libtpu: 0.0.40
codegen_flags: <defaults>
</compile_context>

<pallas_src>
import functools

import numpy as np
import jax
import jax.numpy as jnp
from jax.experimental import pallas as pl
from jax.experimental.pallas import tpu as pltpu


# ----------------------------- fused Pallas kernel -------------------------- #

def _encoder_kernel(x_ref, w1_ref, w2_ref, wt_ref, vec_ref, csum_ref, o_ref,
                    *, bn_n, bn_eps, enc_dim):
    f32, bf16 = jnp.float32, jnp.bfloat16

    x = x_ref[...]                                               # [B, 784] bf16

    # Conv2d(1, 8, 3, s=2, p=1) + ReLU  -> [B, 14*14*8]
    y1 = jnp.dot(x, w1_ref[...], preferred_element_type=f32)
    y1 = jnp.maximum(y1 + vec_ref[0:1, :], 0.0)

    # Conv2d(8, 16, 3, s=2, p=1)        -> [B, 7*7*16]   (pre-activation, f32)
    z2 = jnp.dot(y1.astype(bf16), w2_ref[...], preferred_element_type=f32)
    z2 = z2 + vec_ref[1:2, 0:784]

    # BatchNorm2d(16) (train-mode batch statistics, biased variance) + ReLU.
    # Channel reduce/expand over the (h, w, c) lane grouping via tiny constant
    # matmuls; rsqrt goes to the otherwise-idle EUP slot.
    csum = csum_ref[...]                                         # [784, 16]
    csum_t = vec_ref[8:24, 0:784]                                # [16, 784]
    inv_n = 1.0 / bn_n
    mean_c = jnp.dot(jnp.sum(z2, axis=0, keepdims=True), csum,
                     preferred_element_type=f32) * inv_n         # [1, 16]
    msq_c = jnp.dot(jnp.sum(z2 * z2, axis=0, keepdims=True), csum,
                    preferred_element_type=f32) * inv_n          # [1, 16]
    var_c = msq_c - mean_c * mean_c
    scale_c = vec_ref[5:6, 0:16] * jax.lax.rsqrt(var_c + bn_eps)   # gamma/std
    shift_c = vec_ref[6:7, 0:16] - mean_c * scale_c                # beta - m*s
    scale_cols = jnp.dot(scale_c, csum_t, preferred_element_type=f32)
    shift_cols = jnp.dot(shift_c, csum_t, preferred_element_type=f32)
    y2 = jnp.maximum(z2 * scale_cols + shift_cols, 0.0)          # [B, 784]

    # Conv2d(16, 32, 3, s=2, p=0) + ReLU -> [B, 288]; output lanes already in
    # PyTorch (c, h, w) flatten order.
    y3 = jnp.dot(y2.astype(bf16), wt_ref[0:784, :],
                 preferred_element_type=f32)
    y3 = jnp.maximum(y3 + vec_ref[2:3, 0:288], 0.0)

    # Linear(288, 128) + ReLU
    h1 = jnp.dot(y3.astype(bf16), wt_ref[784:1072, 0:128],
                 preferred_element_type=f32)
    h1 = jnp.maximum(h1 + vec_ref[3:4, 0:128], 0.0)

    # Linear(128, encoded_space_dim)
    out = jnp.dot(h1.astype(bf16), wt_ref[1072:1200, 0:enc_dim],
                  preferred_element_type=f32)
    o_ref[...] = out + vec_ref[4:5, 0:enc_dim]


# --------------------------- operand preparation ----------------------------- #

def _conv_as_matmul(w_oihw, hi, wi, ho, wo, stride, pad, chw_out):
    """Dense [Hi*Wi*Ci, Ho*Wo*Co] bf16 matrix implementing a 3x3 strided conv
    (zero padding included).  Input lanes ordered (h, w, c); output lanes
    ordered (h, w, c), or (c, h, w) (PyTorch flatten order) if chw_out."""
    co, ci, kh, kw = w_oihw.shape
    ph = np.zeros((hi, ho, kh), np.float32)
    for y in range(ho):
        for k in range(kh):
            a = stride * y - pad + k
            if 0 <= a < hi:
                ph[a, y, k] = 1.0
    pw = np.zeros((wi, wo, kw), np.float32)
    for xx in range(wo):
        for l in range(kw):
            b = stride * xx - pad + l
            if 0 <= b < wi:
                pw[b, xx, l] = 1.0
    w = w_oihw.astype(jnp.float32)                       # [O, C, kh, kw]
    spec = 'ayk,bxl,ockl->abcoyx' if chw_out else 'ayk,bxl,ockl->abcyxo'
    m = jnp.einsum(spec, ph, pw, w)
    return m.reshape(hi * wi * ci, ho * wo * co).astype(jnp.bfloat16)


def _prepare_operands(params, enc_dim):
    # Per-layer dense matrices (O(1) in batch).
    w1 = _conv_as_matmul(params["c1_w"], 28, 28, 14, 14, 2, 1, chw_out=False)
    w2 = _conv_as_matmul(params["c2_w"], 14, 14, 7, 7, 2, 1, chw_out=False)
    w3 = _conv_as_matmul(params["c3_w"], 7, 7, 3, 3, 2, 0, chw_out=True)

    # Pack conv3 + both Linear weights into one bf16 canvas [1200, 288].
    wl1 = params["l1_w"].astype(jnp.bfloat16)                     # [288, 128]
    wl2 = params["l2_w"].astype(jnp.bfloat16)                     # [128, enc]
    tail = jnp.concatenate([
        w3,                                                       # rows    0:784
        jnp.pad(wl1, ((0, 0), (0, 288 - 128))),                   # rows  784:1072
        jnp.pad(wl2, ((0, 0), (0, 288 - enc_dim))),               # rows 1072:1200
    ], axis=0)

    # Small f32 vector slab: biases (pre-expanded per lane), BN gamma/beta,
    # and csum_t, all packed into one [24, 1568] array (one DMA).
    width = 1568

    def row(v):
        v = jnp.asarray(v, jnp.float32).reshape(1, -1)
        return jnp.pad(v, ((0, 0), (0, width - v.shape[1])))

    csum_np = np.tile(np.eye(16, dtype=np.float32), (49, 1))      # [784, 16]
    vecs = jnp.concatenate([
        row(jnp.tile(params["c1_b"], 14 * 14)),    # row 0: conv1 bias  [1568]
        row(jnp.tile(params["c2_b"], 7 * 7)),      # row 1: conv2 bias  [784]
        row(jnp.repeat(params["c3_b"], 3 * 3)),    # row 2: conv3 bias  [288]
        row(params["l1_b"]),                       # row 3: lin1 bias   [128]
        row(params["l2_b"]),                       # row 4: lin2 bias   [enc]
        row(params["bn_g"]),                       # row 5: BN gamma    [16]
        row(params["bn_b"]),                       # row 6: BN beta     [16]
        jnp.zeros((1, width), jnp.float32),        # row 7: padding
        jnp.pad(jnp.asarray(csum_np.T),            # rows 8:24: csum_t  [16,784]
                ((0, 0), (0, width - 784))),
    ], axis=0)

    return dict(w1=w1, w2=w2, tail=tail, vecs=vecs,
                csum=jnp.asarray(csum_np))


def _full_spec(a):
    ndim = a.ndim
    return pl.BlockSpec(tuple(a.shape), lambda i, _n=ndim: (0,) * _n)


# --------------------------------- forward ----------------------------------- #

def encoder_forward(params, x_nchw):
    batch = x_nchw.shape[0]
    assert x_nchw.shape[1:] == (1, 28, 28), x_nchw.shape
    enc_dim = params["l2_w"].shape[1]
    assert 1 <= enc_dim <= 288, enc_dim

    ops = _prepare_operands(params, enc_dim)
    # C == 1, so NCHW -> [B, H*W] is a pure reshape (lanes ordered (h, w)).
    x2d = x_nchw.astype(jnp.bfloat16).reshape(batch, 28 * 28)

    args = [x2d, ops["w1"], ops["w2"], ops["tail"], ops["vecs"], ops["csum"]]

    kernel = functools.partial(_encoder_kernel,
                               bn_n=float(batch * 7 * 7), bn_eps=1e-5,
                               enc_dim=enc_dim)

    # Single grid step: batch stays in one block so BatchNorm uses exact
    # full-batch statistics.  Weight footprint is O(1) (~5.6 MiB bf16);
    # activations are O(B) and tiny, so this fits VMEM on v5e/v6e/v7x.
    return pl.pallas_call(
        kernel,
        out_shape=jax.ShapeDtypeStruct((batch, enc_dim), jnp.float32),
        grid=(1,),
        in_specs=[_full_spec(a) for a in args],
        out_specs=pl.BlockSpec((batch, enc_dim), lambda i: (0, 0)),
        compiler_params=pltpu.CompilerParams(
            dimension_semantics=("arbitrary",),
            vmem_limit_bytes=32 * 1024 * 1024),
    )(*args)


# ------------------------------ parameters ----------------------------------- #

def init_params(key, encoded_space_dim):
    ks = jax.random.split(key, 10)

    def rnd(k, shape, scale=0.1):
        return (scale * jax.random.normal(k, shape)).astype(jnp.float32)

    return {
        "c1_w": rnd(ks[0], (8, 1, 3, 3)),   "c1_b": rnd(ks[1], (8,)),
        "c2_w": rnd(ks[2], (16, 8, 3, 3)),  "c2_b": rnd(ks[3], (16,)),
        "bn_g": jnp.ones((16,), jnp.float32),
        "bn_b": jnp.zeros((16,), jnp.float32),
        "c3_w": rnd(ks[4], (32, 16, 3, 3)), "c3_b": rnd(ks[5], (32,)),
        "l1_w": rnd(ks[6], (3 * 3 * 32, 128)), "l1_b": rnd(ks[7], (128,)),
        "l2_w": rnd(ks[8], (128, encoded_space_dim)),
        "l2_b": rnd(ks[9], (encoded_space_dim,)),
    }


# -------------------------- pure-JAX reference -------------------------------- #

def _ref_conv(x_nhwc, w_oihw, b, stride, pad):
    w = jnp.transpose(w_oihw, (2, 3, 1, 0))  # HWIO
    y = jax.lax.conv_general_dilated(
        x_nhwc, w, window_strides=(stride, stride),
        padding=((pad, pad), (pad, pad)),
        dimension_numbers=("NHWC", "HWIO", "NHWC"))
    return y + b.reshape(1, 1, 1, -1)


def encoder_reference(params, x_nchw):
    B = x_nchw.shape[0]
    x = jnp.transpose(x_nchw, (0, 2, 3, 1)).astype(jnp.float32)
    x = jax.nn.relu(_ref_conv(x, params["c1_w"], params["c1_b"], 2, 1))
    x = _ref_conv(x, params["c2_w"], params["c2_b"], 2, 1)
    mean = jnp.mean(x, axis=(0, 1, 2), keepdims=True)
    var = jnp.mean((x - mean) ** 2, axis=(0, 1, 2), keepdims=True)
    x = (x - mean) * jax.lax.rsqrt(var + 1e-5) \
        * params["bn_g"].reshape(1, 1, 1, -1) + params["bn_b"].reshape(1, 1, 1, -1)
    x = jax.nn.relu(x)
    x = jax.nn.relu(_ref_conv(x, params["c3_w"], params["c3_b"], 2, 0))
    x = jnp.transpose(x, (0, 3, 1, 2)).reshape(B, -1)      # PyTorch (c,h,w) flatten
    x = jax.nn.relu(x @ params["l1_w"] + params["l1_b"])
    return x @ params["l2_w"] + params["l2_b"]


# ---------------------------------- main -------------------------------------- #

if __name__ == "__main__":
    key = jax.random.PRNGKey(0)
    k_x, k_p = jax.random.split(key)

    encoded_space_dim = 32
    batch = 2
    # Input must be 1x28x28 for the 3*3*32 flatten dimension in the module.
    x = jax.random.normal(k_x, (batch, 1, 28, 28), dtype=jnp.float32)
    params = init_params(k_p, encoded_space_dim)

    fwd = jax.jit(encoder_forward)
    out = jax.block_until_ready(fwd(params, x))

    ref = jax.block_until_ready(encoder_reference(params, x))
    assert out.shape == (batch, encoded_space_dim), out.shape
    # bf16 MXU operands (per perf review) with f32 accumulation: tolerance
    # loosened from the all-f32 2e-3 accordingly.
    assert jnp.allclose(out, ref, atol=3e-2, rtol=3e-2), \
        float(jnp.max(jnp.abs(out - ref)))

    print("KERNEL_OK")
</pallas_src>

<mosaic_0001>
module attributes {stable_mosaic.version = 11 : i64} {
  func.func @_encoder_kernel(%arg0: i32, %arg1: memref<2x784xbf16, #tpu.memory_space<vmem>>, %arg2: memref<784x1568xbf16, #tpu.memory_space<vmem>>, %arg3: memref<1568x784xbf16, #tpu.memory_space<vmem>>, %arg4: memref<1200x288xbf16, #tpu.memory_space<vmem>>, %arg5: memref<24x1568xf32, #tpu.memory_space<vmem>>, %arg6: memref<784x16xf32, #tpu.memory_space<vmem>>, %arg7: memref<2x32xf32, #tpu.memory_space<vmem>>) attributes {dimension_semantics = [#tpu.dimension_semantics<arbitrary>], iteration_bounds = array<i64: 1>, scalar_prefetch = 0 : i64, scratch_operands = 0 : i64, tpu.core_type = #tpu.core_type<tc>, window_params = [{pipeline_mode = #tpu.pipeline_mode<synchronous>, transform_indices = @transform_0, window_bounds = array<i64: 2, 784>}, {pipeline_mode = #tpu.pipeline_mode<synchronous>, transform_indices = @transform_1, window_bounds = array<i64: 784, 1568>}, {pipeline_mode = #tpu.pipeline_mode<synchronous>, transform_indices = @transform_2, window_bounds = array<i64: 1568, 784>}, {pipeline_mode = #tpu.pipeline_mode<synchronous>, transform_indices = @transform_3, window_bounds = array<i64: 1200, 288>}, {pipeline_mode = #tpu.pipeline_mode<synchronous>, transform_indices = @transform_4, window_bounds = array<i64: 24, 1568>}, {pipeline_mode = #tpu.pipeline_mode<synchronous>, transform_indices = @transform_5, window_bounds = array<i64: 784, 16>}, {pipeline_mode = #tpu.pipeline_mode<synchronous>, transform_indices = @transform_6, window_bounds = array<i64: 2, 32>}]} {
    %c0 = arith.constant 0 : index
    %c0_0 = arith.constant 0 : index
    %0 = vector.load %arg1[%c0, %c0_0] : memref<2x784xbf16, #tpu.memory_space<vmem>>, vector<2x784xbf16>
    %c0_1 = arith.constant 0 : index
    %c0_2 = arith.constant 0 : index
    %1 = vector.load %arg2[%c0_1, %c0_2] : memref<784x1568xbf16, #tpu.memory_space<vmem>>, vector<784x1568xbf16>
    %cst = arith.constant dense<0.000000e+00> : vector<2x1568xf32>
    %2 = tpu.matmul %0, %1, %cst {dimension_numbers = #tpu.dot_dimension_numbers<[1], [0], [0], [1], [0, 0, 1, 1], [], []>} : vector<2x784xbf16>, vector<784x1568xbf16>, vector<2x1568xf32> -> vector<2x1568xf32>
    %c0_3 = arith.constant 0 : index
    %c0_4 = arith.constant 0 : index
    %3 = vector.load %arg5[%c0_3, %c0_4] : memref<24x1568xf32, #tpu.memory_space<vmem>>, vector<1x1568xf32>
    %4 = vector.broadcast %3 : vector<1x1568xf32> to vector<2x1568xf32>
    %5 = arith.addf %2, %4 : vector<2x1568xf32>
    %cst_5 = arith.constant 0.000000e+00 : f32
    %6 = vector.broadcast %cst_5 : f32 to vector<2x1568xf32>
    %7 = arith.maximumf %5, %6 : vector<2x1568xf32>
    %8 = arith.truncf %7 : vector<2x1568xf32> to vector<2x1568xbf16>
    %c0_6 = arith.constant 0 : index
    %c0_7 = arith.constant 0 : index
    %9 = vector.load %arg3[%c0_6, %c0_7] : memref<1568x784xbf16, #tpu.memory_space<vmem>>, vector<1568x784xbf16>
    %cst_8 = arith.constant dense<0.000000e+00> : vector<2x784xf32>
    %10 = tpu.matmul %8, %9, %cst_8 {dimension_numbers = #tpu.dot_dimension_numbers<[1], [0], [0], [1], [0, 0, 1, 1], [], []>} : vector<2x1568xbf16>, vector<1568x784xbf16>, vector<2x784xf32> -> vector<2x784xf32>
    %c1 = arith.constant 1 : index
    %c0_9 = arith.constant 0 : index
    %11 = vector.load %arg5[%c1, %c0_9] : memref<24x1568xf32, #tpu.memory_space<vmem>>, vector<1x784xf32>
    %12 = vector.broadcast %11 : vector<1x784xf32> to vector<2x784xf32>
    %13 = arith.addf %10, %12 : vector<2x784xf32>
    %c0_10 = arith.constant 0 : index
    %c0_11 = arith.constant 0 : index
    %14 = vector.load %arg6[%c0_10, %c0_11] : memref<784x16xf32, #tpu.memory_space<vmem>>, vector<784x16xf32>
    %c8 = arith.constant 8 : index
    %c0_12 = arith.constant 0 : index
    %15 = vector.load %arg5[%c8, %c0_12] : memref<24x1568xf32, #tpu.memory_space<vmem>>, vector<16x784xf32>
    %cst_13 = arith.constant dense<0.000000e+00> : vector<784xf32>
    %16 = vector.multi_reduction <add>, %13, %cst_13 [0] : vector<2x784xf32> to vector<784xf32>
    %17 = vector.shape_cast %16 : vector<784xf32> to vector<1x784xf32>
    %cst_14 = arith.constant dense<0.000000e+00> : vector<1x16xf32>
    %18 = tpu.matmul %17, %14, %cst_14 {dimension_numbers = #tpu.dot_dimension_numbers<[1], [0], [0], [1], [0, 0, 1, 1], [], []>} : vector<1x784xf32>, vector<784x16xf32>, vector<1x16xf32> -> vector<1x16xf32>
    %cst_15 = arith.constant 0.0102040814 : f32
    %19 = vector.broadcast %cst_15 : f32 to vector<1x16xf32>
    %20 = arith.mulf %18, %19 : vector<1x16xf32>
    %21 = arith.mulf %13, %13 : vector<2x784xf32>
    %cst_16 = arith.constant dense<0.000000e+00> : vector<784xf32>
    %22 = vector.multi_reduction <add>, %21, %cst_16 [0] : vector<2x784xf32> to vector<784xf32>
    %23 = vector.shape_cast %22 : vector<784xf32> to vector<1x784xf32>
    %cst_17 = arith.constant dense<0.000000e+00> : vector<1x16xf32>
    %24 = tpu.matmul %23, %14, %cst_17 {dimension_numbers = #tpu.dot_dimension_numbers<[1], [0], [0], [1], [0, 0, 1, 1], [], []>} : vector<1x784xf32>, vector<784x16xf32>, vector<1x16xf32> -> vector<1x16xf32>
    %cst_18 = arith.constant 0.0102040814 : f32
    %25 = vector.broadcast %cst_18 : f32 to vector<1x16xf32>
    %26 = arith.mulf %24, %25 : vector<1x16xf32>
    %27 = arith.mulf %20, %20 : vector<1x16xf32>
    %28 = arith.subf %26, %27 : vector<1x16xf32>
    %c5 = arith.constant 5 : index
    %c0_19 = arith.constant 0 : index
    %29 = vector.load %arg5[%c5, %c0_19] : memref<24x1568xf32, #tpu.memory_space<vmem>>, vector<1x16xf32>
    %cst_20 = arith.constant 9.99999974E-6 : f32
    %30 = vector.broadcast %cst_20 : f32 to vector<1x16xf32>
    %31 = arith.addf %28, %30 : vector<1x16xf32>
    %32 = math.rsqrt %31 : vector<1x16xf32>
    %33 = arith.mulf %29, %32 : vector<1x16xf32>
    %c6 = arith.constant 6 : index
    %c0_21 = arith.constant 0 : index
    %34 = vector.load %arg5[%c6, %c0_21] : memref<24x1568xf32, #tpu.memory_space<vmem>>, vector<1x16xf32>
    %35 = arith.mulf %20, %33 : vector<1x16xf32>
    %36 = arith.subf %34, %35 : vector<1x16xf32>
    %cst_22 = arith.constant dense<0.000000e+00> : vector<1x784xf32>
    %37 = tpu.matmul %33, %15, %cst_22 {dimension_numbers = #tpu.dot_dimension_numbers<[1], [0], [0], [1], [0, 0, 1, 1], [], []>} : vector<1x16xf32>, vector<16x784xf32>, vector<1x784xf32> -> vector<1x784xf32>
    %cst_23 = arith.constant dense<0.000000e+00> : vector<1x784xf32>
    %38 = tpu.matmul %36, %15, %cst_23 {dimension_numbers = #tpu.dot_dimension_numbers<[1], [0], [0], [1], [0, 0, 1, 1], [], []>} : vector<1x16xf32>, vector<16x784xf32>, vector<1x784xf32> -> vector<1x784xf32>
    %39 = vector.broadcast %37 : vector<1x784xf32> to vector<2x784xf32>
    %40 = arith.mulf %13, %39 : vector<2x784xf32>
    %41 = vector.broadcast %38 : vector<1x784xf32> to vector<2x784xf32>
    %42 = arith.addf %40, %41 : vector<2x784xf32>
    %cst_24 = arith.constant 0.000000e+00 : f32
    %43 = vector.broadcast %cst_24 : f32 to vector<2x784xf32>
    %44 = arith.maximumf %42, %43 : vector<2x784xf32>
    %45 = arith.truncf %44 : vector<2x784xf32> to vector<2x784xbf16>
    %c0_25 = arith.constant 0 : index
    %c0_26 = arith.constant 0 : index
    %46 = vector.load %arg4[%c0_25, %c0_26] : memref<1200x288xbf16, #tpu.memory_space<vmem>>, vector<784x288xbf16>
    %cst_27 = arith.constant dense<0.000000e+00> : vector<2x288xf32>
    %47 = tpu.matmul %45, %46, %cst_27 {dimension_numbers = #tpu.dot_dimension_numbers<[1], [0], [0], [1], [0, 0, 1, 1], [], []>} : vector<2x784xbf16>, vector<784x288xbf16>, vector<2x288xf32> -> vector<2x288xf32>
    %c2 = arith.constant 2 : index
    %c0_28 = arith.constant 0 : index
    %48 = vector.load %arg5[%c2, %c0_28] : memref<24x1568xf32, #tpu.memory_space<vmem>>, vector<1x288xf32>
    %49 = vector.broadcast %48 : vector<1x288xf32> to vector<2x288xf32>
    %50 = arith.addf %47, %49 : vector<2x288xf32>
    %cst_29 = arith.constant 0.000000e+00 : f32
    %51 = vector.broadcast %cst_29 : f32 to vector<2x288xf32>
    %52 = arith.maximumf %50, %51 : vector<2x288xf32>
    %53 = arith.truncf %52 : vector<2x288xf32> to vector<2x288xbf16>
    %c784 = arith.constant 784 : index
    %c0_30 = arith.constant 0 : index
    %54 = vector.load %arg4[%c784, %c0_30] : memref<1200x288xbf16, #tpu.memory_space<vmem>>, vector<288x128xbf16>
    %cst_31 = arith.constant dense<0.000000e+00> : vector<2x128xf32>
    %55 = tpu.matmul %53, %54, %cst_31 {dimension_numbers = #tpu.dot_dimension_numbers<[1], [0], [0], [1], [0, 0, 1, 1], [], []>} : vector<2x288xbf16>, vector<288x128xbf16>, vector<2x128xf32> -> vector<2x128xf32>
    %c3 = arith.constant 3 : index
    %c0_32 = arith.constant 0 : index
    %56 = vector.load %arg5[%c3, %c0_32] : memref<24x1568xf32, #tpu.memory_space<vmem>>, vector<1x128xf32>
    %57 = vector.broadcast %56 : vector<1x128xf32> to vector<2x128xf32>
    %58 = arith.addf %55, %57 : vector<2x128xf32>
    %cst_33 = arith.constant 0.000000e+00 : f32
    %59 = vector.broadcast %cst_33 : f32 to vector<2x128xf32>
    %60 = arith.maximumf %58, %59 : vector<2x128xf32>
    %61 = arith.truncf %60 : vector<2x128xf32> to vector<2x128xbf16>
    %c1072 = arith.constant 1072 : index
    %c0_34 = arith.constant 0 : index
    %62 = vector.load %arg4[%c1072, %c0_34] : memref<1200x288xbf16, #tpu.memory_space<vmem>>, vector<128x32xbf16>
    %cst_35 = arith.constant dense<0.000000e+00> : vector<2x32xf32>
    %63 = tpu.matmul %61, %62, %cst_35 {dimension_numbers = #tpu.dot_dimension_numbers<[1], [0], [0], [1], [0, 0, 1, 1], [], []>} : vector<2x128xbf16>, vector<128x32xbf16>, vector<2x32xf32> -> vector<2x32xf32>
    %c4 = arith.constant 4 : index
    %c0_36 = arith.constant 0 : index
    %64 = vector.load %arg5[%c4, %c0_36] : memref<24x1568xf32, #tpu.memory_space<vmem>>, vector<1x32xf32>
    %65 = vector.broadcast %64 : vector<1x32xf32> to vector<2x32xf32>
    %66 = arith.addf %63, %65 : vector<2x32xf32>
    %c0_37 = arith.constant 0 : index
    %c0_38 = arith.constant 0 : index
    %67 = vector.load %arg7[%c0_37, %c0_38] : memref<2x32xf32, #tpu.memory_space<vmem>>, vector<2x32xf32>
    tpu.vector_store %arg7[%c0_37, %c0_38], %66 {strides = array<i32>} : memref<2x32xf32, #tpu.memory_space<vmem>>, vector<2x32xf32>,
    return
  }
  func.func @transform_0(%arg0: i32) -> (i32, i32) {
    %c0_i32 = arith.constant 0 : i32
    %c0_i32_0 = arith.constant 0 : i32
    %c0_i32_1 = arith.constant 0 : i32
    return %c0_i32, %c0_i32_0 : i32, i32
  }
  func.func @transform_1(%arg0: i32) -> (i32, i32) {
    %c0_i32 = arith.constant 0 : i32
    %c0_i32_0 = arith.constant 0 : i32
    %c0_i32_1 = arith.constant 0 : i32
    return %c0_i32, %c0_i32_0 : i32, i32
  }
  func.func @transform_2(%arg0: i32) -> (i32, i32) {
    %c0_i32 = arith.constant 0 : i32
    %c0_i32_0 = arith.constant 0 : i32
    %c0_i32_1 = arith.constant 0 : i32
    return %c0_i32, %c0_i32_0 : i32, i32
  }
  func.func @transform_3(%arg0: i32) -> (i32, i32) {
    %c0_i32 = arith.constant 0 : i32
    %c0_i32_0 = arith.constant 0 : i32
    %c0_i32_1 = arith.constant 0 : i32
    return %c0_i32, %c0_i32_0 : i32, i32
  }
  func.func @transform_4(%arg0: i32) -> (i32, i32) {
    %c0_i32 = arith.constant 0 : i32
    %c0_i32_0 = arith.constant 0 : i32
    %c0_i32_1 = arith.constant 0 : i32
    return %c0_i32, %c0_i32_0 : i32, i32
  }
  func.func @transform_5(%arg0: i32) -> (i32, i32) {
    %c0_i32 = arith.constant 0 : i32
    %c0_i32_0 = arith.constant 0 : i32
    %c0_i32_1 = arith.constant 0 : i32
    return %c0_i32, %c0_i32_0 : i32, i32
  }
  func.func @transform_6(%arg0: i32) -> (i32, i32) {
    %c0_i32 = arith.constant 0 : i32
    %c0_i32_0 = arith.constant 0 : i32
    %c0_i32_1 = arith.constant 0 : i32
    return %c0_i32, %c0_i32_0 : i32, i32
  }
}

</mosaic_0001>

<bundles_post_ra>
// kernel: tile.13
= control target key start
LH: loop header
LB: loop body
LE: loop exit
PB: predicated region body
PF: predicated region fallthrough
CT: control target
= control target key end

     0   :  { %s166_s0 = inlined_call_operand.vmem [shape: f32[8], index: 0, kind: input, shape index: {}]   ;;  %s167_s1 = inlined_call_operand.vmem [shape: f32[196,8], index: 1, kind: output, shape index: {}]  }
   0x1   :  { %v4_v0 = vld [vmem:[%s166_s0] ss:$0 sm:$0xff] }
   0x2   :  { %5 = vst [vmem:[%s167_s1] sm:$0xff] %v4_v0  ;;  %54 = vst [vmem:[%s167_s1 + $0x8] sm:$0xff] %v4_v0 }
   0x3   :  { %55 = vst [vmem:[%s167_s1 + $0x10] sm:$0xff] %v4_v0  ;;  %56 = vst [vmem:[%s167_s1 + $0x18] sm:$0xff] %v4_v0 }
   0x4   :  { %57 = vst [vmem:[%s167_s1 + $0x20] sm:$0xff] %v4_v0  ;;  %58 = vst [vmem:[%s167_s1 + $0x28] sm:$0xff] %v4_v0 }
   0x5   :  { %59 = vst [vmem:[%s167_s1 + $0x30] sm:$0xff] %v4_v0  ;;  %60 = vst [vmem:[%s167_s1 + $0x38] sm:$0xff] %v4_v0 }
   0x6   :  { %61 = vst [vmem:[%s167_s1 + $0x40] sm:$0xff] %v4_v0  ;;  %62 = vst [vmem:[%s167_s1 + $0x48] sm:$0xff] %v4_v0 }
   0x7   :  { %63 = vst [vmem:[%s167_s1 + $0x50] sm:$0xff] %v4_v0  ;;  %64 = vst [vmem:[%s167_s1 + $0x58] sm:$0xff] %v4_v0 }
   0x8   :  { %65 = vst [vmem:[%s167_s1 + $0x60] sm:$0xff] %v4_v0  ;;  %66 = vst [vmem:[%s167_s1 + $0x68] sm:$0xff] %v4_v0 }
   0x9   :  { %67 = vst [vmem:[%s167_s1 + $0x70] sm:$0xff] %v4_v0  ;;  %68 = vst [vmem:[%s167_s1 + $0x78] sm:$0xff] %v4_v0 }
   0xa   :  { %69 = vst [vmem:[%s167_s1 + $0x80] sm:$0xff] %v4_v0  ;;  %70 = vst [vmem:[%s167_s1 + $0x88] sm:$0xff] %v4_v0 }
   0xb   :  { %71 = vst [vmem:[%s167_s1 + $0x90] sm:$0xff] %v4_v0  ;;  %72 = vst [vmem:[%s167_s1 + $0x98] sm:$0xff] %v4_v0 }
   0xc   :  { %73 = vst [vmem:[%s167_s1 + $0xa0] sm:$0xff] %v4_v0  ;;  %74 = vst [vmem:[%s167_s1 + $0xa8] sm:$0xff] %v4_v0 }
   0xd   :  { %75 = vst [vmem:[%s167_s1 + $0xb0] sm:$0xff] %v4_v0  ;;  %76 = vst [vmem:[%s167_s1 + $0xb8] sm:$0xff] %v4_v0 }
   0xe   :  { %77 = vst [vmem:[%s167_s1 + $0xc0] sm:$0xff] %v4_v0 }

// kernel: tile.14
= control target key start
LH: loop header
LB: loop body
LE: loop exit
PB: predicated region body
PF: predicated region fallthrough
CT: control target
= control target key end

     0   :  { %vm6_vm0 = vcmask 1043458   ;;  %s96_s6 = smov 3  ;;  %s99_s9 = smov 12  ;;  %vm10_vm1 = vcmask 1045508   ;;  %vm14_vm2 = vcmask 1047558   ;;  %vm29_vm3 = vcmask 1044484   ;;  %s1239_s0 = inlined_call_operand.vmem [shape: f32[196,8], index: 0, kind: input, shape index: {}]   ;;  %s1240_s1 = inlined_call_operand.vmem [shape: f32[1,1568], index: 1, kind: output, shape index: {}]  }
   0x1   :  { %v695_v0 = vld [vmem:[%s1239_s0 + $0x8e] ss:$16 sm:%s96_s6]   ;;  %s60_s12 = smov 3  ;;  %s63_s13 = smov 12  ;;  %vm16_vm4 = vcmask 64512   ;;  %vm56_vm5 = vcmask 1048512  }
   0x2   :  { %v696_v1 = vld [vmem:[%s1239_s0 + $0x8e] ss:$16 sm:%s99_s9]   ;;  %v689_v3 = vld [vmem:[%s1239_s0 + $0x8f] ss:$16 sm:%s60_s12]   ;;  %s73_s18 = smov 3  ;;  %s76_s19 = smov 12 }
   0x3   :  { %v102_v2 = vsel %vm6_vm0, %v696_v1, %v695_v0  ;;  %v690_v4 = vld [vmem:[%s1239_s0 + $0x8f] ss:$16 sm:%s63_s13]   ;;  %s805_s20 = smov 112   ;;  %v691_v6 = vld [vmem:[%s1239_s0 + $0xe] ss:$16 sm:%s73_s18]   ;;  %s81_s23 = smov 48 }
   0x4   :  { %103 = vrot.lane.b32.xlu1 %v102_v2, %s805_s20  ;;  %v66_v5 = vsel %vm6_vm0, %v690_v4, %v689_v3  ;;  %s86_s24 = smov 192  ;;  %s806_s25 = smov 120   ;;  %v692_v7 = vld [vmem:[%s1239_s0 + $0xe] ss:$16 sm:%s76_s19]   ;;  %vm92_vm6 = vcmask 982912   ;;  %vm128_vm7 = vcmask 917312  }
   0x5   :  { %67 = vrot.lane.b32.xlu0 %v66_v5, %s806_s25  ;;  %s37_s28 = smov 3  ;;  %s40_s29 = smov 12  ;;  %v79_v8 = vsel %vm6_vm0, %v692_v7, %v691_v6  ;;  %v693_v9 = vld [vmem:[%s1239_s0 + $0xe] ss:$16 sm:%s81_s23]   ;;  %vm164_vm8 = vcmask 851712   ;;  %vm200_vm9 = vcmask 786112  }
   0x6   :  { %v694_v10 = vld [vmem:[%s1239_s0 + $0xe] ss:$16 sm:%s86_s24]   ;;  %s45_s5 = smov 48  ;;  %s50_s6 = smov 192  ;;  %v84_v11 = vsel %vm10_vm1, %v693_v9, %v79_v8  ;;  %v685_v12 = vld [vmem:[%s1239_s0 + $0xf] ss:$16 sm:%s37_s28]  }
   0x7   :  { %v686_v13 = vld [vmem:[%s1239_s0 + $0xf] ss:$16 sm:%s40_s29]   ;;  %s132_s11 = smov 3  ;;  %v89_v14 = vsel %vm14_vm2, %v694_v10, %v84_v11  ;;  %s135_s16 = smov 12  ;;  %vm236_vm10 = vcmask 720512   ;;  %vm272_vm11 = vcmask 654912  }
   0x8   :  { %v43_v15 = vsel %vm6_vm0, %v686_v13, %v685_v12  ;;  %v687_v16 = vld [vmem:[%s1239_s0 + $0xf] ss:$16 sm:%s45_s5]   ;;  %s109_s17 = smov 3  ;;  %90 = vrot.lane.b32.xlu1 %v89_v14, %s805_s20  ;;  %s112_s20 = smov 12  ;;  %vm308_vm12 = vcmask 589312   ;;  %vm344_vm13 = vcmask 523712  }
   0x9   :  { %v688_v17 = vld [vmem:[%s1239_s0 + $0xf] ss:$16 sm:%s50_s6]   ;;  %v48_v18 = vsel %vm10_vm1, %v687_v16, %v43_v15  ;;  %v701_v19 = vld [vmem:[%s1239_s0 + $0x8d] ss:$16 sm:%s132_s11]   ;;  %s117_s21 = smov 48  ;;  %s122_s27 = smov 192 }
   0xa   :  { %v53_v20 = vsel %vm14_vm2, %v688_v17, %v48_v18  ;;  %v702_v21 = vld [vmem:[%s1239_s0 + $0x8d] ss:$16 sm:%s135_s16]   ;;  %s168_s29 = smov 3  ;;  %s171_s30 = smov 12  ;;  %vm380_vm14 = vcmask 458112   ;;  %vm416_vm15 = vcmask 392512  }
   0xb   :  { %v697_v22 = vld [vmem:[%s1239_s0 + $0xd] ss:$16 sm:%s109_s17]   ;;  %54 = vrot.lane.b32.xlu0 %v53_v20, %s806_s25  ;;  %v138_v23 = vsel %vm6_vm0, %v702_v21, %v701_v19  ;;  %s145_s6 = smov 3  ;;  %s148_s7 = smov 12 }
   0xc   :  { %v698_v24 = vld [vmem:[%s1239_s0 + $0xd] ss:$16 sm:%s112_s20]   ;;  %s807_s8 = smov 104   ;;  %v707_v29 = vld [vmem:[%s1239_s0 + $0x8c] ss:$16 sm:%s168_s29]   ;;  %s153_s11 = smov 48 }
   0xd   :  { %v115_v25 = vsel %vm6_vm0, %v698_v24, %v697_v22  ;;  %v699_v26 = vld [vmem:[%s1239_s0 + $0xd] ss:$16 sm:%s117_s21]   ;;  %139 = vrot.lane.b32.xlu1 %v138_v23, %s807_s8  ;;  %s158_s12 = smov 192  ;;  %s204_s17 = smov 3 }
   0xe   :  { %v700_v27 = vld [vmem:[%s1239_s0 + $0xd] ss:$16 sm:%s122_s27]   ;;  %v120_v28 = vsel %vm10_vm1, %v699_v26, %v115_v25  ;;  %v708_v31 = vld [vmem:[%s1239_s0 + $0x8c] ss:$16 sm:%s171_s30]   ;;  %s207_s20 = smov 12  ;;  %s181_s21 = smov 3 }
   0xf   :  { %v125_v30 = vsel %vm14_vm2, %v700_v27, %v120_v28  ;;  %v703_v32 = vld [vmem:[%s1239_s0 + $0xc] ss:$16 sm:%s145_s6]   ;;  %v174_v33 = vsel %vm6_vm0, %v708_v31, %v707_v29  ;;  %s184_s27 = smov 12  ;;  %s808_s25 = smov 96   ;;  %v713_v39 = vld [vmem:[%s1239_s0 + $0x8b] ss:$16 sm:%s204_s17]  }
  0x10   :  { %126 = vrot.lane.b32.xlu0 %v125_v30, %s807_s8  ;;  %v704_v34 = vld [vmem:[%s1239_s0 + $0xc] ss:$16 sm:%s148_s7]   ;;  %s189_s30 = smov 48  ;;  %s194_s2 = smov 192 }
  0x11   :  { %v151_v35 = vsel %vm6_vm0, %v704_v34, %v703_v32  ;;  %v705_v36 = vld [vmem:[%s1239_s0 + $0xc] ss:$16 sm:%s153_s11]   ;;  %175 = vrot.lane.b32.xlu1 %v174_v33, %s808_s25  ;;  %s240_s7 = smov 3  ;;  %s243_s10 = smov 12 }
  0x12   :  { %v706_v37 = vld [vmem:[%s1239_s0 + $0xc] ss:$16 sm:%s158_s12]   ;;  %v156_v38 = vsel %vm10_vm1, %v705_v36, %v151_v35  ;;  %v714_v41 = vld [vmem:[%s1239_s0 + $0x8b] ss:$16 sm:%s207_s20]   ;;  %s217_s11 = smov 3  ;;  %s220_s16 = smov 12 }
  0x13   :  { %v161_v40 = vsel %vm14_vm2, %v706_v37, %v156_v38  ;;  %v709_v42 = vld [vmem:[%s1239_s0 + $0xb] ss:$16 sm:%s181_s21]   ;;  %v210_v43 = vsel %vm6_vm0, %v714_v41, %v713_v39  ;;  %s809_s17 = smov 88   ;;  %v719_v49 = vld [vmem:[%s1239_s0 + $0x8a] ss:$16 sm:%s240_s7]   ;;  %s225_s20 = smov 48 }
  0x14   :  { %162 = vrot.lane.b32.xlu0 %v161_v40, %s808_s25  ;;  %v710_v44 = vld [vmem:[%s1239_s0 + $0xb] ss:$16 sm:%s184_s27]   ;;  %s230_s21 = smov 192  ;;  %s276_s27 = smov 3 }
  0x15   :  { %v187_v45 = vsel %vm6_vm0, %v710_v44, %v709_v42  ;;  %v711_v46 = vld [vmem:[%s1239_s0 + $0xb] ss:$16 sm:%s189_s30]   ;;  %211 = vrot.lane.b32.xlu1 %v210_v43, %s809_s17  ;;  %s279_s29 = smov 12  ;;  %s253_s30 = smov 3 }
  0x16   :  { %v712_v47 = vld [vmem:[%s1239_s0 + $0xb] ss:$16 sm:%s194_s2]   ;;  %v192_v48 = vsel %vm10_vm1, %v711_v46, %v187_v45  ;;  %v720_v51 = vld [vmem:[%s1239_s0 + $0x8a] ss:$16 sm:%s243_s10]   ;;  %s256_s6 = smov 12  ;;  %s810_s7 = smov 80  }
  0x17   :  { %v197_v50 = vsel %vm14_vm2, %v712_v47, %v192_v48  ;;  %v715_v52 = vld [vmem:[%s1239_s0 + $0xa] ss:$16 sm:%s217_s11]   ;;  %v246_v53 = vsel %vm6_vm0, %v720_v51, %v719_v49  ;;  %v725_v59 = vld [vmem:[%s1239_s0 + $0x89] ss:$16 sm:%s276_s27]   ;;  %s261_s10 = smov 48  ;;  %s266_s11 = smov 192 }
  0x18   :  { %198 = vrot.lane.b32.xlu0 %v197_v50, %s809_s17  ;;  %v716_v54 = vld [vmem:[%s1239_s0 + $0xa] ss:$16 sm:%s220_s16]   ;;  %s312_s16 = smov 3  ;;  %s315_s19 = smov 12 }
  0x19   :  { %v223_v55 = vsel %vm6_vm0, %v716_v54, %v715_v52  ;;  %v717_v56 = vld [vmem:[%s1239_s0 + $0xa] ss:$16 sm:%s225_s20]   ;;  %247 = vrot.lane.b32.xlu1 %v246_v53, %s810_s7  ;;  %s289_s20 = smov 3  ;;  %s292_s26 = smov 12 }
  0x1a   :  { %v718_v57 = vld [vmem:[%s1239_s0 + $0xa] ss:$16 sm:%s230_s21]   ;;  %v228_v58 = vsel %vm10_vm1, %v717_v56, %v223_v55  ;;  %v726_v61 = vld [vmem:[%s1239_s0 + $0x89] ss:$16 sm:%s279_s29]   ;;  %s811_s27 = smov 72   ;;  %s297_s29 = smov 48 }
  0x1b   :  { %v233_v60 = vsel %vm14_vm2, %v718_v57, %v228_v58  ;;  %v721_v62 = vld [vmem:[%s1239_s0 + $0x9] ss:$16 sm:%s253_s30]   ;;  %v282_v63 = vsel %vm6_vm0, %v726_v61, %v725_v59  ;;  %v731_v5 = vld [vmem:[%s1239_s0 + $0x88] ss:$16 sm:%s312_s16]   ;;  %s302_s30 = smov 192  ;;  %s351_s9 = smov 12 }
  0x1c   :  { %234 = vrot.lane.b32.xlu0 %v233_v60, %s810_s7  ;;  %v722_v0 = vld [vmem:[%s1239_s0 + $0x9] ss:$16 sm:%s256_s6]   ;;  %s348_s6 = smov 3  ;;  %s328_s15 = smov 12  ;;  %v763_v56 = vld [vmem:[%s1239_s0 + $0xbf] sm:$0x10]  }
  0x1d   :  { %v259_v1 = vsel %vm6_vm0, %v722_v0, %v721_v62  ;;  %v723_v2 = vld [vmem:[%s1239_s0 + $0x9] ss:$16 sm:%s261_s10]   ;;  %283 = vrot.lane.b32.xlu1 %v282_v63, %s811_s27  ;;  %s325_s10 = smov 3  ;;  %s812_s16 = smov 64  }
  0x1e   :  { %v724_v3 = vld [vmem:[%s1239_s0 + $0x9] ss:$16 sm:%s266_s11]   ;;  %v264_v4 = vsel %vm10_vm1, %v723_v2, %v259_v1  ;;  %v732_v7 = vld [vmem:[%s1239_s0 + $0x88] ss:$16 sm:%s315_s19]   ;;  %s333_s19 = smov 48  ;;  %s387_s28 = smov 12 }
  0x1f   :  { %v269_v6 = vsel %vm14_vm2, %v724_v3, %v264_v4  ;;  %v727_v8 = vld [vmem:[%s1239_s0 + $0x8] ss:$16 sm:%s289_s20]   ;;  %v318_v9 = vsel %vm6_vm0, %v732_v7, %v731_v5  ;;  %v737_v15 = vld [vmem:[%s1239_s0 + $0x87] ss:$16 sm:%s348_s6]   ;;  %s338_s20 = smov 192  ;;  %s364_s5 = smov 12 }
  0x20   :  { %270 = vrot.lane.b32.xlu0 %v269_v6, %s811_s27  ;;  %v728_v10 = vld [vmem:[%s1239_s0 + $0x8] ss:$16 sm:%s292_s26]   ;;  %s384_s26 = smov 3  ;;  %s813_s6 = smov 56   ;;  %v770_v4 = vld [vmem:[%s1239_s0 + $0xbe] sm:$0x10]  }
  0x21   :  { %v295_v11 = vsel %vm6_vm0, %v728_v10, %v727_v8  ;;  %v729_v12 = vld [vmem:[%s1239_s0 + $0x8] ss:$16 sm:%s297_s29]   ;;  %319 = vrot.lane.b32.xlu1 %v318_v9, %s812_s16  ;;  %s361_s29 = smov 3  ;;  %s423_s18 = smov 12 }
  0x22   :  { %v730_v13 = vld [vmem:[%s1239_s0 + $0x8] ss:$16 sm:%s302_s30]   ;;  %v300_v14 = vsel %vm10_vm1, %v729_v12, %v295_v11  ;;  %v738_v17 = vld [vmem:[%s1239_s0 + $0x87] ss:$16 sm:%s351_s9]   ;;  %s369_s9 = smov 48  ;;  %s400_s24 = smov 12 }
  0x23   :  { %v305_v16 = vsel %vm14_vm2, %v730_v13, %v300_v14  ;;  %v733_v18 = vld [vmem:[%s1239_s0 + $0x7] ss:$16 sm:%s325_s10]   ;;  %v354_v19 = vsel %vm6_vm0, %v738_v17, %v737_v15  ;;  %v743_v25 = vld [vmem:[%s1239_s0 + $0x86] ss:$16 sm:%s384_s26]   ;;  %s374_s10 = smov 192  ;;  %s814_s26 = smov 48  }
  0x24   :  { %306 = vrot.lane.b32.xlu0 %v305_v16, %s812_s16  ;;  %v734_v20 = vld [vmem:[%s1239_s0 + $0x7] ss:$16 sm:%s328_s15]   ;;  %s420_s15 = smov 3  ;;  %s459_s8 = smov 12  ;;  %v777_v16 = vld [vmem:[%s1239_s0 + $0xbd] sm:$0x10]  }
  0x25   :  { %v331_v21 = vsel %vm6_vm0, %v734_v20, %v733_v18  ;;  %v735_v22 = vld [vmem:[%s1239_s0 + $0x7] ss:$16 sm:%s333_s19]   ;;  %355 = vrot.lane.b32.xlu1 %v354_v19, %s813_s6  ;;  %s397_s19 = smov 3  ;;  %s436_s14 = smov 12 }
  0x26   :  { %v736_v23 = vld [vmem:[%s1239_s0 + $0x7] ss:$16 sm:%s338_s20]   ;;  %v336_v24 = vsel %vm10_vm1, %v735_v22, %v331_v21  ;;  %v744_v27 = vld [vmem:[%s1239_s0 + $0x86] ss:$16 sm:%s387_s28]   ;;  %s405_s28 = smov 48  ;;  %s495_s25 = smov 12 }
  0x27   :  { %v341_v26 = vsel %vm14_vm2, %v736_v23, %v336_v24  ;;  %v739_v28 = vld [vmem:[%s1239_s0 + $0x6] ss:$16 sm:%s361_s29]   ;;  %v390_v29 = vsel %vm6_vm0, %v744_v27, %v743_v25  ;;  %v749_v35 = vld [vmem:[%s1239_s0 + $0x85] ss:$16 sm:%s420_s15]   ;;  %s410_s29 = smov 192  ;;  %s815_s15 = smov 40  }
  0x28   :  { %342 = vrot.lane.b32.xlu0 %v341_v26, %s813_s6  ;;  %v740_v30 = vld [vmem:[%s1239_s0 + $0x6] ss:$16 sm:%s364_s5]   ;;  %s456_s5 = smov 3  ;;  %s472_s4 = smov 12 }
  0x29   :  { %v367_v31 = vsel %vm6_vm0, %v740_v30, %v739_v28  ;;  %v741_v32 = vld [vmem:[%s1239_s0 + $0x6] ss:$16 sm:%s369_s9]   ;;  %391 = vrot.lane.b32.xlu1 %v390_v29, %s814_s26  ;;  %s433_s9 = smov 3  ;;  %s482_s11 = smov 192  ;;  %v684_v28 = vld [vmem:[%s1239_s0 + $0xbc] sm:$0x10]  }
  0x2a   :  { %v742_v33 = vld [vmem:[%s1239_s0 + $0x6] ss:$16 sm:%s374_s10]   ;;  %v372_v34 = vsel %vm10_vm1, %v741_v32, %v367_v31  ;;  %v750_v37 = vld [vmem:[%s1239_s0 + $0x85] ss:$16 sm:%s423_s18]   ;;  %s441_s18 = smov 48  ;;  %s477_s10 = smov 48 }
  0x2b   :  { %v377_v36 = vsel %vm14_vm2, %v742_v33, %v372_v34  ;;  %v745_v38 = vld [vmem:[%s1239_s0 + $0x5] ss:$16 sm:%s397_s19]   ;;  %v426_v39 = vsel %vm6_vm0, %v750_v37, %v749_v35  ;;  %v755_v45 = vld [vmem:[%s1239_s0 + $0x84] ss:$16 sm:%s456_s5]   ;;  %s446_s19 = smov 192  ;;  %s816_s5 = smov 32  }
  0x2c   :  { %378 = vrot.lane.b32.xlu0 %v377_v36, %s814_s26  ;;  %v746_v40 = vld [vmem:[%s1239_s0 + $0x5] ss:$16 sm:%s400_s24]   ;;  %s492_s24 = smov 3  ;;  %s534_s16 = smov 3 }
  0x2d   :  { %v403_v41 = vsel %vm6_vm0, %v746_v40, %v745_v38  ;;  %v747_v42 = vld [vmem:[%s1239_s0 + $0x5] ss:$16 sm:%s405_s28]   ;;  %427 = vrot.lane.b32.xlu1 %v426_v39, %s815_s15  ;;  %s469_s28 = smov 3  ;;  %s511_s20 = smov 3 }
  0x2e   :  { %v748_v43 = vld [vmem:[%s1239_s0 + $0x5] ss:$16 sm:%s410_s29]   ;;  %v408_v44 = vsel %vm10_vm1, %v747_v42, %v403_v41  ;;  %v756_v47 = vld [vmem:[%s1239_s0 + $0x84] ss:$16 sm:%s459_s8]   ;;  %s514_s26 = smov 12  ;;  %s817_s27 = smov 24  }
  0x2f   :  { %v413_v46 = vsel %vm14_vm2, %v748_v43, %v408_v44  ;;  %v751_v48 = vld [vmem:[%s1239_s0 + $0x4] ss:$16 sm:%s433_s9]   ;;  %v462_v49 = vsel %vm6_vm0, %v756_v47, %v755_v45  ;;  %v761_v55 = vld [vmem:[%s1239_s0 + $0x83] ss:$16 sm:%s492_s24]   ;;  %s519_s2 = smov 48  ;;  %s524_s3 = smov 192 }
  0x30   :  { %414 = vrot.lane.b32.xlu0 %v413_v46, %s815_s15  ;;  %v752_v50 = vld [vmem:[%s1239_s0 + $0x4] ss:$16 sm:%s436_s14]   ;;  %s576_s8 = smov 3  ;;  %s553_s12 = smov 3 }
  0x31   :  { %v439_v51 = vsel %vm6_vm0, %v752_v50, %v751_v48  ;;  %v753_v52 = vld [vmem:[%s1239_s0 + $0x4] ss:$16 sm:%s441_s18]   ;;  %463 = vrot.lane.b32.xlu1 %v462_v49, %s816_s5  ;;  %s556_s17 = smov 12  ;;  %s818_s18 = smov 16  }
  0x32   :  { %v754_v53 = vld [vmem:[%s1239_s0 + $0x4] ss:$16 sm:%s446_s19]   ;;  %v444_v54 = vsel %vm10_vm1, %v753_v52, %v439_v51  ;;  %v762_v58 = vld [vmem:[%s1239_s0 + $0x83] ss:$16 sm:%s495_s25]   ;;  %s537_s19 = smov 12  ;;  %s561_s23 = smov 48 }
  0x33   :  { %v449_v57 = vsel %vm14_vm2, %v754_v53, %v444_v54  ;;  %v757_v59 = vld [vmem:[%s1239_s0 + $0x3] ss:$16 sm:%s469_s28]   ;;  %v498_v60 = vsel %vm6_vm0, %v762_v58, %v761_v55  ;;  %v768_v3 = vld [vmem:[%s1239_s0 + $0x82] ss:$16 sm:%s534_s16]   ;;  %s566_s24 = smov 192  ;;  %s20_s29 = smov 3 }
  0x34   :  { %450 = vrot.lane.b32.xlu0 %v449_v57, %s816_s5  ;;  %v758_v61 = vld [vmem:[%s1239_s0 + $0x3] ss:$16 sm:%s472_s4]   ;;  %v502_v62 = vsel %vm29_vm3, %v763_v56, %v498_v60  ;;  %s8_s4 = smov 48  ;;  %s12_s9 = smov 192 }
  0x35   :  { %v475_v63 = vsel %vm6_vm0, %v758_v61, %v757_v59  ;;  %v759_v0 = vld [vmem:[%s1239_s0 + $0x3] ss:$16 sm:%s477_s10]   ;;  %503 = vrot.lane.b32.xlu1 %v502_v62, %s817_s27  ;;  %s819_s10 = smov 8   ;;  %s2_s15 = smov 3 }
  0x36   :  { %v760_v1 = vld [vmem:[%s1239_s0 + $0x3] ss:$16 sm:%s482_s11]   ;;  %v480_v2 = vsel %vm10_vm1, %v759_v0, %v475_v63  ;;  %v769_v6 = vld [vmem:[%s1239_s0 + $0x82] ss:$16 sm:%s537_s19]   ;;  %s579_s11 = smov 12  ;;  %s4_s16 = smov 12 }
  0x37   :  { %v485_v5 = vsel %vm14_vm2, %v760_v1, %v480_v2  ;;  %v764_v7 = vld [vmem:[%s1239_s0 + $0x2] ss:$16 sm:%s511_s20]   ;;  %v540_v8 = vsel %vm6_vm0, %v769_v6, %v768_v3  ;;  %v775_v15 = vld [vmem:[%s1239_s0 + $0x81] ss:$16 sm:%s576_s8]  }
  0x38   :  { %486 = vrot.lane.b32.xlu0 %v485_v5, %s817_s27  ;;  %v765_v9 = vld [vmem:[%s1239_s0 + $0x2] ss:$16 sm:%s514_s26]   ;;  %v544_v10 = vsel %vm29_vm3, %v770_v4, %v540_v8 }
  0x39   :  { %v517_v11 = vsel %vm6_vm0, %v765_v9, %v764_v7  ;;  %v766_v12 = vld [vmem:[%s1239_s0 + $0x2] ss:$16 sm:%s519_s2]   ;;  %545 = vrot.lane.b32.xlu1 %v544_v10, %s818_s18 }
  0x3a   :  { %v767_v13 = vld [vmem:[%s1239_s0 + $0x2] ss:$16 sm:%s524_s3]   ;;  %v522_v14 = vsel %vm10_vm1, %v766_v12, %v517_v11  ;;  %v776_v18 = vld [vmem:[%s1239_s0 + $0x81] ss:$16 sm:%s579_s11]   ;;  %s23_s3 = smov 12 }
  0x3b   :  { %v527_v17 = vsel %vm14_vm2, %v767_v13, %v522_v14  ;;  %v771_v19 = vld [vmem:[%s1239_s0 + $0x1] ss:$16 sm:%s553_s12]   ;;  %v582_v20 = vsel %vm6_vm0, %v776_v18, %v775_v15  ;;  %v682_v27 = vld [vmem:[%s1239_s0 + $0x80] ss:$16 sm:%s20_s29]  }
  0x3c   :  { %528 = vrot.lane.b32.xlu0 %v527_v17, %s818_s18  ;;  %v772_v21 = vld [vmem:[%s1239_s0 + $0x1] ss:$16 sm:%s556_s17]   ;;  %v586_v22 = vsel %vm29_vm3, %v777_v16, %v582_v20 }
  0x3d   :  { %v559_v23 = vsel %vm6_vm0, %v772_v21, %v771_v19  ;;  %v773_v24 = vld [vmem:[%s1239_s0 + $0x1] ss:$16 sm:%s561_s23]   ;;  %587 = vrot.lane.b32.xlu1 %v586_v22, %s819_s10 }
  0x3e   :  { %v774_v25 = vld [vmem:[%s1239_s0 + $0x1] ss:$16 sm:%s566_s24]   ;;  %v564_v26 = vsel %vm10_vm1, %v773_v24, %v559_v23  ;;  %v683_v30 = vld [vmem:[%s1239_s0 + $0x80] ss:$16 sm:%s23_s3]  }
  0x3f   :  { %v569_v29 = vsel %vm14_vm2, %v774_v25, %v564_v26  ;;  %v9_v31 = vld [vmem:[%s1239_s0] ss:$16 sm:%s8_s4]   ;;  %v26_v32 = vsel %vm6_vm0, %v683_v30, %v682_v27 }
  0x40   :  { %570 = vrot.lane.b32.xlu0 %v569_v29, %s819_s10  ;;  %v13_v33 = vld [vmem:[%s1239_s0] ss:$16 sm:%s12_s9]   ;;  %v30_v34 = vsel %vm29_vm3, %v684_v28, %v26_v32  ;;  %vm572_vm3 = vcmask 130112  }
  0x41   :  { %v3_v35 = vld [vmem:[%s1239_s0] ss:$16 sm:%s2_s15]   ;;  %33 = vst.msk [vmem:[#allocation0 + $0x40] ss:$8 sm:$0xf] %vm16_vm4, %v30_v34  }
  0x42   :  { %v5_v36 = vld [vmem:[%s1239_s0] ss:$16 sm:%s4_s16]   ;;  %35 = vst.msk [vmem:[#allocation0 + $0x5c] sm:$0x10] %vm16_vm4, %v30_v34  }
  0x43   :  { %v7_v37 = vsel %vm6_vm0, %v5_v36, %v3_v35  ;;  %vm452_vm0 = vcmask 326912  }
  0x44   :  { %v11_v38 = vsel %vm10_vm1, %v9_v31, %v7_v37  ;;  %vm488_vm1 = vcmask 261312  }
  0x45   :  { %v15_v39 = vsel %vm14_vm2, %v13_v33, %v11_v38  ;;  %vm530_vm2 = vcmask 195712  }
  0x46   :  { %17 = vst.msk [vmem:[#allocation0] ss:$8 sm:$0xf] %vm16_vm4, %v15_v39   ;;  %18 = vst.msk [vmem:[#allocation0] ss:$8 sm:$0xf0] %vm16_vm4, %v15_v39  }
  0x76   :  { %v104_v40 = vpop.permute.xlu1 %103  }
  0x77   :  { %v68_v41 = vpop.permute.xlu0 %67  }
  0x78   :  { %71 = vst.msk [vmem:[#allocation0 + $0x40] ss:$8 sm:$0xf] %vm56_vm5, %v68_v41  }
  0x79   :  { %107 = vst.msk [vmem:[#allocation0 + $0x40] ss:$8 sm:$0xf] %vm92_vm6, %v104_v40  }
  0x7a   :  { %v91_v42 = vpop.permute.xlu1 %90  }
  0x7d   :  { %v55_v43 = vpop.permute.xlu0 %54  }
  0x7e   :  { %57 = vst.msk [vmem:[#allocation0] ss:$8 sm:$0xf] %vm56_vm5, %v55_v43   ;;  %58 = vst.msk [vmem:[#allocation0] ss:$8 sm:$0xf0] %vm56_vm5, %v55_v43  }
  0x7f   :  { %93 = vst.msk [vmem:[#allocation0] ss:$8 sm:$0xf] %vm92_vm6, %v91_v42   ;;  %94 = vst.msk [vmem:[#allocation0] ss:$8 sm:$0xf0] %vm92_vm6, %v91_v42   ;;  %v140_v44 = vpop.permute.xlu1 %139  }
  0x80   :  { %143 = vst.msk [vmem:[#allocation0 + $0x40] ss:$8 sm:$0xf] %vm128_vm7, %v140_v44  }
  0x82   :  { %v127_v45 = vpop.permute.xlu0 %126  }
  0x83   :  { %129 = vst.msk [vmem:[#allocation0] ss:$8 sm:$0xf] %vm128_vm7, %v127_v45   ;;  %130 = vst.msk [vmem:[#allocation0] ss:$8 sm:$0xf0] %vm128_vm7, %v127_v45   ;;  %v176_v46 = vpop.permute.xlu1 %175  }
  0x84   :  { %179 = vst.msk [vmem:[#allocation0 + $0x40] ss:$8 sm:$0xf] %vm164_vm8, %v176_v46  }
  0x86   :  { %v163_v47 = vpop.permute.xlu0 %162  }
  0x87   :  { %165 = vst.msk [vmem:[#allocation0] ss:$8 sm:$0xf] %vm164_vm8, %v163_v47   ;;  %166 = vst.msk [vmem:[#allocation0] ss:$8 sm:$0xf0] %vm164_vm8, %v163_v47   ;;  %v212_v48 = vpop.permute.xlu1 %211  }
  0x88   :  { %215 = vst.msk [vmem:[#allocation0 + $0x40] ss:$8 sm:$0xf] %vm200_vm9, %v212_v48  }
  0x8a   :  { %v199_v49 = vpop.permute.xlu0 %198  }
  0x8b   :  { %201 = vst.msk [vmem:[#allocation0] ss:$8 sm:$0xf] %vm200_vm9, %v199_v49   ;;  %202 = vst.msk [vmem:[#allocation0] ss:$8 sm:$0xf0] %vm200_vm9, %v199_v49   ;;  %v248_v50 = vpop.permute.xlu1 %247  }
  0x8c   :  { %251 = vst.msk [vmem:[#allocation0 + $0x40] ss:$8 sm:$0xf] %vm236_vm10, %v248_v50  }
  0x8e   :  { %v235_v51 = vpop.permute.xlu0 %234  }
  0x8f   :  { %237 = vst.msk [vmem:[#allocation0] ss:$8 sm:$0xf] %vm236_vm10, %v235_v51   ;;  %238 = vst.msk [vmem:[#allocation0] ss:$8 sm:$0xf0] %vm236_vm10, %v235_v51   ;;  %v284_v52 = vpop.permute.xlu1 %283  }
  0x90   :  { %287 = vst.msk [vmem:[#allocation0 + $0x40] ss:$8 sm:$0xf] %vm272_vm11, %v284_v52  }
  0x92   :  { %v271_v53 = vpop.permute.xlu0 %270  }
  0x93   :  { %273 = vst.msk [vmem:[#allocation0] ss:$8 sm:$0xf] %vm272_vm11, %v271_v53   ;;  %274 = vst.msk [vmem:[#allocation0] ss:$8 sm:$0xf0] %vm272_vm11, %v271_v53   ;;  %v320_v54 = vpop.permute.xlu1 %319  }
  0x94   :  { %323 = vst.msk [vmem:[#allocation0 + $0x40] ss:$8 sm:$0xf] %vm308_vm12, %v320_v54  }
  0x96   :  { %v307_v55 = vpop.permute.xlu0 %306  }
  0x97   :  { %309 = vst.msk [vmem:[#allocation0] ss:$8 sm:$0xf] %vm308_vm12, %v307_v55   ;;  %310 = vst.msk [vmem:[#allocation0] ss:$8 sm:$0xf0] %vm308_vm12, %v307_v55   ;;  %v356_v56 = vpop.permute.xlu1 %355  }
  0x98   :  { %359 = vst.msk [vmem:[#allocation0 + $0x40] ss:$8 sm:$0xf] %vm344_vm13, %v356_v56  }
  0x9a   :  { %v343_v57 = vpop.permute.xlu0 %342  }
  0x9b   :  { %345 = vst.msk [vmem:[#allocation0] ss:$8 sm:$0xf] %vm344_vm13, %v343_v57   ;;  %346 = vst.msk [vmem:[#allocation0] ss:$8 sm:$0xf0] %vm344_vm13, %v343_v57   ;;  %v392_v58 = vpop.permute.xlu1 %391  }
  0x9c   :  { %395 = vst.msk [vmem:[#allocation0 + $0x40] ss:$8 sm:$0xf] %vm380_vm14, %v392_v58  }
  0x9e   :  { %v379_v59 = vpop.permute.xlu0 %378  }
  0x9f   :  { %381 = vst.msk [vmem:[#allocation0] ss:$8 sm:$0xf] %vm380_vm14, %v379_v59   ;;  %382 = vst.msk [vmem:[#allocation0] ss:$8 sm:$0xf0] %vm380_vm14, %v379_v59   ;;  %v428_v60 = vpop.permute.xlu1 %427  }
  0xa0   :  { %431 = vst.msk [vmem:[#allocation0 + $0x40] ss:$8 sm:$0xf] %vm416_vm15, %v428_v60  }
  0xa2   :  { %v415_v61 = vpop.permute.xlu0 %414  }
  0xa3   :  { %417 = vst.msk [vmem:[#allocation0] ss:$8 sm:$0xf] %vm416_vm15, %v415_v61   ;;  %418 = vst.msk [vmem:[#allocation0] ss:$8 sm:$0xf0] %vm416_vm15, %v415_v61   ;;  %v464_v62 = vpop.permute.xlu1 %463  }
  0xa4   :  { %467 = vst.msk [vmem:[#allocation0 + $0x40] ss:$8 sm:$0xf] %vm452_vm0, %v464_v62  }
  0xa6   :  { %v451_v63 = vpop.permute.xlu0 %450  }
  0xa7   :  { %453 = vst.msk [vmem:[#allocation0] ss:$8 sm:$0xf] %vm452_vm0, %v451_v63   ;;  %454 = vst.msk [vmem:[#allocation0] ss:$8 sm:$0xf0] %vm452_vm0, %v451_v63   ;;  %v504_v0 = vpop.permute.xlu1 %503  }
  0xa8   :  { %507 = vst.msk [vmem:[#allocation0 + $0x40] ss:$8 sm:$0xf] %vm488_vm1, %v504_v0   ;;  %509 = vst.msk [vmem:[#allocation0 + $0x5c] sm:$0x10] %vm488_vm1, %v504_v0  }
  0xaa   :  { %v487_v1 = vpop.permute.xlu0 %486  }
  0xab   :  { %489 = vst.msk [vmem:[#allocation0] ss:$8 sm:$0xf] %vm488_vm1, %v487_v1   ;;  %490 = vst.msk [vmem:[#allocation0] ss:$8 sm:$0xf0] %vm488_vm1, %v487_v1   ;;  %v546_v2 = vpop.permute.xlu1 %545  }
  0xac   :  { %549 = vst.msk [vmem:[#allocation0 + $0x40] ss:$8 sm:$0xf] %vm530_vm2, %v546_v2   ;;  %551 = vst.msk [vmem:[#allocation0 + $0x5c] sm:$0x10] %vm530_vm2, %v546_v2  }
  0xae   :  { %v529_v3 = vpop.permute.xlu0 %528  }
  0xaf   :  { %531 = vst.msk [vmem:[#allocation0] ss:$8 sm:$0xf] %vm530_vm2, %v529_v3   ;;  %532 = vst.msk [vmem:[#allocation0] ss:$8 sm:$0xf0] %vm530_vm2, %v529_v3   ;;  %v588_v4 = vpop.permute.xlu1 %587  }
  0xb0   :  { %591 = vst.msk [vmem:[#allocation0 + $0x40] ss:$8 sm:$0xf] %vm572_vm3, %v588_v4   ;;  %593 = vst.msk [vmem:[#allocation0 + $0x5c] sm:$0x10] %vm572_vm3, %v588_v4  }
  0xb2   :  { %v571_v5 = vpop.permute.xlu0 %570  }
  0xb3   :  { %573 = vst.msk [vmem:[#allocation0] ss:$8 sm:$0xf] %vm572_vm3, %v571_v5   ;;  %574 = vst.msk [vmem:[#allocation0] ss:$8 sm:$0xf0] %vm572_vm3, %v571_v5  }
  0xb7   :  { %v642_v6 = vld [vmem:[#allocation0 + $0x40] sm:$0x1]  ;;  %v648_v7 = vld [vmem:[#allocation0 + $0x48] sm:$0x1]  ;;  %v654_v8 = vld [vmem:[#allocation0 + $0x50] sm:$0x1] }
  0xb8   :  { %785 = vst [vmem:[%s1240_s1 + $0x8] sm:$0x1] %v642_v6  ;;  %786 = vst [vmem:[%s1240_s1 + $0x9] sm:$0x1] %v648_v7  ;;  %v660_v9 = vld [vmem:[#allocation0 + $0x58] sm:$0x1] }
  0xb9   :  { %787 = vst [vmem:[%s1240_s1 + $0xa] sm:$0x1] %v654_v8  ;;  %v666_v10 = vld [vmem:[#allocation0 + $0x60] sm:$0x1]  ;;  %788 = vst [vmem:[%s1240_s1 + $0xb] sm:$0x1] %v660_v9 }
  0xba   :  { %789 = vst [vmem:[%s1240_s1 + $0xc] sm:$0x1] %v666_v10  ;;  %v597_v11 = vld [vmem:[#allocation0] sm:$0x1]  ;;  %v601_v12 = vld [vmem:[#allocation0 + $0x8] sm:$0x1] }
  0xbb   :  { %v606_v13 = vld [vmem:[#allocation0 + $0x10] sm:$0x1]  ;;  %599 = vst [vmem:[%s1240_s1] sm:$0x1] %v597_v11  ;;  %778 = vst [vmem:[%s1240_s1 + $0x1] sm:$0x1] %v601_v12 }
  0xbc   :  { %779 = vst [vmem:[%s1240_s1 + $0x2] sm:$0x1] %v606_v13  ;;  %v612_v14 = vld [vmem:[#allocation0 + $0x18] sm:$0x1]  ;;  %v618_v15 = vld [vmem:[#allocation0 + $0x20] sm:$0x1] }
  0xbd   :  { %v624_v16 = vld [vmem:[#allocation0 + $0x28] sm:$0x1]  ;;  %780 = vst [vmem:[%s1240_s1 + $0x3] sm:$0x1] %v612_v14  ;;  %781 = vst [vmem:[%s1240_s1 + $0x4] sm:$0x1] %v618_v15 }
  0xbe   :  { %782 = vst [vmem:[%s1240_s1 + $0x5] sm:$0x1] %v624_v16  ;;  %v630_v17 = vld [vmem:[#allocation0 + $0x30] sm:$0x1]  ;;  %v636_v18 = vld [vmem:[#allocation0 + $0x38] sm:$0x1] }
  0xbf   :  { %783 = vst [vmem:[%s1240_s1 + $0x6] sm:$0x1] %v630_v17  ;;  %784 = vst [vmem:[%s1240_s1 + $0x7] sm:$0x1] %v636_v18 }

// kernel: tile.18
= control target key start
LH: loop header
LB: loop body
LE: loop exit
PB: predicated region body
PF: predicated region fallthrough
CT: control target
= control target key end

     0   :  { %s58_s0 = inlined_call_operand.vmem [shape: f32[16], index: 0, kind: input, shape index: {}]   ;;  %s59_s1 = inlined_call_operand.vmem [shape: f32[49,16], index: 1, kind: output, shape index: {}]  }
   0x1   :  { %v4_v0 = vld [vmem:[%s58_s0] ss:$0 sm:$0xff] }
   0x2   :  { %5 = vst [vmem:[%s59_s1] sm:$0xff] %v4_v0  ;;  %18 = vst [vmem:[%s59_s1 + $0x8] sm:$0xff] %v4_v0 }
   0x3   :  { %19 = vst [vmem:[%s59_s1 + $0x10] sm:$0xff] %v4_v0  ;;  %20 = vst [vmem:[%s59_s1 + $0x18] sm:$0xff] %v4_v0 }
   0x4   :  { %21 = vst [vmem:[%s59_s1 + $0x20] sm:$0xff] %v4_v0  ;;  %22 = vst [vmem:[%s59_s1 + $0x28] sm:$0xff] %v4_v0 }
   0x5   :  { %23 = vst [vmem:[%s59_s1 + $0x30] sm:$0xff] %v4_v0 }

// kernel: tile.19
= control target key start
LH: loop header
LB: loop body
LE: loop exit
PB: predicated region body
PF: predicated region fallthrough
CT: control target
= control target key end

     0   :  { %s12_s8 = smov 48  ;;  %vm14_vm0 = vcmask 1045508   ;;  %s36_s13 = smov 48  ;;  %vm4_vm1 = vcmask 1046532   ;;  %vm6_vm2 = vcmask 130048   ;;  %vm18_vm3 = vcmask 1048448   ;;  %s261_s0 = inlined_call_operand.vmem [shape: f32[49,16], index: 0, kind: input, shape index: {}]   ;;  %s262_s1 = inlined_call_operand.vmem [shape: f32[1,784], index: 1, kind: output, shape index: {}]  }
   0x1   :  { %v139_v0 = vld [vmem:[%s261_s0 + $0x7] ss:$8 sm:$0xf]   ;;  %v143_v2 = vld [vmem:[%s261_s0 + $0x5] ss:$8 sm:$0xf]  }
   0x2   :  { %v140_v1 = vld [vmem:[%s261_s0 + $0x7] ss:$8 sm:%s12_s8]   ;;  %v144_v4 = vld [vmem:[%s261_s0 + $0x5] ss:$8 sm:%s36_s13]   ;;  %s166_s18 = smov 112   ;;  %s24_s19 = smov 48 }
   0x3   :  { %v15_v3 = vsel %vm14_vm0, %v140_v1, %v139_v0  ;;  %v141_v5 = vld [vmem:[%s261_s0 + $0x6] ss:$8 sm:$0xf]   ;;  %v39_v6 = vsel %vm14_vm0, %v144_v4, %v143_v2  ;;  %v145_v7 = vld [vmem:[%s261_s0 + $0x4] ss:$8 sm:$0xf]  }
   0x4   :  { %16 = vrot.lane.b32.xlu0 %v15_v3, %s166_s18  ;;  %s167_s22 = smov 80   ;;  %v142_v8 = vld [vmem:[%s261_s0 + $0x6] ss:$8 sm:%s24_s19]   ;;  %s48_s25 = smov 48  ;;  %vm30_vm4 = vcmask 917248   ;;  %vm42_vm5 = vcmask 786048  }
   0x5   :  { %40 = vrot.lane.b32.xlu1 %v39_v6, %s167_s22  ;;  %v27_v9 = vsel %vm14_vm0, %v142_v8, %v141_v5  ;;  %v146_v10 = vld [vmem:[%s261_s0 + $0x4] ss:$8 sm:%s48_s25]   ;;  %v147_v11 = vld [vmem:[%s261_s0 + $0x3] ss:$8 sm:$0xf]   ;;  %s60_s30 = smov 48 }
   0x6   :  { %v51_v12 = vsel %vm14_vm0, %v146_v10, %v145_v7  ;;  %v148_v13 = vld [vmem:[%s261_s0 + $0x3] ss:$8 sm:%s60_s30]   ;;  %v149_v14 = vld [vmem:[%s261_s0 + $0x2] ss:$8 sm:$0xf]   ;;  %s168_s6 = smov 96  }
   0x7   :  { %s72_s7 = smov 48  ;;  %s169_s8 = smov 64   ;;  %v63_v15 = vsel %vm14_vm0, %v148_v13, %v147_v11  ;;  %v151_v17 = vld [vmem:[%s261_s0 + $0x1] ss:$8 sm:$0xf]   ;;  %vm54_vm6 = vcmask 654848  }
   0x8   :  { %28 = vrot.lane.b32.xlu0 %v27_v9, %s168_s6  ;;  %v150_v16 = vld [vmem:[%s261_s0 + $0x2] ss:$8 sm:%s72_s7]   ;;  %s84_s13 = smov 48  ;;  %v2_v20 = vld [vmem:[%s261_s0] ss:$8 sm:$0xf]  }
   0x9   :  { %52 = vrot.lane.b32.xlu1 %v51_v12, %s169_s8  ;;  %v75_v18 = vsel %vm14_vm0, %v150_v16, %v149_v14  ;;  %v152_v19 = vld [vmem:[%s261_s0 + $0x1] ss:$8 sm:%s84_s13]   ;;  %v3_v21 = vld [vmem:[%s261_s0] ss:$8 sm:$0x70]   ;;  %s170_s0 = smov 48  }
   0xa   :  { %v5_v22 = vsel %vm4_vm1, %v3_v21, %v2_v20  ;;  %s171_s20 = smov 32   ;;  %v87_v23 = vsel %vm14_vm0, %v152_v19, %v151_v17  ;;  %s172_s21 = smov 16   ;;  %vm66_vm7 = vcmask 523648   ;;  %vm78_vm8 = vcmask 392448  }
   0xb   :  { %7 = vst.msk [vmem:[#allocation0] ss:$8 sm:$0xf] %vm6_vm2, %v5_v22   ;;  %8 = vst.msk [vmem:[#allocation0] ss:$8 sm:$0x70] %vm6_vm2, %v5_v22  }
   0xc   :  { %64 = vrot.lane.b32.xlu0 %v63_v15, %s170_s0  ;;  %vm90_vm9 = vcmask 261248  }
   0xd   :  { %76 = vrot.lane.b32.xlu1 %v75_v18, %s171_s20 }
  0x10   :  { %88 = vrot.lane.b32.xlu0 %v87_v23, %s172_s21 }
  0x12   :  { %v129_v24 = vld [vmem:[#allocation0 + $0x30] sm:$0x1] }
  0x13   :  { %158 = vst [vmem:[%s262_s1 + $0x6] sm:$0x1] %v129_v24 }
  0x76   :  { %v17_v25 = vpop.permute.xlu0 %16  }
  0x77   :  { %19 = vst.msk [vmem:[#allocation0] ss:$8 sm:$0xf] %vm18_vm3, %v17_v25   ;;  %20 = vst.msk [vmem:[#allocation0] ss:$8 sm:$0x30] %vm18_vm3, %v17_v25   ;;  %v41_v26 = vpop.permute.xlu1 %40  }
  0x7a   :  { %v29_v27 = vpop.permute.xlu0 %28  }
  0x7b   :  { %31 = vst.msk [vmem:[#allocation0] ss:$8 sm:$0xf] %vm30_vm4, %v29_v27   ;;  %32 = vst.msk [vmem:[#allocation0] ss:$8 sm:$0x30] %vm30_vm4, %v29_v27   ;;  %v53_v28 = vpop.permute.xlu1 %52  }
  0x7c   :  { %43 = vst.msk [vmem:[#allocation0] ss:$8 sm:$0xf] %vm42_vm5, %v41_v26   ;;  %44 = vst.msk [vmem:[#allocation0] ss:$8 sm:$0x30] %vm42_vm5, %v41_v26  }
  0x7d   :  { %55 = vst.msk [vmem:[#allocation0] ss:$8 sm:$0xf] %vm54_vm6, %v53_v28   ;;  %56 = vst.msk [vmem:[#allocation0] ss:$8 sm:$0x30] %vm54_vm6, %v53_v28  }
  0x7e   :  { %v65_v29 = vpop.permute.xlu0 %64  }
  0x7f   :  { %67 = vst.msk [vmem:[#allocation0] ss:$8 sm:$0xf] %vm66_vm7, %v65_v29   ;;  %68 = vst.msk [vmem:[#allocation0] ss:$8 sm:$0x30] %vm66_vm7, %v65_v29   ;;  %v77_v30 = vpop.permute.xlu1 %76  }
  0x80   :  { %79 = vst.msk [vmem:[#allocation0] ss:$8 sm:$0xf] %vm78_vm8, %v77_v30   ;;  %80 = vst.msk [vmem:[#allocation0] ss:$8 sm:$0x30] %vm78_vm8, %v77_v30  }
  0x82   :  { %v89_v31 = vpop.permute.xlu0 %88  }
  0x83   :  { %91 = vst.msk [vmem:[#allocation0] ss:$8 sm:$0xf] %vm90_vm9, %v89_v31   ;;  %92 = vst.msk [vmem:[#allocation0] ss:$8 sm:$0x30] %vm90_vm9, %v89_v31  }
  0x8a   :  { %v96_v32 = vld [vmem:[#allocation0] sm:$0x1]  ;;  %v100_v33 = vld [vmem:[#allocation0 + $0x8] sm:$0x1]  ;;  %v105_v34 = vld [vmem:[#allocation0 + $0x10] sm:$0x1] }
  0x8b   :  { %98 = vst [vmem:[%s262_s1] sm:$0x1] %v96_v32  ;;  %153 = vst [vmem:[%s262_s1 + $0x1] sm:$0x1] %v100_v33  ;;  %v111_v35 = vld [vmem:[#allocation0 + $0x18] sm:$0x1] }
  0x8c   :  { %154 = vst [vmem:[%s262_s1 + $0x2] sm:$0x1] %v105_v34  ;;  %v117_v36 = vld [vmem:[#allocation0 + $0x20] sm:$0x1]  ;;  %v123_v37 = vld [vmem:[#allocation0 + $0x28] sm:$0x1] }
  0x8d   :  { %155 = vst [vmem:[%s262_s1 + $0x3] sm:$0x1] %v111_v35  ;;  %156 = vst [vmem:[%s262_s1 + $0x4] sm:$0x1] %v117_v36 }
  0x8e   :  { %157 = vst [vmem:[%s262_s1 + $0x5] sm:$0x1] %v123_v37 }

// kernel: encoder_forward.1
= control target key start
LH: loop header
LB: loop body
LE: loop exit
PB: predicated region body
PF: predicated region fallthrough
CT: control target
= control target key end

     0   :  { %v721_v36 = vlaneseq  ;;  %v18576_v37 = vmov 1966171168   ;;  %vm4075_vm0 = vcmask 130048   ;;  %vm18579_vm1 = vmmov 0   ;;  %s24146_s0 = inlined_call_operand.vmem [shape: bf16[2,784], index: 0, kind: input, shape index: {}]   ;;  %s24147_s1 = inlined_call_operand.vmem [shape: bf16[784,1568], index: 1, kind: input, shape index: {}]   ;;  %s24148_s2 = inlined_call_operand.vmem [shape: bf16[1568,784], index: 2, kind: input, shape index: {}]   ;;  %s24149_s3 = inlined_call_operand.vmem [shape: bf16[1200,288], index: 3, kind: input, shape index: {}]   ;;  %s24150_s4 = inlined_call_operand.vmem [shape: f32[24,1568], index: 4, kind: input, shape index: {}]   ;;  %s24151_s5 = inlined_call_operand.vmem [shape: f32[784,16], index: 5, kind: input, shape index: {}]   ;;  %s24152_s6 = inlined_call_operand.hbm [shape: f32[2,32], index: 6, kind: output, shape index: {}]  }
   0x1   :  { %v16416_v0 = vld [vmem:[%s24147_s1 + $0x4] ss:$52 sps:$4 sm:$0xff]   ;;  %v16418_v1 = vld [vmem:[%s24147_s1 + $0xc] ss:$52 sps:$4 sm:$0xff]   ;;  %v16421_v3 = vld [vmem:[%s24147_s1 + $0x8] ss:$52 sps:$4 sm:$0xff]   ;;  %v789_v38 = vunpack.c.l.s4 %v18576_v37 }
   0x2   :  { %4079 = vmatprep.subr.bf16.mxu0 %v16416_v0  ;;  %v16420_v2 = vld [vmem:[%s24147_s1] ss:$52 sps:$4 sm:$0xff]   ;;  %4243 = vmatprep.subr.bf16.mxu1 %v16418_v1  ;;  %v16426_v6 = vld [vmem:[%s24147_s1 + $0x68] ss:$52 sps:$4 sm:$0xff]   ;;  %v16427_v7 = vld [vmem:[%s24147_s1 + $0x70] ss:$52 sps:$4 sm:$0xff]  }
   0x3   :  { %v16422_v4 = vld [vmem:[%s24147_s1 + $0x6c] ss:$52 sps:$4 sm:$0xff]   ;;  %4080 = vmatpush1.bf16.msra.mxu0 %v16420_v2  ;;  %4244 = vmatpush1.bf16.msra.mxu1 %v16421_v3  ;;  %v16424_v5 = vld [vmem:[%s24147_s1 + $0x74] ss:$52 sps:$4 sm:$0xff]   ;;  %v16430_v9 = vld [vmem:[%s24147_s1 + $0xdc] ss:$52 sps:$4 sm:$0xff]   ;;  %v790_v43 = vunpack.c.0.s8 %v789_v38 }
   0x4   :  { %4081 = vmatprep.subr.bf16.mxu0 %v16422_v4  ;;  %4245 = vmatprep.subr.bf16.mxu1 %v16424_v5  ;;  %v16428_v8 = vld [vmem:[%s24147_s1 + $0xd4] ss:$52 sps:$4 sm:$0xff]   ;;  %v16432_v10 = vld [vmem:[%s24147_s1 + $0xd0] ss:$52 sps:$4 sm:$0xff]   ;;  %v16433_v11 = vld [vmem:[%s24147_s1 + $0xd8] ss:$52 sps:$4 sm:$0xff]  }
   0x5   :  { %v16434_v12 = vld [vmem:[%s24147_s1 + $0x13c] ss:$52 sps:$4 sm:$0xff]   ;;  %v16436_v13 = vld [vmem:[%s24147_s1 + $0x144] ss:$52 sps:$4 sm:$0xff]   ;;  %v16439_v15 = vld [vmem:[%s24147_s1 + $0x140] ss:$52 sps:$4 sm:$0xff]  }
   0x6   :  { %v16438_v14 = vld [vmem:[%s24147_s1 + $0x138] ss:$52 sps:$4 sm:$0xff]   ;;  %v16444_v18 = vld [vmem:[%s24147_s1 + $0x1a0] ss:$52 sps:$4 sm:$0xff]   ;;  %v16445_v19 = vld [vmem:[%s24147_s1 + $0x1a8] ss:$52 sps:$4 sm:$0xff]  }
   0x7   :  { %4082 = vmatpush1.bf16.msra.mxu0 %v16426_v6  ;;  %4246 = vmatpush1.bf16.msra.mxu1 %v16427_v7  ;;  %v16440_v16 = vld [vmem:[%s24147_s1 + $0x1a4] ss:$52 sps:$4 sm:$0xff]   ;;  %v16442_v17 = vld [vmem:[%s24147_s1 + $0x1ac] ss:$52 sps:$4 sm:$0xff]   ;;  %v16448_v21 = vld [vmem:[%s24147_s1 + $0x214] ss:$52 sps:$4 sm:$0xff]  }
   0x8   :  { %4083 = vmatprep.subr.bf16.mxu0 %v16428_v8  ;;  %4247 = vmatprep.subr.bf16.mxu1 %v16430_v9  ;;  %v16446_v20 = vld [vmem:[%s24147_s1 + $0x20c] ss:$52 sps:$4 sm:$0xff]   ;;  %v16450_v22 = vld [vmem:[%s24147_s1 + $0x208] ss:$52 sps:$4 sm:$0xff]   ;;  %v16451_v23 = vld [vmem:[%s24147_s1 + $0x210] ss:$52 sps:$4 sm:$0xff]  }
   0x9   :  { %v16452_v24 = vld [vmem:[%s24147_s1 + $0x274] ss:$52 sps:$4 sm:$0xff]   ;;  %v16454_v25 = vld [vmem:[%s24147_s1 + $0x27c] ss:$52 sps:$4 sm:$0xff]   ;;  %v16457_v27 = vld [vmem:[%s24147_s1 + $0x278] ss:$52 sps:$4 sm:$0xff]  }
   0xa   :  { %v16456_v26 = vld [vmem:[%s24147_s1 + $0x270] ss:$52 sps:$4 sm:$0xff]   ;;  %v16462_v30 = vld [vmem:[%s24147_s1 + $0x2d8] ss:$52 sps:$4 sm:$0xff]   ;;  %v16463_v31 = vld [vmem:[%s24147_s1 + $0x2e0] ss:$52 sps:$4 sm:$0xff]  }
   0xb   :  { %4084 = vmatpush1.bf16.msra.mxu0 %v16432_v10  ;;  %4248 = vmatpush1.bf16.msra.mxu1 %v16433_v11  ;;  %v16458_v28 = vld [vmem:[%s24147_s1 + $0x2dc] ss:$52 sps:$4 sm:$0xff]   ;;  %v16460_v29 = vld [vmem:[%s24147_s1 + $0x2e4] ss:$52 sps:$4 sm:$0xff]   ;;  %v16466_v33 = vld [vmem:[%s24147_s1 + $0x34c] ss:$52 sps:$4 sm:$0xff]  }
   0xc   :  { %4085 = vmatprep.subr.bf16.mxu0 %v16434_v12  ;;  %4249 = vmatprep.subr.bf16.mxu1 %v16436_v13  ;;  %v16464_v32 = vld [vmem:[%s24147_s1 + $0x344] ss:$52 sps:$4 sm:$0xff]   ;;  %v16468_v34 = vld [vmem:[%s24147_s1 + $0x340] ss:$52 sps:$4 sm:$0xff]   ;;  %v16469_v35 = vld [vmem:[%s24147_s1 + $0x348] ss:$52 sps:$4 sm:$0xff]  }
   0xd   :  { %v16470_v39 = vld [vmem:[%s24147_s1 + $0x3ac] ss:$52 sps:$4 sm:$0xff]   ;;  %v16472_v40 = vld [vmem:[%s24147_s1 + $0x3b4] ss:$52 sps:$4 sm:$0xff]   ;;  %v18734_v42 = vshrl.u32 %v721_v36, 7 }
   0xe   :  { %v16474_v41 = vld [vmem:[%s24147_s1 + $0x3a8] ss:$52 sps:$4 sm:$0xff]   ;;  %v16475_v44 = vld [vmem:[%s24147_s1 + $0x3b0] ss:$52 sps:$4 sm:$0xff]   ;;  %v16481_v48 = vld [vmem:[%s24147_s1 + $0x418] ss:$52 sps:$4 sm:$0xff]  }
   0xf   :  { %4086 = vmatpush1.bf16.msra.mxu0 %v16438_v14  ;;  %4250 = vmatpush1.bf16.msra.mxu1 %v16439_v15  ;;  %v16476_v45 = vld [vmem:[%s24147_s1 + $0x414] ss:$52 sps:$4 sm:$0xff]   ;;  %v16478_v46 = vld [vmem:[%s24147_s1 + $0x41c] ss:$52 sps:$4 sm:$0xff]   ;;  %v793_v49 = vsub.s32 %v790_v43, %v18734_v42  ;;  %v16484_v51 = vld [vmem:[%s24147_s1 + $0x484] ss:$52 sps:$4 sm:$0xff]  }
  0x10   :  { %4087 = vmatprep.subr.bf16.mxu0 %v16440_v16  ;;  %4251 = vmatprep.subr.bf16.mxu1 %v16442_v17  ;;  %v16480_v47 = vld [vmem:[%s24147_s1 + $0x410] ss:$52 sps:$4 sm:$0xff]   ;;  %v16486_v53 = vld [vmem:[%s24147_s1 + $0x478] ss:$52 sps:$4 sm:$0xff]   ;;  %v16487_v55 = vld [vmem:[%s24147_s1 + $0x480] ss:$52 sps:$4 sm:$0xff]  }
  0x11   :  { %v16482_v50 = vld [vmem:[%s24147_s1 + $0x47c] ss:$52 sps:$4 sm:$0xff]   ;;  %v25_v52 = vld [vmem:[%s24146_s0] sm:$0x7f]  ;;  %v16496_v63 = vld [vmem:[%s24147_s1 + $0x554] ss:$52 sps:$4 sm:$0xff]  }
  0x12   :  { %v794_v54 = vrot.slane %v25_v52, %v793_v49  ;;  %v16488_v56 = vld [vmem:[%s24147_s1 + $0x4e4] ss:$52 sps:$4 sm:$0xff]   ;;  %v16490_v57 = vld [vmem:[%s24147_s1 + $0x4ec] ss:$52 sps:$4 sm:$0xff]   ;;  %v16493_v61 = vld [vmem:[%s24147_s1 + $0x4e8] ss:$52 sps:$4 sm:$0xff]   ;;  %v787_v8 = vcombine.high %v25_v52, %v25_v52 }
  0x13   :  { %4088 = vmatpush1.bf16.msra.mxu0 %v16444_v18  ;;  %4252 = vmatpush1.bf16.msra.mxu1 %v16445_v19  ;;  %v16492_v59 = vld [vmem:[%s24147_s1 + $0x4e0] ss:$52 sps:$4 sm:$0xff]   ;;  %v16498_v0 = vld [vmem:[%s24147_s1 + $0x548] ss:$52 sps:$4 sm:$0xff]   ;;  %v16499_v1 = vld [vmem:[%s24147_s1 + $0x550] ss:$52 sps:$4 sm:$0xff]  }
  0x14   :  { %4089 = vmatprep.subr.bf16.mxu0 %v16446_v20  ;;  %4253 = vmatprep.subr.bf16.mxu1 %v16448_v21  ;;  %v802_v58 = vcombine.high %v794_v54, %v794_v54  ;;  %v16494_v62 = vld [vmem:[%s24147_s1 + $0x54c] ss:$52 sps:$4 sm:$0xff]   ;;  %v16500_v2 = vld [vmem:[%s24147_s1 + $0x5b4] ss:$52 sps:$4 sm:$0xff]   ;;  %v16502_v3 = vld [vmem:[%s24147_s1 + $0x5bc] ss:$52 sps:$4 sm:$0xff]   ;;  %v801_v11 = vrot.slane %v787_v8, %v793_v49  ;;  %v18828_v16 = vrot.slane %v794_v54, %v793_v49 }
  0x15   :  { %v16504_v4 = vld [vmem:[%s24147_s1 + $0x5b0] ss:$52 sps:$4 sm:$0xff]   ;;  %v16505_v5 = vld [vmem:[%s24147_s1 + $0x5b8] ss:$52 sps:$4 sm:$0xff]   ;;  %v16511_v10 = vld [vmem:[%s24147_s1 + $0x620] ss:$52 sps:$4 sm:$0xff]  }
  0x16   :  { %v18776_v60 = vrot.slane %v802_v58, %v793_v49  ;;  %v16506_v6 = vld [vmem:[%s24147_s1 + $0x61c] ss:$52 sps:$4 sm:$0xff]   ;;  %v16508_v7 = vld [vmem:[%s24147_s1 + $0x624] ss:$52 sps:$4 sm:$0xff]   ;;  %v16517_v13 = vld [vmem:[%s24147_s1 + $0x68c] ss:$52 sps:$4 sm:$0xff]   ;;  %v803_v14 = vcombine.high %v801_v11, %v801_v11  ;;  %v18833_v18 = vrot.slane %v801_v11, %v793_v49 }
  0x17   :  { %4090 = vmatpush1.bf16.msra.mxu0 %v16450_v22  ;;  %4254 = vmatpush1.bf16.msra.mxu1 %v16451_v23  ;;  %v16510_v9 = vld [vmem:[%s24147_s1 + $0x618] ss:$52 sps:$4 sm:$0xff]   ;;  %v16512_v15 = vld [vmem:[%s24147_s1 + $0x680] ss:$52 sps:$4 sm:$0xff]   ;;  %v16515_v17 = vld [vmem:[%s24147_s1 + $0x688] ss:$52 sps:$4 sm:$0xff]  }
  0x18   :  { %4091 = vmatprep.subr.bf16.mxu0 %v16452_v24  ;;  %4255 = vmatprep.subr.bf16.mxu1 %v16454_v25  ;;  %v16514_v12 = vld [vmem:[%s24147_s1 + $0x684] ss:$52 sps:$4 sm:$0xff]   ;;  %v18835_v19 = vrot.slane %v803_v14, %v793_v49  ;;  %v16520_v20 = vld [vmem:[%s24147_s1 + $0x6ec] ss:$52 sps:$4 sm:$0xff]   ;;  %v16523_v21 = vld [vmem:[%s24147_s1 + $0x6f4] ss:$52 sps:$4 sm:$0xff]   ;;  %v18845_v22 = vcombine.high %v18776_v60, %v18776_v60 }
  0x19   :  { %4111 = vmatprep.mubr.bf16.mxu0 %v18776_v60  ;;  %4275 = vmatprep.mubr.bf16.mxu1 %v18776_v60  ;;  %v16518_v23 = vld [vmem:[%s24147_s1 + $0x6e8] ss:$52 sps:$4 sm:$0xff]   ;;  %v16521_v24 = vld [vmem:[%s24147_s1 + $0x6f0] ss:$52 sps:$4 sm:$0xff]   ;;  %v16544_v37 = vld [vmem:[%s24147_s1 + $0x88c] ss:$52 sps:$4 sm:$0xff]  }
  0x1a   :  { %v16526_v25 = vld [vmem:[%s24147_s1 + $0x754] ss:$52 sps:$4 sm:$0xff]   ;;  %v16553_v43 = vld [vmem:[%s24147_s1 + $0x8fc] ss:$52 sps:$4 sm:$0xff]   ;;  %v16568_v54 = vld [vmem:[%s24147_s1 + $0xa2c] ss:$52 sps:$4 sm:$0xff]  }
  0x1b   :  { %4092 = vmatpush1.bf16.msra.mxu0 %v16456_v26  ;;  %4256 = vmatpush1.bf16.msra.mxu1 %v16457_v27  ;;  %v16529_v26 = vld [vmem:[%s24147_s1 + $0x75c] ss:$52 sps:$4 sm:$0xff]   ;;  %v16547_v38 = vld [vmem:[%s24147_s1 + $0x894] ss:$52 sps:$4 sm:$0xff]   ;;  %v16599_v14 = vld [vmem:[%s24147_s1 + $0xc38] ss:$52 sps:$4 sm:$0xff]  }
  0x1c   :  { %4093 = vmatprep.subr.bf16.mxu0 %v16458_v28  ;;  %4257 = vmatprep.subr.bf16.mxu1 %v16460_v29  ;;  %v16524_v27 = vld [vmem:[%s24147_s1 + $0x750] ss:$52 sps:$4 sm:$0xff]   ;;  %v16527_v28 = vld [vmem:[%s24147_s1 + $0x758] ss:$52 sps:$4 sm:$0xff]   ;;  %v16539_v36 = vld [vmem:[%s24147_s1 + $0x828] ss:$52 sps:$4 sm:$0xff]  }
  0x1d   :  { %v16532_v29 = vld [vmem:[%s24147_s1 + $0x7bc] ss:$52 sps:$4 sm:$0xff]   ;;  %v16557_v49 = vld [vmem:[%s24147_s1 + $0x960] ss:$52 sps:$4 sm:$0xff]  }
  0x1e   :  { %v16560_v52 = vld [vmem:[%s24147_s1 + $0x9c0] ss:$52 sps:$4 sm:$0xff]  }
  0x1f   :  { %4094 = vmatpush1.bf16.msra.mxu0 %v16462_v30  ;;  %4258 = vmatpush1.bf16.msra.mxu1 %v16463_v31  ;;  %v16535_v30 = vld [vmem:[%s24147_s1 + $0x7c4] ss:$52 sps:$4 sm:$0xff]   ;;  %v16574_v58 = vld [vmem:[%s24147_s1 + $0xa94] ss:$52 sps:$4 sm:$0xff]  }
  0x20   :  { %4095 = vmatprep.subr.bf16.mxu0 %v16464_v32  ;;  %4259 = vmatprep.subr.bf16.mxu1 %v16466_v33  ;;  %v16530_v31 = vld [vmem:[%s24147_s1 + $0x7b8] ss:$52 sps:$4 sm:$0xff]   ;;  %v16533_v32 = vld [vmem:[%s24147_s1 + $0x7c0] ss:$52 sps:$4 sm:$0xff]  }
  0x21   :  { %v16538_v33 = vld [vmem:[%s24147_s1 + $0x824] ss:$52 sps:$4 sm:$0xff]   ;;  %v16595_v8 = vld [vmem:[%s24147_s1 + $0xbd4] ss:$52 sps:$4 sm:$0xff]  }
  0x22   :  { %v16598_v11 = vld [vmem:[%s24147_s1 + $0xc34] ss:$52 sps:$4 sm:$0xff]  }
  0x23   :  { %4096 = vmatpush1.bf16.msra.mxu0 %v16468_v34  ;;  %4260 = vmatpush1.bf16.msra.mxu1 %v16469_v35  ;;  %v16541_v34 = vld [vmem:[%s24147_s1 + $0x82c] ss:$52 sps:$4 sm:$0xff]  }
  0x24   :  { %4097 = vmatprep.subr.bf16.mxu0 %v16470_v39  ;;  %4261 = vmatprep.subr.bf16.mxu1 %v16472_v40  ;;  %v16536_v35 = vld [vmem:[%s24147_s1 + $0x820] ss:$52 sps:$4 sm:$0xff]   ;;  %v16542_v39 = vld [vmem:[%s24147_s1 + $0x888] ss:$52 sps:$4 sm:$0xff]   ;;  %v16545_v40 = vld [vmem:[%s24147_s1 + $0x890] ss:$52 sps:$4 sm:$0xff]  }
  0x27   :  { %4098 = vmatpush1.bf16.msra.mxu0 %v16474_v41  ;;  %4262 = vmatpush1.bf16.msra.mxu1 %v16475_v44  ;;  %v16550_v41 = vld [vmem:[%s24147_s1 + $0x8f4] ss:$52 sps:$4 sm:$0xff]   ;;  %v16548_v44 = vld [vmem:[%s24147_s1 + $0x8f0] ss:$52 sps:$4 sm:$0xff]  }
  0x28   :  { %4099 = vmatprep.subr.bf16.mxu0 %v16476_v45  ;;  %4263 = vmatprep.subr.bf16.mxu1 %v16478_v46  ;;  %v16551_v45 = vld [vmem:[%s24147_s1 + $0x8f8] ss:$52 sps:$4 sm:$0xff]   ;;  %v16556_v46 = vld [vmem:[%s24147_s1 + $0x95c] ss:$52 sps:$4 sm:$0xff]  }
  0x2b   :  { %4100 = vmatpush1.bf16.msra.mxu0 %v16480_v47  ;;  %4264 = vmatpush1.bf16.msra.mxu1 %v16481_v48  ;;  %v16559_v47 = vld [vmem:[%s24147_s1 + $0x964] ss:$52 sps:$4 sm:$0xff]  }
  0x2c   :  { %4101 = vmatprep.subr.bf16.mxu0 %v16482_v50  ;;  %4265 = vmatprep.subr.bf16.mxu1 %v16484_v51  ;;  %v16554_v48 = vld [vmem:[%s24147_s1 + $0x958] ss:$52 sps:$4 sm:$0xff]  }
  0x2d   :  { %v16562_v50 = vld [vmem:[%s24147_s1 + $0x9c4] ss:$52 sps:$4 sm:$0xff]   ;;  %v16565_v51 = vld [vmem:[%s24147_s1 + $0x9cc] ss:$52 sps:$4 sm:$0xff]  }
  0x2f   :  { %4102 = vmatpush1.bf16.msra.mxu0 %v16486_v53  ;;  %4266 = vmatpush1.bf16.msra.mxu1 %v16487_v55  ;;  %v16563_v53 = vld [vmem:[%s24147_s1 + $0x9c8] ss:$52 sps:$4 sm:$0xff]  }
  0x30   :  { %4103 = vmatprep.subr.bf16.mxu0 %v16488_v56  ;;  %4267 = vmatprep.subr.bf16.mxu1 %v16490_v57  ;;  %v16571_v55 = vld [vmem:[%s24147_s1 + $0xa34] ss:$52 sps:$4 sm:$0xff]   ;;  %v16569_v57 = vld [vmem:[%s24147_s1 + $0xa30] ss:$52 sps:$4 sm:$0xff]  }
  0x31   :  { %v16566_v56 = vld [vmem:[%s24147_s1 + $0xa28] ss:$52 sps:$4 sm:$0xff]  }
  0x33   :  { %4104 = vmatpush1.bf16.msra.mxu0 %v16492_v59  ;;  %4268 = vmatpush1.bf16.msra.mxu1 %v16493_v61  ;;  %v16577_v59 = vld [vmem:[%s24147_s1 + $0xa9c] ss:$52 sps:$4 sm:$0xff]  }
  0x34   :  { %4105 = vmatprep.subr.bf16.mxu0 %v16494_v62  ;;  %4269 = vmatprep.subr.bf16.mxu1 %v16496_v63  ;;  %v16572_v61 = vld [vmem:[%s24147_s1 + $0xa90] ss:$52 sps:$4 sm:$0xff]   ;;  %v16575_v62 = vld [vmem:[%s24147_s1 + $0xa98] ss:$52 sps:$4 sm:$0xff]  }
  0x35   :  { %v16580_v63 = vld [vmem:[%s24147_s1 + $0xafc] ss:$52 sps:$4 sm:$0xff]  }
  0x37   :  { %4106 = vmatpush1.bf16.msra.mxu0 %v16498_v0  ;;  %4270 = vmatpush1.bf16.msra.mxu1 %v16499_v1  ;;  %v16583_v0 = vld [vmem:[%s24147_s1 + $0xb04] ss:$52 sps:$4 sm:$0xff]  }
  0x38   :  { %4107 = vmatprep.subr.bf16.mxu0 %v16500_v2  ;;  %4271 = vmatprep.subr.bf16.mxu1 %v16502_v3  ;;  %v16578_v1 = vld [vmem:[%s24147_s1 + $0xaf8] ss:$52 sps:$4 sm:$0xff]   ;;  %v16581_v2 = vld [vmem:[%s24147_s1 + $0xb00] ss:$52 sps:$4 sm:$0xff]  }
  0x39   :  { %v16586_v3 = vld [vmem:[%s24147_s1 + $0xb64] ss:$52 sps:$4 sm:$0xff]  }
  0x3b   :  { %4108 = vmatpush1.bf16.msra.mxu0 %v16504_v4  ;;  %4272 = vmatpush1.bf16.msra.mxu1 %v16505_v5  ;;  %v16589_v4 = vld [vmem:[%s24147_s1 + $0xb6c] ss:$52 sps:$4 sm:$0xff]  }
  0x3c   :  { %4109 = vmatprep.subr.bf16.mxu0 %v16506_v6  ;;  %4273 = vmatprep.subr.bf16.mxu1 %v16508_v7  ;;  %v16584_v5 = vld [vmem:[%s24147_s1 + $0xb60] ss:$52 sps:$4 sm:$0xff]   ;;  %v16587_v6 = vld [vmem:[%s24147_s1 + $0xb68] ss:$52 sps:$4 sm:$0xff]  }
  0x3d   :  { %v16592_v7 = vld [vmem:[%s24147_s1 + $0xbcc] ss:$52 sps:$4 sm:$0xff]  }
  0x3f   :  { %4110 = vmatpush1.bf16.msra.mxu0 %v16510_v9  ;;  %4274 = vmatpush1.bf16.msra.mxu1 %v16511_v10  ;;  %v16590_v9 = vld [vmem:[%s24147_s1 + $0xbc8] ss:$52 sps:$4 sm:$0xff]   ;;  %v16593_v10 = vld [vmem:[%s24147_s1 + $0xbd0] ss:$52 sps:$4 sm:$0xff]  }
  0x40   :  { %4120 = vmatprep.subr.bf16.mxu0 %v16514_v12  ;;  %4284 = vmatprep.subr.bf16.mxu1 %v16517_v13  ;;  %v16601_v12 = vld [vmem:[%s24147_s1 + $0xc3c] ss:$52 sps:$4 sm:$0xff]  }
  0x41   :  { %v16596_v13 = vld [vmem:[%s24147_s1 + $0xc30] ss:$52 sps:$4 sm:$0xff]  }
  0x42   :  { %4112 = vmatmul.mubr.bf16.vlgmr.msra.gmra.mrb[0].mxu0 %v18828_v16  ;;  %4276 = vmatmul.mubr.bf16.vlgmr.msra.gmra.mrb[0].mxu1 %v18828_v16 }
  0x43   :  { %4121 = vmatpush1.bf16.msra.mxu0 %v16512_v15  ;;  %4285 = vmatpush1.bf16.msra.mxu1 %v16515_v17  ;;  %v16604_v15 = vld [vmem:[%s24147_s1 + $0xc9c] ss:$52 sps:$4 sm:$0xff]   ;;  %v16607_v17 = vld [vmem:[%s24147_s1 + $0xca4] ss:$52 sps:$4 sm:$0xff]  }
  0x44   :  { %4122 = vmatprep.subr.bf16.mxu0 %v16520_v20  ;;  %4286 = vmatprep.subr.bf16.mxu1 %v16523_v21  ;;  %v16602_v20 = vld [vmem:[%s24147_s1 + $0xc98] ss:$52 sps:$4 sm:$0xff]   ;;  %v16605_v21 = vld [vmem:[%s24147_s1 + $0xca0] ss:$52 sps:$4 sm:$0xff]  }
  0x45   :  { %4152 = vmatprep.mubr.bf16.mxu0 %v18845_v22  ;;  %4316 = vmatprep.mubr.bf16.mxu1 %v18845_v22 }
  0x47   :  { %4123 = vmatpush1.bf16.msra.mxu0 %v16518_v23  ;;  %4287 = vmatpush1.bf16.msra.mxu1 %v16521_v24  ;;  %v16610_v23 = vld [vmem:[%s24147_s1 + $0xd04] ss:$52 sps:$4 sm:$0xff]   ;;  %v16613_v24 = vld [vmem:[%s24147_s1 + $0xd0c] ss:$52 sps:$4 sm:$0xff]  }
  0x48   :  { %4124 = vmatprep.subr.bf16.mxu0 %v16526_v25  ;;  %4288 = vmatprep.subr.bf16.mxu1 %v16529_v26  ;;  %v16608_v25 = vld [vmem:[%s24147_s1 + $0xd00] ss:$52 sps:$4 sm:$0xff]   ;;  %v19036_v26 = vcombine.high %v18828_v16, %v18828_v16 }
  0x4b   :  { %4125 = vmatpush1.bf16.msra.mxu0 %v16524_v27  ;;  %4289 = vmatpush1.bf16.msra.mxu1 %v16527_v28  ;;  %v16611_v27 = vld [vmem:[%s24147_s1 + $0xd08] ss:$52 sps:$4 sm:$0xff]   ;;  %v16616_v28 = vld [vmem:[%s24147_s1 + $0xd6c] ss:$52 sps:$4 sm:$0xff]  }
  0x4c   :  { %4126 = vmatprep.subr.bf16.mxu0 %v16532_v29  ;;  %4290 = vmatprep.subr.bf16.mxu1 %v16535_v30  ;;  %v16619_v29 = vld [vmem:[%s24147_s1 + $0xd74] ss:$52 sps:$4 sm:$0xff]  }
  0x4d   :  { %v16614_v30 = vld [vmem:[%s24147_s1 + $0xd68] ss:$52 sps:$4 sm:$0xff]  }
  0x4f   :  { %4127 = vmatpush1.bf16.msra.mxu0 %v16530_v31  ;;  %4291 = vmatpush1.bf16.msra.mxu1 %v16533_v32  ;;  %v16617_v31 = vld [vmem:[%s24147_s1 + $0xd70] ss:$52 sps:$4 sm:$0xff]   ;;  %v16622_v32 = vld [vmem:[%s24147_s1 + $0xdd4] ss:$52 sps:$4 sm:$0xff]  }
  0x50   :  { %4128 = vmatprep.subr.bf16.mxu0 %v16538_v33  ;;  %4292 = vmatprep.subr.bf16.mxu1 %v16541_v34  ;;  %v16625_v33 = vld [vmem:[%s24147_s1 + $0xddc] ss:$52 sps:$4 sm:$0xff]  }
  0x51   :  { %v16620_v34 = vld [vmem:[%s24147_s1 + $0xdd0] ss:$52 sps:$4 sm:$0xff]  }
  0x53   :  { %4129 = vmatpush1.bf16.msra.mxu0 %v16536_v35  ;;  %4293 = vmatpush1.bf16.msra.mxu1 %v16539_v36  ;;  %v16623_v35 = vld [vmem:[%s24147_s1 + $0xdd8] ss:$52 sps:$4 sm:$0xff]   ;;  %v16628_v36 = vld [vmem:[%s24147_s1 + $0xe3c] ss:$52 sps:$4 sm:$0xff]  }
  0x54   :  { %4130 = vmatprep.subr.bf16.mxu0 %v16544_v37  ;;  %4294 = vmatprep.subr.bf16.mxu1 %v16547_v38  ;;  %v16631_v37 = vld [vmem:[%s24147_s1 + $0xe44] ss:$52 sps:$4 sm:$0xff]  }
  0x55   :  { %v16626_v38 = vld [vmem:[%s24147_s1 + $0xe38] ss:$52 sps:$4 sm:$0xff]  }
  0x57   :  { %4131 = vmatpush1.bf16.msra.mxu0 %v16542_v39  ;;  %4295 = vmatpush1.bf16.msra.mxu1 %v16545_v40  ;;  %v16629_v39 = vld [vmem:[%s24147_s1 + $0xe40] ss:$52 sps:$4 sm:$0xff]   ;;  %v16634_v40 = vld [vmem:[%s24147_s1 + $0xea4] ss:$52 sps:$4 sm:$0xff]  }
  0x58   :  { %4132 = vmatprep.subr.bf16.mxu0 %v16550_v41  ;;  %4296 = vmatprep.subr.bf16.mxu1 %v16553_v43  ;;  %v16637_v41 = vld [vmem:[%s24147_s1 + $0xeac] ss:$52 sps:$4 sm:$0xff]  }
  0x59   :  { %v16632_v43 = vld [vmem:[%s24147_s1 + $0xea0] ss:$52 sps:$4 sm:$0xff]  }
  0x5b   :  { %4133 = vmatpush1.bf16.msra.mxu0 %v16548_v44  ;;  %4297 = vmatpush1.bf16.msra.mxu1 %v16551_v45  ;;  %v16635_v44 = vld [vmem:[%s24147_s1 + $0xea8] ss:$52 sps:$4 sm:$0xff]   ;;  %v16640_v45 = vld [vmem:[%s24147_s1 + $0xf0c] ss:$52 sps:$4 sm:$0xff]  }
  0x5c   :  { %4134 = vmatprep.subr.bf16.mxu0 %v16556_v46  ;;  %4298 = vmatprep.subr.bf16.mxu1 %v16559_v47  ;;  %v16643_v46 = vld [vmem:[%s24147_s1 + $0xf14] ss:$52 sps:$4 sm:$0xff]  }
  0x5d   :  { %v16638_v47 = vld [vmem:[%s24147_s1 + $0xf08] ss:$52 sps:$4 sm:$0xff]  }
  0x5f   :  { %4135 = vmatpush1.bf16.msra.mxu0 %v16554_v48  ;;  %4299 = vmatpush1.bf16.msra.mxu1 %v16557_v49  ;;  %v16641_v48 = vld [vmem:[%s24147_s1 + $0xf10] ss:$52 sps:$4 sm:$0xff]   ;;  %v16646_v49 = vld [vmem:[%s24147_s1 + $0xf74] ss:$52 sps:$4 sm:$0xff]  }
  0x60   :  { %4136 = vmatprep.subr.bf16.mxu0 %v16562_v50  ;;  %4300 = vmatprep.subr.bf16.mxu1 %v16565_v51  ;;  %v16649_v50 = vld [vmem:[%s24147_s1 + $0xf7c] ss:$52 sps:$4 sm:$0xff]  }
  0x61   :  { %v16644_v51 = vld [vmem:[%s24147_s1 + $0xf70] ss:$52 sps:$4 sm:$0xff]  }
  0x63   :  { %4137 = vmatpush1.bf16.msra.mxu0 %v16560_v52  ;;  %4301 = vmatpush1.bf16.msra.mxu1 %v16563_v53  ;;  %v16647_v52 = vld [vmem:[%s24147_s1 + $0xf78] ss:$52 sps:$4 sm:$0xff]   ;;  %v16652_v53 = vld [vmem:[%s24147_s1 + $0xfdc] ss:$52 sps:$4 sm:$0xff]  }
  0x64   :  { %4138 = vmatprep.subr.bf16.mxu0 %v16568_v54  ;;  %4302 = vmatprep.subr.bf16.mxu1 %v16571_v55  ;;  %v16655_v54 = vld [vmem:[%s24147_s1 + $0xfe4] ss:$52 sps:$4 sm:$0xff]  }
  0x65   :  { %v16650_v55 = vld [vmem:[%s24147_s1 + $0xfd8] ss:$52 sps:$4 sm:$0xff]  }
  0x67   :  { %4139 = vmatpush1.bf16.msra.mxu0 %v16566_v56  ;;  %4303 = vmatpush1.bf16.msra.mxu1 %v16569_v57  ;;  %v16653_v56 = vld [vmem:[%s24147_s1 + $0xfe0] ss:$52 sps:$4 sm:$0xff]   ;;  %v16658_v57 = vld [vmem:[%s24147_s1 + $0x1044] ss:$52 sps:$4 sm:$0xff]  }
  0x68   :  { %4140 = vmatprep.subr.bf16.mxu0 %v16574_v58  ;;  %4304 = vmatprep.subr.bf16.mxu1 %v16577_v59  ;;  %v16661_v58 = vld [vmem:[%s24147_s1 + $0x104c] ss:$52 sps:$4 sm:$0xff]  }
  0x69   :  { %v16656_v59 = vld [vmem:[%s24147_s1 + $0x1040] ss:$52 sps:$4 sm:$0xff]  }
  0x6b   :  { %4141 = vmatpush1.bf16.msra.mxu0 %v16572_v61  ;;  %4305 = vmatpush1.bf16.msra.mxu1 %v16575_v62  ;;  %v16659_v61 = vld [vmem:[%s24147_s1 + $0x1048] ss:$52 sps:$4 sm:$0xff]   ;;  %v16664_v62 = vld [vmem:[%s24147_s1 + $0x10ac] ss:$52 sps:$4 sm:$0xff]  }
  0x6c   :  { %4142 = vmatprep.subr.bf16.mxu0 %v16580_v63  ;;  %4306 = vmatprep.subr.bf16.mxu1 %v16583_v0  ;;  %v16667_v63 = vld [vmem:[%s24147_s1 + $0x10b4] ss:$52 sps:$4 sm:$0xff]  }
  0x6d   :  { %v16662_v0 = vld [vmem:[%s24147_s1 + $0x10a8] ss:$52 sps:$4 sm:$0xff]  }
  0x6f   :  { %4143 = vmatpush1.bf16.msra.mxu0 %v16578_v1  ;;  %4307 = vmatpush1.bf16.msra.mxu1 %v16581_v2  ;;  %v16665_v1 = vld [vmem:[%s24147_s1 + $0x10b0] ss:$52 sps:$4 sm:$0xff]   ;;  %v16670_v2 = vld [vmem:[%s24147_s1 + $0x1114] ss:$52 sps:$4 sm:$0xff]  }
  0x70   :  { %4144 = vmatprep.subr.bf16.mxu0 %v16586_v3  ;;  %4308 = vmatprep.subr.bf16.mxu1 %v16589_v4  ;;  %v16673_v3 = vld [vmem:[%s24147_s1 + $0x111c] ss:$52 sps:$4 sm:$0xff]  }
  0x71   :  { %v16668_v4 = vld [vmem:[%s24147_s1 + $0x1110] ss:$52 sps:$4 sm:$0xff]  }
  0x73   :  { %4145 = vmatpush1.bf16.msra.mxu0 %v16584_v5  ;;  %4309 = vmatpush1.bf16.msra.mxu1 %v16587_v6  ;;  %v16671_v5 = vld [vmem:[%s24147_s1 + $0x1118] ss:$52 sps:$4 sm:$0xff]   ;;  %v16676_v6 = vld [vmem:[%s24147_s1 + $0x117c] ss:$52 sps:$4 sm:$0xff]  }
  0x74   :  { %4146 = vmatprep.subr.bf16.mxu0 %v16592_v7  ;;  %4310 = vmatprep.subr.bf16.mxu1 %v16595_v8  ;;  %v16679_v7 = vld [vmem:[%s24147_s1 + $0x1184] ss:$52 sps:$4 sm:$0xff]  }
  0x75   :  { %v16674_v8 = vld [vmem:[%s24147_s1 + $0x1178] ss:$52 sps:$4 sm:$0xff]  }
  0x77   :  { %4147 = vmatpush1.bf16.msra.mxu0 %v16590_v9  ;;  %4311 = vmatpush1.bf16.msra.mxu1 %v16593_v10  ;;  %v16677_v9 = vld [vmem:[%s24147_s1 + $0x1180] ss:$52 sps:$4 sm:$0xff]   ;;  %v16682_v10 = vld [vmem:[%s24147_s1 + $0x11e4] ss:$52 sps:$4 sm:$0xff]  }
  0x78   :  { %4148 = vmatprep.subr.bf16.mxu0 %v16598_v11  ;;  %4312 = vmatprep.subr.bf16.mxu1 %v16601_v12  ;;  %v16685_v11 = vld [vmem:[%s24147_s1 + $0x11ec] ss:$52 sps:$4 sm:$0xff]  }
  0x79   :  { %v16680_v12 = vld [vmem:[%s24147_s1 + $0x11e0] ss:$52 sps:$4 sm:$0xff]  }
  0x7b   :  { %4149 = vmatpush1.bf16.msra.mxu0 %v16596_v13  ;;  %4313 = vmatpush1.bf16.msra.mxu1 %v16599_v14  ;;  %v16683_v13 = vld [vmem:[%s24147_s1 + $0x11e8] ss:$52 sps:$4 sm:$0xff]   ;;  %v16688_v14 = vld [vmem:[%s24147_s1 + $0x124c] ss:$52 sps:$4 sm:$0xff]  }
  0x7c   :  { %4150 = vmatprep.subr.bf16.mxu0 %v16604_v15  ;;  %4314 = vmatprep.subr.bf16.mxu1 %v16607_v17  ;;  %v16691_v15 = vld [vmem:[%s24147_s1 + $0x1254] ss:$52 sps:$4 sm:$0xff]  }
  0x7d   :  { %v16686_v17 = vld [vmem:[%s24147_s1 + $0x1248] ss:$52 sps:$4 sm:$0xff]  }
  0x7f   :  { %4151 = vmatpush1.bf16.msra.mxu0 %v16602_v20  ;;  %4315 = vmatpush1.bf16.msra.mxu1 %v16605_v21  ;;  %v16689_v20 = vld [vmem:[%s24147_s1 + $0x1250] ss:$52 sps:$4 sm:$0xff]   ;;  %v16694_v21 = vld [vmem:[%s24147_s1 + $0x12b4] ss:$52 sps:$4 sm:$0xff]  }
  0x80   :  { %4161 = vmatprep.subr.bf16.mxu0 %v16610_v23  ;;  %4325 = vmatprep.subr.bf16.mxu1 %v16613_v24  ;;  %v16697_v23 = vld [vmem:[%s24147_s1 + $0x12bc] ss:$52 sps:$4 sm:$0xff]  }
  0x81   :  { %v16692_v24 = vld [vmem:[%s24147_s1 + $0x12b0] ss:$52 sps:$4 sm:$0xff]  }
  0x82   :  { %4153 = vmatmul.mubr.bf16.vlgmr.msra.gmra.mrb[0].mxu0 %v19036_v26  ;;  %4317 = vmatmul.mubr.bf16.vlgmr.msra.gmra.mrb[0].mxu1 %v19036_v26 }
  0x83   :  { %4162 = vmatpush1.bf16.msra.mxu0 %v16608_v25  ;;  %4326 = vmatpush1.bf16.msra.mxu1 %v16611_v27  ;;  %v16695_v25 = vld [vmem:[%s24147_s1 + $0x12b8] ss:$52 sps:$4 sm:$0xff]   ;;  %v16700_v27 = vld [vmem:[%s24147_s1 + $0x131c] ss:$52 sps:$4 sm:$0xff]  }
  0x84   :  { %4163 = vmatprep.subr.bf16.mxu0 %v16616_v28  ;;  %4327 = vmatprep.subr.bf16.mxu1 %v16619_v29  ;;  %v16703_v28 = vld [vmem:[%s24147_s1 + $0x1324] ss:$52 sps:$4 sm:$0xff]  }
  0x85   :  { %4193 = vmatprep.mubr.bf16.mxu0 %v18835_v19  ;;  %4357 = vmatprep.mubr.bf16.mxu1 %v18835_v19  ;;  %v16698_v29 = vld [vmem:[%s24147_s1 + $0x1318] ss:$52 sps:$4 sm:$0xff]  }
  0x87   :  { %4164 = vmatpush1.bf16.msra.mxu0 %v16614_v30  ;;  %4328 = vmatpush1.bf16.msra.mxu1 %v16617_v31  ;;  %v16701_v30 = vld [vmem:[%s24147_s1 + $0x1320] ss:$52 sps:$4 sm:$0xff]   ;;  %v16707_v31 = vld [vmem:[%s24147_s1 + $0x1c] ss:$52 sps:$4 sm:$0xff]  }
  0x88   :  { %4165 = vmatprep.subr.bf16.mxu0 %v16622_v32  ;;  %4329 = vmatprep.subr.bf16.mxu1 %v16625_v33  ;;  %v16713_v32 = vld [vmem:[%s24147_s1 + $0x1384] ss:$52 sps:$4 sm:$0xff]  }
  0x89   :  { %v16705_v33 = vld [vmem:[%s24147_s1 + $0x18] ss:$52 sps:$4 sm:$0xff]  }
  0x8b   :  { %4166 = vmatpush1.bf16.msra.mxu0 %v16620_v34  ;;  %4330 = vmatpush1.bf16.msra.mxu1 %v16623_v35  ;;  %v16711_v34 = vld [vmem:[%s24147_s1 + $0x1380] ss:$52 sps:$4 sm:$0xff]   ;;  %v16710_v35 = vld [vmem:[%s24147_s1 + $0x84] ss:$52 sps:$4 sm:$0xff]  }
  0x8c   :  { %4167 = vmatprep.subr.bf16.mxu0 %v16628_v36  ;;  %4331 = vmatprep.subr.bf16.mxu1 %v16631_v37  ;;  %v16722_v36 = vld [vmem:[%s24147_s1 + $0x138c] ss:$52 sps:$4 sm:$0xff]  }
  0x8d   :  { %v16708_v37 = vld [vmem:[%s24147_s1 + $0x80] ss:$52 sps:$4 sm:$0xff]  }
  0x8f   :  { %4168 = vmatpush1.bf16.msra.mxu0 %v16626_v38  ;;  %4332 = vmatpush1.bf16.msra.mxu1 %v16629_v39  ;;  %v16716_v38 = vld [vmem:[%s24147_s1 + $0xec] ss:$52 sps:$4 sm:$0xff]   ;;  %v24153_v39 = vmov 0  }
  0x90   :  { %4169 = vmatprep.subr.bf16.mxu0 %v16634_v40  ;;  %4333 = vmatprep.subr.bf16.mxu1 %v16637_v41  ;;  %v16714_v40 = vld [vmem:[%s24147_s1 + $0xe8] ss:$52 sps:$4 sm:$0xff]  }
  0x91   :  { %v16719_v41 = vld [vmem:[%s24147_s1 + $0x154] ss:$52 sps:$4 sm:$0xff]  }
  0x93   :  { %4170 = vmatpush1.bf16.msra.mxu0 %v16632_v43  ;;  %4334 = vmatpush1.bf16.msra.mxu1 %v16635_v44  ;;  %v19261_v43 = vcombine.high %v18833_v18, %v18833_v18  ;;  %v16717_v44 = vld [vmem:[%s24147_s1 + $0x150] ss:$52 sps:$4 sm:$0xff]  }
  0x94   :  { %4171 = vmatprep.subr.bf16.mxu0 %v16640_v45  ;;  %4335 = vmatprep.subr.bf16.mxu1 %v16643_v46  ;;  %v16720_v45 = vld [vmem:[%s24147_s1 + $0x1388] ss:$52 sps:$4 sm:$0xff]  }
  0x95   :  { %v16725_v46 = vld [vmem:[%s24147_s1 + $0x1bc] ss:$52 sps:$4 sm:$0xff]  }
  0x97   :  { %4172 = vmatpush1.bf16.msra.mxu0 %v16638_v47  ;;  %4336 = vmatpush1.bf16.msra.mxu1 %v16641_v48  ;;  %v16728_v47 = vld [vmem:[%s24147_s1 + $0x14] ss:$52 sps:$4 sm:$0xff]   ;;  %v16723_v48 = vld [vmem:[%s24147_s1 + $0x1b8] ss:$52 sps:$4 sm:$0xff]  }
  0x98   :  { %4173 = vmatprep.subr.bf16.mxu0 %v16646_v49  ;;  %4337 = vmatprep.subr.bf16.mxu1 %v16649_v50  ;;  %v16731_v49 = vld [vmem:[%s24147_s1 + $0x224] ss:$52 sps:$4 sm:$0xff]  }
  0x99   :  { %v16726_v50 = vld [vmem:[%s24147_s1 + $0x10] ss:$52 sps:$4 sm:$0xff]  }
  0x9b   :  { %4174 = vmatpush1.bf16.msra.mxu0 %v16644_v51  ;;  %4338 = vmatpush1.bf16.msra.mxu1 %v16647_v52  ;;  %v16729_v51 = vld [vmem:[%s24147_s1 + $0x220] ss:$52 sps:$4 sm:$0xff]   ;;  %v16734_v52 = vld [vmem:[%s24147_s1 + $0x7c] ss:$52 sps:$4 sm:$0xff]  }
  0x9c   :  { %4175 = vmatprep.subr.bf16.mxu0 %v16652_v53  ;;  %4339 = vmatprep.subr.bf16.mxu1 %v16655_v54  ;;  %v16737_v53 = vld [vmem:[%s24147_s1 + $0x28c] ss:$52 sps:$4 sm:$0xff]  }
  0x9d   :  { %v16732_v54 = vld [vmem:[%s24147_s1 + $0x78] ss:$52 sps:$4 sm:$0xff]  }
  0x9f   :  { %4176 = vmatpush1.bf16.msra.mxu0 %v16650_v55  ;;  %4340 = vmatpush1.bf16.msra.mxu1 %v16653_v56  ;;  %v16735_v55 = vld [vmem:[%s24147_s1 + $0x288] ss:$52 sps:$4 sm:$0xff]   ;;  %v16740_v56 = vld [vmem:[%s24147_s1 + $0xe4] ss:$52 sps:$4 sm:$0xff]  }
  0xa0   :  { %4177 = vmatprep.subr.bf16.mxu0 %v16658_v57  ;;  %4341 = vmatprep.subr.bf16.mxu1 %v16661_v58  ;;  %v16743_v57 = vld [vmem:[%s24147_s1 + $0x2f4] ss:$52 sps:$4 sm:$0xff]  }
  0xa1   :  { %v16738_v58 = vld [vmem:[%s24147_s1 + $0xe0] ss:$52 sps:$4 sm:$0xff]  }
  0xa3   :  { %4178 = vmatpush1.bf16.msra.mxu0 %v16656_v59  ;;  %4342 = vmatpush1.bf16.msra.mxu1 %v16659_v61  ;;  %v16741_v59 = vld [vmem:[%s24147_s1 + $0x2f0] ss:$52 sps:$4 sm:$0xff]   ;;  %v16746_v61 = vld [vmem:[%s24147_s1 + $0x14c] ss:$52 sps:$4 sm:$0xff]  }
  0xa4   :  { %4179 = vmatprep.subr.bf16.mxu0 %v16664_v62  ;;  %4343 = vmatprep.subr.bf16.mxu1 %v16667_v63  ;;  %v16749_v62 = vld [vmem:[%s24147_s1 + $0x35c] ss:$52 sps:$4 sm:$0xff]  }
  0xa5   :  { %v16744_v63 = vld [vmem:[%s24147_s1 + $0x148] ss:$52 sps:$4 sm:$0xff]  }
  0xa7   :  { %4180 = vmatpush1.bf16.msra.mxu0 %v16662_v0  ;;  %4344 = vmatpush1.bf16.msra.mxu1 %v16665_v1  ;;  %v16747_v0 = vld [vmem:[%s24147_s1 + $0x358] ss:$52 sps:$4 sm:$0xff]   ;;  %v16752_v1 = vld [vmem:[%s24147_s1 + $0x1b4] ss:$52 sps:$4 sm:$0xff]  }
  0xa8   :  { %4181 = vmatprep.subr.bf16.mxu0 %v16670_v2  ;;  %4345 = vmatprep.subr.bf16.mxu1 %v16673_v3  ;;  %v16755_v2 = vld [vmem:[%s24147_s1 + $0x3c4] ss:$52 sps:$4 sm:$0xff]  }
  0xa9   :  { %v16750_v3 = vld [vmem:[%s24147_s1 + $0x1b0] ss:$52 sps:$4 sm:$0xff]  }
  0xab   :  { %4182 = vmatpush1.bf16.msra.mxu0 %v16668_v4  ;;  %4346 = vmatpush1.bf16.msra.mxu1 %v16671_v5  ;;  %v16753_v4 = vld [vmem:[%s24147_s1 + $0x3c0] ss:$52 sps:$4 sm:$0xff]   ;;  %v16758_v5 = vld [vmem:[%s24147_s1 + $0x21c] ss:$52 sps:$4 sm:$0xff]  }
  0xac   :  { %4183 = vmatprep.subr.bf16.mxu0 %v16676_v6  ;;  %4347 = vmatprep.subr.bf16.mxu1 %v16679_v7  ;;  %v16761_v6 = vld [vmem:[%s24147_s1 + $0x42c] ss:$52 sps:$4 sm:$0xff]  }
  0xad   :  { %v16756_v7 = vld [vmem:[%s24147_s1 + $0x218] ss:$52 sps:$4 sm:$0xff]  }
  0xaf   :  { %4184 = vmatpush1.bf16.msra.mxu0 %v16674_v8  ;;  %4348 = vmatpush1.bf16.msra.mxu1 %v16677_v9  ;;  %v16759_v8 = vld [vmem:[%s24147_s1 + $0x428] ss:$52 sps:$4 sm:$0xff]   ;;  %v16764_v9 = vld [vmem:[%s24147_s1 + $0x284] ss:$52 sps:$4 sm:$0xff]  }
  0xb0   :  { %4185 = vmatprep.subr.bf16.mxu0 %v16682_v10  ;;  %4349 = vmatprep.subr.bf16.mxu1 %v16685_v11  ;;  %v16767_v10 = vld [vmem:[%s24147_s1 + $0x494] ss:$52 sps:$4 sm:$0xff]  }
  0xb1   :  { %v16762_v11 = vld [vmem:[%s24147_s1 + $0x280] ss:$52 sps:$4 sm:$0xff]  }
  0xb3   :  { %4186 = vmatpush1.bf16.msra.mxu0 %v16680_v12  ;;  %4350 = vmatpush1.bf16.msra.mxu1 %v16683_v13  ;;  %v16765_v12 = vld [vmem:[%s24147_s1 + $0x490] ss:$52 sps:$4 sm:$0xff]   ;;  %v16770_v13 = vld [vmem:[%s24147_s1 + $0x2ec] ss:$52 sps:$4 sm:$0xff]  }
  0xb4   :  { %4187 = vmatprep.subr.bf16.mxu0 %v16688_v14  ;;  %4351 = vmatprep.subr.bf16.mxu1 %v16691_v15  ;;  %v16773_v14 = vld [vmem:[%s24147_s1 + $0x4fc] ss:$52 sps:$4 sm:$0xff]  }
  0xb5   :  { %v16768_v15 = vld [vmem:[%s24147_s1 + $0x2e8] ss:$52 sps:$4 sm:$0xff]  }
  0xb7   :  { %4188 = vmatpush1.bf16.msra.mxu0 %v16686_v17  ;;  %4352 = vmatpush1.bf16.msra.mxu1 %v16689_v20  ;;  %v16771_v17 = vld [vmem:[%s24147_s1 + $0x4f8] ss:$52 sps:$4 sm:$0xff]   ;;  %v16776_v20 = vld [vmem:[%s24147_s1 + $0x354] ss:$52 sps:$4 sm:$0xff]  }
  0xb8   :  { %4189 = vmatprep.subr.bf16.mxu0 %v16694_v21  ;;  %4353 = vmatprep.subr.bf16.mxu1 %v16697_v23  ;;  %v16779_v21 = vld [vmem:[%s24147_s1 + $0x564] ss:$52 sps:$4 sm:$0xff]  }
  0xb9   :  { %v16774_v23 = vld [vmem:[%s24147_s1 + $0x350] ss:$52 sps:$4 sm:$0xff]  }
  0xbb   :  { %4190 = vmatpush1.bf16.msra.mxu0 %v16692_v24  ;;  %4354 = vmatpush1.bf16.msra.mxu1 %v16695_v25  ;;  %v16777_v24 = vld [vmem:[%s24147_s1 + $0x560] ss:$52 sps:$4 sm:$0xff]   ;;  %v16782_v25 = vld [vmem:[%s24147_s1 + $0x3bc] ss:$52 sps:$4 sm:$0xff]  }
  0xbc   :  { %4191 = vmatprep.subr.bf16.mxu0 %v16700_v27  ;;  %4355 = vmatprep.subr.bf16.mxu1 %v16703_v28  ;;  %v16785_v27 = vld [vmem:[%s24147_s1 + $0x5cc] ss:$52 sps:$4 sm:$0xff]  }
  0xbd   :  { %v16780_v28 = vld [vmem:[%s24147_s1 + $0x3b8] ss:$52 sps:$4 sm:$0xff]  }
  0xbf   :  { %4192 = vmatpush1.bf16.msra.mxu0 %v16698_v29  ;;  %4356 = vmatpush1.bf16.msra.mxu1 %v16701_v30  ;;  %v16783_v29 = vld [vmem:[%s24147_s1 + $0x5c8] ss:$52 sps:$4 sm:$0xff]   ;;  %v16788_v30 = vld [vmem:[%s24147_s1 + $0x424] ss:$52 sps:$4 sm:$0xff]  }
  0xc0   :  { %4571 = vmatprep.subr.bf16.mxu1 %v16707_v31  ;;  %4202 = vmatprep.subr.bf16.mxu0 %v16713_v32  ;;  %v16791_v31 = vld [vmem:[%s24147_s1 + $0x634] ss:$52 sps:$4 sm:$0xff]  }
  0xc1   :  { %v16786_v32 = vld [vmem:[%s24147_s1 + $0x420] ss:$52 sps:$4 sm:$0xff]  }
  0xc2   :  { %4194 = vmatmul.mubr.bf16.vlgmr.msra.gmra.mrb[0].mxu0 %v18833_v18  ;;  %4358 = vmatmul.mubr.bf16.vlgmr.msra.gmra.mrb[0].mxu1 %v18833_v18 }
  0xc3   :  { %4572 = vmatpush1.bf16.msra.mxu1 %v16705_v33  ;;  %4203 = vmatpush1.bf16.msra.mxu0 %v16711_v34  ;;  %v16789_v33 = vld [vmem:[%s24147_s1 + $0x630] ss:$52 sps:$4 sm:$0xff]   ;;  %v16794_v34 = vld [vmem:[%s24147_s1 + $0x48c] ss:$52 sps:$4 sm:$0xff]  }
  0xc4   :  { %4573 = vmatprep.subr.bf16.mxu1 %v16710_v35  ;;  %4234 = vmatprep.mubr.bf16.mxu0 %v24153_v39  ;;  %v16797_v35 = vld [vmem:[%s24147_s1 + $0x69c] ss:$52 sps:$4 sm:$0xff]  }
  0xc5   :  { %4366 = vmatprep.subr.bf16.mxu0 %v16722_v36  ;;  %4603 = vmatprep.mubr.bf16.mxu1 %v18776_v60  ;;  %v16792_v36 = vld [vmem:[%s24147_s1 + $0x488] ss:$52 sps:$4 sm:$0xff]  }
  0xc7   :  { %4574 = vmatpush1.bf16.msra.mxu1 %v16708_v37  ;;  %v16795_v37 = vld [vmem:[%s24147_s1 + $0x698] ss:$52 sps:$4 sm:$0xff]  }
  0xc8   :  { %4575 = vmatprep.subr.bf16.mxu1 %v16716_v38  ;;  %v16800_v38 = vld [vmem:[%s24147_s1 + $0x4f4] ss:$52 sps:$4 sm:$0xff]  }
  0xcb   :  { %4576 = vmatpush1.bf16.msra.mxu1 %v16714_v40  ;;  %v16803_v40 = vld [vmem:[%s24147_s1 + $0x704] ss:$52 sps:$4 sm:$0xff]  }
  0xcc   :  { %4577 = vmatprep.subr.bf16.mxu1 %v16719_v41  ;;  %v16798_v41 = vld [vmem:[%s24147_s1 + $0x4f0] ss:$52 sps:$4 sm:$0xff]  }
  0xce   :  { %14519 = vmatmul.mubr.msk.bf16.vlgmr.msra.gmra.mrb[0].mxu0 %vm4075_vm0, %v19261_v43 }
  0xcf   :  { %4578 = vmatpush1.bf16.msra.mxu1 %v16717_v44  ;;  %4367 = vmatpush1.bf16.msra.mxu0 %v16720_v45  ;;  %v16801_v44 = vld [vmem:[%s24147_s1 + $0x700] ss:$52 sps:$4 sm:$0xff]   ;;  %v16806_v45 = vld [vmem:[%s24147_s1 + $0x55c] ss:$52 sps:$4 sm:$0xff]  }
  0xd0   :  { %4579 = vmatprep.subr.bf16.mxu1 %v16725_v46  ;;  %4398 = vmatprep.mubr.bf16.mxu0 %v24153_v39  ;;  %v16809_v46 = vld [vmem:[%s24147_s1 + $0x76c] ss:$52 sps:$4 sm:$0xff]  }
  0xd1   :  { %4407 = vmatprep.subr.bf16.mxu0 %v16728_v47  ;;  %v16804_v47 = vld [vmem:[%s24147_s1 + $0x558] ss:$52 sps:$4 sm:$0xff]  }
  0xd3   :  { %4580 = vmatpush1.bf16.msra.mxu1 %v16723_v48  ;;  %v16807_v48 = vld [vmem:[%s24147_s1 + $0x768] ss:$52 sps:$4 sm:$0xff]  }
  0xd4   :  { %4581 = vmatprep.subr.bf16.mxu1 %v16731_v49  ;;  %v16812_v49 = vld [vmem:[%s24147_s1 + $0x5c4] ss:$52 sps:$4 sm:$0xff]  }
  0xd6   :  { %14520 = vmatmul.mubr.msk.bf16.vlgmr.msra.gmra.mrb[4].mxu0 %vm4075_vm0, %v19261_v43 }
  0xd7   :  { %4408 = vmatpush1.bf16.msra.mxu0 %v16726_v50  ;;  %4582 = vmatpush1.bf16.msra.mxu1 %v16729_v51  ;;  %v16815_v50 = vld [vmem:[%s24147_s1 + $0x7d4] ss:$52 sps:$4 sm:$0xff]  }
  0xd8   :  { %4409 = vmatprep.subr.bf16.mxu0 %v16734_v52  ;;  %4583 = vmatprep.subr.bf16.mxu1 %v16737_v53  ;;  %v16810_v51 = vld [vmem:[%s24147_s1 + $0x5c0] ss:$52 sps:$4 sm:$0xff]   ;;  %v16813_v52 = vld [vmem:[%s24147_s1 + $0x7d0] ss:$52 sps:$4 sm:$0xff]  }
  0xd9   :  { %4439 = vmatprep.mubr.bf16.mxu0 %v18776_v60  ;;  %v16818_v53 = vld [vmem:[%s24147_s1 + $0x62c] ss:$52 sps:$4 sm:$0xff]  }
  0xdb   :  { %4410 = vmatpush1.bf16.msra.mxu0 %v16732_v54  ;;  %4584 = vmatpush1.bf16.msra.mxu1 %v16735_v55  ;;  %v16821_v54 = vld [vmem:[%s24147_s1 + $0x83c] ss:$52 sps:$4 sm:$0xff]  }
  0xdc   :  { %4411 = vmatprep.subr.bf16.mxu0 %v16740_v56  ;;  %4585 = vmatprep.subr.bf16.mxu1 %v16743_v57  ;;  %v16816_v55 = vld [vmem:[%s24147_s1 + $0x628] ss:$52 sps:$4 sm:$0xff]   ;;  %v16819_v56 = vld [vmem:[%s24147_s1 + $0x838] ss:$52 sps:$4 sm:$0xff]  }
  0xdd   :  { %v16824_v57 = vld [vmem:[%s24147_s1 + $0x694] ss:$52 sps:$4 sm:$0xff]  }
  0xdf   :  { %4412 = vmatpush1.bf16.msra.mxu0 %v16738_v58  ;;  %4586 = vmatpush1.bf16.msra.mxu1 %v16741_v59  ;;  %v16827_v58 = vld [vmem:[%s24147_s1 + $0x8a4] ss:$52 sps:$4 sm:$0xff]  }
  0xe0   :  { %4413 = vmatprep.subr.bf16.mxu0 %v16746_v61  ;;  %4587 = vmatprep.subr.bf16.mxu1 %v16749_v62  ;;  %v16822_v59 = vld [vmem:[%s24147_s1 + $0x690] ss:$52 sps:$4 sm:$0xff]   ;;  %v16825_v61 = vld [vmem:[%s24147_s1 + $0x8a0] ss:$52 sps:$4 sm:$0xff]  }
  0xe1   :  { %v16830_v62 = vld [vmem:[%s24147_s1 + $0x6fc] ss:$52 sps:$4 sm:$0xff]  }
  0xe3   :  { %4414 = vmatpush1.bf16.msra.mxu0 %v16744_v63  ;;  %4588 = vmatpush1.bf16.msra.mxu1 %v16747_v0  ;;  %v16833_v63 = vld [vmem:[%s24147_s1 + $0x90c] ss:$52 sps:$4 sm:$0xff]  }
  0xe4   :  { %4415 = vmatprep.subr.bf16.mxu0 %v16752_v1  ;;  %4589 = vmatprep.subr.bf16.mxu1 %v16755_v2  ;;  %v16828_v0 = vld [vmem:[%s24147_s1 + $0x6f8] ss:$52 sps:$4 sm:$0xff]   ;;  %v16831_v1 = vld [vmem:[%s24147_s1 + $0x908] ss:$52 sps:$4 sm:$0xff]  }
  0xe5   :  { %v16836_v2 = vld [vmem:[%s24147_s1 + $0x764] ss:$52 sps:$4 sm:$0xff]  }
  0xe7   :  { %4416 = vmatpush1.bf16.msra.mxu0 %v16750_v3  ;;  %4590 = vmatpush1.bf16.msra.mxu1 %v16753_v4  ;;  %v16839_v3 = vld [vmem:[%s24147_s1 + $0x974] ss:$52 sps:$4 sm:$0xff]  }
  0xe8   :  { %4417 = vmatprep.subr.bf16.mxu0 %v16758_v5  ;;  %4591 = vmatprep.subr.bf16.mxu1 %v16761_v6  ;;  %v16834_v4 = vld [vmem:[%s24147_s1 + $0x760] ss:$52 sps:$4 sm:$0xff]   ;;  %v16837_v5 = vld [vmem:[%s24147_s1 + $0x970] ss:$52 sps:$4 sm:$0xff]  }
  0xe9   :  { %v16842_v6 = vld [vmem:[%s24147_s1 + $0x7cc] ss:$52 sps:$4 sm:$0xff]  }
  0xeb   :  { %4418 = vmatpush1.bf16.msra.mxu0 %v16756_v7  ;;  %4592 = vmatpush1.bf16.msra.mxu1 %v16759_v8  ;;  %v16845_v7 = vld [vmem:[%s24147_s1 + $0x9dc] ss:$52 sps:$4 sm:$0xff]  }
  0xec   :  { %4419 = vmatprep.subr.bf16.mxu0 %v16764_v9  ;;  %4593 = vmatprep.subr.bf16.mxu1 %v16767_v10  ;;  %v16840_v8 = vld [vmem:[%s24147_s1 + $0x7c8] ss:$52 sps:$4 sm:$0xff]   ;;  %v16843_v9 = vld [vmem:[%s24147_s1 + $0x9d8] ss:$52 sps:$4 sm:$0xff]  }
  0xed   :  { %v16848_v10 = vld [vmem:[%s24147_s1 + $0x834] ss:$52 sps:$4 sm:$0xff]  }
  0xef   :  { %4420 = vmatpush1.bf16.msra.mxu0 %v16762_v11  ;;  %4594 = vmatpush1.bf16.msra.mxu1 %v16765_v12  ;;  %v16851_v11 = vld [vmem:[%s24147_s1 + $0xa44] ss:$52 sps:$4 sm:$0xff]  }
  0xf0   :  { %4421 = vmatprep.subr.bf16.mxu0 %v16770_v13  ;;  %4595 = vmatprep.subr.bf16.mxu1 %v16773_v14  ;;  %v16846_v12 = vld [vmem:[%s24147_s1 + $0x830] ss:$52 sps:$4 sm:$0xff]   ;;  %v16849_v13 = vld [vmem:[%s24147_s1 + $0xa40] ss:$52 sps:$4 sm:$0xff]  }
  0xf1   :  { %v16854_v14 = vld [vmem:[%s24147_s1 + $0x89c] ss:$52 sps:$4 sm:$0xff]  }
  0xf3   :  { %4422 = vmatpush1.bf16.msra.mxu0 %v16768_v15  ;;  %4596 = vmatpush1.bf16.msra.mxu1 %v16771_v17  ;;  %v16857_v15 = vld [vmem:[%s24147_s1 + $0xaac] ss:$52 sps:$4 sm:$0xff]  }
  0xf4   :  { %4423 = vmatprep.subr.bf16.mxu0 %v16776_v20  ;;  %4597 = vmatprep.subr.bf16.mxu1 %v16779_v21  ;;  %v16852_v17 = vld [vmem:[%s24147_s1 + $0x898] ss:$52 sps:$4 sm:$0xff]   ;;  %v16855_v20 = vld [vmem:[%s24147_s1 + $0xaa8] ss:$52 sps:$4 sm:$0xff]  }
  0xf5   :  { %v16860_v21 = vld [vmem:[%s24147_s1 + $0x904] ss:$52 sps:$4 sm:$0xff]  }
  0xf7   :  { %4424 = vmatpush1.bf16.msra.mxu0 %v16774_v23  ;;  %4598 = vmatpush1.bf16.msra.mxu1 %v16777_v24  ;;  %v16863_v23 = vld [vmem:[%s24147_s1 + $0xb14] ss:$52 sps:$4 sm:$0xff]  }
  0xf8   :  { %4425 = vmatprep.subr.bf16.mxu0 %v16782_v25  ;;  %4599 = vmatprep.subr.bf16.mxu1 %v16785_v27  ;;  %v16858_v24 = vld [vmem:[%s24147_s1 + $0x900] ss:$52 sps:$4 sm:$0xff]   ;;  %v16861_v25 = vld [vmem:[%s24147_s1 + $0xb10] ss:$52 sps:$4 sm:$0xff]  }
  0xf9   :  { %v16866_v27 = vld [vmem:[%s24147_s1 + $0x96c] ss:$52 sps:$4 sm:$0xff]  }
  0xfb   :  { %4426 = vmatpush1.bf16.msra.mxu0 %v16780_v28  ;;  %4600 = vmatpush1.bf16.msra.mxu1 %v16783_v29  ;;  %v16869_v28 = vld [vmem:[%s24147_s1 + $0xb7c] ss:$52 sps:$4 sm:$0xff]  }
  0xfc   :  { %4427 = vmatprep.subr.bf16.mxu0 %v16788_v30  ;;  %4601 = vmatprep.subr.bf16.mxu1 %v16791_v31  ;;  %v16864_v29 = vld [vmem:[%s24147_s1 + $0x968] ss:$52 sps:$4 sm:$0xff]   ;;  %v16867_v30 = vld [vmem:[%s24147_s1 + $0xb78] ss:$52 sps:$4 sm:$0xff]  }
  0xfd   :  { %v16872_v31 = vld [vmem:[%s24147_s1 + $0x9d4] ss:$52 sps:$4 sm:$0xff]  }
  0xff   :  { %4428 = vmatpush1.bf16.msra.mxu0 %v16786_v32  ;;  %4602 = vmatpush1.bf16.msra.mxu1 %v16789_v33  ;;  %v16875_v32 = vld [vmem:[%s24147_s1 + $0xbe4] ss:$52 sps:$4 sm:$0xff]  }
 0x100   :  { %4429 = vmatprep.subr.bf16.mxu0 %v16794_v34  ;;  %4612 = vmatprep.subr.bf16.mxu1 %v16797_v35  ;;  %v16870_v33 = vld [vmem:[%s24147_s1 + $0x9d0] ss:$52 sps:$4 sm:$0xff]   ;;  %v16873_v34 = vld [vmem:[%s24147_s1 + $0xbe0] ss:$52 sps:$4 sm:$0xff]  }
 0x101   :  { %v16878_v35 = vld [vmem:[%s24147_s1 + $0xa3c] ss:$52 sps:$4 sm:$0xff]  }
 0x102   :  { %4604 = vmatmul.mubr.bf16.vlgmr.msra.gmra.mrb[4].mxu1 %v18828_v16 }
 0x103   :  { %4430 = vmatpush1.bf16.msra.mxu0 %v16792_v36  ;;  %4613 = vmatpush1.bf16.msra.mxu1 %v16795_v37  ;;  %v16881_v36 = vld [vmem:[%s24147_s1 + $0xc4c] ss:$52 sps:$4 sm:$0xff]  }
 0x104   :  { %4431 = vmatprep.subr.bf16.mxu0 %v16800_v38  ;;  %4614 = vmatprep.subr.bf16.mxu1 %v16803_v40  ;;  %v16876_v37 = vld [vmem:[%s24147_s1 + $0xa38] ss:$52 sps:$4 sm:$0xff]   ;;  %v16879_v38 = vld [vmem:[%s24147_s1 + $0xc48] ss:$52 sps:$4 sm:$0xff]  }
 0x105   :  { %4644 = vmatprep.mubr.bf16.mxu1 %v18845_v22  ;;  %v16884_v40 = vld [vmem:[%s24147_s1 + $0xaa4] ss:$52 sps:$4 sm:$0xff]  }
 0x107   :  { %4432 = vmatpush1.bf16.msra.mxu0 %v16798_v41  ;;  %4615 = vmatpush1.bf16.msra.mxu1 %v16801_v44  ;;  %v16887_v41 = vld [vmem:[%s24147_s1 + $0xcb4] ss:$52 sps:$4 sm:$0xff]  }
 0x108   :  { %4433 = vmatprep.subr.bf16.mxu0 %v16806_v45  ;;  %4616 = vmatprep.subr.bf16.mxu1 %v16809_v46  ;;  %v16882_v44 = vld [vmem:[%s24147_s1 + $0xaa0] ss:$52 sps:$4 sm:$0xff]   ;;  %v16885_v45 = vld [vmem:[%s24147_s1 + $0xcb0] ss:$52 sps:$4 sm:$0xff]  }
 0x109   :  { %v16890_v46 = vld [vmem:[%s24147_s1 + $0xb0c] ss:$52 sps:$4 sm:$0xff]  }
 0x10b   :  { %4434 = vmatpush1.bf16.msra.mxu0 %v16804_v47  ;;  %4617 = vmatpush1.bf16.msra.mxu1 %v16807_v48  ;;  %v16893_v47 = vld [vmem:[%s24147_s1 + $0xd1c] ss:$52 sps:$4 sm:$0xff]  }
 0x10c   :  { %4435 = vmatprep.subr.bf16.mxu0 %v16812_v49  ;;  %4618 = vmatprep.subr.bf16.mxu1 %v16815_v50  ;;  %v16888_v48 = vld [vmem:[%s24147_s1 + $0xb08] ss:$52 sps:$4 sm:$0xff]   ;;  %v16891_v49 = vld [vmem:[%s24147_s1 + $0xd18] ss:$52 sps:$4 sm:$0xff]  }
 0x10d   :  { %v16896_v50 = vld [vmem:[%s24147_s1 + $0xb74] ss:$52 sps:$4 sm:$0xff]  }
 0x10f   :  { %4436 = vmatpush1.bf16.msra.mxu0 %v16810_v51  ;;  %4619 = vmatpush1.bf16.msra.mxu1 %v16813_v52  ;;  %v16899_v51 = vld [vmem:[%s24147_s1 + $0xd84] ss:$52 sps:$4 sm:$0xff]  }
 0x110   :  { %4437 = vmatprep.subr.bf16.mxu0 %v16818_v53  ;;  %4620 = vmatprep.subr.bf16.mxu1 %v16821_v54  ;;  %v16894_v52 = vld [vmem:[%s24147_s1 + $0xb70] ss:$52 sps:$4 sm:$0xff]   ;;  %v16897_v53 = vld [vmem:[%s24147_s1 + $0xd80] ss:$52 sps:$4 sm:$0xff]  }
 0x111   :  { %v16902_v54 = vld [vmem:[%s24147_s1 + $0xbdc] ss:$52 sps:$4 sm:$0xff]  }
 0x113   :  { %4438 = vmatpush1.bf16.msra.mxu0 %v16816_v55  ;;  %4621 = vmatpush1.bf16.msra.mxu1 %v16819_v56  ;;  %v16905_v55 = vld [vmem:[%s24147_s1 + $0xdec] ss:$52 sps:$4 sm:$0xff]  }
 0x114   :  { %4448 = vmatprep.subr.bf16.mxu0 %v16824_v57  ;;  %4622 = vmatprep.subr.bf16.mxu1 %v16827_v58  ;;  %v16900_v56 = vld [vmem:[%s24147_s1 + $0xbd8] ss:$52 sps:$4 sm:$0xff]   ;;  %v16903_v57 = vld [vmem:[%s24147_s1 + $0xde8] ss:$52 sps:$4 sm:$0xff]  }
 0x115   :  { %v16908_v58 = vld [vmem:[%s24147_s1 + $0xc44] ss:$52 sps:$4 sm:$0xff]  }
 0x116   :  { %4440 = vmatmul.mubr.bf16.vlgmr.msra.gmra.mrb[8].mxu0 %v18828_v16 }
 0x117   :  { %4449 = vmatpush1.bf16.msra.mxu0 %v16822_v59  ;;  %4623 = vmatpush1.bf16.msra.mxu1 %v16825_v61  ;;  %v16911_v59 = vld [vmem:[%s24147_s1 + $0xe54] ss:$52 sps:$4 sm:$0xff]  }
 0x118   :  { %4450 = vmatprep.subr.bf16.mxu0 %v16830_v62  ;;  %4624 = vmatprep.subr.bf16.mxu1 %v16833_v63  ;;  %v16906_v61 = vld [vmem:[%s24147_s1 + $0xc40] ss:$52 sps:$4 sm:$0xff]   ;;  %v16909_v62 = vld [vmem:[%s24147_s1 + $0xe50] ss:$52 sps:$4 sm:$0xff]  }
 0x119   :  { %4480 = vmatprep.mubr.bf16.mxu0 %v18845_v22  ;;  %v16914_v63 = vld [vmem:[%s24147_s1 + $0xcac] ss:$52 sps:$4 sm:$0xff]  }
 0x11b   :  { %4451 = vmatpush1.bf16.msra.mxu0 %v16828_v0  ;;  %4625 = vmatpush1.bf16.msra.mxu1 %v16831_v1  ;;  %v16917_v0 = vld [vmem:[%s24147_s1 + $0xebc] ss:$52 sps:$4 sm:$0xff]  }
 0x11c   :  { %4452 = vmatprep.subr.bf16.mxu0 %v16836_v2  ;;  %4626 = vmatprep.subr.bf16.mxu1 %v16839_v3  ;;  %v16912_v1 = vld [vmem:[%s24147_s1 + $0xca8] ss:$52 sps:$4 sm:$0xff]   ;;  %v16915_v2 = vld [vmem:[%s24147_s1 + $0xeb8] ss:$52 sps:$4 sm:$0xff]  }
 0x11d   :  { %v16920_v3 = vld [vmem:[%s24147_s1 + $0xd14] ss:$52 sps:$4 sm:$0xff]  }
 0x11f   :  { %4453 = vmatpush1.bf16.msra.mxu0 %v16834_v4  ;;  %4627 = vmatpush1.bf16.msra.mxu1 %v16837_v5  ;;  %v16923_v4 = vld [vmem:[%s24147_s1 + $0xf24] ss:$52 sps:$4 sm:$0xff]  }
 0x120   :  { %4454 = vmatprep.subr.bf16.mxu0 %v16842_v6  ;;  %4628 = vmatprep.subr.bf16.mxu1 %v16845_v7  ;;  %v16918_v5 = vld [vmem:[%s24147_s1 + $0xd10] ss:$52 sps:$4 sm:$0xff]   ;;  %v16921_v6 = vld [vmem:[%s24147_s1 + $0xf20] ss:$52 sps:$4 sm:$0xff]  }
 0x121   :  { %v16926_v7 = vld [vmem:[%s24147_s1 + $0xd7c] ss:$52 sps:$4 sm:$0xff]  }
 0x123   :  { %4455 = vmatpush1.bf16.msra.mxu0 %v16840_v8  ;;  %4629 = vmatpush1.bf16.msra.mxu1 %v16843_v9  ;;  %v16929_v8 = vld [vmem:[%s24147_s1 + $0xf8c] ss:$52 sps:$4 sm:$0xff]  }
 0x124   :  { %4456 = vmatprep.subr.bf16.mxu0 %v16848_v10  ;;  %4630 = vmatprep.subr.bf16.mxu1 %v16851_v11  ;;  %v16924_v9 = vld [vmem:[%s24147_s1 + $0xd78] ss:$52 sps:$4 sm:$0xff]   ;;  %v16927_v10 = vld [vmem:[%s24147_s1 + $0xf88] ss:$52 sps:$4 sm:$0xff]  }
 0x125   :  { %v16932_v11 = vld [vmem:[%s24147_s1 + $0xde4] ss:$52 sps:$4 sm:$0xff]  }
 0x127   :  { %4457 = vmatpush1.bf16.msra.mxu0 %v16846_v12  ;;  %4631 = vmatpush1.bf16.msra.mxu1 %v16849_v13  ;;  %v16935_v12 = vld [vmem:[%s24147_s1 + $0xff4] ss:$52 sps:$4 sm:$0xff]  }
 0x128   :  { %4458 = vmatprep.subr.bf16.mxu0 %v16854_v14  ;;  %4632 = vmatprep.subr.bf16.mxu1 %v16857_v15  ;;  %v16930_v13 = vld [vmem:[%s24147_s1 + $0xde0] ss:$52 sps:$4 sm:$0xff]   ;;  %v16933_v14 = vld [vmem:[%s24147_s1 + $0xff0] ss:$52 sps:$4 sm:$0xff]  }
 0x129   :  { %v16938_v15 = vld [vmem:[%s24147_s1 + $0xe4c] ss:$52 sps:$4 sm:$0xff]  }
 0x12b   :  { %4459 = vmatpush1.bf16.msra.mxu0 %v16852_v17  ;;  %4633 = vmatpush1.bf16.msra.mxu1 %v16855_v20  ;;  %v16941_v17 = vld [vmem:[%s24147_s1 + $0x105c] ss:$52 sps:$4 sm:$0xff]  }
 0x12c   :  { %4460 = vmatprep.subr.bf16.mxu0 %v16860_v21  ;;  %4634 = vmatprep.subr.bf16.mxu1 %v16863_v23  ;;  %v16936_v20 = vld [vmem:[%s24147_s1 + $0xe48] ss:$52 sps:$4 sm:$0xff]   ;;  %v16939_v21 = vld [vmem:[%s24147_s1 + $0x1058] ss:$52 sps:$4 sm:$0xff]  }
 0x12d   :  { %v16944_v23 = vld [vmem:[%s24147_s1 + $0xeb4] ss:$52 sps:$4 sm:$0xff]  }
 0x12f   :  { %4461 = vmatpush1.bf16.msra.mxu0 %v16858_v24  ;;  %4635 = vmatpush1.bf16.msra.mxu1 %v16861_v25  ;;  %v16947_v24 = vld [vmem:[%s24147_s1 + $0x10c4] ss:$52 sps:$4 sm:$0xff]  }
 0x130   :  { %4462 = vmatprep.subr.bf16.mxu0 %v16866_v27  ;;  %4636 = vmatprep.subr.bf16.mxu1 %v16869_v28  ;;  %v16942_v25 = vld [vmem:[%s24147_s1 + $0xeb0] ss:$52 sps:$4 sm:$0xff]   ;;  %v16945_v27 = vld [vmem:[%s24147_s1 + $0x10c0] ss:$52 sps:$4 sm:$0xff]  }
 0x131   :  { %v16950_v28 = vld [vmem:[%s24147_s1 + $0xf1c] ss:$52 sps:$4 sm:$0xff]  }
 0x133   :  { %4463 = vmatpush1.bf16.msra.mxu0 %v16864_v29  ;;  %4637 = vmatpush1.bf16.msra.mxu1 %v16867_v30  ;;  %v16953_v29 = vld [vmem:[%s24147_s1 + $0x112c] ss:$52 sps:$4 sm:$0xff]  }
 0x134   :  { %4464 = vmatprep.subr.bf16.mxu0 %v16872_v31  ;;  %4638 = vmatprep.subr.bf16.mxu1 %v16875_v32  ;;  %v16948_v30 = vld [vmem:[%s24147_s1 + $0xf18] ss:$52 sps:$4 sm:$0xff]   ;;  %v16951_v31 = vld [vmem:[%s24147_s1 + $0x1128] ss:$52 sps:$4 sm:$0xff]  }
 0x135   :  { %v16956_v32 = vld [vmem:[%s24147_s1 + $0xf84] ss:$52 sps:$4 sm:$0xff]  }
 0x137   :  { %4465 = vmatpush1.bf16.msra.mxu0 %v16870_v33  ;;  %4639 = vmatpush1.bf16.msra.mxu1 %v16873_v34  ;;  %v16959_v33 = vld [vmem:[%s24147_s1 + $0x1194] ss:$52 sps:$4 sm:$0xff]  }
 0x138   :  { %4466 = vmatprep.subr.bf16.mxu0 %v16878_v35  ;;  %4640 = vmatprep.subr.bf16.mxu1 %v16881_v36  ;;  %v16954_v34 = vld [vmem:[%s24147_s1 + $0xf80] ss:$52 sps:$4 sm:$0xff]   ;;  %v16957_v35 = vld [vmem:[%s24147_s1 + $0x1190] ss:$52 sps:$4 sm:$0xff]  }
 0x139   :  { %v16962_v36 = vld [vmem:[%s24147_s1 + $0xfec] ss:$52 sps:$4 sm:$0xff]  }
 0x13b   :  { %4467 = vmatpush1.bf16.msra.mxu0 %v16876_v37  ;;  %4641 = vmatpush1.bf16.msra.mxu1 %v16879_v38  ;;  %v16965_v37 = vld [vmem:[%s24147_s1 + $0x11fc] ss:$52 sps:$4 sm:$0xff]  }
 0x13c   :  { %4468 = vmatprep.subr.bf16.mxu0 %v16884_v40  ;;  %4642 = vmatprep.subr.bf16.mxu1 %v16887_v41  ;;  %v16960_v38 = vld [vmem:[%s24147_s1 + $0xfe8] ss:$52 sps:$4 sm:$0xff]   ;;  %v16963_v40 = vld [vmem:[%s24147_s1 + $0x11f8] ss:$52 sps:$4 sm:$0xff]  }
 0x13d   :  { %v16968_v41 = vld [vmem:[%s24147_s1 + $0x1054] ss:$52 sps:$4 sm:$0xff]  }
 0x13f   :  { %4469 = vmatpush1.bf16.msra.mxu0 %v16882_v44  ;;  %4643 = vmatpush1.bf16.msra.mxu1 %v16885_v45  ;;  %v16971_v44 = vld [vmem:[%s24147_s1 + $0x1264] ss:$52 sps:$4 sm:$0xff]  }
 0x140   :  { %4470 = vmatprep.subr.bf16.mxu0 %v16890_v46  ;;  %4653 = vmatprep.subr.bf16.mxu1 %v16893_v47  ;;  %v16966_v45 = vld [vmem:[%s24147_s1 + $0x1050] ss:$52 sps:$4 sm:$0xff]   ;;  %v16969_v46 = vld [vmem:[%s24147_s1 + $0x1260] ss:$52 sps:$4 sm:$0xff]  }
 0x141   :  { %v16974_v47 = vld [vmem:[%s24147_s1 + $0x10bc] ss:$52 sps:$4 sm:$0xff]  }
 0x142   :  { %4645 = vmatmul.mubr.bf16.vlgmr.msra.gmra.mrb[4].mxu1 %v19036_v26 }
 0x143   :  { %4471 = vmatpush1.bf16.msra.mxu0 %v16888_v48  ;;  %4654 = vmatpush1.bf16.msra.mxu1 %v16891_v49  ;;  %v16977_v48 = vld [vmem:[%s24147_s1 + $0x12cc] ss:$52 sps:$4 sm:$0xff]  }
 0x144   :  { %4472 = vmatprep.subr.bf16.mxu0 %v16896_v50  ;;  %4655 = vmatprep.subr.bf16.mxu1 %v16899_v51  ;;  %v16972_v49 = vld [vmem:[%s24147_s1 + $0x10b8] ss:$52 sps:$4 sm:$0xff]   ;;  %v16975_v50 = vld [vmem:[%s24147_s1 + $0x12c8] ss:$52 sps:$4 sm:$0xff]  }
 0x145   :  { %4685 = vmatprep.mubr.bf16.mxu1 %v18835_v19  ;;  %v16980_v51 = vld [vmem:[%s24147_s1 + $0x1124] ss:$52 sps:$4 sm:$0xff]  }
 0x147   :  { %4473 = vmatpush1.bf16.msra.mxu0 %v16894_v52  ;;  %4656 = vmatpush1.bf16.msra.mxu1 %v16897_v53  ;;  %v16983_v52 = vld [vmem:[%s24147_s1 + $0x1334] ss:$52 sps:$4 sm:$0xff]  }
 0x148   :  { %4474 = vmatprep.subr.bf16.mxu0 %v16902_v54  ;;  %4657 = vmatprep.subr.bf16.mxu1 %v16905_v55  ;;  %v16978_v53 = vld [vmem:[%s24147_s1 + $0x1120] ss:$52 sps:$4 sm:$0xff]   ;;  %v16981_v54 = vld [vmem:[%s24147_s1 + $0x1330] ss:$52 sps:$4 sm:$0xff]  }
 0x149   :  { %v16986_v55 = vld [vmem:[%s24147_s1 + $0x118c] ss:$52 sps:$4 sm:$0xff]  }
 0x14b   :  { %4475 = vmatpush1.bf16.msra.mxu0 %v16900_v56  ;;  %4658 = vmatpush1.bf16.msra.mxu1 %v16903_v57  ;;  %v16989_v56 = vld [vmem:[%s24147_s1 + $0x139c] ss:$52 sps:$4 sm:$0xff]  }
 0x14c   :  { %4476 = vmatprep.subr.bf16.mxu0 %v16908_v58  ;;  %4659 = vmatprep.subr.bf16.mxu1 %v16911_v59  ;;  %v16984_v57 = vld [vmem:[%s24147_s1 + $0x1188] ss:$52 sps:$4 sm:$0xff]   ;;  %v16987_v58 = vld [vmem:[%s24147_s1 + $0x1398] ss:$52 sps:$4 sm:$0xff]  }
 0x14d   :  { %v16992_v59 = vld [vmem:[%s24147_s1 + $0x11f4] ss:$52 sps:$4 sm:$0xff]  }
 0x14f   :  { %4477 = vmatpush1.bf16.msra.mxu0 %v16906_v61  ;;  %4660 = vmatpush1.bf16.msra.mxu1 %v16909_v62  ;;  %v17001_v61 = vld [vmem:[%s24147_s1 + $0x2c] ss:$52 sps:$4 sm:$0xff]   ;;  %v16990_v62 = vld [vmem:[%s24147_s1 + $0x11f0] ss:$52 sps:$4 sm:$0xff]  }
 0x150   :  { %4478 = vmatprep.subr.bf16.mxu0 %v16914_v63  ;;  %4661 = vmatprep.subr.bf16.mxu1 %v16917_v0  ;;  %v16995_v63 = vld [vmem:[%s24147_s1 + $0x125c] ss:$52 sps:$4 sm:$0xff]   ;;  %v16993_v0 = vld [vmem:[%s24147_s1 + $0x1258] ss:$52 sps:$4 sm:$0xff]  }
 0x153   :  { %4479 = vmatpush1.bf16.msra.mxu0 %v16912_v1  ;;  %4662 = vmatpush1.bf16.msra.mxu1 %v16915_v2  ;;  %v16998_v1 = vld [vmem:[%s24147_s1 + $0x12c4] ss:$52 sps:$4 sm:$0xff]   ;;  %v16996_v2 = vld [vmem:[%s24147_s1 + $0x12c0] ss:$52 sps:$4 sm:$0xff]  }
 0x154   :  { %4489 = vmatprep.subr.bf16.mxu0 %v16920_v3  ;;  %4663 = vmatprep.subr.bf16.mxu1 %v16923_v4  ;;  %v16999_v3 = vld [vmem:[%s24147_s1 + $0x28] ss:$52 sps:$4 sm:$0xff]   ;;  %v17004_v4 = vld [vmem:[%s24147_s1 + $0x132c] ss:$52 sps:$4 sm:$0xff]  }
 0x156   :  { %4481 = vmatmul.mubr.bf16.vlgmr.msra.gmra.mrb[8].mxu0 %v19036_v26 }
 0x157   :  { %4490 = vmatpush1.bf16.msra.mxu0 %v16918_v5  ;;  %4664 = vmatpush1.bf16.msra.mxu1 %v16921_v6  ;;  %v17007_v5 = vld [vmem:[%s24147_s1 + $0x94] ss:$52 sps:$4 sm:$0xff]  }
 0x158   :  { %4491 = vmatprep.subr.bf16.mxu0 %v16926_v7  ;;  %4665 = vmatprep.subr.bf16.mxu1 %v16929_v8  ;;  %v17002_v6 = vld [vmem:[%s24147_s1 + $0x1328] ss:$52 sps:$4 sm:$0xff]   ;;  %v17005_v7 = vld [vmem:[%s24147_s1 + $0x90] ss:$52 sps:$4 sm:$0xff]  }
 0x159   :  { %4521 = vmatprep.mubr.bf16.mxu0 %v18835_v19  ;;  %v17010_v8 = vld [vmem:[%s24147_s1 + $0xfc] ss:$52 sps:$4 sm:$0xff]  }
 0x15b   :  { %4492 = vmatpush1.bf16.msra.mxu0 %v16924_v9  ;;  %4666 = vmatpush1.bf16.msra.mxu1 %v16927_v10  ;;  %v17016_v9 = vld [vmem:[%s24147_s1 + $0x1394] ss:$52 sps:$4 sm:$0xff]   ;;  %v17008_v10 = vld [vmem:[%s24147_s1 + $0xf8] ss:$52 sps:$4 sm:$0xff]  }
 0x15c   :  { %4493 = vmatprep.subr.bf16.mxu0 %v16932_v11  ;;  %4667 = vmatprep.subr.bf16.mxu1 %v16935_v12  ;;  %v17013_v11 = vld [vmem:[%s24147_s1 + $0x164] ss:$52 sps:$4 sm:$0xff]  }
 0x15d   :  { %v17014_v12 = vld [vmem:[%s24147_s1 + $0x1390] ss:$52 sps:$4 sm:$0xff]  }
 0x15f   :  { %4494 = vmatpush1.bf16.msra.mxu0 %v16930_v13  ;;  %4668 = vmatpush1.bf16.msra.mxu1 %v16933_v14  ;;  %v17022_v14 = vld [vmem:[%s24147_s1 + $0x24] ss:$52 sps:$4 sm:$0xff]  }
 0x160   :  { %4495 = vmatprep.subr.bf16.mxu0 %v16938_v15  ;;  %4669 = vmatprep.subr.bf16.mxu1 %v16941_v17 }
 0x163   :  { %4496 = vmatpush1.bf16.msra.mxu0 %v16936_v20  ;;  %4670 = vmatpush1.bf16.msra.mxu1 %v16939_v21  ;;  %v17011_v20 = vld [vmem:[%s24147_s1 + $0x160] ss:$52 sps:$4 sm:$0xff]  }
 0x164   :  { %4497 = vmatprep.subr.bf16.mxu0 %v16944_v23  ;;  %4671 = vmatprep.subr.bf16.mxu1 %v16947_v24  ;;  %v17019_v21 = vld [vmem:[%s24147_s1 + $0x1cc] ss:$52 sps:$4 sm:$0xff]  }
 0x165   :  { %v712_v24 = vld [vmem:[%s24150_s4] ss:$8 sm:$0xf] }
 0x167   :  { %4498 = vmatpush1.bf16.msra.mxu0 %v16942_v25  ;;  %4672 = vmatpush1.bf16.msra.mxu1 %v16945_v27  ;;  %v713_v25 = vld [vmem:[%s24150_s4] ss:$8 sm:$0xf0] }
 0x168   :  { %4499 = vmatprep.subr.bf16.mxu0 %v16950_v28  ;;  %4673 = vmatprep.subr.bf16.mxu1 %v16953_v29  ;;  %v17017_v27 = vld [vmem:[%s24147_s1 + $0x1c8] ss:$52 sps:$4 sm:$0xff]   ;;  %v17020_v29 = vld [vmem:[%s24147_s1 + $0x20] ss:$52 sps:$4 sm:$0xff]  }
 0x169   :  { %v17025_v28 = vld [vmem:[%s24147_s1 + $0x234] ss:$52 sps:$4 sm:$0xff]  }
 0x16b   :  { %4500 = vmatpush1.bf16.msra.mxu0 %v16948_v30  ;;  %4674 = vmatpush1.bf16.msra.mxu1 %v16951_v31  ;;  %v17023_v30 = vld [vmem:[%s24147_s1 + $0x230] ss:$52 sps:$4 sm:$0xff]   ;;  %v17028_v31 = vld [vmem:[%s24147_s1 + $0x8c] ss:$52 sps:$4 sm:$0xff]  }
 0x16c   :  { %4501 = vmatprep.subr.bf16.mxu0 %v16956_v32  ;;  %4675 = vmatprep.subr.bf16.mxu1 %v16959_v33  ;;  %v17031_v32 = vld [vmem:[%s24147_s1 + $0x29c] ss:$52 sps:$4 sm:$0xff]   ;;  %v19908_v33 = vor.u32 %v713_v25, %v712_v24  ;;  %v17076_v24 = vld [vmem:[%s24147_s1 + $0x3cc] ss:$52 sps:$4 sm:$0xff]  }
 0x16d   :  { %v17079_v25 = vld [vmem:[%s24147_s1 + $0x5dc] ss:$52 sps:$4 sm:$0xff]  }
 0x16f   :  { %4502 = vmatpush1.bf16.msra.mxu0 %v16954_v34  ;;  %4676 = vmatpush1.bf16.msra.mxu1 %v16957_v35  ;;  %v19911_v34 = vsub.s32 2, %v18734_v42  ;;  %v19914_v35 = vsub.s32 3, %v18734_v42 }
 0x170   :  { %4503 = vmatprep.subr.bf16.mxu0 %v16962_v36  ;;  %4677 = vmatprep.subr.bf16.mxu1 %v16965_v37  ;;  %v17026_v37 = vld [vmem:[%s24147_s1 + $0x88] ss:$52 sps:$4 sm:$0xff]  }
 0x171   :  { %24181 = vst [vmem:[#allocation5_spill] sm:$0xff] %v19911_v34 }
 0x173   :  { %4504 = vmatpush1.bf16.msra.mxu0 %v16960_v38  ;;  %4678 = vmatpush1.bf16.msra.mxu1 %v16963_v40  ;;  %v17029_v40 = vld [vmem:[%s24147_s1 + $0x298] ss:$52 sps:$4 sm:$0xff]  }
 0x174   :  { %4505 = vmatprep.subr.bf16.mxu0 %v16968_v41  ;;  %4679 = vmatprep.subr.bf16.mxu1 %v16971_v44  ;;  %v17034_v44 = vld [vmem:[%s24147_s1 + $0xf4] ss:$52 sps:$4 sm:$0xff]  }
 0x177   :  { %4506 = vmatpush1.bf16.msra.mxu0 %v16966_v45  ;;  %4680 = vmatpush1.bf16.msra.mxu1 %v16969_v46  ;;  %v17037_v45 = vld [vmem:[%s24147_s1 + $0x304] ss:$52 sps:$4 sm:$0xff]   ;;  %v732_v46 = vrot.slane %v19908_v33, %v19911_v34 }
 0x178   :  { %4507 = vmatprep.subr.bf16.mxu0 %v16974_v47  ;;  %4681 = vmatprep.subr.bf16.mxu1 %v16977_v48  ;;  %v736_v48 = vrot.slane %v19908_v33, %v19914_v35 }
 0x17b   :  { %4508 = vmatpush1.bf16.msra.mxu0 %v16972_v49  ;;  %4682 = vmatpush1.bf16.msra.mxu1 %v16975_v50  ;;  %v17032_v49 = vld [vmem:[%s24147_s1 + $0xf0] ss:$52 sps:$4 sm:$0xff]   ;;  %v17035_v50 = vld [vmem:[%s24147_s1 + $0x300] ss:$52 sps:$4 sm:$0xff]  }
 0x17c   :  { %4509 = vmatprep.subr.bf16.mxu0 %v16980_v51  ;;  %4683 = vmatprep.subr.bf16.mxu1 %v16983_v52  ;;  %v17040_v51 = vld [vmem:[%s24147_s1 + $0x15c] ss:$52 sps:$4 sm:$0xff]   ;;  %v17043_v52 = vld [vmem:[%s24147_s1 + $0x36c] ss:$52 sps:$4 sm:$0xff]  }
 0x17f   :  { %4510 = vmatpush1.bf16.msra.mxu0 %v16978_v53  ;;  %4684 = vmatpush1.bf16.msra.mxu1 %v16981_v54 }
 0x180   :  { %4511 = vmatprep.subr.bf16.mxu0 %v16986_v55  ;;  %4694 = vmatprep.subr.bf16.mxu1 %v16989_v56  ;;  %v17038_v56 = vld [vmem:[%s24147_s1 + $0x158] ss:$52 sps:$4 sm:$0xff]  }
 0x182   :  { %4686 = vmatmul.mubr.bf16.vlgmr.msra.gmra.mrb[4].mxu1 %v18833_v18 }
 0x183   :  { %4512 = vmatpush1.bf16.msra.mxu0 %v16984_v57  ;;  %4695 = vmatpush1.bf16.msra.mxu1 %v16987_v58 }
 0x184   :  { %4513 = vmatprep.subr.bf16.mxu0 %v16992_v59  ;;  %4726 = vmatprep.mubr.bf16.mxu1 %v24153_v39  ;;  %v17041_v59 = vld [vmem:[%s24147_s1 + $0x368] ss:$52 sps:$4 sm:$0xff]  }
 0x185   :  { %4899 = vmatprep.subr.bf16.mxu1 %v17001_v61 }
 0x187   :  { %4514 = vmatpush1.bf16.msra.mxu0 %v16990_v62  ;;  %v17046_v62 = vld [vmem:[%s24147_s1 + $0x1c4] ss:$52 sps:$4 sm:$0xff]  }
 0x188   :  { %4515 = vmatprep.subr.bf16.mxu0 %v16995_v63  ;;  %v17049_v63 = vld [vmem:[%s24147_s1 + $0x3d4] ss:$52 sps:$4 sm:$0xff]  }
 0x18b   :  { %4516 = vmatpush1.bf16.msra.mxu0 %v16993_v0 }
 0x18c   :  { %4517 = vmatprep.subr.bf16.mxu0 %v16998_v1 }
 0x18e   :  { %14522 = vmatmul.mubr.msk.bf16.vlgmr.msra.gmra.mrb[4].mxu1 %vm4075_vm0, %v19261_v43 }
 0x18f   :  { %4518 = vmatpush1.bf16.msra.mxu0 %v16996_v2  ;;  %4900 = vmatpush1.bf16.msra.mxu1 %v16999_v3  ;;  %v17044_v2 = vld [vmem:[%s24147_s1 + $0x1c0] ss:$52 sps:$4 sm:$0xff]   ;;  %v17047_v3 = vld [vmem:[%s24147_s1 + $0x3d0] ss:$52 sps:$4 sm:$0xff]  }
 0x190   :  { %4519 = vmatprep.subr.bf16.mxu0 %v17004_v4  ;;  %4901 = vmatprep.subr.bf16.mxu1 %v17007_v5  ;;  %v17052_v4 = vld [vmem:[%s24147_s1 + $0x22c] ss:$52 sps:$4 sm:$0xff]   ;;  %v17055_v5 = vld [vmem:[%s24147_s1 + $0x43c] ss:$52 sps:$4 sm:$0xff]  }
 0x191   :  { %4931 = vmatprep.mubr.bf16.mxu1 %v18776_v60 }
 0x193   :  { %4520 = vmatpush1.bf16.msra.mxu0 %v17002_v6  ;;  %4902 = vmatpush1.bf16.msra.mxu1 %v17005_v7  ;;  %v17050_v6 = vld [vmem:[%s24147_s1 + $0x228] ss:$52 sps:$4 sm:$0xff]   ;;  %v17053_v7 = vld [vmem:[%s24147_s1 + $0x438] ss:$52 sps:$4 sm:$0xff]  }
 0x194   :  { %4903 = vmatprep.subr.bf16.mxu1 %v17010_v8  ;;  %4530 = vmatprep.subr.bf16.mxu0 %v17016_v9  ;;  %v17058_v8 = vld [vmem:[%s24147_s1 + $0x294] ss:$52 sps:$4 sm:$0xff]   ;;  %v17061_v9 = vld [vmem:[%s24147_s1 + $0x4a4] ss:$52 sps:$4 sm:$0xff]  }
 0x195   :  { %v4359_v13 = vpop.f32.mrb[0].mxu1 }
 0x196   :  { %4522 = vmatmul.mubr.bf16.vlgmr.msra.gmra.mrb[8].mxu0 %v18833_v18  ;;  %v4361_v15 = vpop.f32.mrb[1].mxu1  ;;  %v16238_v53 = vadd.f32 %v4359_v13, %v732_v46  ;;  %v17067_v13 = vld [vmem:[%s24147_s1 + $0x50c] ss:$52 sps:$4 sm:$0xff]   ;;  %v17097_v46 = vld [vmem:[%s24147_s1 + $0x714] ss:$52 sps:$4 sm:$0xff]  }
 0x197   :  { %4904 = vmatpush1.bf16.msra.mxu1 %v17008_v10  ;;  %v4363_v17 = vpop.f32.mrb[2].mxu1  ;;  %4531 = vmatpush1.bf16.msra.mxu0 %v17014_v12  ;;  %v16240_v54 = vadd.f32 %v4361_v15, %v736_v48  ;;  %v17056_v10 = vld [vmem:[%s24147_s1 + $0x290] ss:$52 sps:$4 sm:$0xff]   ;;  %v17065_v15 = vld [vmem:[%s24147_s1 + $0x508] ss:$52 sps:$4 sm:$0xff]  }
 0x198   :  { %v4364_v23 = vpop.f32.mrb[3].mxu1  ;;  %4905 = vmatprep.subr.bf16.mxu1 %v17013_v11  ;;  %4562 = vmatprep.mubr.bf16.mxu0 %v24153_v39  ;;  %v17059_v11 = vld [vmem:[%s24147_s1 + $0x4a0] ss:$52 sps:$4 sm:$0xff]   ;;  %v17064_v12 = vld [vmem:[%s24147_s1 + $0x2fc] ss:$52 sps:$4 sm:$0xff]  }
 0x199   :  { %4735 = vmatprep.subr.bf16.mxu0 %v17022_v14  ;;  %v17062_v14 = vld [vmem:[%s24147_s1 + $0x2f8] ss:$52 sps:$4 sm:$0xff]   ;;  %v17071_v23 = vld [vmem:[%s24147_s1 + $0x570] ss:$52 sps:$4 sm:$0xff]  }
 0x19a   :  { %v17070_v17 = vld [vmem:[%s24147_s1 + $0x364] ss:$52 sps:$4 sm:$0xff]  }
 0x19b   :  { %4906 = vmatpush1.bf16.msra.mxu1 %v17011_v20  ;;  %v17073_v20 = vld [vmem:[%s24147_s1 + $0x574] ss:$52 sps:$4 sm:$0xff]   ;;  %v17095_v48 = vld [vmem:[%s24147_s1 + $0x710] ss:$52 sps:$4 sm:$0xff]  }
 0x19c   :  { %4907 = vmatprep.subr.bf16.mxu1 %v17019_v21  ;;  %v17068_v21 = vld [vmem:[%s24147_s1 + $0x360] ss:$52 sps:$4 sm:$0xff]  }
 0x19f   :  { %4908 = vmatpush1.bf16.msra.mxu1 %v17017_v27  ;;  %v17074_v27 = vld [vmem:[%s24147_s1 + $0x3c8] ss:$52 sps:$4 sm:$0xff]  }
 0x1a0   :  { %4909 = vmatprep.subr.bf16.mxu1 %v17025_v28  ;;  %v17077_v28 = vld [vmem:[%s24147_s1 + $0x5d8] ss:$52 sps:$4 sm:$0xff]  }
 0x1a1   :  { %v19916_v36 = vpop.f32.mrb[0].mxu0 }
 0x1a2   :  { %14521 = vmatmul.mubr.msk.bf16.vlgmr.msra.gmra.mrb[8].mxu0 %vm4075_vm0, %v19261_v43  ;;  %v19923_v38 = vpop.f32.mrb[1].mxu0 }
 0x1a3   :  { %4736 = vmatpush1.bf16.msra.mxu0 %v17020_v29  ;;  %4910 = vmatpush1.bf16.msra.mxu1 %v17023_v30  ;;  %v4240_v41 = vpop.f32.mrb[2].mxu0  ;;  %v17082_v29 = vld [vmem:[%s24147_s1 + $0x434] ss:$52 sps:$4 sm:$0xff]   ;;  %v17085_v30 = vld [vmem:[%s24147_s1 + $0x644] ss:$52 sps:$4 sm:$0xff]  }
 0x1a4   :  { %v4241_v47 = vpop.f32.mrb[3].mxu0  ;;  %4737 = vmatprep.subr.bf16.mxu0 %v17028_v31  ;;  %4911 = vmatprep.subr.bf16.mxu1 %v17031_v32  ;;  %v17080_v31 = vld [vmem:[%s24147_s1 + $0x430] ss:$52 sps:$4 sm:$0xff]   ;;  %v17083_v32 = vld [vmem:[%s24147_s1 + $0x640] ss:$52 sps:$4 sm:$0xff]  }
 0x1a5   :  { %4767 = vmatprep.mubr.bf16.mxu0 %v18776_v60  ;;  %v17086_v41 = vld [vmem:[%s24147_s1 + $0x498] ss:$52 sps:$4 sm:$0xff]   ;;  %v17092_v47 = vld [vmem:[%s24147_s1 + $0x500] ss:$52 sps:$4 sm:$0xff]  }
 0x1a7   :  { %4738 = vmatpush1.bf16.msra.mxu0 %v17026_v37  ;;  %4912 = vmatpush1.bf16.msra.mxu1 %v17029_v40  ;;  %v17088_v37 = vld [vmem:[%s24147_s1 + $0x49c] ss:$52 sps:$4 sm:$0xff]   ;;  %v17091_v40 = vld [vmem:[%s24147_s1 + $0x6ac] ss:$52 sps:$4 sm:$0xff]  }
 0x1a8   :  { %4739 = vmatprep.subr.bf16.mxu0 %v17034_v44  ;;  %4913 = vmatprep.subr.bf16.mxu1 %v17037_v45  ;;  %v17089_v44 = vld [vmem:[%s24147_s1 + $0x6a8] ss:$52 sps:$4 sm:$0xff]   ;;  %v17094_v45 = vld [vmem:[%s24147_s1 + $0x504] ss:$52 sps:$4 sm:$0xff]  }
 0x1a9   :  { %v4400_v55 = vpop.f32.mrb[4].mxu0 }
 0x1aa   :  { %v19954_v57 = vadd.f32 %v16238_v53, %v4400_v55  ;;  %v4402_v58 = vpop.f32.mrb[5].mxu0  ;;  %v17106_v53 = vld [vmem:[%s24147_s1 + $0x5d4] ss:$52 sps:$4 sm:$0xff]   ;;  %v17104_v55 = vld [vmem:[%s24147_s1 + $0x5d0] ss:$52 sps:$4 sm:$0xff]  }
 0x1ab   :  { %4740 = vmatpush1.bf16.msra.mxu0 %v17032_v49  ;;  %v19959_v61 = vadd.f32 %v16240_v54, %v4402_v58  ;;  %4914 = vmatpush1.bf16.msra.mxu1 %v17035_v50  ;;  %v4404_v0 = vpop.f32.mrb[6].mxu0  ;;  %v17100_v49 = vld [vmem:[%s24147_s1 + $0x56c] ss:$52 sps:$4 sm:$0xff]   ;;  %v17103_v50 = vld [vmem:[%s24147_s1 + $0x77c] ss:$52 sps:$4 sm:$0xff]  }
 0x1ac   :  { %4741 = vmatprep.subr.bf16.mxu0 %v17040_v51  ;;  %4915 = vmatprep.subr.bf16.mxu1 %v17043_v52  ;;  %v4405_v1 = vpop.f32.mrb[7].mxu0  ;;  %v17098_v51 = vld [vmem:[%s24147_s1 + $0x568] ss:$52 sps:$4 sm:$0xff]   ;;  %v17101_v52 = vld [vmem:[%s24147_s1 + $0x778] ss:$52 sps:$4 sm:$0xff]  }
 0x1ad   :  { %v17109_v54 = vld [vmem:[%s24147_s1 + $0x7e4] ss:$52 sps:$4 sm:$0xff]   ;;  %v17112_v58 = vld [vmem:[%s24147_s1 + $0x63c] ss:$52 sps:$4 sm:$0xff]   ;;  %v17121_v1 = vld [vmem:[%s24147_s1 + $0x8b4] ss:$52 sps:$4 sm:$0xff]  }
 0x1ae   :  { %v17118_v0 = vld [vmem:[%s24147_s1 + $0x6a4] ss:$52 sps:$4 sm:$0xff]  }
 0x1af   :  { %4742 = vmatpush1.bf16.msra.mxu0 %v17038_v56  ;;  %4916 = vmatpush1.bf16.msra.mxu1 %v17041_v59  ;;  %v17107_v56 = vld [vmem:[%s24147_s1 + $0x7e0] ss:$52 sps:$4 sm:$0xff]  }
 0x1b0   :  { %4743 = vmatprep.subr.bf16.mxu0 %v17046_v62  ;;  %4917 = vmatprep.subr.bf16.mxu1 %v17049_v63  ;;  %v17115_v59 = vld [vmem:[%s24147_s1 + $0x84c] ss:$52 sps:$4 sm:$0xff]   ;;  %v17113_v63 = vld [vmem:[%s24147_s1 + $0x848] ss:$52 sps:$4 sm:$0xff]  }
 0x1b1   :  { %v17110_v62 = vld [vmem:[%s24147_s1 + $0x638] ss:$52 sps:$4 sm:$0xff]  }
 0x1b3   :  { %4744 = vmatpush1.bf16.msra.mxu0 %v17044_v2  ;;  %4918 = vmatpush1.bf16.msra.mxu1 %v17047_v3  ;;  %v17116_v2 = vld [vmem:[%s24147_s1 + $0x6a0] ss:$52 sps:$4 sm:$0xff]   ;;  %v17119_v3 = vld [vmem:[%s24147_s1 + $0x8b0] ss:$52 sps:$4 sm:$0xff]  }
 0x1b4   :  { %4745 = vmatprep.subr.bf16.mxu0 %v17052_v4  ;;  %4919 = vmatprep.subr.bf16.mxu1 %v17055_v5  ;;  %v17124_v4 = vld [vmem:[%s24147_s1 + $0x70c] ss:$52 sps:$4 sm:$0xff]   ;;  %v17127_v5 = vld [vmem:[%s24147_s1 + $0x91c] ss:$52 sps:$4 sm:$0xff]  }
 0x1b7   :  { %4746 = vmatpush1.bf16.msra.mxu0 %v17050_v6  ;;  %4920 = vmatpush1.bf16.msra.mxu1 %v17053_v7  ;;  %v17122_v6 = vld [vmem:[%s24147_s1 + $0x708] ss:$52 sps:$4 sm:$0xff]   ;;  %v17125_v7 = vld [vmem:[%s24147_s1 + $0x918] ss:$52 sps:$4 sm:$0xff]  }
 0x1b8   :  { %4747 = vmatprep.subr.bf16.mxu0 %v17058_v8  ;;  %4921 = vmatprep.subr.bf16.mxu1 %v17061_v9  ;;  %v17130_v8 = vld [vmem:[%s24147_s1 + $0x774] ss:$52 sps:$4 sm:$0xff]   ;;  %v17133_v9 = vld [vmem:[%s24147_s1 + $0x984] ss:$52 sps:$4 sm:$0xff]  }
 0x1bb   :  { %4748 = vmatpush1.bf16.msra.mxu0 %v17056_v10  ;;  %4922 = vmatpush1.bf16.msra.mxu1 %v17059_v11  ;;  %v17128_v10 = vld [vmem:[%s24147_s1 + $0x770] ss:$52 sps:$4 sm:$0xff]   ;;  %v17131_v11 = vld [vmem:[%s24147_s1 + $0x980] ss:$52 sps:$4 sm:$0xff]  }
 0x1bc   :  { %4749 = vmatprep.subr.bf16.mxu0 %v17064_v12  ;;  %4923 = vmatprep.subr.bf16.mxu1 %v17067_v13  ;;  %v17136_v12 = vld [vmem:[%s24147_s1 + $0x7dc] ss:$52 sps:$4 sm:$0xff]   ;;  %v17139_v13 = vld [vmem:[%s24147_s1 + $0x9ec] ss:$52 sps:$4 sm:$0xff]  }
 0x1bf   :  { %4750 = vmatpush1.bf16.msra.mxu0 %v17062_v14  ;;  %4924 = vmatpush1.bf16.msra.mxu1 %v17065_v15  ;;  %v17134_v14 = vld [vmem:[%s24147_s1 + $0x7d8] ss:$52 sps:$4 sm:$0xff]   ;;  %v17137_v15 = vld [vmem:[%s24147_s1 + $0x9e8] ss:$52 sps:$4 sm:$0xff]  }
 0x1c0   :  { %4751 = vmatprep.subr.bf16.mxu0 %v17070_v17  ;;  %4925 = vmatprep.subr.bf16.mxu1 %v17073_v20  ;;  %v17142_v17 = vld [vmem:[%s24147_s1 + $0x844] ss:$52 sps:$4 sm:$0xff]   ;;  %v17145_v20 = vld [vmem:[%s24147_s1 + $0xa54] ss:$52 sps:$4 sm:$0xff]  }
 0x1c3   :  { %4752 = vmatpush1.bf16.msra.mxu0 %v17068_v21  ;;  %4926 = vmatpush1.bf16.msra.mxu1 %v17071_v23  ;;  %v17140_v21 = vld [vmem:[%s24147_s1 + $0x840] ss:$52 sps:$4 sm:$0xff]   ;;  %v17143_v23 = vld [vmem:[%s24147_s1 + $0xa50] ss:$52 sps:$4 sm:$0xff]  }
 0x1c4   :  { %4753 = vmatprep.subr.bf16.mxu0 %v17076_v24  ;;  %4927 = vmatprep.subr.bf16.mxu1 %v17079_v25  ;;  %v17148_v24 = vld [vmem:[%s24147_s1 + $0x8ac] ss:$52 sps:$4 sm:$0xff]   ;;  %v17151_v25 = vld [vmem:[%s24147_s1 + $0xabc] ss:$52 sps:$4 sm:$0xff]  }
 0x1c7   :  { %4754 = vmatpush1.bf16.msra.mxu0 %v17074_v27  ;;  %4928 = vmatpush1.bf16.msra.mxu1 %v17077_v28  ;;  %v17146_v27 = vld [vmem:[%s24147_s1 + $0x8a8] ss:$52 sps:$4 sm:$0xff]   ;;  %v17149_v28 = vld [vmem:[%s24147_s1 + $0xab8] ss:$52 sps:$4 sm:$0xff]  }
 0x1c8   :  { %4755 = vmatprep.subr.bf16.mxu0 %v17082_v29  ;;  %4929 = vmatprep.subr.bf16.mxu1 %v17085_v30  ;;  %v17154_v29 = vld [vmem:[%s24147_s1 + $0x914] ss:$52 sps:$4 sm:$0xff]   ;;  %v17157_v30 = vld [vmem:[%s24147_s1 + $0xb24] ss:$52 sps:$4 sm:$0xff]  }
 0x1cb   :  { %4756 = vmatpush1.bf16.msra.mxu0 %v17080_v31  ;;  %4930 = vmatpush1.bf16.msra.mxu1 %v17083_v32  ;;  %v17152_v31 = vld [vmem:[%s24147_s1 + $0x910] ss:$52 sps:$4 sm:$0xff]   ;;  %v17155_v32 = vld [vmem:[%s24147_s1 + $0xb20] ss:$52 sps:$4 sm:$0xff]  }
 0x1cc   :  { %4757 = vmatprep.subr.bf16.mxu0 %v17088_v37  ;;  %4940 = vmatprep.subr.bf16.mxu1 %v17091_v40  ;;  %v17160_v37 = vld [vmem:[%s24147_s1 + $0x97c] ss:$52 sps:$4 sm:$0xff]   ;;  %v17163_v40 = vld [vmem:[%s24147_s1 + $0xb8c] ss:$52 sps:$4 sm:$0xff]  }
 0x1ce   :  { %4932 = vmatmul.mubr.bf16.vlgmr.msra.gmra.mrb[8].mxu1 %v18828_v16 }
 0x1cf   :  { %4758 = vmatpush1.bf16.msra.mxu0 %v17086_v41  ;;  %4941 = vmatpush1.bf16.msra.mxu1 %v17089_v44  ;;  %v17158_v41 = vld [vmem:[%s24147_s1 + $0x978] ss:$52 sps:$4 sm:$0xff]   ;;  %v17161_v44 = vld [vmem:[%s24147_s1 + $0xb88] ss:$52 sps:$4 sm:$0xff]  }
 0x1d0   :  { %4759 = vmatprep.subr.bf16.mxu0 %v17094_v45  ;;  %4942 = vmatprep.subr.bf16.mxu1 %v17097_v46  ;;  %v17166_v45 = vld [vmem:[%s24147_s1 + $0x9e4] ss:$52 sps:$4 sm:$0xff]   ;;  %v17169_v46 = vld [vmem:[%s24147_s1 + $0xbf4] ss:$52 sps:$4 sm:$0xff]  }
 0x1d1   :  { %4972 = vmatprep.mubr.bf16.mxu1 %v18845_v22 }
 0x1d3   :  { %4760 = vmatpush1.bf16.msra.mxu0 %v17092_v47  ;;  %4943 = vmatpush1.bf16.msra.mxu1 %v17095_v48  ;;  %v17164_v47 = vld [vmem:[%s24147_s1 + $0x9e0] ss:$52 sps:$4 sm:$0xff]   ;;  %v17167_v48 = vld [vmem:[%s24147_s1 + $0xbf0] ss:$52 sps:$4 sm:$0xff]  }
 0x1d4   :  { %4761 = vmatprep.subr.bf16.mxu0 %v17100_v49  ;;  %4944 = vmatprep.subr.bf16.mxu1 %v17103_v50  ;;  %v17172_v49 = vld [vmem:[%s24147_s1 + $0xa4c] ss:$52 sps:$4 sm:$0xff]   ;;  %v17175_v50 = vld [vmem:[%s24147_s1 + $0xc5c] ss:$52 sps:$4 sm:$0xff]  }
 0x1d7   :  { %4762 = vmatpush1.bf16.msra.mxu0 %v17098_v51  ;;  %4945 = vmatpush1.bf16.msra.mxu1 %v17101_v52  ;;  %v17170_v51 = vld [vmem:[%s24147_s1 + $0xa48] ss:$52 sps:$4 sm:$0xff]   ;;  %v17173_v52 = vld [vmem:[%s24147_s1 + $0xc58] ss:$52 sps:$4 sm:$0xff]  }
 0x1d8   :  { %4763 = vmatprep.subr.bf16.mxu0 %v17106_v53  ;;  %4946 = vmatprep.subr.bf16.mxu1 %v17109_v54  ;;  %v17178_v53 = vld [vmem:[%s24147_s1 + $0xab4] ss:$52 sps:$4 sm:$0xff]   ;;  %v17181_v54 = vld [vmem:[%s24147_s1 + $0xcc4] ss:$52 sps:$4 sm:$0xff]  }
 0x1db   :  { %4764 = vmatpush1.bf16.msra.mxu0 %v17104_v55  ;;  %4947 = vmatpush1.bf16.msra.mxu1 %v17107_v56  ;;  %v17176_v55 = vld [vmem:[%s24147_s1 + $0xab0] ss:$52 sps:$4 sm:$0xff]   ;;  %v17179_v56 = vld [vmem:[%s24147_s1 + $0xcc0] ss:$52 sps:$4 sm:$0xff]  }
 0x1dc   :  { %4765 = vmatprep.subr.bf16.mxu0 %v17112_v58  ;;  %4948 = vmatprep.subr.bf16.mxu1 %v17115_v59  ;;  %v17184_v58 = vld [vmem:[%s24147_s1 + $0xb1c] ss:$52 sps:$4 sm:$0xff]   ;;  %v17187_v59 = vld [vmem:[%s24147_s1 + $0xd2c] ss:$52 sps:$4 sm:$0xff]  }
 0x1df   :  { %4766 = vmatpush1.bf16.msra.mxu0 %v17110_v62  ;;  %4949 = vmatpush1.bf16.msra.mxu1 %v17113_v63  ;;  %v17182_v62 = vld [vmem:[%s24147_s1 + $0xb18] ss:$52 sps:$4 sm:$0xff]   ;;  %v17185_v63 = vld [vmem:[%s24147_s1 + $0xd28] ss:$52 sps:$4 sm:$0xff]  }
 0x1e0   :  { %4776 = vmatprep.subr.bf16.mxu0 %v17118_v0  ;;  %4950 = vmatprep.subr.bf16.mxu1 %v17121_v1  ;;  %v17190_v0 = vld [vmem:[%s24147_s1 + $0xb84] ss:$52 sps:$4 sm:$0xff]   ;;  %v17193_v1 = vld [vmem:[%s24147_s1 + $0xd94] ss:$52 sps:$4 sm:$0xff]  }
 0x1e2   :  { %4768 = vmatmul.mubr.bf16.vlgmr.msra.gmra.mrb[12].mxu0 %v18828_v16 }
 0x1e3   :  { %4777 = vmatpush1.bf16.msra.mxu0 %v17116_v2  ;;  %4951 = vmatpush1.bf16.msra.mxu1 %v17119_v3  ;;  %v17188_v2 = vld [vmem:[%s24147_s1 + $0xb80] ss:$52 sps:$4 sm:$0xff]   ;;  %v17191_v3 = vld [vmem:[%s24147_s1 + $0xd90] ss:$52 sps:$4 sm:$0xff]  }
 0x1e4   :  { %4778 = vmatprep.subr.bf16.mxu0 %v17124_v4  ;;  %4952 = vmatprep.subr.bf16.mxu1 %v17127_v5  ;;  %v17196_v4 = vld [vmem:[%s24147_s1 + $0xbec] ss:$52 sps:$4 sm:$0xff]   ;;  %v17199_v5 = vld [vmem:[%s24147_s1 + $0xdfc] ss:$52 sps:$4 sm:$0xff]  }
 0x1e5   :  { %4808 = vmatprep.mubr.bf16.mxu0 %v18845_v22 }
 0x1e7   :  { %4779 = vmatpush1.bf16.msra.mxu0 %v17122_v6  ;;  %4953 = vmatpush1.bf16.msra.mxu1 %v17125_v7  ;;  %v17194_v6 = vld [vmem:[%s24147_s1 + $0xbe8] ss:$52 sps:$4 sm:$0xff]   ;;  %v17197_v7 = vld [vmem:[%s24147_s1 + $0xdf8] ss:$52 sps:$4 sm:$0xff]  }
 0x1e8   :  { %4780 = vmatprep.subr.bf16.mxu0 %v17130_v8  ;;  %4954 = vmatprep.subr.bf16.mxu1 %v17133_v9  ;;  %v17202_v8 = vld [vmem:[%s24147_s1 + $0xc54] ss:$52 sps:$4 sm:$0xff]   ;;  %v17205_v9 = vld [vmem:[%s24147_s1 + $0xe64] ss:$52 sps:$4 sm:$0xff]  }
 0x1eb   :  { %4781 = vmatpush1.bf16.msra.mxu0 %v17128_v10  ;;  %4955 = vmatpush1.bf16.msra.mxu1 %v17131_v11  ;;  %v17200_v10 = vld [vmem:[%s24147_s1 + $0xc50] ss:$52 sps:$4 sm:$0xff]   ;;  %v17203_v11 = vld [vmem:[%s24147_s1 + $0xe60] ss:$52 sps:$4 sm:$0xff]  }
 0x1ec   :  { %4782 = vmatprep.subr.bf16.mxu0 %v17136_v12  ;;  %4956 = vmatprep.subr.bf16.mxu1 %v17139_v13  ;;  %v17208_v12 = vld [vmem:[%s24147_s1 + $0xcbc] ss:$52 sps:$4 sm:$0xff]   ;;  %v17211_v13 = vld [vmem:[%s24147_s1 + $0xecc] ss:$52 sps:$4 sm:$0xff]  }
 0x1ef   :  { %4783 = vmatpush1.bf16.msra.mxu0 %v17134_v14  ;;  %4957 = vmatpush1.bf16.msra.mxu1 %v17137_v15  ;;  %v17206_v14 = vld [vmem:[%s24147_s1 + $0xcb8] ss:$52 sps:$4 sm:$0xff]   ;;  %v17209_v15 = vld [vmem:[%s24147_s1 + $0xec8] ss:$52 sps:$4 sm:$0xff]  }
 0x1f0   :  { %4784 = vmatprep.subr.bf16.mxu0 %v17142_v17  ;;  %4958 = vmatprep.subr.bf16.mxu1 %v17145_v20  ;;  %v17214_v17 = vld [vmem:[%s24147_s1 + $0xd24] ss:$52 sps:$4 sm:$0xff]   ;;  %v17217_v20 = vld [vmem:[%s24147_s1 + $0xf34] ss:$52 sps:$4 sm:$0xff]  }
 0x1f3   :  { %4785 = vmatpush1.bf16.msra.mxu0 %v17140_v21  ;;  %4959 = vmatpush1.bf16.msra.mxu1 %v17143_v23  ;;  %v17212_v21 = vld [vmem:[%s24147_s1 + $0xd20] ss:$52 sps:$4 sm:$0xff]   ;;  %v17215_v23 = vld [vmem:[%s24147_s1 + $0xf30] ss:$52 sps:$4 sm:$0xff]  }
 0x1f4   :  { %4786 = vmatprep.subr.bf16.mxu0 %v17148_v24  ;;  %4960 = vmatprep.subr.bf16.mxu1 %v17151_v25  ;;  %v17220_v24 = vld [vmem:[%s24147_s1 + $0xd8c] ss:$52 sps:$4 sm:$0xff]   ;;  %v17223_v25 = vld [vmem:[%s24147_s1 + $0xf9c] ss:$52 sps:$4 sm:$0xff]  }
 0x1f7   :  { %4787 = vmatpush1.bf16.msra.mxu0 %v17146_v27  ;;  %4961 = vmatpush1.bf16.msra.mxu1 %v17149_v28  ;;  %v17218_v27 = vld [vmem:[%s24147_s1 + $0xd88] ss:$52 sps:$4 sm:$0xff]   ;;  %v17221_v28 = vld [vmem:[%s24147_s1 + $0xf98] ss:$52 sps:$4 sm:$0xff]  }
 0x1f8   :  { %4788 = vmatprep.subr.bf16.mxu0 %v17154_v29  ;;  %4962 = vmatprep.subr.bf16.mxu1 %v17157_v30  ;;  %v17226_v29 = vld [vmem:[%s24147_s1 + $0xdf4] ss:$52 sps:$4 sm:$0xff]   ;;  %v17229_v30 = vld [vmem:[%s24147_s1 + $0x1004] ss:$52 sps:$4 sm:$0xff]  }
 0x1fb   :  { %4789 = vmatpush1.bf16.msra.mxu0 %v17152_v31  ;;  %4963 = vmatpush1.bf16.msra.mxu1 %v17155_v32  ;;  %v17224_v31 = vld [vmem:[%s24147_s1 + $0xdf0] ss:$52 sps:$4 sm:$0xff]   ;;  %v17227_v32 = vld [vmem:[%s24147_s1 + $0x1000] ss:$52 sps:$4 sm:$0xff]  }
 0x1fc   :  { %4790 = vmatprep.subr.bf16.mxu0 %v17160_v37  ;;  %4964 = vmatprep.subr.bf16.mxu1 %v17163_v40  ;;  %v17232_v37 = vld [vmem:[%s24147_s1 + $0xe5c] ss:$52 sps:$4 sm:$0xff]   ;;  %v17235_v40 = vld [vmem:[%s24147_s1 + $0x106c] ss:$52 sps:$4 sm:$0xff]  }
 0x1ff   :  { %4791 = vmatpush1.bf16.msra.mxu0 %v17158_v41  ;;  %4965 = vmatpush1.bf16.msra.mxu1 %v17161_v44  ;;  %v17230_v41 = vld [vmem:[%s24147_s1 + $0xe58] ss:$52 sps:$4 sm:$0xff]   ;;  %v17233_v44 = vld [vmem:[%s24147_s1 + $0x1068] ss:$52 sps:$4 sm:$0xff]  }
 0x200   :  { %4792 = vmatprep.subr.bf16.mxu0 %v17166_v45  ;;  %4966 = vmatprep.subr.bf16.mxu1 %v17169_v46  ;;  %v17238_v45 = vld [vmem:[%s24147_s1 + $0xec4] ss:$52 sps:$4 sm:$0xff]   ;;  %v17241_v46 = vld [vmem:[%s24147_s1 + $0x10d4] ss:$52 sps:$4 sm:$0xff]  }
 0x203   :  { %4793 = vmatpush1.bf16.msra.mxu0 %v17164_v47  ;;  %4967 = vmatpush1.bf16.msra.mxu1 %v17167_v48  ;;  %v17236_v47 = vld [vmem:[%s24147_s1 + $0xec0] ss:$52 sps:$4 sm:$0xff]   ;;  %v17239_v48 = vld [vmem:[%s24147_s1 + $0x10d0] ss:$52 sps:$4 sm:$0xff]  }
 0x204   :  { %4794 = vmatprep.subr.bf16.mxu0 %v17172_v49  ;;  %4968 = vmatprep.subr.bf16.mxu1 %v17175_v50  ;;  %v17244_v49 = vld [vmem:[%s24147_s1 + $0xf2c] ss:$52 sps:$4 sm:$0xff]   ;;  %v17247_v50 = vld [vmem:[%s24147_s1 + $0x113c] ss:$52 sps:$4 sm:$0xff]  }
 0x207   :  { %4795 = vmatpush1.bf16.msra.mxu0 %v17170_v51  ;;  %4969 = vmatpush1.bf16.msra.mxu1 %v17173_v52  ;;  %v17242_v51 = vld [vmem:[%s24147_s1 + $0xf28] ss:$52 sps:$4 sm:$0xff]   ;;  %v17245_v52 = vld [vmem:[%s24147_s1 + $0x1138] ss:$52 sps:$4 sm:$0xff]  }
 0x208   :  { %4796 = vmatprep.subr.bf16.mxu0 %v17178_v53  ;;  %4970 = vmatprep.subr.bf16.mxu1 %v17181_v54  ;;  %v17250_v53 = vld [vmem:[%s24147_s1 + $0xf94] ss:$52 sps:$4 sm:$0xff]   ;;  %v17253_v54 = vld [vmem:[%s24147_s1 + $0x11a4] ss:$52 sps:$4 sm:$0xff]  }
 0x20b   :  { %4797 = vmatpush1.bf16.msra.mxu0 %v17176_v55  ;;  %4971 = vmatpush1.bf16.msra.mxu1 %v17179_v56  ;;  %v17248_v55 = vld [vmem:[%s24147_s1 + $0xf90] ss:$52 sps:$4 sm:$0xff]   ;;  %v17251_v56 = vld [vmem:[%s24147_s1 + $0x11a0] ss:$52 sps:$4 sm:$0xff]  }
 0x20c   :  { %4798 = vmatprep.subr.bf16.mxu0 %v17184_v58  ;;  %4981 = vmatprep.subr.bf16.mxu1 %v17187_v59  ;;  %v17256_v58 = vld [vmem:[%s24147_s1 + $0xffc] ss:$52 sps:$4 sm:$0xff]   ;;  %v17259_v59 = vld [vmem:[%s24147_s1 + $0x120c] ss:$52 sps:$4 sm:$0xff]  }
 0x20e   :  { %4973 = vmatmul.mubr.bf16.vlgmr.msra.gmra.mrb[8].mxu1 %v19036_v26 }
 0x20f   :  { %4799 = vmatpush1.bf16.msra.mxu0 %v17182_v62  ;;  %4982 = vmatpush1.bf16.msra.mxu1 %v17185_v63  ;;  %v17254_v62 = vld [vmem:[%s24147_s1 + $0xff8] ss:$52 sps:$4 sm:$0xff]   ;;  %v17257_v63 = vld [vmem:[%s24147_s1 + $0x1208] ss:$52 sps:$4 sm:$0xff]  }
 0x210   :  { %4800 = vmatprep.subr.bf16.mxu0 %v17190_v0  ;;  %4983 = vmatprep.subr.bf16.mxu1 %v17193_v1  ;;  %v17262_v0 = vld [vmem:[%s24147_s1 + $0x1064] ss:$52 sps:$4 sm:$0xff]   ;;  %v17265_v1 = vld [vmem:[%s24147_s1 + $0x1274] ss:$52 sps:$4 sm:$0xff]  }
 0x211   :  { %5013 = vmatprep.mubr.bf16.mxu1 %v18835_v19 }
 0x213   :  { %4801 = vmatpush1.bf16.msra.mxu0 %v17188_v2  ;;  %4984 = vmatpush1.bf16.msra.mxu1 %v17191_v3  ;;  %v17260_v2 = vld [vmem:[%s24147_s1 + $0x1060] ss:$52 sps:$4 sm:$0xff]   ;;  %v17263_v3 = vld [vmem:[%s24147_s1 + $0x1270] ss:$52 sps:$4 sm:$0xff]  }
 0x214   :  { %4802 = vmatprep.subr.bf16.mxu0 %v17196_v4  ;;  %4985 = vmatprep.subr.bf16.mxu1 %v17199_v5  ;;  %v17268_v4 = vld [vmem:[%s24147_s1 + $0x10cc] ss:$52 sps:$4 sm:$0xff]   ;;  %v17271_v5 = vld [vmem:[%s24147_s1 + $0x12dc] ss:$52 sps:$4 sm:$0xff]  }
 0x217   :  { %4803 = vmatpush1.bf16.msra.mxu0 %v17194_v6  ;;  %4986 = vmatpush1.bf16.msra.mxu1 %v17197_v7  ;;  %v17266_v6 = vld [vmem:[%s24147_s1 + $0x10c8] ss:$52 sps:$4 sm:$0xff]   ;;  %v17269_v7 = vld [vmem:[%s24147_s1 + $0x12d8] ss:$52 sps:$4 sm:$0xff]  }
 0x218   :  { %4804 = vmatprep.subr.bf16.mxu0 %v17202_v8  ;;  %4987 = vmatprep.subr.bf16.mxu1 %v17205_v9  ;;  %v17274_v8 = vld [vmem:[%s24147_s1 + $0x1134] ss:$52 sps:$4 sm:$0xff]   ;;  %v17277_v9 = vld [vmem:[%s24147_s1 + $0x1344] ss:$52 sps:$4 sm:$0xff]  }
 0x21b   :  { %4805 = vmatpush1.bf16.msra.mxu0 %v17200_v10  ;;  %4988 = vmatpush1.bf16.msra.mxu1 %v17203_v11  ;;  %v17272_v10 = vld [vmem:[%s24147_s1 + $0x1130] ss:$52 sps:$4 sm:$0xff]   ;;  %v17275_v11 = vld [vmem:[%s24147_s1 + $0x1340] ss:$52 sps:$4 sm:$0xff]  }
 0x21c   :  { %4806 = vmatprep.subr.bf16.mxu0 %v17208_v12  ;;  %4989 = vmatprep.subr.bf16.mxu1 %v17211_v13  ;;  %v17280_v12 = vld [vmem:[%s24147_s1 + $0x119c] ss:$52 sps:$4 sm:$0xff]   ;;  %v17283_v13 = vld [vmem:[%s24147_s1 + $0x13ac] ss:$52 sps:$4 sm:$0xff]  }
 0x21f   :  { %4807 = vmatpush1.bf16.msra.mxu0 %v17206_v14  ;;  %4990 = vmatpush1.bf16.msra.mxu1 %v17209_v15  ;;  %v17278_v14 = vld [vmem:[%s24147_s1 + $0x1198] ss:$52 sps:$4 sm:$0xff]   ;;  %v17281_v15 = vld [vmem:[%s24147_s1 + $0x13a8] ss:$52 sps:$4 sm:$0xff]  }
 0x220   :  { %4817 = vmatprep.subr.bf16.mxu0 %v17214_v17  ;;  %4991 = vmatprep.subr.bf16.mxu1 %v17217_v20  ;;  %v17286_v17 = vld [vmem:[%s24147_s1 + $0x1204] ss:$52 sps:$4 sm:$0xff]   ;;  %v17284_v20 = vld [vmem:[%s24147_s1 + $0x1200] ss:$52 sps:$4 sm:$0xff]  }
 0x222   :  { %4809 = vmatmul.mubr.bf16.vlgmr.msra.gmra.mrb[12].mxu0 %v19036_v26 }
 0x223   :  { %4818 = vmatpush1.bf16.msra.mxu0 %v17212_v21  ;;  %4992 = vmatpush1.bf16.msra.mxu1 %v17215_v23  ;;  %v17293_v21 = vld [vmem:[%s24147_s1 + $0x9f0] ss:$52 sps:$4 sm:$0xff]   ;;  %v17289_v23 = vld [vmem:[%s24147_s1 + $0x126c] ss:$52 sps:$4 sm:$0xff]  }
 0x224   :  { %4819 = vmatprep.subr.bf16.mxu0 %v17220_v24  ;;  %4993 = vmatprep.subr.bf16.mxu1 %v17223_v25  ;;  %v17287_v24 = vld [vmem:[%s24147_s1 + $0x1268] ss:$52 sps:$4 sm:$0xff]  }
 0x225   :  { %4849 = vmatprep.mubr.bf16.mxu0 %v18835_v19  ;;  %v17292_v25 = vld [vmem:[%s24147_s1 + $0x12d4] ss:$52 sps:$4 sm:$0xff]  }
 0x227   :  { %4820 = vmatpush1.bf16.msra.mxu0 %v17218_v27  ;;  %4994 = vmatpush1.bf16.msra.mxu1 %v17221_v28  ;;  %v17290_v27 = vld [vmem:[%s24147_s1 + $0x12d0] ss:$52 sps:$4 sm:$0xff]  }
 0x228   :  { %4821 = vmatprep.subr.bf16.mxu0 %v17226_v29  ;;  %4995 = vmatprep.subr.bf16.mxu1 %v17229_v30  ;;  %v17294_v28 = vld [vmem:[%s24147_s1 + $0x6b0] ss:$52 sps:$4 sm:$0xff]   ;;  %v17298_v30 = vld [vmem:[%s24147_s1 + $0xa58] ss:$52 sps:$4 sm:$0xff]  }
 0x229   :  { %v17297_v29 = vld [vmem:[%s24147_s1 + $0x133c] ss:$52 sps:$4 sm:$0xff]  }
 0x22b   :  { %4822 = vmatpush1.bf16.msra.mxu0 %v17224_v31  ;;  %4996 = vmatpush1.bf16.msra.mxu1 %v17227_v32  ;;  %v17295_v31 = vld [vmem:[%s24147_s1 + $0x1338] ss:$52 sps:$4 sm:$0xff]  }
 0x22c   :  { %4823 = vmatprep.subr.bf16.mxu0 %v17232_v37  ;;  %4997 = vmatprep.subr.bf16.mxu1 %v17235_v40  ;;  %v17299_v32 = vld [vmem:[%s24147_s1 + $0x718] ss:$52 sps:$4 sm:$0xff]   ;;  %v17300_v37 = vld [vmem:[%s24147_s1 + $0xac0] ss:$52 sps:$4 sm:$0xff]  }
 0x22d   :  { %v17306_v40 = vld [vmem:[%s24147_s1 + $0x13a4] ss:$52 sps:$4 sm:$0xff]  }
 0x22f   :  { %4824 = vmatpush1.bf16.msra.mxu0 %v17230_v41  ;;  %4998 = vmatpush1.bf16.msra.mxu1 %v17233_v44  ;;  %v17301_v41 = vld [vmem:[%s24147_s1 + $0x780] ss:$52 sps:$4 sm:$0xff]  }
 0x230   :  { %4825 = vmatprep.subr.bf16.mxu0 %v17238_v45  ;;  %4999 = vmatprep.subr.bf16.mxu1 %v17241_v46  ;;  %v17304_v44 = vld [vmem:[%s24147_s1 + $0x13a0] ss:$52 sps:$4 sm:$0xff]   ;;  %v17302_v45 = vld [vmem:[%s24147_s1 + $0xb28] ss:$52 sps:$4 sm:$0xff]  }
 0x233   :  { %4826 = vmatpush1.bf16.msra.mxu0 %v17236_v47  ;;  %5000 = vmatpush1.bf16.msra.mxu1 %v17239_v48  ;;  %v17303_v47 = vld [vmem:[%s24147_s1 + $0x7e8] ss:$52 sps:$4 sm:$0xff]   ;;  %v17309_v48 = vld [vmem:[%s24147_s1 + $0x370] ss:$52 sps:$4 sm:$0xff]  }
 0x234   :  { %4827 = vmatprep.subr.bf16.mxu0 %v17244_v49  ;;  %5001 = vmatprep.subr.bf16.mxu1 %v17247_v50 }
 0x237   :  { %4828 = vmatpush1.bf16.msra.mxu0 %v17242_v51  ;;  %5002 = vmatpush1.bf16.msra.mxu1 %v17245_v52  ;;  %v17307_v51 = vld [vmem:[%s24147_s1 + $0xb90] ss:$52 sps:$4 sm:$0xff]  }
 0x238   :  { %4829 = vmatprep.subr.bf16.mxu0 %v17250_v53  ;;  %5003 = vmatprep.subr.bf16.mxu1 %v17253_v54  ;;  %v17308_v52 = vld [vmem:[%s24147_s1 + $0x850] ss:$52 sps:$4 sm:$0xff]   ;;  %v17311_v53 = vld [vmem:[%s24147_s1 + $0xbf8] ss:$52 sps:$4 sm:$0xff]  }
 0x239   :  { %v17310_v54 = vld [vmem:[%s24147_s1 + $0x30] ss:$52 sps:$4 sm:$0xff]  }
 0x23b   :  { %4830 = vmatpush1.bf16.msra.mxu0 %v17248_v55  ;;  %5004 = vmatpush1.bf16.msra.mxu1 %v17251_v56  ;;  %v17312_v55 = vld [vmem:[%s24147_s1 + $0x8b8] ss:$52 sps:$4 sm:$0xff]  }
 0x23c   :  { %4831 = vmatprep.subr.bf16.mxu0 %v17256_v58  ;;  %5005 = vmatprep.subr.bf16.mxu1 %v17259_v59  ;;  %v17313_v56 = vld [vmem:[%s24147_s1 + $0x3d8] ss:$52 sps:$4 sm:$0xff]   ;;  %v17315_v58 = vld [vmem:[%s24147_s1 + $0xc60] ss:$52 sps:$4 sm:$0xff]  }
 0x23d   :  { %v17314_v59 = vld [vmem:[%s24147_s1 + $0x98] ss:$52 sps:$4 sm:$0xff]  }
 0x23f   :  { %4832 = vmatpush1.bf16.msra.mxu0 %v17254_v62  ;;  %5006 = vmatpush1.bf16.msra.mxu1 %v17257_v63  ;;  %v17316_v62 = vld [vmem:[%s24147_s1 + $0x920] ss:$52 sps:$4 sm:$0xff]   ;;  %v20547_v63 = vsub.s32 1, %v18734_v42 }
 0x240   :  { %4833 = vmatprep.subr.bf16.mxu0 %v17262_v0  ;;  %5007 = vmatprep.subr.bf16.mxu1 %v17265_v1  ;;  %v17317_v0 = vld [vmem:[%s24147_s1 + $0x440] ss:$52 sps:$4 sm:$0xff]   ;;  %v17319_v1 = vld [vmem:[%s24147_s1 + $0xcc8] ss:$52 sps:$4 sm:$0xff]  }
 0x241   :  { %24182 = vst [vmem:[#allocation6_spill] sm:$0xff] %v20547_v63 }
 0x243   :  { %4834 = vmatpush1.bf16.msra.mxu0 %v17260_v2  ;;  %5008 = vmatpush1.bf16.msra.mxu1 %v17263_v3  ;;  %v17318_v2 = vld [vmem:[%s24147_s1 + $0x100] ss:$52 sps:$4 sm:$0xff]   ;;  %v17320_v3 = vld [vmem:[%s24147_s1 + $0x988] ss:$52 sps:$4 sm:$0xff]  }
 0x244   :  { %4835 = vmatprep.subr.bf16.mxu0 %v17268_v4  ;;  %5009 = vmatprep.subr.bf16.mxu1 %v17271_v5  ;;  %v17321_v4 = vld [vmem:[%s24147_s1 + $0x4a8] ss:$52 sps:$4 sm:$0xff]   ;;  %v728_v5 = vrot.slane %v19908_v33, %v20547_v63 }
 0x247   :  { %4836 = vmatpush1.bf16.msra.mxu0 %v17266_v6  ;;  %5010 = vmatpush1.bf16.msra.mxu1 %v17269_v7  ;;  %v17322_v7 = vld [vmem:[%s24147_s1 + $0x168] ss:$52 sps:$4 sm:$0xff]  }
 0x248   :  { %4837 = vmatprep.subr.bf16.mxu0 %v17274_v8  ;;  %5011 = vmatprep.subr.bf16.mxu1 %v17277_v9 }
 0x24b   :  { %4838 = vmatpush1.bf16.msra.mxu0 %v17272_v10  ;;  %5012 = vmatpush1.bf16.msra.mxu1 %v17275_v11  ;;  %v24157_v11 = vmov 0.0  }
 0x24c   :  { %4839 = vmatprep.subr.bf16.mxu0 %v17280_v12  ;;  %5022 = vmatprep.subr.bf16.mxu1 %v17283_v13  ;;  %v17324_v12 = vld [vmem:[%s24147_s1 + $0x510] ss:$52 sps:$4 sm:$0xff]   ;;  %v16237_v13 = vadd.f32 %v19923_v38, %v728_v5  ;;  %v17375_v5 = vld [vmem:[%s24147_s1 + $0xfa0] ss:$52 sps:$4 sm:$0xff]  }
 0x24e   :  { %5014 = vmatmul.mubr.bf16.vlgmr.msra.gmra.mrb[8].mxu1 %v18833_v18  ;;  %v5224_v38 = vmax.f32 %v16237_v13, 0.0  ;;  %v17386_v13 = vld [vmem:[%s24148_s2 + $0xc] ss:$28 sps:$4 sm:$0xff]  }
 0x24f   :  { %4840 = vmatpush1.bf16.msra.mxu0 %v17278_v14  ;;  %5023 = vmatpush1.bf16.msra.mxu1 %v17281_v15  ;;  %v17325_v14 = vld [vmem:[%s24147_s1 + $0x1d0] ss:$52 sps:$4 sm:$0xff]  }
 0x250   :  { %4841 = vmatprep.subr.bf16.mxu0 %v17286_v17  ;;  %5054 = vmatprep.mubr.bf16.mxu1 %v24153_v39  ;;  %v17329_v15 = vld [vmem:[%s24148_s2 + $0x4] ss:$28 sps:$4 sm:$0xff]   ;;  %v17326_v17 = vld [vmem:[%s24147_s1 + $0x578] ss:$52 sps:$4 sm:$0xff]  }
 0x251   :  { %15427 = vmatprep.subr.bf16.mxu1 %v17293_v21  ;;  %v17331_v21 = vld [vmem:[%s24147_s1 + $0x5e0] ss:$52 sps:$4 sm:$0xff]  }
 0x253   :  { %4842 = vmatpush1.bf16.msra.mxu0 %v17284_v20  ;;  %v17327_v20 = vld [vmem:[%s24148_s2] ss:$28 sps:$4 sm:$0xff]  }
 0x254   :  { %4843 = vmatprep.subr.bf16.mxu0 %v17289_v23  ;;  %v17334_v23 = vld [vmem:[%s24148_s2 + $0x3c] ss:$28 sps:$4 sm:$0xff]  }
 0x257   :  { %4844 = vmatpush1.bf16.msra.mxu0 %v17287_v24  ;;  %v20606_v24 = vpack.c.bf16 %v5224_v38, %v5224_v38  ;;  %v17387_v38 = vld [vmem:[%s24148_s2 + $0x2a0] ss:$28 sps:$4 sm:$0xff]  }
 0x258   :  { %4845 = vmatprep.subr.bf16.mxu0 %v17292_v25  ;;  %v17332_v25 = vld [vmem:[%s24148_s2 + $0x38] ss:$28 sps:$4 sm:$0xff]  }
 0x25a   :  { %14524 = vmatmul.mubr.msk.bf16.vlgmr.msra.gmra.mrb[8].mxu1 %vm4075_vm0, %v19261_v43 }
 0x25b   :  { %4846 = vmatpush1.bf16.msra.mxu0 %v17290_v27  ;;  %15428 = vmatpush3.bf16.msra.mxu1 %v17294_v28  ;;  %v17335_v27 = vld [vmem:[%s24147_s1 + $0x2a0] ss:$52 sps:$4 sm:$0xff]   ;;  %v17336_v28 = vld [vmem:[%s24147_s1 + $0x648] ss:$52 sps:$4 sm:$0xff]  }
 0x25c   :  { %4847 = vmatprep.subr.bf16.mxu0 %v17297_v29  ;;  %15429 = vmatprep.subr.bf16.mxu1 %v17298_v30  ;;  %v17337_v29 = vld [vmem:[%s24148_s2 + $0x70] ss:$28 sps:$4 sm:$0xff]   ;;  %v17340_v30 = vld [vmem:[%s24147_s1 + $0x308] ss:$52 sps:$4 sm:$0xff]  }
 0x25d   :  { %5135 = vmatprep.mubr.bf16.mxu1 %v18845_v22 }
 0x25f   :  { %4848 = vmatpush1.bf16.msra.mxu0 %v17295_v31  ;;  %15430 = vmatpush3.bf16.msra.mxu1 %v17299_v32  ;;  %v17341_v31 = vld [vmem:[%s24147_s1 + $0x1070] ss:$52 sps:$4 sm:$0xff]   ;;  %v17344_v32 = vld [vmem:[%s24148_s2 + $0xac] ss:$28 sps:$4 sm:$0xff]  }
 0x260   :  { %15431 = vmatprep.subr.bf16.mxu1 %v17300_v37  ;;  %4858 = vmatprep.subr.bf16.mxu0 %v17306_v40  ;;  %v17342_v37 = vld [vmem:[%s24148_s2 + $0xa8] ss:$28 sps:$4 sm:$0xff]  }
 0x261   :  { %v20505_v46 = vpop.f32.mrb[4].mxu1  ;;  %v17345_v40 = vld [vmem:[%s24147_s1 + $0xd30] ss:$52 sps:$4 sm:$0xff]  }
 0x262   :  { %4850 = vmatmul.mubr.bf16.vlgmr.msra.gmra.mrb[12].mxu0 %v18833_v18  ;;  %v20514_v22 = vpop.f32.mrb[5].mxu1 }
 0x263   :  { %15432 = vmatpush3.bf16.msra.mxu1 %v17301_v41  ;;  %v4732_v49 = vpop.f32.mrb[6].mxu1  ;;  %4859 = vmatpush1.bf16.msra.mxu0 %v17304_v44  ;;  %v17346_v41 = vld [vmem:[%s24147_s1 + $0x10d8] ss:$52 sps:$4 sm:$0xff]   ;;  %v17349_v44 = vld [vmem:[%s24148_s2 + $0xe4] ss:$28 sps:$4 sm:$0xff]  }
 0x264   :  { %v4733_v50 = vpop.f32.mrb[7].mxu1  ;;  %15433 = vmatprep.subr.bf16.mxu1 %v17302_v45  ;;  %4890 = vmatprep.mubr.bf16.mxu0 %v24153_v39  ;;  %v17347_v45 = vld [vmem:[%s24148_s2 + $0xe0] ss:$28 sps:$4 sm:$0xff]  }
 0x265   :  { %15405 = vmatprep.subr.bf16.mxu0 %v17309_v48  ;;  %v17351_v48 = vld [vmem:[%s24147_s1 + $0x1140] ss:$52 sps:$4 sm:$0xff]   ;;  %v17354_v49 = vld [vmem:[%s24148_s2 + $0x11c] ss:$28 sps:$4 sm:$0xff]  }
 0x266   :  { %v17352_v50 = vld [vmem:[%s24148_s2 + $0x118] ss:$28 sps:$4 sm:$0xff]  }
 0x267   :  { %15434 = vmatpush3.bf16.msra.mxu1 %v17303_v47  ;;  %v17350_v47 = vld [vmem:[%s24147_s1 + $0xd98] ss:$52 sps:$4 sm:$0xff]  }
 0x268   :  { %15435 = vmatprep.subr.bf16.mxu1 %v17307_v51  ;;  %v17356_v51 = vld [vmem:[%s24147_s1 + $0x11a8] ss:$52 sps:$4 sm:$0xff]  }
 0x26b   :  { %15436 = vmatpush3.bf16.msra.mxu1 %v17308_v52  ;;  %v17359_v52 = vld [vmem:[%s24148_s2 + $0x154] ss:$28 sps:$4 sm:$0xff]  }
 0x26c   :  { %15437 = vmatprep.subr.bf16.mxu1 %v17311_v53  ;;  %v17357_v53 = vld [vmem:[%s24148_s2 + $0x150] ss:$28 sps:$4 sm:$0xff]  }
 0x26e   :  { %14523 = vmatmul.mubr.msk.bf16.vlgmr.msra.gmra.mrb[12].mxu0 %vm4075_vm0, %v19261_v43 }
 0x26f   :  { %15406 = vmatpush3.bf16.msra.mxu0 %v17310_v54  ;;  %15438 = vmatpush3.bf16.msra.mxu1 %v17312_v55  ;;  %v17361_v54 = vld [vmem:[%s24147_s1 + $0x1210] ss:$52 sps:$4 sm:$0xff]   ;;  %v17364_v55 = vld [vmem:[%s24148_s2 + $0x18c] ss:$28 sps:$4 sm:$0xff]  }
 0x270   :  { %15407 = vmatprep.subr.bf16.mxu0 %v17313_v56  ;;  %15439 = vmatprep.subr.bf16.mxu1 %v17315_v58  ;;  %v17362_v56 = vld [vmem:[%s24148_s2 + $0x188] ss:$28 sps:$4 sm:$0xff]  }
 0x271   :  { %5095 = vmatprep.mubr.bf16.mxu0 %v18776_v60  ;;  %v17323_v60 = vld [vmem:[%s24147_s1 + $0x13b0] ss:$52 sps:$4 sm:$0xff]  }
 0x272   :  { %v17365_v58 = vld [vmem:[%s24147_s1 + $0xed0] ss:$52 sps:$4 sm:$0xff]  }
 0x273   :  { %15408 = vmatpush3.bf16.msra.mxu0 %v17314_v59  ;;  %15440 = vmatpush3.bf16.msra.mxu1 %v17316_v62  ;;  %v17366_v59 = vld [vmem:[%s24147_s1 + $0x1278] ss:$52 sps:$4 sm:$0xff]   ;;  %v17369_v62 = vld [vmem:[%s24148_s2 + $0x1c4] ss:$28 sps:$4 sm:$0xff]  }
 0x274   :  { %15409 = vmatprep.subr.bf16.mxu0 %v17317_v0  ;;  %15441 = vmatprep.subr.bf16.mxu1 %v17319_v1  ;;  %v17367_v0 = vld [vmem:[%s24148_s2 + $0x1c0] ss:$28 sps:$4 sm:$0xff]   ;;  %v17370_v1 = vld [vmem:[%s24147_s1 + $0xf38] ss:$52 sps:$4 sm:$0xff]  }
 0x275   :  { %v20567_v6 = vpop.f32.mrb[8].mxu0 }
 0x276   :  { %v20575_v8 = vpop.f32.mrb[9].mxu0 }
 0x277   :  { %15410 = vmatpush3.bf16.msra.mxu0 %v17318_v2  ;;  %15442 = vmatpush3.bf16.msra.mxu1 %v17320_v3  ;;  %v4568_v9 = vpop.f32.mrb[10].mxu0  ;;  %v17371_v2 = vld [vmem:[%s24147_s1 + $0x12e0] ss:$52 sps:$4 sm:$0xff]   ;;  %v17374_v3 = vld [vmem:[%s24148_s2 + $0x1fc] ss:$28 sps:$4 sm:$0xff]  }
 0x278   :  { %v4569_v10 = vpop.f32.mrb[11].mxu0  ;;  %15411 = vmatprep.subr.bf16.mxu0 %v17321_v4  ;;  %15932 = vmatprep.subr.bf16.mxu1 %v24157_v11  ;;  %v17372_v4 = vld [vmem:[%s24148_s2 + $0x1f8] ss:$28 sps:$4 sm:$0xff]   ;;  %v17377_v9 = vld [vmem:[%s24148_s2 + $0x230] ss:$28 sps:$4 sm:$0xff]  }
 0x279   :  { %v17380_v10 = vld [vmem:[%s24147_s1 + $0x1008] ss:$52 sps:$4 sm:$0xff]  }
 0x27a   :  { %5136 = vmatmul.mubr.bf16.vlgmr.msra.gmra.mrb[12].mxu1 %v19036_v26  ;;  %v17330_v26 = vld [vmem:[%s24147_s1 + $0x238] ss:$52 sps:$4 sm:$0xff]  }
 0x27b   :  { %15412 = vmatpush3.bf16.msra.mxu0 %v17322_v7  ;;  %15933 = vmatpush3.bf16.msra.mxu1 %v17323_v60  ;;  %v17376_v7 = vld [vmem:[%s24147_s1 + $0x1348] ss:$52 sps:$4 sm:$0xff]   ;;  %v17379_v60 = vld [vmem:[%s24148_s2 + $0x234] ss:$28 sps:$4 sm:$0xff]  }
 0x27c   :  { %15413 = vmatprep.subr.bf16.mxu0 %v17324_v12  ;;  %15934 = vmatprep.mubr.msk.bf16.mxu1 %vm18579_vm1, %v24157_v11  ;;  %v17383_v12 = vld [vmem:[%s24148_s2 + $0x26c] ss:$28 sps:$4 sm:$0xff]  }
 0x27d   :  { %9605 = vmatprep.subr.bf16.mxu1 %v17329_v15  ;;  %v17384_v15 = vld [vmem:[%s24148_s2 + $0x8] ss:$28 sps:$4 sm:$0xff]  }
 0x27f   :  { %15414 = vmatpush3.bf16.msra.mxu0 %v17325_v14  ;;  %v17381_v14 = vld [vmem:[%s24148_s2 + $0x268] ss:$28 sps:$4 sm:$0xff]  }
 0x280   :  { %15415 = vmatprep.subr.bf16.mxu0 %v17326_v17  ;;  %v17389_v17 = vld [vmem:[%s24148_s2 + $0x2a4] ss:$28 sps:$4 sm:$0xff]  }
 0x282   :  { %15935 = vmatmul.mubr.msk.bf16.vlgmr.msra.gmra.mrb[16].mxu1 %vm4075_vm0, %v19261_v43  ;;  %v17339_v43 = vld [vmem:[%s24148_s2 + $0x74] ss:$28 sps:$4 sm:$0xff]  }
 0x283   :  { %15416 = vmatpush3.bf16.msra.mxu0 %v17330_v26  ;;  %9606 = vmatpush1.bf16.msra.mxu1 %v17327_v20  ;;  %v17390_v20 = vld [vmem:[%s24148_s2 + $0x40] ss:$28 sps:$4 sm:$0xff]  }
 0x284   :  { %9637 = vmatprep.mubr.bf16.mxu1 %v20606_v24  ;;  %15417 = vmatprep.subr.bf16.mxu0 %v17331_v21  ;;  %v17392_v26 = vld [vmem:[%s24148_s2 + $0x44] ss:$28 sps:$4 sm:$0xff]   ;;  %v17395_v21 = vld [vmem:[%s24148_s2 + $0x2dc] ss:$28 sps:$4 sm:$0xff]  }
 0x285   :  { %9607 = vmatprep.subr.bf16.mxu1 %v17334_v23  ;;  %v17398_v23 = vld [vmem:[%s24148_s2 + $0x7c] ss:$28 sps:$4 sm:$0xff]  }
 0x287   :  { %15418 = vmatpush3.bf16.msra.mxu0 %v17335_v27  ;;  %9608 = vmatpush1.bf16.msra.mxu1 %v17332_v25  ;;  %v20759_v25 = vsub.s32 0, %v18734_v42  ;;  %v17396_v27 = vld [vmem:[%s24148_s2 + $0x78] ss:$28 sps:$4 sm:$0xff]  }
 0x288   :  { %15419 = vmatprep.subr.bf16.mxu0 %v17336_v28  ;;  %9609 = vmatprep.subr.bf16.mxu1 %v17339_v43  ;;  %v17401_v43 = vld [vmem:[%s24148_s2 + $0x314] ss:$28 sps:$4 sm:$0xff]  }
 0x289   :  { %24183 = vst [vmem:[#allocation7_spill] sm:$0xff] %v20759_v25  ;;  %v724_v28 = vrot.slane %v19908_v33, %v20759_v25 }
 0x28b   :  { %15420 = vmatpush3.bf16.msra.mxu0 %v17340_v30  ;;  %9610 = vmatpush1.bf16.msra.mxu1 %v17337_v29  ;;  %v17404_v29 = vld [vmem:[%s24148_s2 + $0xb4] ss:$28 sps:$4 sm:$0xff]  }
 0x28c   :  { %15449 = vmatprep.subr.bf16.mxu0 %v17341_v31  ;;  %9611 = vmatprep.subr.bf16.mxu1 %v17344_v32  ;;  %v17399_v30 = vld [vmem:[%s24148_s2 + $0x310] ss:$28 sps:$4 sm:$0xff]   ;;  %v16236_v32 = vadd.f32 %v19916_v36, %v724_v28  ;;  %v17467_v28 = vld [vmem:[%s24148_s2 + $0x57c] ss:$28 sps:$4 sm:$0xff]  }
 0x28d   :  { %v17402_v31 = vld [vmem:[%s24148_s2 + $0xb0] ss:$28 sps:$4 sm:$0xff]  }
 0x28e   :  { %5096 = vmatmul.mubr.bf16.vlgmr.msra.gmra.mrb[16].mxu0 %v18828_v16  ;;  %v17355_v16 = vld [vmem:[%s24147_s1 + $0xe00] ss:$52 sps:$4 sm:$0xff]   ;;  %v5223_v36 = vmax.f32 %v16236_v32, 0.0 }
 0x28f   :  { %15450 = vmatpush3.bf16.msra.mxu0 %v17345_v40  ;;  %9612 = vmatpush1.bf16.msra.mxu1 %v17342_v37  ;;  %v17407_v37 = vld [vmem:[%s24148_s2 + $0x34c] ss:$28 sps:$4 sm:$0xff]   ;;  %v17476_v32 = vld [vmem:[%s24148_s2 + $0x354] ss:$28 sps:$4 sm:$0xff]  }
 0x290   :  { %15451 = vmatprep.subr.bf16.mxu0 %v17346_v41  ;;  %9613 = vmatprep.subr.bf16.mxu1 %v17349_v44  ;;  %v17410_v40 = vld [vmem:[%s24148_s2 + $0xec] ss:$28 sps:$4 sm:$0xff]  }
 0x291   :  { %5175 = vmatprep.mubr.bf16.mxu0 %v18835_v19  ;;  %v17360_v19 = vld [vmem:[%s24147_s1 + $0xe68] ss:$52 sps:$4 sm:$0xff]  }
 0x292   :  { %v17405_v41 = vld [vmem:[%s24148_s2 + $0x348] ss:$28 sps:$4 sm:$0xff]  }
 0x293   :  { %15452 = vmatpush3.bf16.msra.mxu0 %v17350_v47  ;;  %9614 = vmatpush1.bf16.msra.mxu1 %v17347_v45  ;;  %v17408_v44 = vld [vmem:[%s24148_s2 + $0xe8] ss:$28 sps:$4 sm:$0xff]  }
 0x294   :  { %15453 = vmatprep.subr.bf16.mxu0 %v17351_v48  ;;  %9615 = vmatprep.subr.bf16.mxu1 %v17354_v49  ;;  %v17413_v45 = vld [vmem:[%s24148_s2 + $0x384] ss:$28 sps:$4 sm:$0xff]   ;;  %v5226_v48 = vmax.f32 %v19959_v61, 0.0  ;;  %v17417_v61 = vld [vmem:[%s24148_s2 + $0x3b8] ss:$28 sps:$4 sm:$0xff]  }
 0x295   :  { %v17416_v47 = vld [vmem:[%s24148_s2 + $0x124] ss:$28 sps:$4 sm:$0xff]  }
 0x296   :  { %v17411_v49 = vld [vmem:[%s24148_s2 + $0x380] ss:$28 sps:$4 sm:$0xff]  }
 0x297   :  { %15454 = vmatpush3.bf16.msra.mxu0 %v17355_v16  ;;  %9616 = vmatpush1.bf16.msra.mxu1 %v17352_v50  ;;  %v17414_v50 = vld [vmem:[%s24148_s2 + $0x120] ss:$28 sps:$4 sm:$0xff]  }
 0x298   :  { %15455 = vmatprep.subr.bf16.mxu0 %v17356_v51  ;;  %9617 = vmatprep.subr.bf16.mxu1 %v17359_v52  ;;  %v17419_v16 = vld [vmem:[%s24148_s2 + $0x3bc] ss:$28 sps:$4 sm:$0xff]   ;;  %v20811_v51 = vpack.c.bf16 %v5223_v36, %v5223_v36  ;;  %v20813_v52 = vpack.c.bf16 %v5226_v48, %v5226_v48  ;;  %v17482_v36 = vld [vmem:[%s24148_s2 + $0x38c] ss:$28 sps:$4 sm:$0xff]   ;;  %v17488_v48 = vld [vmem:[%s24148_s2 + $0x3c4] ss:$28 sps:$4 sm:$0xff]  }
 0x29b   :  { %15456 = vmatpush3.bf16.msra.mxu0 %v17360_v19  ;;  %9618 = vmatpush1.bf16.msra.mxu1 %v17357_v53  ;;  %v17422_v53 = vld [vmem:[%s24148_s2 + $0x15c] ss:$28 sps:$4 sm:$0xff]  }
 0x29c   :  { %15457 = vmatprep.subr.bf16.mxu0 %v17361_v54  ;;  %9619 = vmatprep.subr.bf16.mxu1 %v17364_v55  ;;  %v17420_v19 = vld [vmem:[%s24148_s2 + $0x158] ss:$28 sps:$4 sm:$0xff]  }
 0x29d   :  { %v17425_v54 = vld [vmem:[%s24148_s2 + $0x3f4] ss:$28 sps:$4 sm:$0xff]  }
 0x29e   :  { %v17428_v55 = vld [vmem:[%s24148_s2 + $0x194] ss:$28 sps:$4 sm:$0xff]  }
 0x29f   :  { %15458 = vmatpush3.bf16.msra.mxu0 %v17365_v58  ;;  %9620 = vmatpush1.bf16.msra.mxu1 %v17362_v56  ;;  %v17423_v56 = vld [vmem:[%s24148_s2 + $0x3f0] ss:$28 sps:$4 sm:$0xff]  }
 0x2a0   :  { %15459 = vmatprep.subr.bf16.mxu0 %v17366_v59  ;;  %9621 = vmatprep.subr.bf16.mxu1 %v17369_v62  ;;  %v17426_v58 = vld [vmem:[%s24148_s2 + $0x190] ss:$28 sps:$4 sm:$0xff]   ;;  %v17429_v62 = vld [vmem:[%s24148_s2 + $0x428] ss:$28 sps:$4 sm:$0xff]  }
 0x2a1   :  { %v17431_v59 = vld [vmem:[%s24148_s2 + $0x42c] ss:$28 sps:$4 sm:$0xff]  }
 0x2a3   :  { %15460 = vmatpush3.bf16.msra.mxu0 %v17370_v1  ;;  %9622 = vmatpush1.bf16.msra.mxu1 %v17367_v0  ;;  %v17434_v0 = vld [vmem:[%s24148_s2 + $0x1cc] ss:$28 sps:$4 sm:$0xff]  }
 0x2a4   :  { %15461 = vmatprep.subr.bf16.mxu0 %v17371_v2  ;;  %9623 = vmatprep.subr.bf16.mxu1 %v17374_v3  ;;  %v17432_v1 = vld [vmem:[%s24148_s2 + $0x1c8] ss:$28 sps:$4 sm:$0xff]  }
 0x2a5   :  { %v17437_v2 = vld [vmem:[%s24148_s2 + $0x464] ss:$28 sps:$4 sm:$0xff]  }
 0x2a6   :  { %v17440_v3 = vld [vmem:[%s24148_s2 + $0x204] ss:$28 sps:$4 sm:$0xff]  }
 0x2a7   :  { %15462 = vmatpush3.bf16.msra.mxu0 %v17375_v5  ;;  %9624 = vmatpush1.bf16.msra.mxu1 %v17372_v4  ;;  %v17435_v4 = vld [vmem:[%s24148_s2 + $0x460] ss:$28 sps:$4 sm:$0xff]  }
 0x2a8   :  { %15463 = vmatprep.subr.bf16.mxu0 %v17376_v7  ;;  %9625 = vmatprep.subr.bf16.mxu1 %v17379_v60  ;;  %v17438_v5 = vld [vmem:[%s24148_s2 + $0x200] ss:$28 sps:$4 sm:$0xff]   ;;  %v17441_v60 = vld [vmem:[%s24148_s2 + $0x498] ss:$28 sps:$4 sm:$0xff]  }
 0x2a9   :  { %v17443_v7 = vld [vmem:[%s24148_s2 + $0x49c] ss:$28 sps:$4 sm:$0xff]  }
 0x2ab   :  { %15464 = vmatpush3.bf16.msra.mxu0 %v17380_v10  ;;  %9626 = vmatpush1.bf16.msra.mxu1 %v17377_v9  ;;  %v17446_v9 = vld [vmem:[%s24148_s2 + $0x23c] ss:$28 sps:$4 sm:$0xff]  }
 0x2ac   :  { %9627 = vmatprep.subr.bf16.mxu1 %v17383_v12  ;;  %9892 = vmatprep.subr.bf16.mxu0 %v17386_v13  ;;  %v17444_v10 = vld [vmem:[%s24148_s2 + $0x238] ss:$28 sps:$4 sm:$0xff]  }
 0x2ad   :  { %v17449_v12 = vld [vmem:[%s24148_s2 + $0x4d4] ss:$28 sps:$4 sm:$0xff]  }
 0x2ae   :  { %5176 = vmatmul.mubr.bf16.vlgmr.msra.gmra.mrb[20].mxu0 %v18833_v18  ;;  %v17393_v18 = vld [vmem:[%s24148_s2 + $0x2d8] ss:$28 sps:$4 sm:$0xff]  }
 0x2af   :  { %9628 = vmatpush1.bf16.msra.mxu1 %v17381_v14  ;;  %9893 = vmatpush1.bf16.msra.mxu0 %v17384_v15  ;;  %v17452_v13 = vld [vmem:[%s24148_s2 + $0x274] ss:$28 sps:$4 sm:$0xff]  }
 0x2b0   :  { %9924 = vmatprep.mubr.bf16.mxu0 %v20606_v24  ;;  %9629 = vmatprep.subr.bf16.mxu1 %v17389_v17  ;;  %v17447_v14 = vld [vmem:[%s24148_s2 + $0x4d0] ss:$28 sps:$4 sm:$0xff]  }
 0x2b1   :  { %9894 = vmatprep.subr.bf16.mxu0 %v17392_v26  ;;  %v17450_v15 = vld [vmem:[%s24148_s2 + $0x270] ss:$28 sps:$4 sm:$0xff]   ;;  %v17456_v26 = vld [vmem:[%s24148_s2 + $0x2a8] ss:$28 sps:$4 sm:$0xff]  }
 0x2b2   :  { %v17455_v17 = vld [vmem:[%s24148_s2 + $0x50c] ss:$28 sps:$4 sm:$0xff]  }
 0x2b3   :  { %9630 = vmatpush1.bf16.msra.mxu1 %v17387_v38  ;;  %9895 = vmatpush1.bf16.msra.mxu0 %v17390_v20  ;;  %v17453_v38 = vld [vmem:[%s24148_s2 + $0x508] ss:$28 sps:$4 sm:$0xff]  }
 0x2b4   :  { %9631 = vmatprep.subr.bf16.mxu1 %v17395_v21  ;;  %9896 = vmatprep.subr.bf16.mxu0 %v17398_v23  ;;  %v17458_v20 = vld [vmem:[%s24148_s2 + $0x2ac] ss:$28 sps:$4 sm:$0xff]   ;;  %v17461_v21 = vld [vmem:[%s24148_s2 + $0x544] ss:$28 sps:$4 sm:$0xff]  }
 0x2b5   :  { %v17459_v23 = vld [vmem:[%s24148_s2 + $0x540] ss:$28 sps:$4 sm:$0xff]  }
 0x2b7   :  { %9632 = vmatpush1.bf16.msra.mxu1 %v17393_v18  ;;  %9897 = vmatpush1.bf16.msra.mxu0 %v17396_v27  ;;  %v17464_v18 = vld [vmem:[%s24148_s2 + $0x2e4] ss:$28 sps:$4 sm:$0xff]  }
 0x2b8   :  { %9633 = vmatprep.subr.bf16.mxu1 %v17401_v43  ;;  %9898 = vmatprep.subr.bf16.mxu0 %v17404_v29  ;;  %v17462_v27 = vld [vmem:[%s24148_s2 + $0x2e0] ss:$28 sps:$4 sm:$0xff]   ;;  %v17465_v43 = vld [vmem:[%s24148_s2 + $0x578] ss:$28 sps:$4 sm:$0xff]  }
 0x2b9   :  { %v17470_v29 = vld [vmem:[%s24148_s2 + $0x31c] ss:$28 sps:$4 sm:$0xff]  }
 0x2bb   :  { %9634 = vmatpush1.bf16.msra.mxu1 %v17399_v30  ;;  %9899 = vmatpush1.bf16.msra.mxu0 %v17402_v31  ;;  %v17468_v30 = vld [vmem:[%s24148_s2 + $0x318] ss:$28 sps:$4 sm:$0xff]  }
 0x2bc   :  { %9635 = vmatprep.subr.bf16.mxu1 %v17407_v37  ;;  %9900 = vmatprep.subr.bf16.mxu0 %v17410_v40  ;;  %v17473_v31 = vld [vmem:[%s24148_s2 + $0x5b4] ss:$28 sps:$4 sm:$0xff]  }
 0x2bd   :  { %v17471_v37 = vld [vmem:[%s24148_s2 + $0x5b0] ss:$28 sps:$4 sm:$0xff]  }
 0x2be   :  { %v17474_v40 = vld [vmem:[%s24148_s2 + $0x350] ss:$28 sps:$4 sm:$0xff]  }
 0x2bf   :  { %9636 = vmatpush1.bf16.msra.mxu1 %v17405_v41  ;;  %9901 = vmatpush1.bf16.msra.mxu0 %v17408_v44  ;;  %v17479_v41 = vld [vmem:[%s24148_s2 + $0x5ec] ss:$28 sps:$4 sm:$0xff]  }
 0x2c0   :  { %9646 = vmatprep.subr.bf16.mxu1 %v17413_v45  ;;  %9902 = vmatprep.subr.bf16.mxu0 %v17416_v47  ;;  %v17477_v44 = vld [vmem:[%s24148_s2 + $0x5e8] ss:$28 sps:$4 sm:$0xff]  }
 0x2c1   :  { %v17480_v45 = vld [vmem:[%s24148_s2 + $0x388] ss:$28 sps:$4 sm:$0xff]  }
 0x2c2   :  { %9638 = vmatmul.mubr.bf16.vlgmr.msra.gmra.mrb[20].mxu1 %v20811_v51  ;;  %v17485_v47 = vld [vmem:[%s24148_s2 + $0x624] ss:$28 sps:$4 sm:$0xff]  }
 0x2c3   :  { %9647 = vmatpush1.bf16.msra.mxu1 %v17411_v49  ;;  %9678 = vmatprep.mubr.bf16.mxu1 %v20813_v52  ;;  %v17483_v49 = vld [vmem:[%s24148_s2 + $0x620] ss:$28 sps:$4 sm:$0xff]  }
 0x2c4   :  { %9903 = vmatpush1.bf16.msra.mxu0 %v17414_v50  ;;  %9648 = vmatprep.subr.bf16.mxu1 %v17419_v16  ;;  %v17486_v50 = vld [vmem:[%s24148_s2 + $0x3c0] ss:$28 sps:$4 sm:$0xff]  }
 0x2c5   :  { %9904 = vmatprep.subr.bf16.mxu0 %v17422_v53  ;;  %v17491_v16 = vld [vmem:[%s24148_s2 + $0x65c] ss:$28 sps:$4 sm:$0xff]  }
 0x2c6   :  { %v17489_v53 = vld [vmem:[%s24148_s2 + $0x658] ss:$28 sps:$4 sm:$0xff]  }
 0x2c7   :  { %9649 = vmatpush1.bf16.msra.mxu1 %v17417_v61  ;;  %v24154_v61 = vsub.s32 5, %v18734_v42 }
 0x2c8   :  { %9905 = vmatpush1.bf16.msra.mxu0 %v17420_v19  ;;  %9650 = vmatprep.subr.bf16.mxu1 %v17425_v54  ;;  %v17494_v19 = vld [vmem:[%s24148_s2 + $0x3fc] ss:$28 sps:$4 sm:$0xff]  }
 0x2c9   :  { %9906 = vmatprep.subr.bf16.mxu0 %v17428_v55  ;;  %v17492_v54 = vld [vmem:[%s24148_s2 + $0x3f8] ss:$28 sps:$4 sm:$0xff]  }
 0x2ca   :  { %v17497_v55 = vld [vmem:[%s24148_s2 + $0x694] ss:$28 sps:$4 sm:$0xff]  }
 0x2cb   :  { %9651 = vmatpush1.bf16.msra.mxu1 %v17423_v56  ;;  %v744_v56 = vrot.slane %v19908_v33, %v24154_v61 }
 0x2cc   :  { %9907 = vmatpush1.bf16.msra.mxu0 %v17426_v58  ;;  %9652 = vmatprep.subr.bf16.mxu1 %v17431_v59  ;;  %v17495_v58 = vld [vmem:[%s24148_s2 + $0x690] ss:$28 sps:$4 sm:$0xff]  }
 0x2cd   :  { %9908 = vmatprep.subr.bf16.mxu0 %v17434_v0  ;;  %v17500_v59 = vld [vmem:[%s24148_s2 + $0x434] ss:$28 sps:$4 sm:$0xff]   ;;  %v17503_v0 = vld [vmem:[%s24148_s2 + $0x6cc] ss:$28 sps:$4 sm:$0xff]  }
 0x2cf   :  { %9653 = vmatpush1.bf16.msra.mxu1 %v17429_v62  ;;  %v17498_v62 = vld [vmem:[%s24148_s2 + $0x430] ss:$28 sps:$4 sm:$0xff]  }
 0x2d0   :  { %9909 = vmatpush1.bf16.msra.mxu0 %v17432_v1  ;;  %9654 = vmatprep.subr.bf16.mxu1 %v17437_v2  ;;  %v16243_v1 = vadd.f32 %v20575_v8, %v744_v56  ;;  %v17501_v2 = vld [vmem:[%s24148_s2 + $0x6c8] ss:$28 sps:$4 sm:$0xff]   ;;  %v17563_v56 = vld [vmem:[%s24148_s2 + $0x8fc] ss:$28 sps:$4 sm:$0xff]  }
 0x2d1   :  { %9910 = vmatprep.subr.bf16.mxu0 %v17440_v3  ;;  %v17506_v3 = vld [vmem:[%s24148_s2 + $0x46c] ss:$28 sps:$4 sm:$0xff]   ;;  %v17509_v8 = vld [vmem:[%s24148_s2 + $0x704] ss:$28 sps:$4 sm:$0xff]  }
 0x2d3   :  { %9655 = vmatpush1.bf16.msra.mxu1 %v17435_v4  ;;  %v5225_v4 = vmax.f32 %v19954_v57, 0.0  ;;  %v17507_v57 = vld [vmem:[%s24148_s2 + $0x700] ss:$28 sps:$4 sm:$0xff]  }
 0x2d4   :  { %9911 = vmatpush1.bf16.msra.mxu0 %v17438_v5  ;;  %9656 = vmatprep.subr.bf16.mxu1 %v17443_v7  ;;  %v17504_v5 = vld [vmem:[%s24148_s2 + $0x468] ss:$28 sps:$4 sm:$0xff]  }
 0x2d5   :  { %9912 = vmatprep.subr.bf16.mxu0 %v17446_v9  ;;  %v17512_v7 = vld [vmem:[%s24148_s2 + $0x4a4] ss:$28 sps:$4 sm:$0xff]  }
 0x2d6   :  { %v17510_v9 = vld [vmem:[%s24148_s2 + $0x4a0] ss:$28 sps:$4 sm:$0xff]  }
 0x2d7   :  { %9657 = vmatpush1.bf16.msra.mxu1 %v17441_v60  ;;  %v5228_v60 = vmax.f32 %v16243_v1, 0.0  ;;  %v17564_v1 = vld [vmem:[%s24148_s2 + $0x698] ss:$28 sps:$4 sm:$0xff]  }
 0x2d8   :  { %9913 = vmatpush1.bf16.msra.mxu0 %v17444_v10  ;;  %9658 = vmatprep.subr.bf16.mxu1 %v17449_v12  ;;  %v17515_v10 = vld [vmem:[%s24148_s2 + $0x73c] ss:$28 sps:$4 sm:$0xff]   ;;  %v21017_v12 = vpack.c.bf16 %v5225_v4, %v5225_v4  ;;  %v17572_v4 = vld [vmem:[%s24148_s2 + $0x6d4] ss:$28 sps:$4 sm:$0xff]  }
 0x2d9   :  { %9914 = vmatprep.subr.bf16.mxu0 %v17452_v13  ;;  %v21019_v13 = vpack.c.bf16 %v5228_v60, %v5228_v60  ;;  %v17573_v60 = vld [vmem:[%s24148_s2 + $0x968] ss:$28 sps:$4 sm:$0xff]  }
 0x2db   :  { %9659 = vmatpush1.bf16.msra.mxu1 %v17447_v14  ;;  %v17513_v14 = vld [vmem:[%s24148_s2 + $0x738] ss:$28 sps:$4 sm:$0xff]  }
 0x2dc   :  { %9915 = vmatpush1.bf16.msra.mxu0 %v17450_v15  ;;  %9660 = vmatprep.subr.bf16.mxu1 %v17455_v17  ;;  %v17518_v15 = vld [vmem:[%s24148_s2 + $0x4dc] ss:$28 sps:$4 sm:$0xff]  }
 0x2dd   :  { %9916 = vmatprep.subr.bf16.mxu0 %v17458_v20  ;;  %v17516_v17 = vld [vmem:[%s24148_s2 + $0x4d8] ss:$28 sps:$4 sm:$0xff]   ;;  %v17519_v20 = vld [vmem:[%s24148_s2 + $0x770] ss:$28 sps:$4 sm:$0xff]  }
 0x2df   :  { %9661 = vmatpush1.bf16.msra.mxu1 %v17453_v38  ;;  %v17521_v38 = vld [vmem:[%s24148_s2 + $0x774] ss:$28 sps:$4 sm:$0xff]  }
 0x2e0   :  { %9917 = vmatpush1.bf16.msra.mxu0 %v17456_v26  ;;  %9662 = vmatprep.subr.bf16.mxu1 %v17461_v21  ;;  %v17524_v26 = vld [vmem:[%s24148_s2 + $0x514] ss:$28 sps:$4 sm:$0xff]  }
 0x2e1   :  { %9918 = vmatprep.subr.bf16.mxu0 %v17464_v18  ;;  %v17522_v21 = vld [vmem:[%s24148_s2 + $0x510] ss:$28 sps:$4 sm:$0xff]  }
 0x2e2   :  { %v17530_v18 = vld [vmem:[%s24148_s2 + $0x54c] ss:$28 sps:$4 sm:$0xff]  }
 0x2e3   :  { %9663 = vmatpush1.bf16.msra.mxu1 %v17459_v23  ;;  %v17527_v23 = vld [vmem:[%s24148_s2 + $0x7ac] ss:$28 sps:$4 sm:$0xff]  }
 0x2e4   :  { %9919 = vmatpush1.bf16.msra.mxu0 %v17462_v27  ;;  %9664 = vmatprep.subr.bf16.mxu1 %v17467_v28  ;;  %v17525_v27 = vld [vmem:[%s24148_s2 + $0x7a8] ss:$28 sps:$4 sm:$0xff]  }
 0x2e5   :  { %9920 = vmatprep.subr.bf16.mxu0 %v17470_v29  ;;  %v17528_v28 = vld [vmem:[%s24148_s2 + $0x548] ss:$28 sps:$4 sm:$0xff]   ;;  %v17531_v29 = vld [vmem:[%s24148_s2 + $0x7e0] ss:$28 sps:$4 sm:$0xff]  }
 0x2e7   :  { %9665 = vmatpush1.bf16.msra.mxu1 %v17465_v43  ;;  %v17533_v43 = vld [vmem:[%s24148_s2 + $0x7e4] ss:$28 sps:$4 sm:$0xff]  }
 0x2e8   :  { %9921 = vmatpush1.bf16.msra.mxu0 %v17468_v30  ;;  %9666 = vmatprep.subr.bf16.mxu1 %v17473_v31  ;;  %v17536_v30 = vld [vmem:[%s24148_s2 + $0x584] ss:$28 sps:$4 sm:$0xff]  }
 0x2e9   :  { %9922 = vmatprep.subr.bf16.mxu0 %v17476_v32  ;;  %v17534_v31 = vld [vmem:[%s24148_s2 + $0x580] ss:$28 sps:$4 sm:$0xff]  }
 0x2ea   :  { %v17539_v32 = vld [vmem:[%s24148_s2 + $0x81c] ss:$28 sps:$4 sm:$0xff]  }
 0x2eb   :  { %9667 = vmatpush1.bf16.msra.mxu1 %v17471_v37  ;;  %v17537_v37 = vld [vmem:[%s24148_s2 + $0x818] ss:$28 sps:$4 sm:$0xff]  }
 0x2ec   :  { %9923 = vmatpush1.bf16.msra.mxu0 %v17474_v40  ;;  %9668 = vmatprep.subr.bf16.mxu1 %v17479_v41  ;;  %v17542_v40 = vld [vmem:[%s24148_s2 + $0x5bc] ss:$28 sps:$4 sm:$0xff]  }
 0x2ed   :  { %9933 = vmatprep.subr.bf16.mxu0 %v17482_v36  ;;  %v17540_v41 = vld [vmem:[%s24148_s2 + $0x5b8] ss:$28 sps:$4 sm:$0xff]   ;;  %v17543_v36 = vld [vmem:[%s24148_s2 + $0x850] ss:$28 sps:$4 sm:$0xff]  }
 0x2ef   :  { %9925 = vmatmul.mubr.bf16.vlgmr.msra.gmra.mrb[24].mxu0 %v20811_v51  ;;  %9669 = vmatpush1.bf16.msra.mxu1 %v17477_v44  ;;  %v17545_v44 = vld [vmem:[%s24148_s2 + $0x854] ss:$28 sps:$4 sm:$0xff]  }
 0x2f0   :  { %9934 = vmatpush1.bf16.msra.mxu0 %v17480_v45  ;;  %9965 = vmatprep.mubr.bf16.mxu0 %v20813_v52  ;;  %v17548_v45 = vld [vmem:[%s24148_s2 + $0x5f4] ss:$28 sps:$4 sm:$0xff]  }
 0x2f1   :  { %9670 = vmatprep.subr.bf16.mxu1 %v17485_v47  ;;  %9935 = vmatprep.subr.bf16.mxu0 %v17488_v48  ;;  %v17546_v47 = vld [vmem:[%s24148_s2 + $0x5f0] ss:$28 sps:$4 sm:$0xff]  }
 0x2f2   :  { %v17551_v48 = vld [vmem:[%s24148_s2 + $0x88c] ss:$28 sps:$4 sm:$0xff]  }
 0x2f3   :  { %9671 = vmatpush1.bf16.msra.mxu1 %v17483_v49  ;;  %v17549_v49 = vld [vmem:[%s24148_s2 + $0x888] ss:$28 sps:$4 sm:$0xff]  }
 0x2f4   :  { %9936 = vmatpush1.bf16.msra.mxu0 %v17486_v50  ;;  %9672 = vmatprep.subr.bf16.mxu1 %v17491_v16  ;;  %v17554_v50 = vld [vmem:[%s24148_s2 + $0x62c] ss:$28 sps:$4 sm:$0xff]  }
 0x2f5   :  { %9937 = vmatprep.subr.bf16.mxu0 %v17494_v19  ;;  %v17552_v16 = vld [vmem:[%s24148_s2 + $0x628] ss:$28 sps:$4 sm:$0xff]   ;;  %v17555_v19 = vld [vmem:[%s24148_s2 + $0x8c0] ss:$28 sps:$4 sm:$0xff]  }
 0x2f7   :  { %9673 = vmatpush1.bf16.msra.mxu1 %v17489_v53  ;;  %v17557_v53 = vld [vmem:[%s24148_s2 + $0x8c4] ss:$28 sps:$4 sm:$0xff]  }
 0x2f8   :  { %9938 = vmatpush1.bf16.msra.mxu0 %v17492_v54  ;;  %9674 = vmatprep.subr.bf16.mxu1 %v17497_v55  ;;  %v17560_v54 = vld [vmem:[%s24148_s2 + $0x664] ss:$28 sps:$4 sm:$0xff]  }
 0x2f9   :  { %9939 = vmatprep.subr.bf16.mxu0 %v17500_v59  ;;  %v17558_v55 = vld [vmem:[%s24148_s2 + $0x660] ss:$28 sps:$4 sm:$0xff]   ;;  %v17561_v59 = vld [vmem:[%s24148_s2 + $0x8f8] ss:$28 sps:$4 sm:$0xff]  }
 0x2fb   :  { %9675 = vmatpush1.bf16.msra.mxu1 %v17495_v58  ;;  %v17566_v58 = vld [vmem:[%s24148_s2 + $0x69c] ss:$28 sps:$4 sm:$0xff]  }
 0x2fc   :  { %9940 = vmatpush1.bf16.msra.mxu0 %v17498_v62  ;;  %9676 = vmatprep.subr.bf16.mxu1 %v17503_v0  ;;  %v13880_v62 = vld [vmem:[%s24150_s4 + $0x40] ss:$8 sm:$0xf] }
 0x2fd   :  { %9941 = vmatprep.subr.bf16.mxu0 %v17506_v3  ;;  %v13881_v0 = vld [vmem:[%s24150_s4 + $0x40] ss:$8 sm:$0x10]  ;;  %v17567_v3 = vld [vmem:[%s24148_s2 + $0x930] ss:$28 sps:$4 sm:$0xff]  }
 0x2ff   :  { %9677 = vmatpush1.bf16.msra.mxu1 %v17501_v2  ;;  %v17569_v2 = vld [vmem:[%s24148_s2 + $0x934] ss:$28 sps:$4 sm:$0xff]  }
 0x300   :  { %9942 = vmatpush1.bf16.msra.mxu0 %v17504_v5  ;;  %9687 = vmatprep.subr.bf16.mxu1 %v17509_v8  ;;  %v21143_v5 = vor.u32 %v13881_v0, %v13880_v62  ;;  %v17570_v8 = vld [vmem:[%s24148_s2 + $0x6d0] ss:$28 sps:$4 sm:$0xff]   ;;  %v17611_v62 = vld [vmem:[%s24148_s2 + $0xabc] ss:$28 sps:$4 sm:$0xff]  }
 0x301   :  { %9943 = vmatprep.subr.bf16.mxu0 %v17512_v7  ;;  %v17575_v7 = vld [vmem:[%s24148_s2 + $0x96c] ss:$28 sps:$4 sm:$0xff]  }
 0x302   :  { %9679 = vmatmul.mubr.bf16.vlgmr.msra.gmra.mrb[20].mxu1 %v21017_v12 }
 0x303   :  { %9688 = vmatpush1.bf16.msra.mxu1 %v17507_v57  ;;  %9719 = vmatprep.mubr.bf16.mxu1 %v21019_v13  ;;  %v17578_v57 = vld [vmem:[%s24148_s2 + $0x70c] ss:$28 sps:$4 sm:$0xff]  }
 0x304   :  { %9944 = vmatpush1.bf16.msra.mxu0 %v17510_v9  ;;  %9689 = vmatprep.subr.bf16.mxu1 %v17515_v10  ;;  %v764_v9 = vrot.slane %v21143_v5, %v19911_v34  ;;  %v768_v10 = vrot.slane %v21143_v5, %v19914_v35 }
 0x305   :  { %9945 = vmatprep.subr.bf16.mxu0 %v17518_v15  ;;  %v17576_v15 = vld [vmem:[%s24148_s2 + $0x708] ss:$28 sps:$4 sm:$0xff]  }
 0x307   :  { %9690 = vmatpush1.bf16.msra.mxu1 %v17513_v14  ;;  %v21162_v14 = vsub.s32 4, %v18734_v42 }
 0x308   :  { %9946 = vmatpush1.bf16.msra.mxu0 %v17516_v17  ;;  %9691 = vmatprep.subr.bf16.mxu1 %v17521_v38  ;;  %v17581_v17 = vld [vmem:[%s24148_s2 + $0x9a4] ss:$28 sps:$4 sm:$0xff]  }
 0x309   :  { %9947 = vmatprep.subr.bf16.mxu0 %v17524_v26 }
 0x30b   :  { %9692 = vmatpush1.bf16.msra.mxu1 %v17519_v20  ;;  %v17584_v20 = vld [vmem:[%s24148_s2 + $0x744] ss:$28 sps:$4 sm:$0xff]  }
 0x30c   :  { %9948 = vmatpush1.bf16.msra.mxu0 %v17522_v21  ;;  %9693 = vmatprep.subr.bf16.mxu1 %v17527_v23  ;;  %v17579_v23 = vld [vmem:[%s24148_s2 + $0x9a0] ss:$28 sps:$4 sm:$0xff]  }
 0x30d   :  { %9949 = vmatprep.subr.bf16.mxu0 %v17530_v18 }
 0x30f   :  { %9694 = vmatpush1.bf16.msra.mxu1 %v17525_v27 }
 0x310   :  { %9950 = vmatpush1.bf16.msra.mxu0 %v17528_v28  ;;  %9695 = vmatprep.subr.bf16.mxu1 %v17533_v43  ;;  %v17582_v43 = vld [vmem:[%s24148_s2 + $0x740] ss:$28 sps:$4 sm:$0xff]  }
 0x311   :  { %9951 = vmatprep.subr.bf16.mxu0 %v17536_v30  ;;  %v751_v30 = vsub.s32 7, %v18734_v42 }
 0x313   :  { %9696 = vmatpush1.bf16.msra.mxu1 %v17531_v29  ;;  %v17587_v29 = vld [vmem:[%s24148_s2 + $0x9dc] ss:$28 sps:$4 sm:$0xff]  }
 0x314   :  { %9952 = vmatpush1.bf16.msra.mxu0 %v17534_v31  ;;  %9697 = vmatprep.subr.bf16.mxu1 %v17539_v32  ;;  %v17585_v31 = vld [vmem:[%s24148_s2 + $0x9d8] ss:$28 sps:$4 sm:$0xff]  }
 0x315   :  { %9953 = vmatprep.subr.bf16.mxu0 %v17542_v40  ;;  %v17590_v32 = vld [vmem:[%s24148_s2 + $0x77c] ss:$28 sps:$4 sm:$0xff]  }
 0x316   :  { %v17588_v40 = vld [vmem:[%s24148_s2 + $0x778] ss:$28 sps:$4 sm:$0xff]  }
 0x317   :  { %9698 = vmatpush1.bf16.msra.mxu1 %v17537_v37  ;;  %v740_v37 = vrot.slane %v19908_v33, %v21162_v14 }
 0x318   :  { %9954 = vmatpush1.bf16.msra.mxu0 %v17540_v41  ;;  %9699 = vmatprep.subr.bf16.mxu1 %v17545_v44  ;;  %v17593_v41 = vld [vmem:[%s24148_s2 + $0xa14] ss:$28 sps:$4 sm:$0xff]   ;;  %v752_v44 = vrot.slane %v19908_v33, %v751_v30  ;;  %v17632_v30 = vld [vmem:[%s24148_s2 + $0x904] ss:$28 sps:$4 sm:$0xff]  }
 0x319   :  { %9955 = vmatprep.subr.bf16.mxu0 %v17548_v45  ;;  %v17596_v45 = vld [vmem:[%s24148_s2 + $0x7b4] ss:$28 sps:$4 sm:$0xff]  }
 0x31b   :  { %9700 = vmatpush1.bf16.msra.mxu1 %v17543_v36  ;;  %v17591_v36 = vld [vmem:[%s24148_s2 + $0xa10] ss:$28 sps:$4 sm:$0xff]  }
 0x31c   :  { %9956 = vmatpush1.bf16.msra.mxu0 %v17546_v47  ;;  %9701 = vmatprep.subr.bf16.mxu1 %v17551_v48  ;;  %v16242_v47 = vadd.f32 %v20567_v6, %v740_v37  ;;  %v17594_v48 = vld [vmem:[%s24148_s2 + $0x7b0] ss:$28 sps:$4 sm:$0xff]  }
 0x31d   :  { %9957 = vmatprep.subr.bf16.mxu0 %v17554_v50  ;;  %v16245_v50 = vadd.f32 %v20514_v22, %v752_v44  ;;  %v17602_v6 = vld [vmem:[%s24148_s2 + $0x7ec] ss:$28 sps:$4 sm:$0xff]   ;;  %v17605_v22 = vld [vmem:[%s24148_s2 + $0xa84] ss:$28 sps:$4 sm:$0xff]   ;;  %v17635_v44 = vld [vmem:[%s24148_s2 + $0xb9c] ss:$28 sps:$4 sm:$0xff]  }
 0x31f   :  { %9702 = vmatpush1.bf16.msra.mxu1 %v17549_v49  ;;  %v17599_v49 = vld [vmem:[%s24148_s2 + $0xa4c] ss:$28 sps:$4 sm:$0xff]  }
 0x320   :  { %9958 = vmatpush1.bf16.msra.mxu0 %v17552_v16  ;;  %9703 = vmatprep.subr.bf16.mxu1 %v17557_v53  ;;  %v17597_v16 = vld [vmem:[%s24148_s2 + $0xa48] ss:$28 sps:$4 sm:$0xff]   ;;  %v5227_v53 = vmax.f32 %v16242_v47, 0.0  ;;  %v17636_v47 = vld [vmem:[%s24148_s2 + $0x938] ss:$28 sps:$4 sm:$0xff]  }
 0x321   :  { %9959 = vmatprep.subr.bf16.mxu0 %v17560_v54  ;;  %v17608_v54 = vld [vmem:[%s24148_s2 + $0x824] ss:$28 sps:$4 sm:$0xff]  }
 0x322   :  { %v21244_v0 = vpack.c.bf16 %v5227_v53, %v5227_v53 }
 0x323   :  { %9704 = vmatpush1.bf16.msra.mxu1 %v17555_v19  ;;  %v17600_v19 = vld [vmem:[%s24148_s2 + $0x7e8] ss:$28 sps:$4 sm:$0xff]  }
 0x324   :  { %9960 = vmatpush1.bf16.msra.mxu0 %v17558_v55  ;;  %9705 = vmatprep.subr.bf16.mxu1 %v17563_v56  ;;  %v5230_v55 = vmax.f32 %v16245_v50, 0.0  ;;  %v17603_v56 = vld [vmem:[%s24148_s2 + $0xa80] ss:$28 sps:$4 sm:$0xff]   ;;  %v17639_v50 = vld [vmem:[%s24148_s2 + $0xbd0] ss:$28 sps:$4 sm:$0xff]  }
 0x325   :  { %9961 = vmatprep.subr.bf16.mxu0 %v17566_v58  ;;  %v756_v58 = vrot.slane %v21143_v5, %v20759_v25 }
 0x327   :  { %9706 = vmatpush1.bf16.msra.mxu1 %v17561_v59  ;;  %v17606_v59 = vld [vmem:[%s24148_s2 + $0x820] ss:$28 sps:$4 sm:$0xff]  }
 0x328   :  { %9962 = vmatpush1.bf16.msra.mxu0 %v17564_v1  ;;  %9707 = vmatprep.subr.bf16.mxu1 %v17569_v2  ;;  %v21246_v1 = vpack.c.bf16 %v5230_v55, %v5230_v55  ;;  %v17645_v55 = vld [vmem:[%s24148_s2 + $0xc08] ss:$28 sps:$4 sm:$0xff]  }
 0x329   :  { %9963 = vmatprep.subr.bf16.mxu0 %v17572_v4 }
 0x32b   :  { %9708 = vmatpush1.bf16.msra.mxu1 %v17567_v3  ;;  %v17614_v3 = vld [vmem:[%s24148_s2 + $0x85c] ss:$28 sps:$4 sm:$0xff]  }
 0x32c   :  { %9964 = vmatpush1.bf16.msra.mxu0 %v17570_v8  ;;  %9709 = vmatprep.subr.bf16.mxu1 %v17575_v7  ;;  %v17609_v7 = vld [vmem:[%s24148_s2 + $0xab8] ss:$28 sps:$4 sm:$0xff]  }
 0x32d   :  { %9974 = vmatprep.subr.bf16.mxu0 %v17578_v57  ;;  %v5056_v38 = vpop.f32.mrb[8].mxu1 }
 0x32e   :  { %v21173_v26 = vadd.f32 %v5056_v38, %v764_v9  ;;  %v5058_v21 = vpop.f32.mrb[9].mxu1  ;;  %v17612_v9 = vld [vmem:[%s24148_s2 + $0x858] ss:$28 sps:$4 sm:$0xff]   ;;  %v17618_v38 = vld [vmem:[%s24148_s2 + $0x890] ss:$28 sps:$4 sm:$0xff]  }
 0x32f   :  { %9966 = vmatmul.mubr.bf16.vlgmr.msra.gmra.mrb[24].mxu0 %v21017_v12  ;;  %9710 = vmatpush1.bf16.msra.mxu1 %v17573_v60  ;;  %v21179_v18 = vadd.f32 %v5058_v21, %v768_v10  ;;  %v5060_v27 = vpop.f32.mrb[10].mxu1  ;;  %v17617_v10 = vld [vmem:[%s24148_s2 + $0xaf4] ss:$28 sps:$4 sm:$0xff]   ;;  %v17621_v21 = vld [vmem:[%s24148_s2 + $0xb28] ss:$28 sps:$4 sm:$0xff]  }
 0x330   :  { %9975 = vmatpush1.bf16.msra.mxu0 %v17576_v15  ;;  %10006 = vmatprep.mubr.bf16.mxu0 %v21019_v13  ;;  %v5061_v28 = vpop.f32.mrb[11].mxu1  ;;  %v17615_v15 = vld [vmem:[%s24148_s2 + $0xaf0] ss:$28 sps:$4 sm:$0xff]   ;;  %v17624_v27 = vld [vmem:[%s24148_s2 + $0x8c8] ss:$28 sps:$4 sm:$0xff]  }
 0x331   :  { %9711 = vmatprep.subr.bf16.mxu1 %v17581_v17  ;;  %9976 = vmatprep.subr.bf16.mxu0 %v17584_v20  ;;  %v17620_v17 = vld [vmem:[%s24148_s2 + $0x894] ss:$28 sps:$4 sm:$0xff]   ;;  %v17623_v20 = vld [vmem:[%s24148_s2 + $0xb2c] ss:$28 sps:$4 sm:$0xff]   ;;  %v17629_v28 = vld [vmem:[%s24148_s2 + $0xb64] ss:$28 sps:$4 sm:$0xff]  }
 0x333   :  { %9712 = vmatpush1.bf16.msra.mxu1 %v17579_v23  ;;  %v17626_v23 = vld [vmem:[%s24148_s2 + $0x8cc] ss:$28 sps:$4 sm:$0xff]  }
 0x334   :  { %9977 = vmatpush1.bf16.msra.mxu0 %v17582_v43  ;;  %9713 = vmatprep.subr.bf16.mxu1 %v17587_v29  ;;  %v17627_v29 = vld [vmem:[%s24148_s2 + $0xb60] ss:$28 sps:$4 sm:$0xff]  }
 0x335   :  { %9978 = vmatprep.subr.bf16.mxu0 %v17590_v32 }
 0x337   :  { %9714 = vmatpush1.bf16.msra.mxu1 %v17585_v31 }
 0x338   :  { %9979 = vmatpush1.bf16.msra.mxu0 %v17588_v40  ;;  %9715 = vmatprep.subr.bf16.mxu1 %v17593_v41  ;;  %v17630_v41 = vld [vmem:[%s24148_s2 + $0x900] ss:$28 sps:$4 sm:$0xff]  }
 0x339   :  { %9980 = vmatprep.subr.bf16.mxu0 %v17596_v45  ;;  %v17638_v45 = vld [vmem:[%s24148_s2 + $0x93c] ss:$28 sps:$4 sm:$0xff]  }
 0x33b   :  { %9716 = vmatpush1.bf16.msra.mxu1 %v17591_v36  ;;  %v17633_v36 = vld [vmem:[%s24148_s2 + $0xb98] ss:$28 sps:$4 sm:$0xff]  }
 0x33c   :  { %9981 = vmatpush1.bf16.msra.mxu0 %v17594_v48  ;;  %9717 = vmatprep.subr.bf16.mxu1 %v17599_v49  ;;  %v17641_v48 = vld [vmem:[%s24148_s2 + $0xbd4] ss:$28 sps:$4 sm:$0xff]  }
 0x33d   :  { %9982 = vmatprep.subr.bf16.mxu0 %v17602_v6 }
 0x33f   :  { %9718 = vmatpush1.bf16.msra.mxu1 %v17597_v16  ;;  %v17644_v16 = vld [vmem:[%s24148_s2 + $0x974] ss:$28 sps:$4 sm:$0xff]  }
 0x340   :  { %9983 = vmatpush1.bf16.msra.mxu0 %v17600_v19  ;;  %9728 = vmatprep.subr.bf16.mxu1 %v17605_v22  ;;  %v17642_v22 = vld [vmem:[%s24148_s2 + $0x970] ss:$28 sps:$4 sm:$0xff]  }
 0x341   :  { %v4892_v2 = vpop.f32.mrb[12].mxu0  ;;  %9984 = vmatprep.subr.bf16.mxu0 %v17608_v54  ;;  %v17647_v54 = vld [vmem:[%s24148_s2 + $0xc0c] ss:$28 sps:$4 sm:$0xff]  }
 0x342   :  { %v21251_v4 = vadd.f32 %v4892_v2, %v756_v58  ;;  %9720 = vmatmul.mubr.bf16.vlgmr.msra.gmra.mrb[20].mxu1 %v21244_v0  ;;  %v21254_v8 = vpop.f32.mrb[13].mxu0  ;;  %v17648_v58 = vld [vmem:[%s24148_s2 + $0x9a8] ss:$28 sps:$4 sm:$0xff]   ;;  %v17651_v2 = vld [vmem:[%s24148_s2 + $0xc40] ss:$28 sps:$4 sm:$0xff]  }
 0x343   :  { %9729 = vmatpush1.bf16.msra.mxu1 %v17603_v56  ;;  %9760 = vmatprep.mubr.bf16.mxu1 %v21246_v1  ;;  %v4896_v60 = vpop.f32.mrb[14].mxu0  ;;  %v17650_v56 = vld [vmem:[%s24148_s2 + $0x9ac] ss:$28 sps:$4 sm:$0xff]  }
 0x344   :  { %9985 = vmatpush1.bf16.msra.mxu0 %v17606_v59  ;;  %v4897_v57 = vpop.f32.mrb[15].mxu0  ;;  %9730 = vmatprep.subr.bf16.mxu1 %v17611_v62  ;;  %v17653_v59 = vld [vmem:[%s24148_s2 + $0xc44] ss:$28 sps:$4 sm:$0xff]  }
 0x345   :  { %9986 = vmatprep.subr.bf16.mxu0 %v17614_v3  ;;  %v17656_v62 = vld [vmem:[%s24148_s2 + $0x9e4] ss:$28 sps:$4 sm:$0xff]   ;;  %v772_v57 = vrot.slane %v21143_v5, %v21162_v14 }
 0x346   :  { %v17654_v3 = vld [vmem:[%s24148_s2 + $0x9e0] ss:$28 sps:$4 sm:$0xff]  }
 0x347   :  { %9731 = vmatpush1.bf16.msra.mxu1 %v17609_v7  ;;  %v17659_v7 = vld [vmem:[%s24148_s2 + $0xc7c] ss:$28 sps:$4 sm:$0xff]  }
 0x348   :  { %9987 = vmatpush1.bf16.msra.mxu0 %v17612_v9  ;;  %9732 = vmatprep.subr.bf16.mxu1 %v17617_v10  ;;  %v17657_v9 = vld [vmem:[%s24148_s2 + $0xc78] ss:$28 sps:$4 sm:$0xff]  }
 0x349   :  { %9988 = vmatprep.subr.bf16.mxu0 %v17620_v17  ;;  %v17662_v10 = vld [vmem:[%s24148_s2 + $0xa1c] ss:$28 sps:$4 sm:$0xff]  }
 0x34b   :  { %9733 = vmatpush1.bf16.msra.mxu1 %v17615_v15 }
 0x34c   :  { %9989 = vmatpush1.bf16.msra.mxu0 %v17618_v38  ;;  %9734 = vmatprep.subr.bf16.mxu1 %v17623_v20  ;;  %v17660_v20 = vld [vmem:[%s24148_s2 + $0xa18] ss:$28 sps:$4 sm:$0xff]  }
 0x34d   :  { %v15443_v43 = vpop.f32.mrb[12].mxu1  ;;  %9990 = vmatprep.subr.bf16.mxu0 %v17626_v23 }
 0x34e   :  { %v15444_v31 = vpop.f32.mrb[13].mxu1 }
 0x34f   :  { %v21296_v32 = vadd.f32 %v15444_v31, %v15443_v43  ;;  %9735 = vmatpush1.bf16.msra.mxu1 %v17621_v21  ;;  %v15446_v37 = vpop.f32.mrb[14].mxu1  ;;  %v17665_v21 = vld [vmem:[%s24148_s2 + $0xcb4] ss:$28 sps:$4 sm:$0xff]   ;;  %v17671_v31 = vld [vmem:[%s24148_s2 + $0xcec] ss:$28 sps:$4 sm:$0xff]  }
 0x350   :  { %9991 = vmatpush1.bf16.msra.mxu0 %v17624_v27  ;;  %v15447_v40 = vpop.f32.mrb[15].mxu1  ;;  %9736 = vmatprep.subr.bf16.mxu1 %v17629_v28  ;;  %v17663_v28 = vld [vmem:[%s24148_s2 + $0xcb0] ss:$28 sps:$4 sm:$0xff]   ;;  %v17669_v37 = vld [vmem:[%s24148_s2 + $0xce8] ss:$28 sps:$4 sm:$0xff]  }
 0x351   :  { %9992 = vmatprep.subr.bf16.mxu0 %v17632_v30  ;;  %v17668_v43 = vld [vmem:[%s24148_s2 + $0xa54] ss:$28 sps:$4 sm:$0xff]   ;;  %v747_v40 = vsub.s32 6, %v18734_v42 }
 0x352   :  { %v17666_v30 = vld [vmem:[%s24148_s2 + $0xa50] ss:$28 sps:$4 sm:$0xff]  }
 0x353   :  { %9737 = vmatpush1.bf16.msra.mxu1 %v17627_v29 }
 0x354   :  { %9993 = vmatpush1.bf16.msra.mxu0 %v17630_v41  ;;  %9738 = vmatprep.subr.bf16.mxu1 %v17635_v44  ;;  %v17672_v41 = vld [vmem:[%s24148_s2 + $0xa88] ss:$28 sps:$4 sm:$0xff]  }
 0x355   :  { %v21316_v49 = vpop.f32.mrb[16].mxu1  ;;  %9994 = vmatprep.subr.bf16.mxu0 %v17638_v45  ;;  %v17677_v44 = vld [vmem:[%s24148_s2 + $0xd24] ss:$28 sps:$4 sm:$0xff]  }
 0x356   :  { %v15936_v6 = vpop.f32.mrb[17].mxu1  ;;  %v17675_v45 = vld [vmem:[%s24148_s2 + $0xd20] ss:$28 sps:$4 sm:$0xff]  }
 0x357   :  { %9739 = vmatpush1.bf16.msra.mxu1 %v17633_v36  ;;  %v5220_v53 = vpop.f32.mrb[18].mxu1  ;;  %v17680_v36 = vld [vmem:[%s24148_s2 + $0xac4] ss:$28 sps:$4 sm:$0xff]  }
 0x358   :  { %9995 = vmatpush1.bf16.msra.mxu0 %v17636_v47  ;;  %v15937_v19 = vpop.f32.mrb[19].mxu1  ;;  %9740 = vmatprep.subr.bf16.mxu1 %v17641_v48  ;;  %v748_v47 = vrot.slane %v19908_v33, %v747_v40  ;;  %v17678_v48 = vld [vmem:[%s24148_s2 + $0xac0] ss:$28 sps:$4 sm:$0xff]   ;;  %v17684_v53 = vld [vmem:[%s24148_s2 + $0xaf8] ss:$28 sps:$4 sm:$0xff]  }
 0x359   :  { %9996 = vmatprep.subr.bf16.mxu0 %v17644_v16  ;;  %v17681_v16 = vld [vmem:[%s24148_s2 + $0xd58] ss:$28 sps:$4 sm:$0xff]  }
 0x35a   :  { %v17686_v33 = vld [vmem:[%s24148_s2 + $0xafc] ss:$28 sps:$4 sm:$0xff]   ;;  %v16244_v6 = vadd.f32 %v20505_v46, %v748_v47  ;;  %v17689_v19 = vld [vmem:[%s24148_s2 + $0xd94] ss:$28 sps:$4 sm:$0xff]   ;;  %v17725_v47 = vld [vmem:[%s24148_s2 + $0xee4] ss:$28 sps:$4 sm:$0xff]  }
 0x35b   :  { %9741 = vmatpush1.bf16.msra.mxu1 %v17639_v50  ;;  %v17683_v50 = vld [vmem:[%s24148_s2 + $0xd5c] ss:$28 sps:$4 sm:$0xff]   ;;  %v17692_v46 = vld [vmem:[%s24148_s2 + $0xb34] ss:$28 sps:$4 sm:$0xff]  }
 0x35c   :  { %9997 = vmatpush1.bf16.msra.mxu0 %v17642_v22  ;;  %9742 = vmatprep.subr.bf16.mxu1 %v17647_v54  ;;  %v760_v22 = vrot.slane %v21143_v5, %v20547_v63  ;;  %v17687_v54 = vld [vmem:[%s24148_s2 + $0xd90] ss:$28 sps:$4 sm:$0xff]  }
 0x35d   :  { %9998 = vmatprep.subr.bf16.mxu0 %v17650_v56  ;;  %v17690_v56 = vld [vmem:[%s24148_s2 + $0xb30] ss:$28 sps:$4 sm:$0xff]  }
 0x35e   :  { %v17695_v5 = vld [vmem:[%s24148_s2 + $0xdcc] ss:$28 sps:$4 sm:$0xff]  }
 0x35f   :  { %9743 = vmatpush1.bf16.msra.mxu1 %v17645_v55  ;;  %v5229_v55 = vmax.f32 %v16244_v6, 0.0  ;;  %v17729_v6 = vld [vmem:[%s24148_s2 + $0xf18] ss:$28 sps:$4 sm:$0xff]  }
 0x360   :  { %9999 = vmatpush1.bf16.msra.mxu0 %v17648_v58  ;;  %9744 = vmatprep.subr.bf16.mxu1 %v17653_v59  ;;  %v16247_v58 = vadd.f32 %v21254_v8, %v760_v22  ;;  %v17693_v59 = vld [vmem:[%s24148_s2 + $0xdc8] ss:$28 sps:$4 sm:$0xff]   ;;  %v17737_v22 = vld [vmem:[%s24148_s2 + $0xf54] ss:$28 sps:$4 sm:$0xff]  }
 0x361   :  { %v15421_v60 = vpop.f32.mrb[16].mxu0  ;;  %10000 = vmatprep.subr.bf16.mxu0 %v17656_v62  ;;  %v17698_v62 = vld [vmem:[%s24148_s2 + $0xb6c] ss:$28 sps:$4 sm:$0xff]   ;;  %v17701_v8 = vld [vmem:[%s24148_s2 + $0xe04] ss:$28 sps:$4 sm:$0xff]  }
 0x362   :  { %v15422_v15 = vpop.f32.mrb[17].mxu0 }
 0x363   :  { %v15423_v17 = vadd.f32 %v15422_v15, %v15421_v60  ;;  %9745 = vmatpush1.bf16.msra.mxu1 %v17651_v2  ;;  %v15424_v38 = vpop.f32.mrb[18].mxu0  ;;  %v17696_v2 = vld [vmem:[%s24148_s2 + $0xb68] ss:$28 sps:$4 sm:$0xff]   ;;  %v17699_v60 = vld [vmem:[%s24148_s2 + $0xe00] ss:$28 sps:$4 sm:$0xff]  }
 0x364   :  { %10001 = vmatpush1.bf16.msra.mxu0 %v17654_v3  ;;  %9746 = vmatprep.subr.bf16.mxu1 %v17659_v7  ;;  %v15425_v23 = vpop.f32.mrb[19].mxu0  ;;  %v17704_v3 = vld [vmem:[%s24148_s2 + $0xba4] ss:$28 sps:$4 sm:$0xff]   ;;  %v5232_v7 = vmax.f32 %v16247_v58, 0.0  ;;  %v17710_v38 = vld [vmem:[%s24148_s2 + $0xbdc] ss:$28 sps:$4 sm:$0xff]  }
 0x365   :  { %v5098_v27 = vadd.f32 %v15423_v17, %v772_v57  ;;  %10002 = vmatprep.subr.bf16.mxu0 %v17662_v10  ;;  %v17702_v57 = vld [vmem:[%s24148_s2 + $0xba0] ss:$28 sps:$4 sm:$0xff]   ;;  %v21465_v10 = vpack.c.bf16 %v5229_v55, %v5229_v55 }
 0x366   :  { %v21467_v15 = vpack.c.bf16 %v5232_v7, %v5232_v7 }
 0x367   :  { %9747 = vmatpush1.bf16.msra.mxu1 %v17657_v9  ;;  %v21375_v29 = vadd.f32 %v21296_v32, %v5098_v27  ;;  %v17674_v32 = vld [vmem:[%s24148_s2 + $0xa8c] ss:$28 sps:$4 sm:$0xff]   ;;  %v17707_v9 = vld [vmem:[%s24148_s2 + $0xe3c] ss:$28 sps:$4 sm:$0xff]  }
 0x368   :  { %10003 = vmatpush1.bf16.msra.mxu0 %v17660_v20  ;;  %9748 = vmatprep.subr.bf16.mxu1 %v17665_v21  ;;  %v17705_v21 = vld [vmem:[%s24148_s2 + $0xe38] ss:$28 sps:$4 sm:$0xff]  }
 0x369   :  { %10004 = vmatprep.subr.bf16.mxu0 %v17668_v43  ;;  %v17708_v27 = vld [vmem:[%s24148_s2 + $0xbd8] ss:$28 sps:$4 sm:$0xff]  }
 0x36a   :  { %v17713_v43 = vld [vmem:[%s24148_s2 + $0xe74] ss:$28 sps:$4 sm:$0xff]  }
 0x36b   :  { %9749 = vmatpush1.bf16.msra.mxu1 %v17663_v28 }
 0x36c   :  { %10005 = vmatpush1.bf16.msra.mxu0 %v17666_v30  ;;  %9750 = vmatprep.subr.bf16.mxu1 %v17671_v31  ;;  %v17716_v30 = vld [vmem:[%s24148_s2 + $0xc14] ss:$28 sps:$4 sm:$0xff]  }
 0x36d   :  { %10015 = vmatprep.subr.bf16.mxu0 %v17674_v32  ;;  %v17711_v32 = vld [vmem:[%s24148_s2 + $0xe70] ss:$28 sps:$4 sm:$0xff]  }
 0x36f   :  { %10007 = vmatmul.mubr.bf16.vlgmr.msra.gmra.mrb[24].mxu0 %v21244_v0  ;;  %9751 = vmatpush1.bf16.msra.mxu1 %v17669_v37 }
 0x370   :  { %10016 = vmatpush1.bf16.msra.mxu0 %v17672_v41  ;;  %10047 = vmatprep.mubr.bf16.mxu0 %v21246_v1 }
 0x371   :  { %9752 = vmatprep.subr.bf16.mxu1 %v17677_v44  ;;  %10017 = vmatprep.subr.bf16.mxu0 %v17680_v36  ;;  %v17714_v44 = vld [vmem:[%s24148_s2 + $0xc10] ss:$28 sps:$4 sm:$0xff]  }
 0x372   :  { %v17719_v36 = vld [vmem:[%s24148_s2 + $0xeac] ss:$28 sps:$4 sm:$0xff]  }
 0x373   :  { %9753 = vmatpush1.bf16.msra.mxu1 %v17675_v45  ;;  %v17720_v45 = vld [vmem:[%s24148_s2 + $0xc48] ss:$28 sps:$4 sm:$0xff]  }
 0x374   :  { %10018 = vmatpush1.bf16.msra.mxu0 %v17678_v48  ;;  %9754 = vmatprep.subr.bf16.mxu1 %v17683_v50  ;;  %v17728_v48 = vld [vmem:[%s24148_s2 + $0xc84] ss:$28 sps:$4 sm:$0xff]  }
 0x375   :  { %10019 = vmatprep.subr.bf16.mxu0 %v17686_v33  ;;  %v17723_v50 = vld [vmem:[%s24148_s2 + $0xee0] ss:$28 sps:$4 sm:$0xff]  }
 0x376   :  { %v17731_v33 = vld [vmem:[%s24148_s2 + $0xf1c] ss:$28 sps:$4 sm:$0xff]  }
 0x377   :  { %9755 = vmatpush1.bf16.msra.mxu1 %v17681_v16  ;;  %v17726_v16 = vld [vmem:[%s24148_s2 + $0xc80] ss:$28 sps:$4 sm:$0xff]  }
 0x378   :  { %10020 = vmatpush1.bf16.msra.mxu0 %v17684_v53  ;;  %9756 = vmatprep.subr.bf16.mxu1 %v17689_v19  ;;  %v17734_v53 = vld [vmem:[%s24148_s2 + $0xcbc] ss:$28 sps:$4 sm:$0xff]  }
 0x379   :  { %10021 = vmatprep.subr.bf16.mxu0 %v17692_v46  ;;  %v17732_v19 = vld [vmem:[%s24148_s2 + $0xcb8] ss:$28 sps:$4 sm:$0xff]  }
 0x37b   :  { %9757 = vmatpush1.bf16.msra.mxu1 %v17687_v54  ;;  %v17740_v54 = vld [vmem:[%s24148_s2 + $0xcf4] ss:$28 sps:$4 sm:$0xff]  }
 0x37c   :  { %10022 = vmatpush1.bf16.msra.mxu0 %v17690_v56  ;;  %9758 = vmatprep.subr.bf16.mxu1 %v17695_v5 }
 0x37d   :  { %10023 = vmatprep.subr.bf16.mxu0 %v17698_v62 }
 0x37f   :  { %9759 = vmatpush1.bf16.msra.mxu1 %v17693_v59 }
 0x380   :  { %10024 = vmatpush1.bf16.msra.mxu0 %v17696_v2  ;;  %9769 = vmatprep.subr.bf16.mxu1 %v17701_v8 }
 0x381   :  { %v15465_v17 = vpop.f32.mrb[20].mxu0  ;;  %10025 = vmatprep.subr.bf16.mxu0 %v17704_v3 }
 0x382   :  { %v15466_v20 = vpop.f32.mrb[21].mxu0  ;;  %9761 = vmatmul.mubr.bf16.vlgmr.msra.gmra.mrb[20].mxu1 %v21465_v10 }
 0x383   :  { %v15467_v23 = vadd.f32 %v15466_v20, %v15465_v17  ;;  %9770 = vmatpush1.bf16.msra.mxu1 %v17699_v60  ;;  %9801 = vmatprep.mubr.bf16.mxu1 %v21467_v15  ;;  %v15468_v28 = vpop.f32.mrb[22].mxu0 }
 0x384   :  { %10026 = vmatpush1.bf16.msra.mxu0 %v17702_v57  ;;  %9771 = vmatprep.subr.bf16.mxu1 %v17707_v9  ;;  %v15469_v31 = vpop.f32.mrb[23].mxu0 }
 0x385   :  { %v5178_v37 = vadd.f32 %v15467_v23, %v21375_v29  ;;  %10027 = vmatprep.subr.bf16.mxu0 %v17710_v38  ;;  %v17717_v29 = vld [vmem:[%s24148_s2 + $0xea8] ss:$28 sps:$4 sm:$0xff]  }
 0x387   :  { %v21491_v41 = vadd.f32 %v21316_v49, %v5178_v37  ;;  %9772 = vmatpush1.bf16.msra.mxu1 %v17705_v21  ;;  %v17722_v49 = vld [vmem:[%s24148_s2 + $0xc4c] ss:$28 sps:$4 sm:$0xff]  }
 0x388   :  { %10028 = vmatpush1.bf16.msra.mxu0 %v17708_v27  ;;  %9773 = vmatprep.subr.bf16.mxu1 %v17713_v43 }
 0x389   :  { %10029 = vmatprep.subr.bf16.mxu0 %v17716_v30 }
 0x38b   :  { %9774 = vmatpush1.bf16.msra.mxu1 %v17711_v32 }
 0x38c   :  { %10030 = vmatpush1.bf16.msra.mxu0 %v17714_v44  ;;  %9775 = vmatprep.subr.bf16.mxu1 %v17719_v36 }
 0x38d   :  { %10031 = vmatprep.subr.bf16.mxu0 %v17722_v49 }
 0x38f   :  { %9776 = vmatpush1.bf16.msra.mxu1 %v17717_v29 }
 0x390   :  { %10032 = vmatpush1.bf16.msra.mxu0 %v17720_v45  ;;  %9777 = vmatprep.subr.bf16.mxu1 %v17725_v47 }
 0x391   :  { %10033 = vmatprep.subr.bf16.mxu0 %v17728_v48 }
 0x393   :  { %9778 = vmatpush1.bf16.msra.mxu1 %v17723_v50 }
 0x394   :  { %10034 = vmatpush1.bf16.msra.mxu0 %v17726_v16  ;;  %9779 = vmatprep.subr.bf16.mxu1 %v17731_v33 }
 0x395   :  { %10035 = vmatprep.subr.bf16.mxu0 %v17734_v53 }
 0x396   :  { %11 = vsyncpa [#allocation3], 0  ;;  %v17735_v46 = vld [vmem:[%s24148_s2 + $0xf50] ss:$28 sps:$4 sm:$0xff]   ;;  %v17741_v58 = vld [vmem:[%s24148_s2 + $0xf88] ss:$28 sps:$4 sm:$0xff]  }
 0x397   :  { %9780 = vmatpush1.bf16.msra.mxu1 %v17729_v6  ;;  %v17738_v55 = vld [vmem:[%s24148_s2 + $0xcf0] ss:$28 sps:$4 sm:$0xff]   ;;  %v17744_v59 = vld [vmem:[%s24148_s2 + $0xd28] ss:$28 sps:$4 sm:$0xff]   ;;  %v17747_v8 = vld [vmem:[%s24148_s2 + $0xfc0] ss:$28 sps:$4 sm:$0xff]  }
 0x398   :  { %10036 = vmatpush1.bf16.msra.mxu0 %v17732_v19  ;;  %9781 = vmatprep.subr.bf16.mxu1 %v17737_v22  ;;  %v17743_v56 = vld [vmem:[%s24148_s2 + $0xf8c] ss:$28 sps:$4 sm:$0xff]   ;;  %v17749_v62 = vld [vmem:[%s24148_s2 + $0xfc4] ss:$28 sps:$4 sm:$0xff]   ;;  %v17755_v7 = vld [vmem:[%s24148_s2 + $0xffc] ss:$28 sps:$4 sm:$0xff]  }
 0x399   :  { %10037 = vmatprep.subr.bf16.mxu0 %v17740_v54  ;;  %v17746_v5 = vld [vmem:[%s24148_s2 + $0xd2c] ss:$28 sps:$4 sm:$0xff]   ;;  %v17752_v2 = vld [vmem:[%s24148_s2 + $0xd64] ss:$28 sps:$4 sm:$0xff]   ;;  %v17758_v60 = vld [vmem:[%s24148_s2 + $0xd9c] ss:$28 sps:$4 sm:$0xff]  }
 0x39a   :  { %v17750_v3 = vld [vmem:[%s24148_s2 + $0xd60] ss:$28 sps:$4 sm:$0xff]   ;;  %v17753_v57 = vld [vmem:[%s24148_s2 + $0xff8] ss:$28 sps:$4 sm:$0xff]   ;;  %v17759_v20 = vld [vmem:[%s24148_s2 + $0x1030] ss:$28 sps:$4 sm:$0xff]  }
 0x39b   :  { %9782 = vmatpush1.bf16.msra.mxu1 %v17735_v46  ;;  %v17756_v9 = vld [vmem:[%s24148_s2 + $0xd98] ss:$28 sps:$4 sm:$0xff]   ;;  %v17762_v21 = vld [vmem:[%s24148_s2 + $0xdd0] ss:$28 sps:$4 sm:$0xff]   ;;  %v17765_v28 = vld [vmem:[%s24148_s2 + $0x1068] ss:$28 sps:$4 sm:$0xff]  }
 0x39c   :  { %10038 = vmatpush1.bf16.msra.mxu0 %v17738_v55  ;;  %9783 = vmatprep.subr.bf16.mxu1 %v17743_v56  ;;  %v17761_v17 = vld [vmem:[%s24148_s2 + $0x1034] ss:$28 sps:$4 sm:$0xff]   ;;  %v17767_v23 = vld [vmem:[%s24148_s2 + $0x106c] ss:$28 sps:$4 sm:$0xff]   ;;  %v17773_v30 = vld [vmem:[%s24148_s2 + $0x10a4] ss:$28 sps:$4 sm:$0xff]  }
 0x39d   :  { %10039 = vmatprep.subr.bf16.mxu0 %v17746_v5  ;;  %v17764_v38 = vld [vmem:[%s24148_s2 + $0xdd4] ss:$28 sps:$4 sm:$0xff]   ;;  %v17770_v27 = vld [vmem:[%s24148_s2 + $0xe0c] ss:$28 sps:$4 sm:$0xff]   ;;  %v17776_v31 = vld [vmem:[%s24148_s2 + $0xe44] ss:$28 sps:$4 sm:$0xff]  }
 0x39e   :  { %v17768_v43 = vld [vmem:[%s24148_s2 + $0xe08] ss:$28 sps:$4 sm:$0xff]   ;;  %v17771_v37 = vld [vmem:[%s24148_s2 + $0x10a0] ss:$28 sps:$4 sm:$0xff]   ;;  %v17777_v29 = vld [vmem:[%s24148_s2 + $0x10d8] ss:$28 sps:$4 sm:$0xff]  }
 0x39f   :  { %9784 = vmatpush1.bf16.msra.mxu1 %v17741_v58  ;;  %v17774_v32 = vld [vmem:[%s24148_s2 + $0xe40] ss:$28 sps:$4 sm:$0xff]   ;;  %v17780_v49 = vld [vmem:[%s24148_s2 + $0xe78] ss:$28 sps:$4 sm:$0xff]   ;;  %v17783_v48 = vld [vmem:[%s24148_s2 + $0x1110] ss:$28 sps:$4 sm:$0xff]  }
 0x3a0   :  { %10040 = vmatpush1.bf16.msra.mxu0 %v17744_v59  ;;  %9785 = vmatprep.subr.bf16.mxu1 %v17749_v62  ;;  %v17779_v44 = vld [vmem:[%s24148_s2 + $0x10dc] ss:$28 sps:$4 sm:$0xff]   ;;  %v17785_v45 = vld [vmem:[%s24148_s2 + $0x1114] ss:$28 sps:$4 sm:$0xff]   ;;  %v17791_v16 = vld [vmem:[%s24148_s2 + $0x114c] ss:$28 sps:$4 sm:$0xff]  }
 0x3a1   :  { %10041 = vmatprep.subr.bf16.mxu0 %v17752_v2  ;;  %v17782_v36 = vld [vmem:[%s24148_s2 + $0xe7c] ss:$28 sps:$4 sm:$0xff]   ;;  %v17788_v47 = vld [vmem:[%s24148_s2 + $0xeb4] ss:$28 sps:$4 sm:$0xff]   ;;  %v17794_v33 = vld [vmem:[%s24148_s2 + $0xeec] ss:$28 sps:$4 sm:$0xff]  }
 0x3a2   :  { %v17786_v50 = vld [vmem:[%s24148_s2 + $0xeb0] ss:$28 sps:$4 sm:$0xff]   ;;  %v17789_v6 = vld [vmem:[%s24148_s2 + $0x1148] ss:$28 sps:$4 sm:$0xff]   ;;  %v5231_v53 = vmax.f32 %v21251_v4, 0.0  ;;  %v5234_v54 = vmax.f32 %v21179_v18, 0.0 }
 0x3a3   :  { %9786 = vmatpush1.bf16.msra.mxu1 %v17747_v8  ;;  %v17792_v19 = vld [vmem:[%s24148_s2 + $0xee8] ss:$28 sps:$4 sm:$0xff]   ;;  %v17795_v4 = vld [vmem:[%s24148_s2 + $0x1180] ss:$28 sps:$4 sm:$0xff]   ;;  %v17801_v59 = vld [vmem:[%s24148_s2 + $0x11b8] ss:$28 sps:$4 sm:$0xff]  }
 0x3a4   :  { %10042 = vmatpush1.bf16.msra.mxu0 %v17750_v3  ;;  %9787 = vmatprep.subr.bf16.mxu1 %v17755_v7  ;;  %v17797_v22 = vld [vmem:[%s24148_s2 + $0x1184] ss:$28 sps:$4 sm:$0xff]   ;;  %v21665_v55 = vpack.c.bf16 %v5231_v53, %v5231_v53  ;;  %v17803_v18 = vld [vmem:[%s24148_s2 + $0x11bc] ss:$28 sps:$4 sm:$0xff]   ;;  %v21673_v5 = vpack.c.bf16 %v5234_v54, %v5234_v54  ;;  %v17809_v2 = vld [vmem:[%s24148_s2 + $0x11f4] ss:$28 sps:$4 sm:$0xff]  }
 0x3a5   :  { %10043 = vmatprep.subr.bf16.mxu0 %v17758_v60  ;;  %v17800_v46 = vld [vmem:[%s24148_s2 + $0xf24] ss:$28 sps:$4 sm:$0xff]   ;;  %v17806_v58 = vld [vmem:[%s24148_s2 + $0xf5c] ss:$28 sps:$4 sm:$0xff]   ;;  %v17812_v8 = vld [vmem:[%s24148_s2 + $0xf94] ss:$28 sps:$4 sm:$0xff]  }
 0x3a6   :  { %v17798_v56 = vld [vmem:[%s24148_s2 + $0xf20] ss:$28 sps:$4 sm:$0xff]   ;;  %v17804_v62 = vld [vmem:[%s24148_s2 + $0xf58] ss:$28 sps:$4 sm:$0xff]   ;;  %v17807_v3 = vld [vmem:[%s24148_s2 + $0x11f0] ss:$28 sps:$4 sm:$0xff]  }
 0x3a7   :  { %9788 = vmatpush1.bf16.msra.mxu1 %v17753_v57  ;;  %v17810_v7 = vld [vmem:[%s24148_s2 + $0xf90] ss:$28 sps:$4 sm:$0xff]   ;;  %v17849_v53 = vld [vmem:[%s24148_s2 + $0x1378] ss:$28 sps:$4 sm:$0xff]   ;;  %vm9601_vm2 = vcmask 261120   ;;  %vm10858_vm3 = vcmask 1041408  }
 0x3a8   :  { %10044 = vmatpush1.bf16.msra.mxu0 %v17756_v9  ;;  %9789 = vmatprep.subr.bf16.mxu1 %v17761_v17  ;;  %v17815_v60 = vld [vmem:[%s24148_s2 + $0x122c] ss:$28 sps:$4 sm:$0xff]   ;;  %v17860_v54 = vld [vmem:[%s24148_s2 + $0x1154] ss:$28 sps:$4 sm:$0xff]   ;;  %vm10901_vm4 = vcmask 123904   ;;  %s18581_s10 = smov [#allocation2]  }
 0x3a9   :  { %10045 = vmatprep.subr.bf16.mxu0 %v17764_v38  ;;  %v17818_v57 = vld [vmem:[%s24148_s2 + $0xfcc] ss:$28 sps:$4 sm:$0xff]   ;;  %v17821_v38 = vld [vmem:[%s24148_s2 + $0x1264] ss:$28 sps:$4 sm:$0xff]   ;;  %s13872_s11 = sshll.u32 %s18581_s10, 4  ;;  %vm13864_vm5 = vcmask 254976   ;;  %s13873_s11 = int_to_ptr.vmem [resolvable:$true] %s13872_s11 }
 0x3aa   :  { %v17813_v9 = vld [vmem:[%s24148_s2 + $0x1228] ss:$28 sps:$4 sm:$0xff]   ;;  %s18552_s12 = scalar_lea.vmem %s13873_s11, 32  ;;  %p18557_p1 = scmp.lt.s32.totalorder %s13873_s11, %s13873_s11 }
 0x3ab   :  { %9790 = vmatpush1.bf16.msra.mxu1 %v17759_v20  ;;  %v17816_v17 = vld [vmem:[%s24148_s2 + $0xfc8] ss:$28 sps:$4 sm:$0xff]   ;;  %p18553_p0 = scmp.ne.s32.totalorder %s13873_s11, %s18552_s12  ;;  %p18558_p2 = scmp.lt.s32.totalorder %s18552_s12, %s18552_s12 }
 0x3ac   :  { %10046 = vmatpush1.bf16.msra.mxu0 %v17762_v21  ;;  %9791 = vmatprep.subr.bf16.mxu1 %v17767_v23  ;;  %v17824_v20 = vld [vmem:[%s24148_s2 + $0x1004] ss:$28 sps:$4 sm:$0xff]  }
 0x3ad   :  { %10056 = vmatprep.subr.bf16.mxu0 %v17770_v27  ;;  %v17819_v21 = vld [vmem:[%s24148_s2 + $0x1260] ss:$28 sps:$4 sm:$0xff]   ;;  %p18559_p3 = por %p18558_p2, %p18557_p1 }
 0x3ae   :  { %v17822_v23 = vld [vmem:[%s24148_s2 + $0x1000] ss:$28 sps:$4 sm:$0xff]  }
 0x3af   :  { %10048 = vmatmul.mubr.bf16.vlgmr.msra.gmra.mrb[24].mxu0 %v21465_v10  ;;  %9792 = vmatpush1.bf16.msra.mxu1 %v17765_v28  ;;  %v17827_v27 = vld [vmem:[%s24148_s2 + $0x129c] ss:$28 sps:$4 sm:$0xff]   ;;  %p18560_p4 = pnand %p18559_p3, %p18553_p0 }
 0x3b0   :  { %10057 = vmatpush1.bf16.msra.mxu0 %v17768_v43  ;;  %10088 = vmatprep.mubr.bf16.mxu0 %v21467_v15  ;;  %v17830_v28 = vld [vmem:[%s24148_s2 + $0x103c] ss:$28 sps:$4 sm:$0xff]  }
 0x3b1   :  { %9793 = vmatprep.subr.bf16.mxu1 %v17773_v30  ;;  %10058 = vmatprep.subr.bf16.mxu0 %v17776_v31  ;;  %v17825_v43 = vld [vmem:[%s24148_s2 + $0x1298] ss:$28 sps:$4 sm:$0xff]  }
 0x3b2   :  { %v17828_v30 = vld [vmem:[%s24148_s2 + $0x1038] ss:$28 sps:$4 sm:$0xff]  }
 0x3b3   :  { %9794 = vmatpush1.bf16.msra.mxu1 %v17771_v37  ;;  %v17833_v31 = vld [vmem:[%s24148_s2 + $0x12d4] ss:$28 sps:$4 sm:$0xff]  }
 0x3b4   :  { %10059 = vmatpush1.bf16.msra.mxu0 %v17774_v32  ;;  %9795 = vmatprep.subr.bf16.mxu1 %v17779_v44  ;;  %v17836_v37 = vld [vmem:[%s24148_s2 + $0x1074] ss:$28 sps:$4 sm:$0xff]  }
 0x3b5   :  { %10060 = vmatprep.subr.bf16.mxu0 %v17782_v36  ;;  %v17831_v32 = vld [vmem:[%s24148_s2 + $0x12d0] ss:$28 sps:$4 sm:$0xff]  }
 0x3b6   :  { %v17834_v44 = vld [vmem:[%s24148_s2 + $0x1070] ss:$28 sps:$4 sm:$0xff]  }
 0x3b7   :  { %9796 = vmatpush1.bf16.msra.mxu1 %v17777_v29  ;;  %v17839_v36 = vld [vmem:[%s24148_s2 + $0x130c] ss:$28 sps:$4 sm:$0xff]  }
 0x3b8   :  { %10061 = vmatpush1.bf16.msra.mxu0 %v17780_v49  ;;  %9797 = vmatprep.subr.bf16.mxu1 %v17785_v45  ;;  %v17842_v29 = vld [vmem:[%s24148_s2 + $0x10ac] ss:$28 sps:$4 sm:$0xff]  }
 0x3b9   :  { %10062 = vmatprep.subr.bf16.mxu0 %v17788_v47  ;;  %v17837_v49 = vld [vmem:[%s24148_s2 + $0x1308] ss:$28 sps:$4 sm:$0xff]  }
 0x3ba   :  { %v17840_v45 = vld [vmem:[%s24148_s2 + $0x10a8] ss:$28 sps:$4 sm:$0xff]  }
 0x3bb   :  { %9798 = vmatpush1.bf16.msra.mxu1 %v17783_v48  ;;  %v17845_v47 = vld [vmem:[%s24148_s2 + $0x1344] ss:$28 sps:$4 sm:$0xff]  }
 0x3bc   :  { %10063 = vmatpush1.bf16.msra.mxu0 %v17786_v50  ;;  %9799 = vmatprep.subr.bf16.mxu1 %v17791_v16  ;;  %v17848_v48 = vld [vmem:[%s24148_s2 + $0x10e4] ss:$28 sps:$4 sm:$0xff]  }
 0x3bd   :  { %10064 = vmatprep.subr.bf16.mxu0 %v17794_v33  ;;  %v17843_v50 = vld [vmem:[%s24148_s2 + $0x1340] ss:$28 sps:$4 sm:$0xff]  }
 0x3be   :  { %v17846_v16 = vld [vmem:[%s24148_s2 + $0x10e0] ss:$28 sps:$4 sm:$0xff]  }
 0x3bf   :  { %9800 = vmatpush1.bf16.msra.mxu1 %v17789_v6  ;;  %v17851_v33 = vld [vmem:[%s24148_s2 + $0x137c] ss:$28 sps:$4 sm:$0xff]  }
 0x3c0   :  { %10065 = vmatpush1.bf16.msra.mxu0 %v17792_v19  ;;  %9810 = vmatprep.subr.bf16.mxu1 %v17797_v22  ;;  %v17854_v6 = vld [vmem:[%s24148_s2 + $0x111c] ss:$28 sps:$4 sm:$0xff]   ;;  %v17857_v22 = vld [vmem:[%s24148_s2 + $0x13b4] ss:$28 sps:$4 sm:$0xff]  }
 0x3c1   :  { %10066 = vmatprep.subr.bf16.mxu0 %v17800_v46  ;;  %v17852_v19 = vld [vmem:[%s24148_s2 + $0x1118] ss:$28 sps:$4 sm:$0xff]   ;;  %v17855_v46 = vld [vmem:[%s24148_s2 + $0x13b0] ss:$28 sps:$4 sm:$0xff]  }
 0x3c2   :  { %9802 = vmatmul.mubr.bf16.vlgmr.msra.gmra.mrb[20].mxu1 %v21665_v55 }
 0x3c3   :  { %9811 = vmatpush1.bf16.msra.mxu1 %v17795_v4  ;;  %9842 = vmatprep.mubr.bf16.mxu1 %v21673_v5  ;;  %v17858_v4 = vld [vmem:[%s24148_s2 + $0x1150] ss:$28 sps:$4 sm:$0xff]  }
 0x3c4   :  { %10067 = vmatpush1.bf16.msra.mxu0 %v17798_v56  ;;  %9812 = vmatprep.subr.bf16.mxu1 %v17803_v18  ;;  %v17863_v56 = vld [vmem:[%s24148_s2 + $0x13ec] ss:$28 sps:$4 sm:$0xff]  }
 0x3c5   :  { %10068 = vmatprep.subr.bf16.mxu0 %v17806_v58  ;;  %v17866_v18 = vld [vmem:[%s24148_s2 + $0x118c] ss:$28 sps:$4 sm:$0xff]  }
 0x3c6   :  { %v17861_v58 = vld [vmem:[%s24148_s2 + $0x13e8] ss:$28 sps:$4 sm:$0xff]  }
 0x3c7   :  { %9813 = vmatpush1.bf16.msra.mxu1 %v17801_v59  ;;  %v17864_v59 = vld [vmem:[%s24148_s2 + $0x1188] ss:$28 sps:$4 sm:$0xff]  }
 0x3c8   :  { %10069 = vmatpush1.bf16.msra.mxu0 %v17804_v62  ;;  %9814 = vmatprep.subr.bf16.mxu1 %v17809_v2  ;;  %v17869_v62 = vld [vmem:[%s24148_s2 + $0x1424] ss:$28 sps:$4 sm:$0xff]  }
 0x3c9   :  { %10070 = vmatprep.subr.bf16.mxu0 %v17812_v8  ;;  %v17872_v2 = vld [vmem:[%s24148_s2 + $0x11c4] ss:$28 sps:$4 sm:$0xff]  }
 0x3ca   :  { %v17867_v8 = vld [vmem:[%s24148_s2 + $0x1420] ss:$28 sps:$4 sm:$0xff]  }
 0x3cb   :  { %9815 = vmatpush1.bf16.msra.mxu1 %v17807_v3  ;;  %v17870_v3 = vld [vmem:[%s24148_s2 + $0x11c0] ss:$28 sps:$4 sm:$0xff]  }
 0x3cc   :  { %10071 = vmatpush1.bf16.msra.mxu0 %v17810_v7  ;;  %9816 = vmatprep.subr.bf16.mxu1 %v17815_v60  ;;  %v17875_v7 = vld [vmem:[%s24148_s2 + $0x145c] ss:$28 sps:$4 sm:$0xff]  }
 0x3cd   :  { %10072 = vmatprep.subr.bf16.mxu0 %v17818_v57  ;;  %v17878_v60 = vld [vmem:[%s24148_s2 + $0x11fc] ss:$28 sps:$4 sm:$0xff]  }
 0x3ce   :  { %v17873_v57 = vld [vmem:[%s24148_s2 + $0x1458] ss:$28 sps:$4 sm:$0xff]  }
 0x3cf   :  { %9817 = vmatpush1.bf16.msra.mxu1 %v17813_v9  ;;  %v17876_v9 = vld [vmem:[%s24148_s2 + $0x11f8] ss:$28 sps:$4 sm:$0xff]  }
 0x3d0   :  { %10073 = vmatpush1.bf16.msra.mxu0 %v17816_v17  ;;  %9818 = vmatprep.subr.bf16.mxu1 %v17821_v38  ;;  %v17881_v17 = vld [vmem:[%s24148_s2 + $0x1494] ss:$28 sps:$4 sm:$0xff]  }
 0x3d1   :  { %10074 = vmatprep.subr.bf16.mxu0 %v17824_v20  ;;  %v17884_v38 = vld [vmem:[%s24148_s2 + $0x1234] ss:$28 sps:$4 sm:$0xff]  }
 0x3d2   :  { %v17879_v20 = vld [vmem:[%s24148_s2 + $0x1490] ss:$28 sps:$4 sm:$0xff]  }
 0x3d3   :  { %9819 = vmatpush1.bf16.msra.mxu1 %v17819_v21  ;;  %v17882_v21 = vld [vmem:[%s24148_s2 + $0x1230] ss:$28 sps:$4 sm:$0xff]  }
 0x3d4   :  { %10075 = vmatpush1.bf16.msra.mxu0 %v17822_v23  ;;  %9820 = vmatprep.subr.bf16.mxu1 %v17827_v27  ;;  %v17887_v23 = vld [vmem:[%s24148_s2 + $0x14cc] ss:$28 sps:$4 sm:$0xff]  }
 0x3d5   :  { %10076 = vmatprep.subr.bf16.mxu0 %v17830_v28  ;;  %v17890_v27 = vld [vmem:[%s24148_s2 + $0x126c] ss:$28 sps:$4 sm:$0xff]  }
 0x3d6   :  { %v17885_v28 = vld [vmem:[%s24148_s2 + $0x14c8] ss:$28 sps:$4 sm:$0xff]  }
 0x3d7   :  { %9821 = vmatpush1.bf16.msra.mxu1 %v17825_v43  ;;  %v5233_v43 = vmax.f32 %v21173_v26, 0.0  ;;  %v17891_v26 = vld [vmem:[%s24148_s2 + $0x1500] ss:$28 sps:$4 sm:$0xff]  }
 0x3d8   :  { %10077 = vmatpush1.bf16.msra.mxu0 %v17828_v30  ;;  %9822 = vmatprep.subr.bf16.mxu1 %v17833_v31  ;;  %v17888_v30 = vld [vmem:[%s24148_s2 + $0x1268] ss:$28 sps:$4 sm:$0xff]  }
 0x3d9   :  { %10078 = vmatprep.subr.bf16.mxu0 %v17836_v37  ;;  %v17893_v31 = vld [vmem:[%s24148_s2 + $0x1504] ss:$28 sps:$4 sm:$0xff]  }
 0x3da   :  { %v17896_v37 = vld [vmem:[%s24148_s2 + $0x12a4] ss:$28 sps:$4 sm:$0xff]  }
 0x3db   :  { %9823 = vmatpush1.bf16.msra.mxu1 %v17831_v32  ;;  %v21866_v32 = vpack.c.bf16 %v5233_v43, %v5233_v43  ;;  %v17950_v43 = vld [vmem:[%s24148_s2 + $0x19c] ss:$28 sps:$4 sm:$0xff]  }
 0x3dc   :  { %10079 = vmatpush1.bf16.msra.mxu0 %v17834_v44  ;;  %9824 = vmatprep.subr.bf16.mxu1 %v17839_v36  ;;  %v17894_v44 = vld [vmem:[%s24148_s2 + $0x12a0] ss:$28 sps:$4 sm:$0xff]  }
 0x3dd   :  { %10080 = vmatprep.subr.bf16.mxu0 %v17842_v29  ;;  %v17902_v36 = vld [vmem:[%s24148_s2 + $0x153c] ss:$28 sps:$4 sm:$0xff]  }
 0x3de   :  { %v17899_v29 = vld [vmem:[%s24148_s2 + $0x12dc] ss:$28 sps:$4 sm:$0xff]  }
 0x3df   :  { %9825 = vmatpush1.bf16.msra.mxu1 %v17837_v49  ;;  %v17900_v49 = vld [vmem:[%s24148_s2 + $0x1538] ss:$28 sps:$4 sm:$0xff]  }
 0x3e0   :  { %10081 = vmatpush1.bf16.msra.mxu0 %v17840_v45  ;;  %9826 = vmatprep.subr.bf16.mxu1 %v17845_v47  ;;  %v17897_v45 = vld [vmem:[%s24148_s2 + $0x12d8] ss:$28 sps:$4 sm:$0xff]  }
 0x3e1   :  { %10082 = vmatprep.subr.bf16.mxu0 %v17848_v48  ;;  %v17908_v47 = vld [vmem:[%s24148_s2 + $0x14] ss:$28 sps:$4 sm:$0xff]  }
 0x3e2   :  { %v17905_v48 = vld [vmem:[%s24148_s2 + $0x1314] ss:$28 sps:$4 sm:$0xff]  }
 0x3e3   :  { %9827 = vmatpush1.bf16.msra.mxu1 %v17843_v50  ;;  %v5235_v50 = vmax.f32 %v21491_v41, 0.0  ;;  %v17909_v41 = vld [vmem:[%s24148_s2 + $0x1348] ss:$28 sps:$4 sm:$0xff]  }
 0x3e4   :  { %10083 = vmatpush1.bf16.msra.mxu0 %v17846_v16  ;;  %9828 = vmatprep.subr.bf16.mxu1 %v17851_v33  ;;  %v17903_v16 = vld [vmem:[%s24148_s2 + $0x1310] ss:$28 sps:$4 sm:$0xff]  }
 0x3e5   :  { %10084 = vmatprep.subr.bf16.mxu0 %v17854_v6  ;;  %v17911_v33 = vld [vmem:[%s24148_s2 + $0x134c] ss:$28 sps:$4 sm:$0xff]  }
 0x3e6   :  { %v17906_v6 = vld [vmem:[%s24148_s2 + $0x10] ss:$28 sps:$4 sm:$0xff]  }
 0x3e7   :  { %9829 = vmatpush1.bf16.msra.mxu1 %v17849_v53  ;;  %v21901_v53 = vpack.c.bf16 %v5235_v50, %v5235_v50  ;;  %v17968_v50 = vld [vmem:[%s24148_s2 + $0x244] ss:$28 sps:$4 sm:$0xff]  }
 0x3e8   :  { %10085 = vmatpush1.bf16.msra.mxu0 %v17852_v19  ;;  %9830 = vmatprep.subr.bf16.mxu1 %v17857_v22  ;;  %v17914_v19 = vld [vmem:[%s24148_s2 + $0x4c] ss:$28 sps:$4 sm:$0xff]   ;;  %v17917_v22 = vld [vmem:[%s24148_s2 + $0x1384] ss:$28 sps:$4 sm:$0xff]  }
 0x3e9   :  { %10086 = vmatprep.subr.bf16.mxu0 %v17860_v54  ;;  %v17912_v54 = vld [vmem:[%s24148_s2 + $0x48] ss:$28 sps:$4 sm:$0xff]  }
 0x3eb   :  { %9831 = vmatpush1.bf16.msra.mxu1 %v17855_v46  ;;  %v17915_v46 = vld [vmem:[%s24148_s2 + $0x1380] ss:$28 sps:$4 sm:$0xff]  }
 0x3ec   :  { %10087 = vmatpush1.bf16.msra.mxu0 %v17858_v4  ;;  %9832 = vmatprep.subr.bf16.mxu1 %v17863_v56  ;;  %v17920_v4 = vld [vmem:[%s24148_s2 + $0x84] ss:$28 sps:$4 sm:$0xff]   ;;  %v17923_v56 = vld [vmem:[%s24148_s2 + $0x13bc] ss:$28 sps:$4 sm:$0xff]  }
 0x3ed   :  { %10097 = vmatprep.subr.bf16.mxu0 %v17866_v18  ;;  %v17918_v18 = vld [vmem:[%s24148_s2 + $0x80] ss:$28 sps:$4 sm:$0xff]  }
 0x3ef   :  { %10089 = vmatmul.mubr.bf16.vlgmr.msra.gmra.mrb[24].mxu0 %v21665_v55  ;;  %9833 = vmatpush1.bf16.msra.mxu1 %v17861_v58  ;;  %v17921_v58 = vld [vmem:[%s24148_s2 + $0x13b8] ss:$28 sps:$4 sm:$0xff]  }
 0x3f0   :  { %10098 = vmatpush1.bf16.msra.mxu0 %v17864_v59  ;;  %10129 = vmatprep.mubr.bf16.mxu0 %v21673_v5  ;;  %v17926_v59 = vld [vmem:[%s24148_s2 + $0xbc] ss:$28 sps:$4 sm:$0xff]  }
 0x3f1   :  { %9834 = vmatprep.subr.bf16.mxu1 %v17869_v62  ;;  %10099 = vmatprep.subr.bf16.mxu0 %v17872_v2  ;;  %v17929_v62 = vld [vmem:[%s24148_s2 + $0x13f4] ss:$28 sps:$4 sm:$0xff]  }
 0x3f2   :  { %v17924_v2 = vld [vmem:[%s24148_s2 + $0xb8] ss:$28 sps:$4 sm:$0xff]  }
 0x3f3   :  { %9835 = vmatpush1.bf16.msra.mxu1 %v17867_v8  ;;  %v17927_v8 = vld [vmem:[%s24148_s2 + $0x13f0] ss:$28 sps:$4 sm:$0xff]  }
 0x3f4   :  { %10100 = vmatpush1.bf16.msra.mxu0 %v17870_v3  ;;  %9836 = vmatprep.subr.bf16.mxu1 %v17875_v7  ;;  %v17932_v3 = vld [vmem:[%s24148_s2 + $0xf4] ss:$28 sps:$4 sm:$0xff]   ;;  %v17935_v7 = vld [vmem:[%s24148_s2 + $0x142c] ss:$28 sps:$4 sm:$0xff]  }
 0x3f5   :  { %10101 = vmatprep.subr.bf16.mxu0 %v17878_v60  ;;  %v17930_v60 = vld [vmem:[%s24148_s2 + $0xf0] ss:$28 sps:$4 sm:$0xff]  }
 0x3f7   :  { %9837 = vmatpush1.bf16.msra.mxu1 %v17873_v57  ;;  %v17933_v57 = vld [vmem:[%s24148_s2 + $0x1428] ss:$28 sps:$4 sm:$0xff]  }
 0x3f8   :  { %10102 = vmatpush1.bf16.msra.mxu0 %v17876_v9  ;;  %9838 = vmatprep.subr.bf16.mxu1 %v17881_v17  ;;  %v17938_v9 = vld [vmem:[%s24148_s2 + $0x12c] ss:$28 sps:$4 sm:$0xff]   ;;  %v17941_v17 = vld [vmem:[%s24148_s2 + $0x1464] ss:$28 sps:$4 sm:$0xff]  }
 0x3f9   :  { %10103 = vmatprep.subr.bf16.mxu0 %v17884_v38  ;;  %v17936_v38 = vld [vmem:[%s24148_s2 + $0x128] ss:$28 sps:$4 sm:$0xff]  }
 0x3fb   :  { %9839 = vmatpush1.bf16.msra.mxu1 %v17879_v20  ;;  %v17939_v20 = vld [vmem:[%s24148_s2 + $0x1460] ss:$28 sps:$4 sm:$0xff]  }
 0x3fc   :  { %10104 = vmatpush1.bf16.msra.mxu0 %v17882_v21  ;;  %9840 = vmatprep.subr.bf16.mxu1 %v17887_v23  ;;  %v17944_v21 = vld [vmem:[%s24148_s2 + $0x164] ss:$28 sps:$4 sm:$0xff]   ;;  %v17947_v23 = vld [vmem:[%s24148_s2 + $0x149c] ss:$28 sps:$4 sm:$0xff]  }
 0x3fd   :  { %10105 = vmatprep.subr.bf16.mxu0 %v17890_v27  ;;  %v17942_v27 = vld [vmem:[%s24148_s2 + $0x160] ss:$28 sps:$4 sm:$0xff]  }
 0x3ff   :  { %9841 = vmatpush1.bf16.msra.mxu1 %v17885_v28  ;;  %v17945_v28 = vld [vmem:[%s24148_s2 + $0x1498] ss:$28 sps:$4 sm:$0xff]  }
 0x400   :  { %10106 = vmatpush1.bf16.msra.mxu0 %v17888_v30  ;;  %9851 = vmatprep.subr.bf16.mxu1 %v17893_v31  ;;  %v17953_v30 = vld [vmem:[%s24148_s2 + $0x14d4] ss:$28 sps:$4 sm:$0xff]  }
 0x401   :  { %10107 = vmatprep.subr.bf16.mxu0 %v17896_v37  ;;  %v17948_v31 = vld [vmem:[%s24148_s2 + $0x198] ss:$28 sps:$4 sm:$0xff]   ;;  %v17951_v37 = vld [vmem:[%s24148_s2 + $0x14d0] ss:$28 sps:$4 sm:$0xff]  }
 0x402   :  { %9843 = vmatmul.mubr.bf16.vlgmr.msra.gmra.mrb[20].mxu1 %v21866_v32 }
 0x403   :  { %9852 = vmatpush1.bf16.msra.mxu1 %v17891_v26  ;;  %9883 = vmatprep.mubr.bf16.mxu1 %v24153_v39  ;;  %v17956_v26 = vld [vmem:[%s24148_s2 + $0x1d4] ss:$28 sps:$4 sm:$0xff]  }
 0x404   :  { %10108 = vmatpush1.bf16.msra.mxu0 %v17894_v44  ;;  %9853 = vmatprep.subr.bf16.mxu1 %v17902_v36  ;;  %v17959_v44 = vld [vmem:[%s24148_s2 + $0x150c] ss:$28 sps:$4 sm:$0xff]  }
 0x405   :  { %10109 = vmatprep.subr.bf16.mxu0 %v17899_v29  ;;  %v17954_v36 = vld [vmem:[%s24148_s2 + $0x1d0] ss:$28 sps:$4 sm:$0xff]   ;;  %v17957_v29 = vld [vmem:[%s24148_s2 + $0x1508] ss:$28 sps:$4 sm:$0xff]  }
 0x407   :  { %9854 = vmatpush1.bf16.msra.mxu1 %v17900_v49  ;;  %v17962_v49 = vld [vmem:[%s24148_s2 + $0x20c] ss:$28 sps:$4 sm:$0xff]  }
 0x408   :  { %10110 = vmatpush1.bf16.msra.mxu0 %v17897_v45  ;;  %10179 = vmatprep.subr.bf16.mxu1 %v17908_v47  ;;  %v17965_v45 = vld [vmem:[%s24148_s2 + $0x1544] ss:$28 sps:$4 sm:$0xff]  }
 0x409   :  { %10111 = vmatprep.subr.bf16.mxu0 %v17905_v48  ;;  %v17960_v47 = vld [vmem:[%s24148_s2 + $0x208] ss:$28 sps:$4 sm:$0xff]   ;;  %v17963_v48 = vld [vmem:[%s24148_s2 + $0x1540] ss:$28 sps:$4 sm:$0xff]  }
 0x40c   :  { %10112 = vmatpush1.bf16.msra.mxu0 %v17903_v16  ;;  %v17972_v16 = vld [vmem:[%s24148_s2 + $0x1d8] ss:$28 sps:$4 sm:$0xff]  }
 0x40d   :  { %10113 = vmatprep.subr.bf16.mxu0 %v17911_v33  ;;  %v17966_v33 = vld [vmem:[%s24148_s2 + $0x240] ss:$28 sps:$4 sm:$0xff]  }
 0x40e   :  { %15214 = vmatmul.mubr.msk.bf16.vlgmr.msra.gmra.mrb[20].mxu1 %vm9601_vm2, %v21901_v53 }
 0x40f   :  { %10180 = vmatpush1.bf16.msra.mxu1 %v17906_v6  ;;  %10211 = vmatprep.mubr.bf16.mxu1 %v20606_v24  ;;  %v17971_v6 = vld [vmem:[%s24148_s2 + $0x27c] ss:$28 sps:$4 sm:$0xff]  }
 0x410   :  { %10114 = vmatpush1.bf16.msra.mxu0 %v17909_v41  ;;  %10181 = vmatprep.subr.bf16.mxu1 %v17914_v19  ;;  %v17969_v41 = vld [vmem:[%s24148_s2 + $0x278] ss:$28 sps:$4 sm:$0xff]  }
 0x411   :  { %10115 = vmatprep.subr.bf16.mxu0 %v17917_v22  ;;  %v17973_v19 = vld [vmem:[%s24148_s2 + $0x18] ss:$28 sps:$4 sm:$0xff]  }
 0x412   :  { %v17976_v22 = vld [vmem:[%s24148_s2 + $0x2b4] ss:$28 sps:$4 sm:$0xff]  }
 0x413   :  { %10182 = vmatpush1.bf16.msra.mxu1 %v17912_v54  ;;  %v17977_v54 = vld [vmem:[%s24148_s2 + $0x210] ss:$28 sps:$4 sm:$0xff]  }
 0x414   :  { %10116 = vmatpush1.bf16.msra.mxu0 %v17915_v46  ;;  %10183 = vmatprep.subr.bf16.mxu1 %v17920_v4  ;;  %v17974_v46 = vld [vmem:[%s24148_s2 + $0x2b0] ss:$28 sps:$4 sm:$0xff]  }
 0x415   :  { %10117 = vmatprep.subr.bf16.mxu0 %v17923_v56  ;;  %v17978_v4 = vld [vmem:[%s24148_s2 + $0x50] ss:$28 sps:$4 sm:$0xff]  }
 0x416   :  { %v17981_v56 = vld [vmem:[%s24148_s2 + $0x2ec] ss:$28 sps:$4 sm:$0xff]  }
 0x417   :  { %10184 = vmatpush1.bf16.msra.mxu1 %v17918_v18  ;;  %v17982_v18 = vld [vmem:[%s24148_s2 + $0x248] ss:$28 sps:$4 sm:$0xff]  }
 0x418   :  { %10118 = vmatpush1.bf16.msra.mxu0 %v17921_v58  ;;  %10185 = vmatprep.subr.bf16.mxu1 %v17926_v59  ;;  %v17979_v58 = vld [vmem:[%s24148_s2 + $0x2e8] ss:$28 sps:$4 sm:$0xff]  }
 0x419   :  { %10119 = vmatprep.subr.bf16.mxu0 %v17929_v62  ;;  %v17986_v59 = vld [vmem:[%s24148_s2 + $0x324] ss:$28 sps:$4 sm:$0xff]  }
 0x41a   :  { %v17987_v62 = vld [vmem:[%s24148_s2 + $0x280] ss:$28 sps:$4 sm:$0xff]  }
 0x41b   :  { %10186 = vmatpush1.bf16.msra.mxu1 %v17924_v2  ;;  %v17984_v2 = vld [vmem:[%s24148_s2 + $0x320] ss:$28 sps:$4 sm:$0xff]  }
 0x41c   :  { %10120 = vmatpush1.bf16.msra.mxu0 %v17927_v8  ;;  %10187 = vmatprep.subr.bf16.mxu1 %v17932_v3  ;;  %v17988_v8 = vld [vmem:[%s24148_s2 + $0xc0] ss:$28 sps:$4 sm:$0xff]  }
 0x41d   :  { %10121 = vmatprep.subr.bf16.mxu0 %v17935_v7  ;;  %v17991_v3 = vld [vmem:[%s24148_s2 + $0x35c] ss:$28 sps:$4 sm:$0xff]  }
 0x41e   :  { %v17992_v7 = vld [vmem:[%s24148_s2 + $0x2b8] ss:$28 sps:$4 sm:$0xff]  }
 0x41f   :  { %10188 = vmatpush1.bf16.msra.mxu1 %v17930_v60  ;;  %v17989_v60 = vld [vmem:[%s24148_s2 + $0x358] ss:$28 sps:$4 sm:$0xff]  }
 0x420   :  { %10122 = vmatpush1.bf16.msra.mxu0 %v17933_v57  ;;  %10189 = vmatprep.subr.bf16.mxu1 %v17938_v9  ;;  %v17993_v57 = vld [vmem:[%s24148_s2 + $0xf8] ss:$28 sps:$4 sm:$0xff]  }
 0x421   :  { %10123 = vmatprep.subr.bf16.mxu0 %v17941_v17  ;;  %v17996_v9 = vld [vmem:[%s24148_s2 + $0x394] ss:$28 sps:$4 sm:$0xff]  }
 0x422   :  { %v17997_v17 = vld [vmem:[%s24148_s2 + $0x2f0] ss:$28 sps:$4 sm:$0xff]  }
 0x423   :  { %10190 = vmatpush1.bf16.msra.mxu1 %v17936_v38  ;;  %v17994_v38 = vld [vmem:[%s24148_s2 + $0x390] ss:$28 sps:$4 sm:$0xff]  }
 0x424   :  { %10124 = vmatpush1.bf16.msra.mxu0 %v17939_v20  ;;  %10191 = vmatprep.subr.bf16.mxu1 %v17944_v21  ;;  %v17998_v20 = vld [vmem:[%s24148_s2 + $0x130] ss:$28 sps:$4 sm:$0xff]  }
 0x425   :  { %10125 = vmatprep.subr.bf16.mxu0 %v17947_v23  ;;  %v18001_v21 = vld [vmem:[%s24148_s2 + $0x3cc] ss:$28 sps:$4 sm:$0xff]  }
 0x426   :  { %v18002_v23 = vld [vmem:[%s24148_s2 + $0x328] ss:$28 sps:$4 sm:$0xff]  }
 0x427   :  { %10192 = vmatpush1.bf16.msra.mxu1 %v17942_v27  ;;  %v17999_v27 = vld [vmem:[%s24148_s2 + $0x3c8] ss:$28 sps:$4 sm:$0xff]  }
 0x428   :  { %10126 = vmatpush1.bf16.msra.mxu0 %v17945_v28  ;;  %10193 = vmatprep.subr.bf16.mxu1 %v17950_v43  ;;  %v18003_v28 = vld [vmem:[%s24148_s2 + $0x168] ss:$28 sps:$4 sm:$0xff]  }
 0x429   :  { %10127 = vmatprep.subr.bf16.mxu0 %v17953_v30  ;;  %v18006_v43 = vld [vmem:[%s24148_s2 + $0x404] ss:$28 sps:$4 sm:$0xff]  }
 0x42a   :  { %v18007_v30 = vld [vmem:[%s24148_s2 + $0x360] ss:$28 sps:$4 sm:$0xff]  }
 0x42b   :  { %10194 = vmatpush1.bf16.msra.mxu1 %v17948_v31  ;;  %v18004_v31 = vld [vmem:[%s24148_s2 + $0x400] ss:$28 sps:$4 sm:$0xff]  }
 0x42c   :  { %10128 = vmatpush1.bf16.msra.mxu0 %v17951_v37  ;;  %10195 = vmatprep.subr.bf16.mxu1 %v17956_v26  ;;  %v18008_v37 = vld [vmem:[%s24148_s2 + $0x1a0] ss:$28 sps:$4 sm:$0xff]  }
 0x42d   :  { %10138 = vmatprep.subr.bf16.mxu0 %v17959_v44  ;;  %v18011_v26 = vld [vmem:[%s24148_s2 + $0x43c] ss:$28 sps:$4 sm:$0xff]  }
 0x42e   :  { %v18012_v44 = vld [vmem:[%s24148_s2 + $0x558] ss:$28 sps:$4 sm:$0xff]  }
 0x42f   :  { %10130 = vmatmul.mubr.bf16.vlgmr.msra.gmra.mrb[24].mxu0 %v21866_v32  ;;  %10196 = vmatpush1.bf16.msra.mxu1 %v17954_v36  ;;  %v18009_v36 = vld [vmem:[%s24148_s2 + $0x438] ss:$28 sps:$4 sm:$0xff]  }
 0x430   :  { %10197 = vmatprep.subr.bf16.mxu1 %v17962_v49  ;;  %10139 = vmatpush1.bf16.msra.mxu0 %v17957_v29  ;;  %v18013_v29 = vld [vmem:[%s24148_s2 + $0x398] ss:$28 sps:$4 sm:$0xff]  }
 0x431   :  { %10140 = vmatprep.subr.bf16.mxu0 %v17965_v45  ;;  %10170 = vmatprep.mubr.bf16.mxu0 %v24153_v39  ;;  %v18016_v49 = vld [vmem:[%s24148_s2 + $0x474] ss:$28 sps:$4 sm:$0xff]  }
 0x432   :  { %v18017_v45 = vld [vmem:[%s24148_s2 + $0x590] ss:$28 sps:$4 sm:$0xff]  }
 0x433   :  { %10198 = vmatpush1.bf16.msra.mxu1 %v17960_v47  ;;  %v18014_v47 = vld [vmem:[%s24148_s2 + $0x470] ss:$28 sps:$4 sm:$0xff]  }
 0x434   :  { %10199 = vmatprep.subr.bf16.mxu1 %v17968_v50  ;;  %10141 = vmatpush1.bf16.msra.mxu0 %v17963_v48  ;;  %v18018_v48 = vld [vmem:[%s24148_s2 + $0x3d0] ss:$28 sps:$4 sm:$0xff]  }
 0x435   :  { %15473 = vmatprep.subr.bf16.mxu0 %v17972_v16  ;;  %v18021_v50 = vld [vmem:[%s24148_s2 + $0x4ac] ss:$28 sps:$4 sm:$0xff]  }
 0x436   :  { %v18019_v16 = vld [vmem:[%s24148_s2 + $0x4a8] ss:$28 sps:$4 sm:$0xff]  }
 0x437   :  { %10200 = vmatpush1.bf16.msra.mxu1 %v17966_v33  ;;  %v18026_v33 = vld [vmem:[%s24148_s2 + $0x4e4] ss:$28 sps:$4 sm:$0xff]  }
 0x438   :  { %10201 = vmatprep.subr.bf16.mxu1 %v17971_v6  ;;  %v18027_v6 = vld [vmem:[%s24148_s2 + $0x600] ss:$28 sps:$4 sm:$0xff]  }
 0x43b   :  { %15215 = vmatmul.mubr.msk.bf16.vlgmr.msra.gmra.mrb[24].mxu0 %vm9601_vm2, %v21901_v53  ;;  %10202 = vmatpush1.bf16.msra.mxu1 %v17969_v41  ;;  %v18024_v41 = vld [vmem:[%s24148_s2 + $0x4e0] ss:$28 sps:$4 sm:$0xff]  }
 0x43c   :  { %15474 = vmatpush3.bf16.msra.mxu0 %v17973_v19  ;;  %10498 = vmatprep.mubr.bf16.mxu0 %v20606_v24  ;;  %v17983_v24 = vld [vmem:[%s24148_s2 + $0x88] ss:$28 sps:$4 sm:$0xff]   ;;  %v18028_v19 = vld [vmem:[%s24148_s2 + $0x440] ss:$28 sps:$4 sm:$0xff]  }
 0x43d   :  { %10203 = vmatprep.subr.bf16.mxu1 %v17976_v22  ;;  %15475 = vmatprep.subr.bf16.mxu0 %v17977_v54  ;;  %v18031_v22 = vld [vmem:[%s24148_s2 + $0x51c] ss:$28 sps:$4 sm:$0xff]  }
 0x43e   :  { %v18032_v54 = vld [vmem:[%s24148_s2 + $0x638] ss:$28 sps:$4 sm:$0xff]  }
 0x43f   :  { %10204 = vmatpush1.bf16.msra.mxu1 %v17974_v46  ;;  %v18029_v46 = vld [vmem:[%s24148_s2 + $0x518] ss:$28 sps:$4 sm:$0xff]  }
 0x440   :  { %15476 = vmatpush3.bf16.msra.mxu0 %v17978_v4  ;;  %10205 = vmatprep.subr.bf16.mxu1 %v17981_v56  ;;  %v18033_v4 = vld [vmem:[%s24148_s2 + $0x478] ss:$28 sps:$4 sm:$0xff]  }
 0x441   :  { %15477 = vmatprep.subr.bf16.mxu0 %v17982_v18  ;;  %v18036_v56 = vld [vmem:[%s24148_s2 + $0x554] ss:$28 sps:$4 sm:$0xff]  }
 0x442   :  { %v18037_v18 = vld [vmem:[%s24148_s2 + $0x670] ss:$28 sps:$4 sm:$0xff]  }
 0x443   :  { %10206 = vmatpush1.bf16.msra.mxu1 %v17979_v58  ;;  %v18034_v58 = vld [vmem:[%s24148_s2 + $0x550] ss:$28 sps:$4 sm:$0xff]  }
 0x444   :  { %15478 = vmatpush3.bf16.msra.mxu0 %v17983_v24  ;;  %10207 = vmatprep.subr.bf16.mxu1 %v17986_v59  ;;  %v18038_v24 = vld [vmem:[%s24148_s2 + $0x4b0] ss:$28 sps:$4 sm:$0xff]  }
 0x445   :  { %15479 = vmatprep.subr.bf16.mxu0 %v17987_v62  ;;  %v18041_v59 = vld [vmem:[%s24148_s2 + $0x58c] ss:$28 sps:$4 sm:$0xff]  }
 0x446   :  { %v18042_v62 = vld [vmem:[%s24148_s2 + $0x6a8] ss:$28 sps:$4 sm:$0xff]  }
 0x447   :  { %10208 = vmatpush1.bf16.msra.mxu1 %v17984_v2  ;;  %v18039_v2 = vld [vmem:[%s24148_s2 + $0x588] ss:$28 sps:$4 sm:$0xff]  }
 0x448   :  { %15480 = vmatpush3.bf16.msra.mxu0 %v17988_v8  ;;  %10209 = vmatprep.subr.bf16.mxu1 %v17991_v3  ;;  %v18043_v8 = vld [vmem:[%s24148_s2 + $0x4e8] ss:$28 sps:$4 sm:$0xff]  }
 0x449   :  { %15481 = vmatprep.subr.bf16.mxu0 %v17992_v7  ;;  %v18046_v3 = vld [vmem:[%s24148_s2 + $0x5c4] ss:$28 sps:$4 sm:$0xff]  }
 0x44a   :  { %v18047_v7 = vld [vmem:[%s24148_s2 + $0x6e0] ss:$28 sps:$4 sm:$0xff]  }
 0x44b   :  { %10210 = vmatpush1.bf16.msra.mxu1 %v17989_v60  ;;  %v18044_v60 = vld [vmem:[%s24148_s2 + $0x5c0] ss:$28 sps:$4 sm:$0xff]  }
 0x44c   :  { %15482 = vmatpush3.bf16.msra.mxu0 %v17993_v57  ;;  %10220 = vmatprep.subr.bf16.mxu1 %v17996_v9  ;;  %v18048_v57 = vld [vmem:[%s24148_s2 + $0x520] ss:$28 sps:$4 sm:$0xff]  }
 0x44d   :  { %15483 = vmatprep.subr.bf16.mxu0 %v17997_v17  ;;  %v18051_v9 = vld [vmem:[%s24148_s2 + $0x5fc] ss:$28 sps:$4 sm:$0xff]  }
 0x44e   :  { %10212 = vmatmul.mubr.bf16.vlgmr.msra.gmra.mrb[24].mxu1 %v20811_v51  ;;  %v18052_v17 = vld [vmem:[%s24148_s2 + $0x8d8] ss:$28 sps:$4 sm:$0xff]  }
 0x44f   :  { %10221 = vmatpush1.bf16.msra.mxu1 %v17994_v38  ;;  %10252 = vmatprep.mubr.bf16.mxu1 %v20813_v52  ;;  %v18049_v38 = vld [vmem:[%s24148_s2 + $0x5f8] ss:$28 sps:$4 sm:$0xff]  }
 0x450   :  { %15484 = vmatpush3.bf16.msra.mxu0 %v17998_v20  ;;  %10222 = vmatprep.subr.bf16.mxu1 %v18001_v21  ;;  %v18053_v20 = vld [vmem:[%s24148_s2 + $0x718] ss:$28 sps:$4 sm:$0xff]  }
 0x451   :  { %15485 = vmatprep.subr.bf16.mxu0 %v18002_v23  ;;  %v18056_v21 = vld [vmem:[%s24148_s2 + $0x634] ss:$28 sps:$4 sm:$0xff]  }
 0x452   :  { %v18057_v23 = vld [vmem:[%s24148_s2 + $0x910] ss:$28 sps:$4 sm:$0xff]  }
 0x453   :  { %10223 = vmatpush1.bf16.msra.mxu1 %v17999_v27  ;;  %v18054_v27 = vld [vmem:[%s24148_s2 + $0x630] ss:$28 sps:$4 sm:$0xff]  }
 0x454   :  { %15486 = vmatpush3.bf16.msra.mxu0 %v18003_v28  ;;  %10224 = vmatprep.subr.bf16.mxu1 %v18006_v43  ;;  %v18058_v28 = vld [vmem:[%s24148_s2 + $0x750] ss:$28 sps:$4 sm:$0xff]  }
 0x455   :  { %15487 = vmatprep.subr.bf16.mxu0 %v18007_v30  ;;  %v18061_v43 = vld [vmem:[%s24148_s2 + $0x66c] ss:$28 sps:$4 sm:$0xff]  }
 0x456   :  { %v18062_v30 = vld [vmem:[%s24148_s2 + $0x948] ss:$28 sps:$4 sm:$0xff]  }
 0x457   :  { %10225 = vmatpush1.bf16.msra.mxu1 %v18004_v31  ;;  %v18059_v31 = vld [vmem:[%s24148_s2 + $0x668] ss:$28 sps:$4 sm:$0xff]  }
 0x458   :  { %15488 = vmatpush3.bf16.msra.mxu0 %v18008_v37  ;;  %10226 = vmatprep.subr.bf16.mxu1 %v18011_v26  ;;  %v18063_v37 = vld [vmem:[%s24148_s2 + $0x788] ss:$28 sps:$4 sm:$0xff]  }
 0x459   :  { %15495 = vmatprep.subr.bf16.mxu0 %v18012_v44  ;;  %v18066_v26 = vld [vmem:[%s24148_s2 + $0x6a4] ss:$28 sps:$4 sm:$0xff]  }
 0x45a   :  { %v18067_v44 = vld [vmem:[%s24148_s2 + $0x980] ss:$28 sps:$4 sm:$0xff]  }
 0x45b   :  { %10499 = vmatmul.mubr.bf16.vlgmr.msra.gmra.mrb[28].mxu0 %v20811_v51  ;;  %10227 = vmatpush1.bf16.msra.mxu1 %v18009_v36  ;;  %v18022_v51 = vld [vmem:[%s24148_s2 + $0x5c8] ss:$28 sps:$4 sm:$0xff]   ;;  %v18064_v36 = vld [vmem:[%s24148_s2 + $0x6a0] ss:$28 sps:$4 sm:$0xff]  }
 0x45c   :  { %15496 = vmatpush3.bf16.msra.mxu0 %v18013_v29  ;;  %10538 = vmatprep.mubr.bf16.mxu0 %v20813_v52  ;;  %v18023_v52 = vld [vmem:[%s24148_s2 + $0x408] ss:$28 sps:$4 sm:$0xff]   ;;  %v18068_v29 = vld [vmem:[%s24148_s2 + $0x7c0] ss:$28 sps:$4 sm:$0xff]  }
 0x45d   :  { %10228 = vmatprep.subr.bf16.mxu1 %v18016_v49  ;;  %15497 = vmatprep.subr.bf16.mxu0 %v18017_v45  ;;  %v18071_v49 = vld [vmem:[%s24148_s2 + $0x6dc] ss:$28 sps:$4 sm:$0xff]  }
 0x45e   :  { %v18072_v45 = vld [vmem:[%s24148_s2 + $0x9b8] ss:$28 sps:$4 sm:$0xff]  }
 0x45f   :  { %10229 = vmatpush1.bf16.msra.mxu1 %v18014_v47  ;;  %v18069_v47 = vld [vmem:[%s24148_s2 + $0x6d8] ss:$28 sps:$4 sm:$0xff]  }
 0x460   :  { %15498 = vmatpush3.bf16.msra.mxu0 %v18018_v48  ;;  %10230 = vmatprep.subr.bf16.mxu1 %v18021_v50  ;;  %v18073_v48 = vld [vmem:[%s24148_s2 + $0x7f8] ss:$28 sps:$4 sm:$0xff]  }
 0x461   :  { %15499 = vmatprep.subr.bf16.mxu0 %v18022_v51  ;;  %v18076_v50 = vld [vmem:[%s24148_s2 + $0x714] ss:$28 sps:$4 sm:$0xff]  }
 0x462   :  { %v18077_v51 = vld [vmem:[%s24148_s2 + $0x9f0] ss:$28 sps:$4 sm:$0xff]  }
 0x463   :  { %10231 = vmatpush1.bf16.msra.mxu1 %v18019_v16  ;;  %v18074_v16 = vld [vmem:[%s24148_s2 + $0x710] ss:$28 sps:$4 sm:$0xff]  }
 0x464   :  { %15500 = vmatpush3.bf16.msra.mxu0 %v18023_v52  ;;  %10232 = vmatprep.subr.bf16.mxu1 %v18026_v33  ;;  %v18078_v52 = vld [vmem:[%s24148_s2 + $0x830] ss:$28 sps:$4 sm:$0xff]  }
 0x465   :  { %15501 = vmatprep.subr.bf16.mxu0 %v18027_v6  ;;  %v18081_v33 = vld [vmem:[%s24148_s2 + $0x74c] ss:$28 sps:$4 sm:$0xff]  }
 0x466   :  { %v18082_v6 = vld [vmem:[%s24148_s2 + $0xa28] ss:$28 sps:$4 sm:$0xff]  }
 0x467   :  { %10233 = vmatpush1.bf16.msra.mxu1 %v18024_v41  ;;  %v18079_v41 = vld [vmem:[%s24148_s2 + $0x748] ss:$28 sps:$4 sm:$0xff]  }
 0x468   :  { %15502 = vmatpush3.bf16.msra.mxu0 %v18028_v19  ;;  %10234 = vmatprep.subr.bf16.mxu1 %v18031_v22  ;;  %v18083_v19 = vld [vmem:[%s24148_s2 + $0x868] ss:$28 sps:$4 sm:$0xff]  }
 0x469   :  { %15503 = vmatprep.subr.bf16.mxu0 %v18032_v54  ;;  %v18086_v22 = vld [vmem:[%s24148_s2 + $0x784] ss:$28 sps:$4 sm:$0xff]  }
 0x46a   :  { %v18088_v54 = vld [vmem:[%s24148_s2 + $0x8a0] ss:$28 sps:$4 sm:$0xff]  }
 0x46b   :  { %10235 = vmatpush1.bf16.msra.mxu1 %v18029_v46  ;;  %v18091_v46 = vld [vmem:[%s24148_s2 + $0x7bc] ss:$28 sps:$4 sm:$0xff]  }
 0x46c   :  { %15504 = vmatpush3.bf16.msra.mxu0 %v18033_v4  ;;  %10236 = vmatprep.subr.bf16.mxu1 %v18036_v56  ;;  %v18092_v4 = vld [vmem:[%s24148_s2 + $0xc58] ss:$28 sps:$4 sm:$0xff]  }
 0x46d   :  { %15505 = vmatprep.subr.bf16.mxu0 %v18037_v18  ;;  %v18089_v56 = vld [vmem:[%s24148_s2 + $0x7b8] ss:$28 sps:$4 sm:$0xff]  }
 0x46e   :  { %v18093_v18 = vld [vmem:[%s24148_s2 + $0xa98] ss:$28 sps:$4 sm:$0xff]  }
 0x46f   :  { %10237 = vmatpush1.bf16.msra.mxu1 %v18034_v58  ;;  %v18096_v58 = vld [vmem:[%s24148_s2 + $0x7f4] ss:$28 sps:$4 sm:$0xff]  }
 0x470   :  { %15506 = vmatpush3.bf16.msra.mxu0 %v18038_v24  ;;  %10238 = vmatprep.subr.bf16.mxu1 %v18041_v59  ;;  %v18097_v24 = vld [vmem:[%s24148_s2 + $0xc90] ss:$28 sps:$4 sm:$0xff]  }
 0x471   :  { %15507 = vmatprep.subr.bf16.mxu0 %v18042_v62  ;;  %v18094_v59 = vld [vmem:[%s24148_s2 + $0x7f0] ss:$28 sps:$4 sm:$0xff]  }
 0x472   :  { %v18098_v62 = vld [vmem:[%s24148_s2 + $0xad0] ss:$28 sps:$4 sm:$0xff]  }
 0x473   :  { %10239 = vmatpush1.bf16.msra.mxu1 %v18039_v2  ;;  %v18101_v2 = vld [vmem:[%s24148_s2 + $0x82c] ss:$28 sps:$4 sm:$0xff]  }
 0x474   :  { %15508 = vmatpush3.bf16.msra.mxu0 %v18043_v8  ;;  %10240 = vmatprep.subr.bf16.mxu1 %v18046_v3  ;;  %v18102_v8 = vld [vmem:[%s24148_s2 + $0xcc8] ss:$28 sps:$4 sm:$0xff]  }
 0x475   :  { %15509 = vmatprep.subr.bf16.mxu0 %v18047_v7  ;;  %v18099_v3 = vld [vmem:[%s24148_s2 + $0x828] ss:$28 sps:$4 sm:$0xff]  }
 0x476   :  { %v18103_v7 = vld [vmem:[%s24148_s2 + $0xb08] ss:$28 sps:$4 sm:$0xff]  }
 0x477   :  { %10241 = vmatpush1.bf16.msra.mxu1 %v18044_v60  ;;  %v18106_v60 = vld [vmem:[%s24148_s2 + $0x864] ss:$28 sps:$4 sm:$0xff]  }
 0x478   :  { %15510 = vmatpush3.bf16.msra.mxu0 %v18048_v57  ;;  %10242 = vmatprep.subr.bf16.mxu1 %v18051_v9  ;;  %v18107_v57 = vld [vmem:[%s24148_s2 + $0xd00] ss:$28 sps:$4 sm:$0xff]  }
 0x479   :  { %15517 = vmatprep.subr.bf16.mxu0 %v18052_v17  ;;  %v18104_v9 = vld [vmem:[%s24148_s2 + $0x860] ss:$28 sps:$4 sm:$0xff]  }
 0x47a   :  { %v18108_v17 = vld [vmem:[%s24148_s2 + $0xb40] ss:$28 sps:$4 sm:$0xff]  }
 0x47b   :  { %10539 = vmatmul.mubr.bf16.vlgmr.msra.gmra.mrb[32].mxu0 %v21017_v12  ;;  %10243 = vmatpush1.bf16.msra.mxu1 %v18049_v38  ;;  %v18111_v38 = vld [vmem:[%s24148_s2 + $0x89c] ss:$28 sps:$4 sm:$0xff]  }
 0x47c   :  { %15518 = vmatpush3.bf16.msra.mxu0 %v18053_v20  ;;  %10578 = vmatprep.mubr.bf16.mxu0 %v21019_v13  ;;  %v18112_v20 = vld [vmem:[%s24148_s2 + $0xd38] ss:$28 sps:$4 sm:$0xff]  }
 0x47d   :  { %10244 = vmatprep.subr.bf16.mxu1 %v18056_v21  ;;  %15519 = vmatprep.subr.bf16.mxu0 %v18057_v23  ;;  %v18109_v21 = vld [vmem:[%s24148_s2 + $0x898] ss:$28 sps:$4 sm:$0xff]  }
 0x47e   :  { %v18113_v23 = vld [vmem:[%s24148_s2 + $0xb78] ss:$28 sps:$4 sm:$0xff]  }
 0x47f   :  { %10245 = vmatpush1.bf16.msra.mxu1 %v18054_v27  ;;  %v18116_v27 = vld [vmem:[%s24148_s2 + $0x8d4] ss:$28 sps:$4 sm:$0xff]  }
 0x480   :  { %15520 = vmatpush3.bf16.msra.mxu0 %v18058_v28  ;;  %10246 = vmatprep.subr.bf16.mxu1 %v18061_v43  ;;  %v18117_v28 = vld [vmem:[%s24148_s2 + $0xd70] ss:$28 sps:$4 sm:$0xff]  }
 0x481   :  { %15521 = vmatprep.subr.bf16.mxu0 %v18062_v30  ;;  %v18114_v43 = vld [vmem:[%s24148_s2 + $0x8d0] ss:$28 sps:$4 sm:$0xff]  }
 0x482   :  { %v18118_v30 = vld [vmem:[%s24148_s2 + $0xbb0] ss:$28 sps:$4 sm:$0xff]  }
 0x483   :  { %10247 = vmatpush1.bf16.msra.mxu1 %v18059_v31  ;;  %v18121_v31 = vld [vmem:[%s24148_s2 + $0x90c] ss:$28 sps:$4 sm:$0xff]  }
 0x484   :  { %15522 = vmatpush3.bf16.msra.mxu0 %v18063_v37  ;;  %10248 = vmatprep.subr.bf16.mxu1 %v18066_v26  ;;  %v18122_v37 = vld [vmem:[%s24148_s2 + $0xda8] ss:$28 sps:$4 sm:$0xff]  }
 0x485   :  { %15523 = vmatprep.subr.bf16.mxu0 %v18067_v44  ;;  %v18119_v26 = vld [vmem:[%s24148_s2 + $0x908] ss:$28 sps:$4 sm:$0xff]  }
 0x486   :  { %v18123_v44 = vld [vmem:[%s24148_s2 + $0xbe8] ss:$28 sps:$4 sm:$0xff]  }
 0x487   :  { %10249 = vmatpush1.bf16.msra.mxu1 %v18064_v36  ;;  %v18126_v36 = vld [vmem:[%s24148_s2 + $0x944] ss:$28 sps:$4 sm:$0xff]  }
 0x488   :  { %15524 = vmatpush3.bf16.msra.mxu0 %v18068_v29  ;;  %10250 = vmatprep.subr.bf16.mxu1 %v18071_v49  ;;  %v18127_v29 = vld [vmem:[%s24148_s2 + $0xde0] ss:$28 sps:$4 sm:$0xff]  }
 0x489   :  { %15525 = vmatprep.subr.bf16.mxu0 %v18072_v45  ;;  %v18124_v49 = vld [vmem:[%s24148_s2 + $0x940] ss:$28 sps:$4 sm:$0xff]  }
 0x48a   :  { %v18128_v45 = vld [vmem:[%s24148_s2 + $0xc20] ss:$28 sps:$4 sm:$0xff]  }
 0x48b   :  { %10251 = vmatpush1.bf16.msra.mxu1 %v18069_v47  ;;  %v18131_v47 = vld [vmem:[%s24148_s2 + $0x97c] ss:$28 sps:$4 sm:$0xff]  }
 0x48c   :  { %15526 = vmatpush3.bf16.msra.mxu0 %v18073_v48  ;;  %10261 = vmatprep.subr.bf16.mxu1 %v18076_v50  ;;  %v18132_v48 = vld [vmem:[%s24148_s2 + $0xfd8] ss:$28 sps:$4 sm:$0xff]  }
 0x48d   :  { %15527 = vmatprep.subr.bf16.mxu0 %v18077_v51  ;;  %v18129_v50 = vld [vmem:[%s24148_s2 + $0x978] ss:$28 sps:$4 sm:$0xff]  }
 0x48e   :  { %10253 = vmatmul.mubr.bf16.vlgmr.msra.gmra.mrb[24].mxu1 %v21017_v12  ;;  %v18087_v12 = vld [vmem:[%s24148_s2 + $0xa60] ss:$28 sps:$4 sm:$0xff]   ;;  %v18133_v51 = vld [vmem:[%s24148_s2 + $0xe18] ss:$28 sps:$4 sm:$0xff]  }
 0x48f   :  { %10262 = vmatpush1.bf16.msra.mxu1 %v18074_v16  ;;  %10293 = vmatprep.mubr.bf16.mxu1 %v21019_v13  ;;  %v18084_v13 = vld [vmem:[%s24148_s2 + $0x780] ss:$28 sps:$4 sm:$0xff]   ;;  %v18136_v16 = vld [vmem:[%s24148_s2 + $0x9b4] ss:$28 sps:$4 sm:$0xff]  }
 0x490   :  { %15528 = vmatpush3.bf16.msra.mxu0 %v18078_v52  ;;  %10263 = vmatprep.subr.bf16.mxu1 %v18081_v33  ;;  %v18137_v52 = vld [vmem:[%s24148_s2 + $0x1010] ss:$28 sps:$4 sm:$0xff]  }
 0x491   :  { %15529 = vmatprep.subr.bf16.mxu0 %v18082_v6  ;;  %v18134_v33 = vld [vmem:[%s24148_s2 + $0x9b0] ss:$28 sps:$4 sm:$0xff]  }
 0x492   :  { %v18138_v6 = vld [vmem:[%s24148_s2 + $0xe50] ss:$28 sps:$4 sm:$0xff]  }
 0x493   :  { %10264 = vmatpush1.bf16.msra.mxu1 %v18079_v41  ;;  %v18141_v41 = vld [vmem:[%s24148_s2 + $0x9ec] ss:$28 sps:$4 sm:$0xff]  }
 0x494   :  { %15530 = vmatpush3.bf16.msra.mxu0 %v18083_v19  ;;  %10265 = vmatprep.subr.bf16.mxu1 %v18086_v22  ;;  %v18142_v19 = vld [vmem:[%s24148_s2 + $0x1048] ss:$28 sps:$4 sm:$0xff]  }
 0x495   :  { %15531 = vmatprep.subr.bf16.mxu0 %v18087_v12  ;;  %v18139_v22 = vld [vmem:[%s24148_s2 + $0x9e8] ss:$28 sps:$4 sm:$0xff]  }
 0x496   :  { %v18143_v12 = vld [vmem:[%s24148_s2 + $0xe88] ss:$28 sps:$4 sm:$0xff]  }
 0x497   :  { %10266 = vmatpush1.bf16.msra.mxu1 %v18084_v13  ;;  %v18146_v13 = vld [vmem:[%s24148_s2 + $0xa24] ss:$28 sps:$4 sm:$0xff]  }
 0x498   :  { %15532 = vmatpush3.bf16.msra.mxu0 %v18088_v54  ;;  %10267 = vmatprep.subr.bf16.mxu1 %v18091_v46  ;;  %v18147_v54 = vld [vmem:[%s24148_s2 + $0x1080] ss:$28 sps:$4 sm:$0xff]  }
 0x499   :  { %15539 = vmatprep.subr.bf16.mxu0 %v18092_v4  ;;  %v18144_v46 = vld [vmem:[%s24148_s2 + $0xa20] ss:$28 sps:$4 sm:$0xff]  }
 0x49a   :  { %v18148_v4 = vld [vmem:[%s24148_s2 + $0xec0] ss:$28 sps:$4 sm:$0xff]  }
 0x49b   :  { %10579 = vmatmul.mubr.bf16.vlgmr.msra.gmra.mrb[36].mxu0 %v21244_v0  ;;  %10268 = vmatpush1.bf16.msra.mxu1 %v18089_v56  ;;  %v18151_v56 = vld [vmem:[%s24148_s2 + $0xa5c] ss:$28 sps:$4 sm:$0xff]  }
 0x49c   :  { %15540 = vmatpush3.bf16.msra.mxu0 %v18093_v18  ;;  %10618 = vmatprep.mubr.bf16.mxu0 %v21246_v1  ;;  %v18152_v18 = vld [vmem:[%s24148_s2 + $0x10b8] ss:$28 sps:$4 sm:$0xff]  }
 0x49d   :  { %10269 = vmatprep.subr.bf16.mxu1 %v18096_v58  ;;  %15541 = vmatprep.subr.bf16.mxu0 %v18097_v24  ;;  %v18149_v58 = vld [vmem:[%s24148_s2 + $0xa58] ss:$28 sps:$4 sm:$0xff]  }
 0x49e   :  { %v18153_v24 = vld [vmem:[%s24148_s2 + $0xef8] ss:$28 sps:$4 sm:$0xff]  }
 0x49f   :  { %10270 = vmatpush1.bf16.msra.mxu1 %v18094_v59  ;;  %v18156_v59 = vld [vmem:[%s24148_s2 + $0xa94] ss:$28 sps:$4 sm:$0xff]  }
 0x4a0   :  { %15542 = vmatpush3.bf16.msra.mxu0 %v18098_v62  ;;  %10271 = vmatprep.subr.bf16.mxu1 %v18101_v2  ;;  %v18157_v62 = vld [vmem:[%s24148_s2 + $0x10f0] ss:$28 sps:$4 sm:$0xff]  }
 0x4a1   :  { %15543 = vmatprep.subr.bf16.mxu0 %v18102_v8  ;;  %v18154_v2 = vld [vmem:[%s24148_s2 + $0xa90] ss:$28 sps:$4 sm:$0xff]  }
 0x4a2   :  { %v18158_v8 = vld [vmem:[%s24148_s2 + $0xf30] ss:$28 sps:$4 sm:$0xff]  }
 0x4a3   :  { %10272 = vmatpush1.bf16.msra.mxu1 %v18099_v3  ;;  %v18161_v3 = vld [vmem:[%s24148_s2 + $0xacc] ss:$28 sps:$4 sm:$0xff]  }
 0x4a4   :  { %15544 = vmatpush3.bf16.msra.mxu0 %v18103_v7  ;;  %10273 = vmatprep.subr.bf16.mxu1 %v18106_v60  ;;  %v18162_v7 = vld [vmem:[%s24148_s2 + $0x1128] ss:$28 sps:$4 sm:$0xff]  }
 0x4a5   :  { %15545 = vmatprep.subr.bf16.mxu0 %v18107_v57  ;;  %v18159_v60 = vld [vmem:[%s24148_s2 + $0xac8] ss:$28 sps:$4 sm:$0xff]  }
 0x4a6   :  { %v18163_v57 = vld [vmem:[%s24148_s2 + $0xf68] ss:$28 sps:$4 sm:$0xff]  }
 0x4a7   :  { %10274 = vmatpush1.bf16.msra.mxu1 %v18104_v9  ;;  %v18166_v9 = vld [vmem:[%s24148_s2 + $0xb04] ss:$28 sps:$4 sm:$0xff]  }
 0x4a8   :  { %15546 = vmatpush3.bf16.msra.mxu0 %v18108_v17  ;;  %10275 = vmatprep.subr.bf16.mxu1 %v18111_v38  ;;  %v18168_v17 = vld [vmem:[%s24148_s2 + $0xfa0] ss:$28 sps:$4 sm:$0xff]  }
 0x4a9   :  { %15547 = vmatprep.subr.bf16.mxu0 %v18112_v20  ;;  %v18171_v38 = vld [vmem:[%s24148_s2 + $0xb3c] ss:$28 sps:$4 sm:$0xff]  }
 0x4aa   :  { %v18172_v20 = vld [vmem:[%s24148_s2 + $0x1358] ss:$28 sps:$4 sm:$0xff]  }
 0x4ab   :  { %10276 = vmatpush1.bf16.msra.mxu1 %v18109_v21  ;;  %v18169_v21 = vld [vmem:[%s24148_s2 + $0xb38] ss:$28 sps:$4 sm:$0xff]  }
 0x4ac   :  { %15548 = vmatpush3.bf16.msra.mxu0 %v18113_v23  ;;  %10277 = vmatprep.subr.bf16.mxu1 %v18116_v27  ;;  %v18173_v23 = vld [vmem:[%s24148_s2 + $0x1198] ss:$28 sps:$4 sm:$0xff]  }
 0x4ad   :  { %15549 = vmatprep.subr.bf16.mxu0 %v18117_v28  ;;  %v18176_v27 = vld [vmem:[%s24148_s2 + $0xb74] ss:$28 sps:$4 sm:$0xff]  }
 0x4ae   :  { %v18177_v28 = vld [vmem:[%s24148_s2 + $0x1390] ss:$28 sps:$4 sm:$0xff]  }
 0x4af   :  { %10278 = vmatpush1.bf16.msra.mxu1 %v18114_v43  ;;  %v18174_v43 = vld [vmem:[%s24148_s2 + $0xb70] ss:$28 sps:$4 sm:$0xff]  }
 0x4b0   :  { %15550 = vmatpush3.bf16.msra.mxu0 %v18118_v30  ;;  %10279 = vmatprep.subr.bf16.mxu1 %v18121_v31  ;;  %v18178_v30 = vld [vmem:[%s24148_s2 + $0x11d0] ss:$28 sps:$4 sm:$0xff]  }
 0x4b1   :  { %15551 = vmatprep.subr.bf16.mxu0 %v18122_v37  ;;  %v14526_v31 = vld [vmem:[%s24150_s4 + $0x1] ss:$8 sm:$0xf] }
 0x4b2   :  { %v14527_v37 = vld [vmem:[%s24150_s4 + $0x1] ss:$8 sm:$0x70] }
 0x4b3   :  { %10280 = vmatpush1.bf16.msra.mxu1 %v18119_v26  ;;  %v18181_v26 = vld [vmem:[%s24148_s2 + $0xbac] ss:$28 sps:$4 sm:$0xff]  }
 0x4b4   :  { %15552 = vmatpush3.bf16.msra.mxu0 %v18123_v44  ;;  %10281 = vmatprep.subr.bf16.mxu1 %v18126_v36  ;;  %v18182_v44 = vld [vmem:[%s24148_s2 + $0x13c8] ss:$28 sps:$4 sm:$0xff]   ;;  %v22560_v36 = vor.u32 %v14527_v37, %v14526_v31 }
 0x4b5   :  { %15553 = vmatprep.subr.bf16.mxu0 %v18127_v29  ;;  %v18179_v29 = vld [vmem:[%s24148_s2 + $0xba8] ss:$28 sps:$4 sm:$0xff]  }
 0x4b6   :  { %v10746_v31 = vld [vmem:[%s24151_s5] sm:$0xff]  ;;  %v10747_v37 = vld [vmem:[%s24151_s5 + $0x8] sm:$0xff] }
 0x4b7   :  { %10282 = vmatpush1.bf16.msra.mxu1 %v18124_v49  ;;  %v18183_v49 = vld [vmem:[%s24148_s2 + $0x1208] ss:$28 sps:$4 sm:$0xff]  }
 0x4b8   :  { %15554 = vmatpush3.bf16.msra.mxu0 %v18128_v45  ;;  %10283 = vmatprep.subr.bf16.mxu1 %v18131_v47  ;;  %v18186_v45 = vld [vmem:[%s24148_s2 + $0xbe4] ss:$28 sps:$4 sm:$0xff]  }
 0x4b9   :  { %15561 = vmatprep.subr.bf16.mxu0 %v18132_v48  ;;  %v18187_v48 = vld [vmem:[%s24148_s2 + $0x1400] ss:$28 sps:$4 sm:$0xff]  }
 0x4bb   :  { %10619 = vmatmul.mubr.bf16.vlgmr.msra.gmra.mrb[40].mxu0 %v21465_v10  ;;  %10284 = vmatpush1.bf16.msra.mxu1 %v18129_v50 }
 0x4bc   :  { %15562 = vmatpush3.bf16.msra.mxu0 %v18133_v51  ;;  %10658 = vmatprep.mubr.bf16.mxu0 %v21467_v15  ;;  %v6045_v51 = vrot.slane %v22560_v36, %v20547_v63 }
 0x4bd   :  { %10285 = vmatprep.subr.bf16.mxu1 %v18136_v16  ;;  %15563 = vmatprep.subr.bf16.mxu0 %v18137_v52  ;;  %v18184_v52 = vld [vmem:[%s24148_s2 + $0xbe0] ss:$28 sps:$4 sm:$0xff]  }
 0x4bf   :  { %10286 = vmatpush1.bf16.msra.mxu1 %v18134_v33 }
 0x4c0   :  { %15564 = vmatpush3.bf16.msra.mxu0 %v18138_v6  ;;  %10287 = vmatprep.subr.bf16.mxu1 %v18141_v41  ;;  %v18188_v6 = vld [vmem:[%s24148_s2 + $0x1240] ss:$28 sps:$4 sm:$0xff]  }
 0x4c1   :  { %15565 = vmatprep.subr.bf16.mxu0 %v18142_v19  ;;  %v18191_v41 = vld [vmem:[%s24148_s2 + $0xc1c] ss:$28 sps:$4 sm:$0xff]  }
 0x4c2   :  { %v18192_v19 = vld [vmem:[%s24148_s2 + $0x1438] ss:$28 sps:$4 sm:$0xff]  }
 0x4c3   :  { %10288 = vmatpush1.bf16.msra.mxu1 %v18139_v22 }
 0x4c4   :  { %15566 = vmatpush3.bf16.msra.mxu0 %v18143_v12  ;;  %10289 = vmatprep.subr.bf16.mxu1 %v18146_v13  ;;  %v18189_v12 = vld [vmem:[%s24148_s2 + $0xc18] ss:$28 sps:$4 sm:$0xff]  }
 0x4c5   :  { %15567 = vmatprep.subr.bf16.mxu0 %v18147_v54  ;;  %v18193_v13 = vld [vmem:[%s24148_s2 + $0x1278] ss:$28 sps:$4 sm:$0xff]  }
 0x4c6   :  { %v18196_v54 = vld [vmem:[%s24148_s2 + $0xc54] ss:$28 sps:$4 sm:$0xff]  }
 0x4c7   :  { %10290 = vmatpush1.bf16.msra.mxu1 %v18144_v46  ;;  %v18197_v46 = vld [vmem:[%s24148_s2 + $0x1470] ss:$28 sps:$4 sm:$0xff]  }
 0x4c8   :  { %15568 = vmatpush3.bf16.msra.mxu0 %v18148_v4  ;;  %10291 = vmatprep.subr.bf16.mxu1 %v18151_v56  ;;  %v18194_v56 = vld [vmem:[%s24148_s2 + $0xc50] ss:$28 sps:$4 sm:$0xff]  }
 0x4c9   :  { %15569 = vmatprep.subr.bf16.mxu0 %v18152_v18  ;;  %v18198_v18 = vld [vmem:[%s24148_s2 + $0x12b0] ss:$28 sps:$4 sm:$0xff]  }
 0x4cb   :  { %10292 = vmatpush1.bf16.msra.mxu1 %v18149_v58  ;;  %v18201_v58 = vld [vmem:[%s24148_s2 + $0xc8c] ss:$28 sps:$4 sm:$0xff]  }
 0x4cc   :  { %15570 = vmatpush3.bf16.msra.mxu0 %v18153_v24  ;;  %10302 = vmatprep.subr.bf16.mxu1 %v18156_v59  ;;  %v18202_v24 = vld [vmem:[%s24148_s2 + $0x14a8] ss:$28 sps:$4 sm:$0xff]  }
 0x4cd   :  { %15571 = vmatprep.subr.bf16.mxu0 %v18157_v62  ;;  %v18199_v62 = vld [vmem:[%s24148_s2 + $0xc88] ss:$28 sps:$4 sm:$0xff]  }
 0x4ce   :  { %10294 = vmatmul.mubr.bf16.vlgmr.msra.gmra.mrb[24].mxu1 %v21244_v0  ;;  %v18167_v0 = vld [vmem:[%s24148_s2 + $0x1160] ss:$28 sps:$4 sm:$0xff]  }
 0x4cf   :  { %10303 = vmatpush1.bf16.msra.mxu1 %v18154_v2  ;;  %10334 = vmatprep.mubr.bf16.mxu1 %v21246_v1  ;;  %v18164_v1 = vld [vmem:[%s24148_s2 + $0xb00] ss:$28 sps:$4 sm:$0xff]   ;;  %v18203_v2 = vld [vmem:[%s24148_s2 + $0x12e8] ss:$28 sps:$4 sm:$0xff]  }
 0x4d0   :  { %15572 = vmatpush3.bf16.msra.mxu0 %v18158_v8  ;;  %10304 = vmatprep.subr.bf16.mxu1 %v18161_v3  ;;  %v18206_v8 = vld [vmem:[%s24148_s2 + $0xcc4] ss:$28 sps:$4 sm:$0xff]  }
 0x4d1   :  { %15573 = vmatprep.subr.bf16.mxu0 %v18162_v7  ;;  %v18207_v3 = vld [vmem:[%s24148_s2 + $0x14e0] ss:$28 sps:$4 sm:$0xff]  }
 0x4d3   :  { %10305 = vmatpush1.bf16.msra.mxu1 %v18159_v60  ;;  %v18204_v60 = vld [vmem:[%s24148_s2 + $0xcc0] ss:$28 sps:$4 sm:$0xff]  }
 0x4d4   :  { %15574 = vmatpush3.bf16.msra.mxu0 %v18163_v57  ;;  %10306 = vmatprep.subr.bf16.mxu1 %v18166_v9  ;;  %v18208_v57 = vld [vmem:[%s24148_s2 + $0x1320] ss:$28 sps:$4 sm:$0xff]  }
 0x4d5   :  { %15575 = vmatprep.subr.bf16.mxu0 %v18167_v0  ;;  %v18211_v9 = vld [vmem:[%s24148_s2 + $0xcfc] ss:$28 sps:$4 sm:$0xff]  }
 0x4d7   :  { %10307 = vmatpush1.bf16.msra.mxu1 %v18164_v1  ;;  %v18209_v1 = vld [vmem:[%s24148_s2 + $0xcf8] ss:$28 sps:$4 sm:$0xff]  }
 0x4d8   :  { %15576 = vmatpush3.bf16.msra.mxu0 %v18168_v17  ;;  %10308 = vmatprep.subr.bf16.mxu1 %v18171_v38  ;;  %v18212_v17 = vld [vmem:[%s24148_s2 + $0x1518] ss:$28 sps:$4 sm:$0xff]  }
 0x4d9   :  { %15583 = vmatprep.subr.bf16.mxu0 %v18172_v20  ;;  %v18215_v38 = vld [vmem:[%s24148_s2 + $0xd34] ss:$28 sps:$4 sm:$0xff]   ;;  %v10762_v20 = vld [vmem:[%s24151_s5 + $0x80] sm:$0xff] }
 0x4db   :  { %10659 = vmatmul.mubr.bf16.vlgmr.msra.gmra.mrb[44].mxu0 %v21665_v55  ;;  %10309 = vmatpush1.bf16.msra.mxu1 %v18169_v21  ;;  %v10763_v21 = vld [vmem:[%s24151_s5 + $0x88] sm:$0xff] }
 0x4dc   :  { %15584 = vmatpush3.bf16.msra.mxu0 %v18173_v23  ;;  %10698 = vmatprep.mubr.bf16.mxu0 %v21673_v5 }
 0x4dd   :  { %10310 = vmatprep.subr.bf16.mxu1 %v18176_v27  ;;  %15585 = vmatprep.subr.bf16.mxu0 %v18177_v28  ;;  %v18213_v27 = vld [vmem:[%s24148_s2 + $0xd30] ss:$28 sps:$4 sm:$0xff]  }
 0x4de   :  { %v18216_v28 = vld [vmem:[%s24148_s2 + $0x1550] ss:$28 sps:$4 sm:$0xff]  }
 0x4df   :  { %10311 = vmatpush1.bf16.msra.mxu1 %v18174_v43  ;;  %v18219_v43 = vld [vmem:[%s24148_s2 + $0xd6c] ss:$28 sps:$4 sm:$0xff]  }
 0x4e0   :  { %15586 = vmatpush3.bf16.msra.mxu0 %v18178_v30  ;;  %10312 = vmatprep.subr.bf16.mxu1 %v18181_v26  ;;  %v22668_v30 = vpack.c.bf16 %v10763_v21, %v10762_v20  ;;  %v10754_v20 = vld [vmem:[%s24151_s5 + $0x40] sm:$0xff]  ;;  %v10755_v21 = vld [vmem:[%s24151_s5 + $0x48] sm:$0xff] }
 0x4e1   :  { %v22571_v47 = vpop.f32.mrb[20].mxu1  ;;  %15587 = vmatprep.subr.bf16.mxu0 %v18182_v44  ;;  %v10764_v44 = vld [vmem:[%s24151_s5 + $0x90] sm:$0xff] }
 0x4e2   :  { %v9887_v50 = vpop.f32.mrb[21].mxu1 }
 0x4e3   :  { %10313 = vmatpush1.bf16.msra.mxu1 %v18179_v29  ;;  %v9889_v16 = vpop.f32.mrb[22].mxu1  ;;  %v22590_v22 = vadd.f32 %v9887_v50, %v6045_v51  ;;  %v10765_v29 = vld [vmem:[%s24151_s5 + $0x98] sm:$0xff]  ;;  %v10748_v51 = vld [vmem:[%s24151_s5 + $0x10] sm:$0xff] }
 0x4e4   :  { %15588 = vmatpush3.bf16.msra.mxu0 %v18183_v49  ;;  %v9890_v33 = vpop.f32.mrb[23].mxu1  ;;  %10314 = vmatprep.subr.bf16.mxu1 %v18186_v45  ;;  %v18217_v49 = vld [vmem:[%s24148_s2 + $0xd68] ss:$28 sps:$4 sm:$0xff]   ;;  %v22685_v45 = vpack.c.bf16 %v10747_v37, %v10746_v31  ;;  %v22691_v50 = vpack.c.bf16 %v10765_v29, %v10764_v44  ;;  %v10749_v16 = vld [vmem:[%s24151_s5 + $0x18] sm:$0xff]  ;;  %v22798_v37 = vpack.c.bf16 %v10755_v21, %v10754_v20 }
 0x4e5   :  { %15589 = vmatprep.subr.bf16.mxu0 %v18187_v48  ;;  %24184 = vst [vmem:[#allocation8_spill] sm:$0xff] %v22590_v22  ;;  %v10866_v4 = vsel %vm10858_vm3, %v22590_v22, 0.0  ;;  %v18222_v48 = vld [vmem:[%s24148_s2 + $0xda4] ss:$28 sps:$4 sm:$0xff]   ;;  %v10795_v20 = vld [vmem:[%s24151_s5 + $0x188] sm:$0xff] }
 0x4e6   :  { %v10867_v59 = vrot.slane %v10866_v4, 4 }
 0x4e7   :  { %10315 = vmatpush1.bf16.msra.mxu1 %v18184_v52  ;;  %v6041_v52 = vrot.slane %v22560_v36, %v20759_v25 }
 0x4e8   :  { %15590 = vmatpush3.bf16.msra.mxu0 %v18188_v6  ;;  %10316 = vmatprep.subr.bf16.mxu1 %v18191_v41  ;;  %v10868_v7 = vadd.f32 %v10867_v59, %v10866_v4  ;;  %v10766_v6 = vld [vmem:[%s24151_s5 + $0xa0] sm:$0xff]  ;;  %v10767_v41 = vld [vmem:[%s24151_s5 + $0xa8] sm:$0xff] }
 0x4e9   :  { %15591 = vmatprep.subr.bf16.mxu0 %v18192_v19  ;;  %v18220_v19 = vld [vmem:[%s24148_s2 + $0xda0] ss:$28 sps:$4 sm:$0xff]   ;;  %v10751_v4 = vld [vmem:[%s24151_s5 + $0x28] sm:$0xff] }
 0x4ea   :  { %v10869_v0 = vrot.slane %v10868_v7, 2 }
 0x4eb   :  { %10317 = vmatpush1.bf16.msra.mxu1 %v18189_v12  ;;  %v22713_v12 = vpack.c.bf16 %v10749_v16, %v10748_v51  ;;  %v10774_v16 = vld [vmem:[%s24151_s5 + $0xe0] sm:$0xff] }
 0x4ec   :  { %15592 = vmatpush3.bf16.msra.mxu0 %v18193_v13  ;;  %10318 = vmatprep.subr.bf16.mxu1 %v18196_v54  ;;  %v10870_v23 = vadd.f32 %v10869_v0, %v10868_v7  ;;  %v18225_v13 = vld [vmem:[%s24148_s2 + $0xddc] ss:$28 sps:$4 sm:$0xff]   ;;  %v22719_v54 = vpack.c.bf16 %v10767_v41, %v10766_v6  ;;  %v10770_v7 = vld [vmem:[%s24151_s5 + $0xc0] sm:$0xff] }
 0x4ed   :  { %15593 = vmatprep.subr.bf16.mxu0 %v18197_v46  ;;  %v10750_v46 = vld [vmem:[%s24151_s5 + $0x20] sm:$0xff] }
 0x4ee   :  { %v10871_v26 = vrot.slane %v10870_v23, 1  ;;  %v22740_v59 = vpack.c.bf16 %v10751_v4, %v10750_v46  ;;  %v18232_v6 = vld [vmem:[%s24148_s2 + $0xe80] ss:$28 sps:$4 sm:$0xff]  }
 0x4ef   :  { %10319 = vmatpush1.bf16.msra.mxu1 %v18194_v56  ;;  %v22728_v56 = vadd.f32 %v22571_v47, %v6041_v52  ;;  %v18228_v47 = vld [vmem:[%s24148_s2 + $0xe14] ss:$28 sps:$4 sm:$0xff]   ;;  %v10775_v52 = vld [vmem:[%s24151_s5 + $0xe8] sm:$0xff] }
 0x4f0   :  { %15594 = vmatpush3.bf16.msra.mxu0 %v18198_v18  ;;  %10320 = vmatprep.subr.bf16.mxu1 %v18201_v58  ;;  %v10872_v33 = vadd.f32 %v10871_v26, %v10870_v23  ;;  %v10768_v18 = vld [vmem:[%s24151_s5 + $0xb0] sm:$0xff]  ;;  %v10769_v58 = vld [vmem:[%s24151_s5 + $0xb8] sm:$0xff]  ;;  %v18234_v26 = vld [vmem:[%s24148_s2 + $0xe84] ss:$28 sps:$4 sm:$0xff]   ;;  %v22830_v4 = vpack.c.bf16 %v10775_v52, %v10774_v16 }
 0x4f1   :  { %15595 = vmatprep.subr.bf16.mxu0 %v18202_v24  ;;  %v18223_v24 = vld [vmem:[%s24148_s2 + $0xdd8] ss:$28 sps:$4 sm:$0xff]  }
 0x4f2   :  { %v10772_v23 = vld [vmem:[%s24151_s5 + $0xd0] sm:$0xff] }
 0x4f3   :  { %10321 = vmatpush1.bf16.msra.mxu1 %v18199_v62  ;;  %v22746_v62 = vpack.c.bf16 %v10769_v58, %v10768_v18  ;;  %v10758_v18 = vld [vmem:[%s24151_s5 + $0x60] sm:$0xff]  ;;  %v10759_v58 = vld [vmem:[%s24151_s5 + $0x68] sm:$0xff] }
 0x4f4   :  { %15596 = vmatpush3.bf16.msra.mxu0 %v18203_v2  ;;  %10322 = vmatprep.subr.bf16.mxu1 %v18206_v8  ;;  %v10752_v2 = vld [vmem:[%s24151_s5 + $0x30] sm:$0xff]  ;;  %v10753_v8 = vld [vmem:[%s24151_s5 + $0x38] sm:$0xff] }
 0x4f5   :  { %15597 = vmatprep.subr.bf16.mxu0 %v18207_v3  ;;  %v10859_v3 = vsel %vm10858_vm3, %v22728_v56, 0.0  ;;  %v22768_v0 = vpack.c.bf16 %v10753_v8, %v10752_v2  ;;  %v18235_v2 = vld [vmem:[%s24148_s2 + $0xeb8] ss:$28 sps:$4 sm:$0xff]  }
 0x4f7   :  { %10323 = vmatpush1.bf16.msra.mxu1 %v18204_v60  ;;  %v10771_v60 = vld [vmem:[%s24151_s5 + $0xc8] sm:$0xff] }
 0x4f8   :  { %15598 = vmatpush3.bf16.msra.mxu0 %v18208_v57  ;;  %10324 = vmatprep.subr.bf16.mxu1 %v18211_v9  ;;  %v18226_v57 = vld [vmem:[%s24148_s2 + $0xe10] ss:$28 sps:$4 sm:$0xff]   ;;  %v6053_v9 = vrot.slane %v22560_v36, %v19914_v35 }
 0x4f9   :  { %15938 = vmatprep.subr.bf16.mxu0 %v24157_v11 }
 0x4fb   :  { %10699 = vmatmul.mubr.bf16.vlgmr.msra.gmra.mrb[48].mxu0 %v21866_v32  ;;  %10325 = vmatpush1.bf16.msra.mxu1 %v18209_v1  ;;  %v18231_v1 = vld [vmem:[%s24148_s2 + $0xe4c] ss:$28 sps:$4 sm:$0xff]  }
 0x4fc   :  { %15939 = vmatpush3.bf16.msra.mxu0 %v18212_v17  ;;  %10326 = vmatprep.subr.bf16.mxu1 %v18215_v38  ;;  %v10860_v17 = vrot.slane %v10859_v3, 4  ;;  %v22774_v38 = vpack.c.bf16 %v10771_v60, %v10770_v7  ;;  %v18240_v7 = vld [vmem:[%s24148_s2 + $0xef4] ss:$28 sps:$4 sm:$0xff]  }
 0x4fd   :  { %15940 = vmatprep.subr.bf16.mxu0 %v24157_v11  ;;  %15942 = vmatprep.mubr.msk.bf16.mxu0 %vm18579_vm1, %v24157_v11 }
 0x4fe   :  { %v10861_v44 = vadd.f32 %v10860_v17, %v10859_v3  ;;  %v22848_v3 = vpack.c.bf16 %v10759_v58, %v10758_v18  ;;  %v10794_v17 = vld [vmem:[%s24151_s5 + $0x180] sm:$0xff] }
 0x4ff   :  { %10327 = vmatpush1.bf16.msra.mxu1 %v18213_v27  ;;  %v10773_v27 = vld [vmem:[%s24151_s5 + $0xd8] sm:$0xff]  ;;  %v10798_v58 = vld [vmem:[%s24151_s5 + $0x1a0] sm:$0xff] }
 0x500   :  { %15941 = vmatpush3.bf16.msra.mxu0 %v18216_v28  ;;  %10328 = vmatprep.subr.bf16.mxu1 %v18219_v43  ;;  %v18229_v43 = vld [vmem:[%s24148_s2 + $0xe48] ss:$28 sps:$4 sm:$0xff]  }
 0x501   :  { %16009 = vmatprep.subr.bf16.mxu0 %v22668_v30 }
 0x503   :  { %15943 = vmatmul.mubr.msk.bf16.vlgmr.msra.gmra.mrb[52].mxu0 %vm9601_vm2, %v21901_v53  ;;  %10329 = vmatpush1.bf16.msra.mxu1 %v18217_v49  ;;  %v10756_v49 = vld [vmem:[%s24151_s5 + $0x50] sm:$0xff] }
 0x504   :  { %16011 = vmatpush3.bf16.msra.mxu0 %v22685_v45  ;;  %10976 = vmatprep.mubr.f32.mxu0 %v10872_v33 }
 0x505   :  { %10330 = vmatprep.subr.bf16.mxu1 %v18222_v48  ;;  %16013 = vmatprep.subr.bf16.mxu0 %v22691_v50  ;;  %v10757_v48 = vld [vmem:[%s24151_s5 + $0x58] sm:$0xff] }
 0x506   :  { %v22824_v41 = vpack.c.bf16 %v10757_v48, %v10756_v49  ;;  %v10796_v49 = vld [vmem:[%s24151_s5 + $0x190] sm:$0xff]  ;;  %v10797_v48 = vld [vmem:[%s24151_s5 + $0x198] sm:$0xff] }
 0x507   :  { %10331 = vmatpush1.bf16.msra.mxu1 %v18220_v19  ;;  %v18237_v19 = vld [vmem:[%s24148_s2 + $0xebc] ss:$28 sps:$4 sm:$0xff]  }
 0x508   :  { %16015 = vmatpush3.bf16.msra.mxu0 %v22713_v12  ;;  %10332 = vmatprep.subr.bf16.mxu1 %v18225_v13  ;;  %v10862_v13 = vrot.slane %v10861_v44, 2 }
 0x509   :  { %16017 = vmatprep.subr.bf16.mxu0 %v22719_v54 }
 0x50a   :  { %v10863_v60 = vadd.f32 %v10862_v13, %v10861_v44  ;;  %v10779_v44 = vld [vmem:[%s24151_s5 + $0x108] sm:$0xff]  ;;  %v10781_v13 = vld [vmem:[%s24151_s5 + $0x118] sm:$0xff] }
 0x50b   :  { %10333 = vmatpush1.bf16.msra.mxu1 %v18223_v24  ;;  %v10776_v24 = vld [vmem:[%s24151_s5 + $0xf0] sm:$0xff] }
 0x50c   :  { %16019 = vmatpush3.bf16.msra.mxu0 %v22740_v59  ;;  %10343 = vmatprep.subr.bf16.mxu1 %v18228_v47  ;;  %v10777_v47 = vld [vmem:[%s24151_s5 + $0xf8] sm:$0xff] }
 0x50d   :  { %16021 = vmatprep.subr.bf16.mxu0 %v22746_v62 }
 0x50e   :  { %v22782_v35 = vpop.f32.mrb[24].mxu0  ;;  %10335 = vmatmul.mubr.bf16.vlgmr.msra.gmra.mrb[24].mxu1 %v21465_v10 }
 0x50f   :  { %v10174_v28 = vpop.f32.mrb[25].mxu0  ;;  %10344 = vmatpush1.bf16.msra.mxu1 %v18226_v57  ;;  %10375 = vmatprep.mubr.bf16.mxu1 %v21467_v15  ;;  %v22804_v15 = vpack.c.bf16 %v10773_v27, %v10772_v23  ;;  %v22854_v57 = vpack.c.bf16 %v10777_v47, %v10776_v24  ;;  %v18238_v23 = vld [vmem:[%s24148_s2 + $0xef0] ss:$28 sps:$4 sm:$0xff]   ;;  %v18244_v47 = vld [vmem:[%s24148_s2 + $0xf60] ss:$28 sps:$4 sm:$0xff]  }
 0x510   :  { %v22795_v31 = vadd.f32 %v10174_v28, %v6053_v9  ;;  %16023 = vmatpush3.bf16.msra.mxu0 %v22768_v0  ;;  %v10176_v10 = vpop.f32.mrb[26].mxu0  ;;  %10345 = vmatprep.subr.bf16.mxu1 %v18231_v1  ;;  %v10760_v9 = vld [vmem:[%s24151_s5 + $0x70] sm:$0xff]  ;;  %v10761_v1 = vld [vmem:[%s24151_s5 + $0x78] sm:$0xff]  ;;  %v18243_v28 = vld [vmem:[%s24148_s2 + $0xf2c] ss:$28 sps:$4 sm:$0xff]  }
 0x511   :  { %v10177_v29 = vpop.f32.mrb[27].mxu0  ;;  %16025 = vmatprep.subr.bf16.mxu0 %v22774_v38  ;;  %v22872_v27 = vpack.c.bf16 %v10761_v1, %v10760_v9  ;;  %v22878_v10 = vpack.c.bf16 %v10795_v20, %v10794_v17  ;;  %v10799_v24 = vld [vmem:[%s24151_s5 + $0x1a8] sm:$0xff]  ;;  %v10800_v17 = vld [vmem:[%s24151_s5 + $0x1b0] sm:$0xff]  ;;  %v10801_v20 = vld [vmem:[%s24151_s5 + $0x1b8] sm:$0xff] }
 0x512   :  { %v10880_v51 = vsel %vm10858_vm3, %v22795_v31, 0.0  ;;  %v10783_v9 = vld [vmem:[%s24151_s5 + $0x128] sm:$0xff] }
 0x513   :  { %v10881_v33 = vrot.slane %v10880_v51, 4  ;;  %10346 = vmatpush1.bf16.msra.mxu1 %v18229_v43  ;;  %v10864_v43 = vrot.slane %v10863_v60, 1 }
 0x514   :  { %16027 = vmatpush3.bf16.msra.mxu0 %v22798_v37  ;;  %10347 = vmatprep.subr.bf16.mxu1 %v18234_v26  ;;  %v10778_v26 = vld [vmem:[%s24151_s5 + $0x100] sm:$0xff] }
 0x515   :  { %v10882_v46 = vadd.f32 %v10881_v33, %v10880_v51  ;;  %16029 = vmatprep.subr.bf16.mxu0 %v22804_v15  ;;  %v18241_v51 = vld [vmem:[%s24148_s2 + $0xf28] ss:$28 sps:$4 sm:$0xff]   ;;  %v22896_v16 = vpack.c.bf16 %v10779_v44, %v10778_v26  ;;  %v10865_v52 = vadd.f32 %v10864_v43, %v10863_v60  ;;  %v10784_v43 = vld [vmem:[%s24151_s5 + $0x130] sm:$0xff]  ;;  %v10785_v26 = vld [vmem:[%s24151_s5 + $0x138] sm:$0xff] }
 0x516   :  { %v18246_v33 = vld [vmem:[%s24148_s2 + $0xf64] ss:$28 sps:$4 sm:$0xff]  }
 0x517   :  { %10348 = vmatpush1.bf16.msra.mxu1 %v18232_v6  ;;  %v10883_v8 = vrot.slane %v10882_v46, 2  ;;  %v22902_v6 = vpack.c.bf16 %v10797_v48, %v10796_v49  ;;  %v10782_v60 = vld [vmem:[%s24151_s5 + $0x120] sm:$0xff]  ;;  %v10803_v49 = vld [vmem:[%s24151_s5 + $0x1c8] sm:$0xff] }
 0x518   :  { %16031 = vmatpush3.bf16.msra.mxu0 %v22824_v41  ;;  %10349 = vmatprep.subr.bf16.mxu1 %v18237_v19  ;;  %v10780_v19 = vld [vmem:[%s24151_s5 + $0x110] sm:$0xff] }
 0x519   :  { %16033 = vmatprep.subr.bf16.mxu0 %v22830_v4  ;;  %v10884_v21 = vadd.f32 %v10883_v8, %v10882_v46  ;;  %v6049_v46 = vrot.slane %v22560_v36, %v19911_v34  ;;  %v18249_v8 = vld [vmem:[%s24148_s2 + $0xf9c] ss:$28 sps:$4 sm:$0xff]   ;;  %v18250_v48 = vld [vmem:[%s24148_s2 + $0xfd0] ss:$28 sps:$4 sm:$0xff]  }
 0x51b   :  { %10350 = vmatpush1.bf16.msra.mxu1 %v18235_v2  ;;  %v10885_v29 = vrot.slane %v10884_v21, 1  ;;  %v22922_v2 = vpack.c.bf16 %v10781_v13, %v10780_v19  ;;  %v22937_v1 = vadd.f32 %v22782_v35, %v6049_v46  ;;  %v18252_v35 = vld [vmem:[%s24148_s2 + $0xfd4] ss:$28 sps:$4 sm:$0xff]   ;;  %v10786_v13 = vld [vmem:[%s24151_s5 + $0x140] sm:$0xff]  ;;  %v10787_v46 = vld [vmem:[%s24151_s5 + $0x148] sm:$0xff] }
 0x51c   :  { %16035 = vmatpush3.bf16.msra.mxu0 %v22848_v3  ;;  %10351 = vmatprep.subr.bf16.mxu1 %v18240_v7  ;;  %v22928_v7 = vpack.c.bf16 %v10799_v24, %v10798_v58  ;;  %v10804_v58 = vld [vmem:[%s24151_s5 + $0x1d0] sm:$0xff]  ;;  %v10805_v24 = vld [vmem:[%s24151_s5 + $0x1d8] sm:$0xff] }
 0x51d   :  { %16037 = vmatprep.subr.bf16.mxu0 %v22854_v57  ;;  %v10886_v18 = vadd.f32 %v10885_v29, %v10884_v21  ;;  %v18247_v21 = vld [vmem:[%s24148_s2 + $0xf98] ss:$28 sps:$4 sm:$0xff]   ;;  %v10873_v44 = vsel %vm10858_vm3, %v22937_v1, 0.0  ;;  %v10802_v29 = vld [vmem:[%s24151_s5 + $0x1c0] sm:$0xff] }
 0x51e   :  { %v22981_v19 = vpack.c.bf16 %v10803_v49, %v10802_v29  ;;  %v10789_v29 = vld [vmem:[%s24151_s5 + $0x158] sm:$0xff]  ;;  %v10806_v49 = vld [vmem:[%s24151_s5 + $0x1e0] sm:$0xff] }
 0x51f   :  { %10352 = vmatpush1.bf16.msra.mxu1 %v18238_v23  ;;  %v22949_v23 = vpack.c.bf16 %v10783_v9, %v10782_v60 }
 0x520   :  { %16039 = vmatpush3.bf16.msra.mxu0 %v22872_v27  ;;  %10353 = vmatprep.subr.bf16.mxu1 %v18243_v28  ;;  %v22955_v28 = vpack.c.bf16 %v10801_v20, %v10800_v17  ;;  %v23001_v17 = vpack.c.bf16 %v10787_v46, %v10786_v13  ;;  %v18258_v20 = vld [vmem:[%s24148_s2 + $0x1044] ss:$28 sps:$4 sm:$0xff]  }
 0x521   :  { %16041 = vmatprep.subr.bf16.mxu0 %v22878_v10 }
 0x523   :  { %10977 = vmatmul.mubr.f32.vlgmr.msra.gmra.mrb[56].mxu0 %v10865_v52  ;;  %10354 = vmatpush1.bf16.msra.mxu1 %v18241_v51  ;;  %v22975_v51 = vpack.c.bf16 %v10785_v26, %v10784_v43  ;;  %v18255_v52 = vld [vmem:[%s24148_s2 + $0x100c] ss:$28 sps:$4 sm:$0xff]   ;;  %v23007_v43 = vpack.c.bf16 %v10805_v24, %v10804_v58  ;;  %v10788_v26 = vld [vmem:[%s24151_s5 + $0x150] sm:$0xff] }
 0x524   :  { %16043 = vmatpush3.bf16.msra.mxu0 %v22896_v16  ;;  %11046 = vmatprep.mubr.f32.mxu0 %v10886_v18  ;;  %v10791_v58 = vld [vmem:[%s24151_s5 + $0x168] sm:$0xff]  ;;  %v10808_v24 = vld [vmem:[%s24151_s5 + $0x1f0] sm:$0xff] }
 0x525   :  { %10355 = vmatprep.subr.bf16.mxu1 %v18246_v33  ;;  %16045 = vmatprep.subr.bf16.mxu0 %v22902_v6  ;;  %v10874_v33 = vrot.slane %v10873_v44, 4 }
 0x527   :  { %10356 = vmatpush1.bf16.msra.mxu1 %v18244_v47 }
 0x528   :  { %16047 = vmatpush3.bf16.msra.mxu0 %v22922_v2  ;;  %10357 = vmatprep.subr.bf16.mxu1 %v18249_v8  ;;  %v18253_v8 = vld [vmem:[%s24148_s2 + $0x1008] ss:$28 sps:$4 sm:$0xff]  }
 0x529   :  { %16049 = vmatprep.subr.bf16.mxu0 %v22928_v7 }
 0x52b   :  { %10358 = vmatpush1.bf16.msra.mxu1 %v18247_v21  ;;  %v10875_v21 = vadd.f32 %v10874_v33, %v10873_v44  ;;  %v10807_v44 = vld [vmem:[%s24151_s5 + $0x1e8] sm:$0xff]  ;;  %v18261_v33 = vld [vmem:[%s24148_s2 + $0x107c] ss:$28 sps:$4 sm:$0xff]  }
 0x52c   :  { %16051 = vmatpush3.bf16.msra.mxu0 %v22949_v23  ;;  %10359 = vmatprep.subr.bf16.mxu1 %v18252_v35  ;;  %v23031_v46 = vpack.c.bf16 %v10807_v44, %v10806_v49  ;;  %v10793_v49 = vld [vmem:[%s24151_s5 + $0x178] sm:$0xff]  ;;  %v18262_v44 = vld [vmem:[%s24148_s2 + $0x10b0] ss:$28 sps:$4 sm:$0xff]  }
 0x52d   :  { %16053 = vmatprep.subr.bf16.mxu0 %v22955_v28  ;;  %v10876_v13 = vrot.slane %v10875_v21, 2 }
 0x52e   :  { %v15489_v18 = vpop.f32.mrb[28].mxu0 }
 0x52f   :  { %v15490_v47 = vpop.f32.mrb[29].mxu0  ;;  %10360 = vmatpush1.bf16.msra.mxu1 %v18250_v48  ;;  %v18256_v48 = vld [vmem:[%s24148_s2 + $0x1040] ss:$28 sps:$4 sm:$0xff]  }
 0x530   :  { %v22998_v60 = vadd.f32 %v15490_v47, %v15489_v18  ;;  %v15492_v9 = vpop.f32.mrb[30].mxu0  ;;  %16055 = vmatpush3.bf16.msra.mxu0 %v22975_v51  ;;  %10361 = vmatprep.subr.bf16.mxu1 %v18255_v52  ;;  %v23025_v52 = vpack.c.bf16 %v10789_v29, %v10788_v26  ;;  %v10790_v18 = vld [vmem:[%s24151_s5 + $0x160] sm:$0xff]  ;;  %v10809_v47 = vld [vmem:[%s24151_s5 + $0x1f8] sm:$0xff]  ;;  %v10792_v29 = vld [vmem:[%s24151_s5 + $0x170] sm:$0xff] }
 0x531   :  { %v15493_v35 = vpop.f32.mrb[31].mxu0  ;;  %16057 = vmatprep.subr.bf16.mxu0 %v22981_v19  ;;  %v23049_v9 = vpack.c.bf16 %v10791_v58, %v10790_v18  ;;  %v23055_v26 = vpack.c.bf16 %v10809_v47, %v10808_v24  ;;  %v18270_v18 = vld [vmem:[%s24148_s2 + $0x1124] ss:$28 sps:$4 sm:$0xff]   ;;  %v18273_v47 = vld [vmem:[%s24148_s2 + $0x115c] ss:$28 sps:$4 sm:$0xff]  }
 0x532   :  { %v10877_v35 = vadd.f32 %v10876_v13, %v10875_v21  ;;  %v23067_v21 = vpack.c.bf16 %v10793_v49, %v10792_v29  ;;  %v18265_v13 = vld [vmem:[%s24148_s2 + $0x10e8] ss:$28 sps:$4 sm:$0xff]   ;;  %v18268_v24 = vld [vmem:[%s24148_s2 + $0x1120] ss:$28 sps:$4 sm:$0xff]   ;;  %v6065_v29 = vrot.slane %v22560_v36, %v747_v40 }
 0x533   :  { %10362 = vmatpush1.bf16.msra.mxu1 %v18253_v8  ;;  %v18259_v8 = vld [vmem:[%s24148_s2 + $0x1078] ss:$28 sps:$4 sm:$0xff]   ;;  %v18279_v49 = vld [vmem:[%s24148_s2 + $0x11cc] ss:$28 sps:$4 sm:$0xff]  }
 0x534   :  { %16059 = vmatpush3.bf16.msra.mxu0 %v23001_v17  ;;  %10363 = vmatprep.subr.bf16.mxu1 %v18258_v20  ;;  %v18264_v20 = vld [vmem:[%s24148_s2 + $0x10b4] ss:$28 sps:$4 sm:$0xff]  }
 0x535   :  { %16061 = vmatprep.subr.bf16.mxu0 %v23007_v43 }
 0x537   :  { %10364 = vmatpush1.bf16.msra.mxu1 %v18256_v48  ;;  %v18267_v48 = vld [vmem:[%s24148_s2 + $0x10ec] ss:$28 sps:$4 sm:$0xff]  }
 0x538   :  { %16063 = vmatpush3.bf16.msra.mxu0 %v23025_v52  ;;  %10365 = vmatprep.subr.bf16.mxu1 %v18261_v33  ;;  %v10878_v33 = vrot.slane %v10877_v35, 1 }
 0x539   :  { %16065 = vmatprep.subr.bf16.mxu0 %v23031_v46 }
 0x53a   :  { %v10879_v58 = vadd.f32 %v10878_v33, %v10877_v35  ;;  %v18274_v35 = vld [vmem:[%s24148_s2 + $0x1190] ss:$28 sps:$4 sm:$0xff]   ;;  %v18277_v33 = vld [vmem:[%s24148_s2 + $0x11c8] ss:$28 sps:$4 sm:$0xff]  }
 0x53b   :  { %10366 = vmatpush1.bf16.msra.mxu1 %v18259_v8  ;;  %v18271_v8 = vld [vmem:[%s24148_s2 + $0x1158] ss:$28 sps:$4 sm:$0xff]  }
 0x53c   :  { %16067 = vmatpush3.bf16.msra.mxu0 %v23049_v9  ;;  %10367 = vmatprep.subr.bf16.mxu1 %v18264_v20  ;;  %v18276_v20 = vld [vmem:[%s24148_s2 + $0x1194] ss:$28 sps:$4 sm:$0xff]  }
 0x53d   :  { %16069 = vmatprep.subr.bf16.mxu0 %v23055_v26 }
 0x53f   :  { %10368 = vmatpush1.bf16.msra.mxu1 %v18262_v44 }
 0x540   :  { %16071 = vmatpush3.bf16.msra.mxu0 %v23067_v21  ;;  %10369 = vmatprep.subr.bf16.mxu1 %v18267_v48 }
 0x543   :  { %11047 = vmatmul.mubr.f32.vlgmr.msra.gmra.mrb[58].mxu0 %v10879_v58  ;;  %10370 = vmatpush1.bf16.msra.mxu1 %v18265_v13  ;;  %v10501_v13 = vadd.f32 %v22998_v60, %v6065_v29  ;;  %v18282_v58 = vld [vmem:[%s24148_s2 + $0x1204] ss:$28 sps:$4 sm:$0xff]   ;;  %v18283_v60 = vld [vmem:[%s24148_s2 + $0x1238] ss:$28 sps:$4 sm:$0xff]  }
 0x544   :  { %10371 = vmatprep.subr.bf16.mxu1 %v18270_v18  ;;  %v18289_v29 = vld [vmem:[%s24148_s2 + $0x12a8] ss:$28 sps:$4 sm:$0xff]  }
 0x547   :  { %10372 = vmatpush1.bf16.msra.mxu1 %v18268_v24 }
 0x548   :  { %10373 = vmatprep.subr.bf16.mxu1 %v18273_v47 }
 0x54b   :  { %10374 = vmatpush1.bf16.msra.mxu1 %v18271_v8  ;;  %v18288_v8 = vld [vmem:[%s24148_s2 + $0x1274] ss:$28 sps:$4 sm:$0xff]  }
 0x54c   :  { %10384 = vmatprep.subr.bf16.mxu1 %v18276_v20  ;;  %v18286_v20 = vld [vmem:[%s24148_s2 + $0x1270] ss:$28 sps:$4 sm:$0xff]  }
 0x54e   :  { %v15511_v44 = vpop.f32.mrb[32].mxu0  ;;  %10376 = vmatmul.mubr.bf16.vlgmr.msra.gmra.mrb[24].mxu1 %v21665_v55  ;;  %v18280_v55 = vld [vmem:[%s24148_s2 + $0x1200] ss:$28 sps:$4 sm:$0xff]  }
 0x54f   :  { %v15512_v48 = vpop.f32.mrb[33].mxu0  ;;  %10385 = vmatpush1.bf16.msra.mxu1 %v18274_v35  ;;  %10416 = vmatprep.mubr.bf16.mxu1 %v21673_v5  ;;  %v18285_v5 = vld [vmem:[%s24148_s2 + $0x123c] ss:$28 sps:$4 sm:$0xff]   ;;  %v18291_v35 = vld [vmem:[%s24148_s2 + $0x12ac] ss:$28 sps:$4 sm:$0xff]  }
 0x550   :  { %v15513_v18 = vadd.f32 %v15512_v48, %v15511_v44  ;;  %v15514_v40 = vpop.f32.mrb[34].mxu0  ;;  %10386 = vmatprep.subr.bf16.mxu1 %v18279_v49  ;;  %v18294_v49 = vld [vmem:[%s24148_s2 + $0x12e4] ss:$28 sps:$4 sm:$0xff]   ;;  %v18297_v48 = vld [vmem:[%s24148_s2 + $0x131c] ss:$28 sps:$4 sm:$0xff]  }
 0x551   :  { %v15515_v24 = vpop.f32.mrb[35].mxu0  ;;  %v18292_v44 = vld [vmem:[%s24148_s2 + $0x12e0] ss:$28 sps:$4 sm:$0xff]   ;;  %v18303_v40 = vld [vmem:[%s24148_s2 + $0x138c] ss:$28 sps:$4 sm:$0xff]  }
 0x552   :  { %v10541_v47 = vadd.f32 %v15513_v18, %v10501_v13  ;;  %v18300_v13 = vld [vmem:[%s24148_s2 + $0x1354] ss:$28 sps:$4 sm:$0xff]  }
 0x553   :  { %10387 = vmatpush1.bf16.msra.mxu1 %v18277_v33  ;;  %v18295_v33 = vld [vmem:[%s24148_s2 + $0x1318] ss:$28 sps:$4 sm:$0xff]   ;;  %v18298_v18 = vld [vmem:[%s24148_s2 + $0x1350] ss:$28 sps:$4 sm:$0xff]  }
 0x554   :  { %10388 = vmatprep.subr.bf16.mxu1 %v18282_v58 }
 0x557   :  { %10389 = vmatpush1.bf16.msra.mxu1 %v18280_v55  ;;  %v18301_v55 = vld [vmem:[%s24148_s2 + $0x1388] ss:$28 sps:$4 sm:$0xff]  }
 0x558   :  { %10390 = vmatprep.subr.bf16.mxu1 %v18285_v5 }
 0x55b   :  { %10391 = vmatpush1.bf16.msra.mxu1 %v18283_v60 }
 0x55c   :  { %10392 = vmatprep.subr.bf16.mxu1 %v18288_v8  ;;  %v18306_v8 = vld [vmem:[%s24148_s2 + $0x13c4] ss:$28 sps:$4 sm:$0xff]  }
 0x55f   :  { %10393 = vmatpush1.bf16.msra.mxu1 %v18286_v20 }
 0x560   :  { %10394 = vmatprep.subr.bf16.mxu1 %v18291_v35 }
 0x563   :  { %10395 = vmatpush1.bf16.msra.mxu1 %v18289_v29  ;;  %v18304_v29 = vld [vmem:[%s24148_s2 + $0x13c0] ss:$28 sps:$4 sm:$0xff]  }
 0x564   :  { %10396 = vmatprep.subr.bf16.mxu1 %v18294_v49  ;;  %v18309_v49 = vld [vmem:[%s24148_s2 + $0x13fc] ss:$28 sps:$4 sm:$0xff]  }
 0x567   :  { %10397 = vmatpush1.bf16.msra.mxu1 %v18292_v44  ;;  %v18307_v44 = vld [vmem:[%s24148_s2 + $0x13f8] ss:$28 sps:$4 sm:$0xff]  }
 0x568   :  { %10398 = vmatprep.subr.bf16.mxu1 %v18297_v48  ;;  %v18310_v48 = vld [vmem:[%s24148_s2 + $0x1430] ss:$28 sps:$4 sm:$0xff]  }
 0x56b   :  { %10399 = vmatpush1.bf16.msra.mxu1 %v18295_v33  ;;  %v18315_v33 = vld [vmem:[%s24148_s2 + $0x146c] ss:$28 sps:$4 sm:$0xff]  }
 0x56c   :  { %10400 = vmatprep.subr.bf16.mxu1 %v18300_v13  ;;  %v18313_v13 = vld [vmem:[%s24148_s2 + $0x1468] ss:$28 sps:$4 sm:$0xff]  }
 0x56e   :  { %v15533_v58 = vpop.f32.mrb[36].mxu0 }
 0x56f   :  { %v15534_v24 = vpop.f32.mrb[37].mxu0  ;;  %10401 = vmatpush1.bf16.msra.mxu1 %v18298_v18  ;;  %v18318_v18 = vld [vmem:[%s24148_s2 + $0x14a4] ss:$28 sps:$4 sm:$0xff]  }
 0x570   :  { %v15535_v5 = vadd.f32 %v15534_v24, %v15533_v58  ;;  %v15536_v60 = vpop.f32.mrb[38].mxu0  ;;  %10402 = vmatprep.subr.bf16.mxu1 %v18303_v40  ;;  %v18316_v40 = vld [vmem:[%s24148_s2 + $0x14a0] ss:$28 sps:$4 sm:$0xff]   ;;  %v18319_v24 = vld [vmem:[%s24148_s2 + $0x14d8] ss:$28 sps:$4 sm:$0xff]  }
 0x571   :  { %v15537_v20 = vpop.f32.mrb[39].mxu0  ;;  %v18321_v58 = vld [vmem:[%s24148_s2 + $0x14dc] ss:$28 sps:$4 sm:$0xff]   ;;  %v18327_v60 = vld [vmem:[%s24148_s2 + $0x154c] ss:$28 sps:$4 sm:$0xff]  }
 0x572   :  { %v10581_v35 = vadd.f32 %v15535_v5, %v10541_v47  ;;  %v18312_v47 = vld [vmem:[%s24148_s2 + $0x1434] ss:$28 sps:$4 sm:$0xff]  }
 0x573   :  { %10403 = vmatpush1.bf16.msra.mxu1 %v18301_v55  ;;  %v18324_v55 = vld [vmem:[%s24148_s2 + $0x1514] ss:$28 sps:$4 sm:$0xff]  }
 0x574   :  { %10404 = vmatprep.subr.bf16.mxu1 %v18306_v8  ;;  %v18322_v5 = vld [vmem:[%s24148_s2 + $0x1510] ss:$28 sps:$4 sm:$0xff]  }
 0x577   :  { %10405 = vmatpush1.bf16.msra.mxu1 %v18304_v29  ;;  %v18325_v29 = vld [vmem:[%s24148_s2 + $0x1548] ss:$28 sps:$4 sm:$0xff]  }
 0x578   :  { %10406 = vmatprep.subr.bf16.mxu1 %v18309_v49 }
 0x57b   :  { %10407 = vmatpush1.bf16.msra.mxu1 %v18307_v44 }
 0x57c   :  { %10408 = vmatprep.subr.bf16.mxu1 %v18312_v47 }
 0x57f   :  { %10409 = vmatpush1.bf16.msra.mxu1 %v18310_v48 }
 0x580   :  { %10410 = vmatprep.subr.bf16.mxu1 %v18315_v33  ;;  %v24155_v33 = vmov 0.0|0.0  }
 0x583   :  { %10411 = vmatpush1.bf16.msra.mxu1 %v18313_v13  ;;  %v10843_v13 = vld [vmem:[%s24151_s5 + $0x308] sm:$0xff] }
 0x584   :  { %10412 = vmatprep.subr.bf16.mxu1 %v18318_v18 }
 0x587   :  { %10413 = vmatpush1.bf16.msra.mxu1 %v18316_v40  ;;  %v10827_v40 = vld [vmem:[%s24151_s5 + $0x288] sm:$0xff] }
 0x588   :  { %10414 = vmatprep.subr.bf16.mxu1 %v18321_v58  ;;  %v10810_v58 = vld [vmem:[%s24151_s5 + $0x200] sm:$0xff] }
 0x58b   :  { %10415 = vmatpush1.bf16.msra.mxu1 %v18319_v24 }
 0x58c   :  { %10425 = vmatprep.subr.bf16.mxu1 %v18324_v55  ;;  %v10828_v55 = vld [vmem:[%s24151_s5 + $0x290] sm:$0xff] }
 0x58e   :  { %v15555_v8 = vpop.f32.mrb[40].mxu0  ;;  %10417 = vmatmul.mubr.bf16.vlgmr.msra.gmra.mrb[24].mxu1 %v21866_v32  ;;  %v10842_v32 = vld [vmem:[%s24151_s5 + $0x300] sm:$0xff] }
 0x58f   :  { %v15556_v20 = vpop.f32.mrb[41].mxu0  ;;  %10426 = vmatpush1.bf16.msra.mxu1 %v18322_v5  ;;  %10457 = vmatprep.mubr.bf16.mxu1 %v24153_v39  ;;  %v23212_v18 = vpack.c.bf16 %v10843_v13, %v10842_v32  ;;  %v10829_v5 = vld [vmem:[%s24151_s5 + $0x298] sm:$0xff]  ;;  %v10814_v13 = vld [vmem:[%s24151_s5 + $0x220] sm:$0xff] }
 0x590   :  { %v15557_v49 = vadd.f32 %v15556_v20, %v15555_v8  ;;  %v15558_v44 = vpop.f32.mrb[42].mxu0  ;;  %10427 = vmatprep.subr.bf16.mxu1 %v18327_v60  ;;  %v23241_v8 = vpack.c.bf16 %v10829_v5, %v10828_v55  ;;  %v10812_v20 = vld [vmem:[%s24151_s5 + $0x210] sm:$0xff] }
 0x591   :  { %v15559_v47 = vpop.f32.mrb[43].mxu0  ;;  %v10831_v44 = vld [vmem:[%s24151_s5 + $0x2a8] sm:$0xff]  ;;  %v10816_v5 = vld [vmem:[%s24151_s5 + $0x230] sm:$0xff] }
 0x592   :  { %v10621_v48 = vadd.f32 %v15557_v49, %v10581_v35  ;;  %v10826_v35 = vld [vmem:[%s24151_s5 + $0x280] sm:$0xff]  ;;  %24185 = vst [vmem:[#allocation9_spill] sm:$0xff] %v23241_v8 }
 0x593   :  { %10428 = vmatpush1.bf16.msra.mxu1 %v18325_v29  ;;  %v23228_v24 = vpack.c.bf16 %v10827_v40, %v10826_v35  ;;  %v10813_v29 = vld [vmem:[%s24151_s5 + $0x218] sm:$0xff]  ;;  %v10830_v49 = vld [vmem:[%s24151_s5 + $0x2a0] sm:$0xff]  ;;  %v10815_v35 = vld [vmem:[%s24151_s5 + $0x228] sm:$0xff] }
 0x594   :  { %16203 = vmatprep.subr.bf16.mxu1 %v24155_v33  ;;  %v23257_v47 = vpack.c.bf16 %v10813_v29, %v10812_v20  ;;  %v23260_v32 = vpack.c.bf16 %v10831_v44, %v10830_v49  ;;  %v10832_v40 = vld [vmem:[%s24151_s5 + $0x2b0] sm:$0xff]  ;;  %v10817_v20 = vld [vmem:[%s24151_s5 + $0x238] sm:$0xff] }
 0x595   :  { %16073 = vmatprep.subr.bf16.mxu0 %v23228_v24  ;;  %v23287_v29 = vpack.c.bf16 %v10817_v20, %v10816_v5 }
 0x596   :  { %24186 = vst [vmem:[#allocation10_spill] sm:$0xff] %v23257_v47  ;;  %24187 = vst [vmem:[#allocation11_spill] sm:$0xff] %v23260_v32 }
 0x597   :  { %24190 = vst [vmem:[#allocation14_spill] sm:$0xff] %v23287_v29 }
 0x59a   :  { %15216 = vmatmul.mubr.msk.bf16.vlgmr.msra.gmra.mrb[24].mxu1 %vm9601_vm2, %v21901_v53  ;;  %v10811_v53 = vld [vmem:[%s24151_s5 + $0x208] sm:$0xff] }
 0x59b   :  { %16205 = vmatpush3.bf16.msra.mxu1 %v23212_v18  ;;  %15957 = vmatprep.mubr.msk.f32.mxu1 %vm18579_vm1, %v24157_v11  ;;  %v23239_v60 = vpack.c.bf16 %v10811_v53, %v10810_v58  ;;  %v10833_v58 = vld [vmem:[%s24151_s5 + $0x2b8] sm:$0xff]  ;;  %v23275_v53 = vpack.c.bf16 %v10815_v35, %v10814_v13 }
 0x59c   :  { %v23278_v55 = vpack.c.bf16 %v10833_v58, %v10832_v40 }
 0x59d   :  { %16075 = vmatpush3.bf16.msra.mxu0 %v23239_v60  ;;  %24188 = vst [vmem:[#allocation12_spill] sm:$0xff] %v23275_v53 }
 0x59e   :  { %16077 = vmatprep.subr.bf16.mxu0 %v23241_v8  ;;  %24189 = vst [vmem:[#allocation13_spill] sm:$0xff] %v23278_v55 }
 0x5a1   :  { %16079 = vmatpush3.bf16.msra.mxu0 %v23257_v47 }
 0x5a2   :  { %16081 = vmatprep.subr.bf16.mxu0 %v23260_v32 }
 0x5a5   :  { %16083 = vmatpush3.bf16.msra.mxu0 %v23275_v53 }
 0x5a6   :  { %16085 = vmatprep.subr.bf16.mxu0 %v23278_v55 }
 0x5a9   :  { %16087 = vmatpush3.bf16.msra.mxu0 %v23287_v29 }
 0x5ae   :  { %v15577_v49 = vpop.f32.mrb[44].mxu0 }
 0x5af   :  { %v15578_v44 = vpop.f32.mrb[45].mxu0 }
 0x5b0   :  { %v15579_v13 = vadd.f32 %v15578_v44, %v15577_v49  ;;  %v15580_v35 = vpop.f32.mrb[46].mxu0 }
 0x5b1   :  { %v15581_v40 = vpop.f32.mrb[47].mxu0 }
 0x5b2   :  { %v10661_v58 = vadd.f32 %v15579_v13, %v10621_v48  ;;  %v10836_v40 = vld [vmem:[%s24151_s5 + $0x2d0] sm:$0xff] }
 0x5ce   :  { %v15599_v39 = vpop.f32.mrb[48].mxu0 }
 0x5cf   :  { %v15600_v61 = vpop.f32.mrb[49].mxu0 }
 0x5d0   :  { %v15601_v33 = vadd.f32 %v15600_v61, %v15599_v39  ;;  %v15602_v11 = vpop.f32.mrb[50].mxu0 }
 0x5d1   :  { %v15603_v63 = vpop.f32.mrb[51].mxu0 }
 0x5d2   :  { %v10701_v34 = vadd.f32 %v15601_v33, %v10661_v58  ;;  %v24192_v63 = vmov 0.0   ;;  %v10818_v33 = vld [vmem:[%s24151_s5 + $0x240] sm:$0xff]  ;;  %v10837_v58 = vld [vmem:[%s24151_s5 + $0x2d8] sm:$0xff] }
 0x5d6   :  { %v10740_v25 = vpop.f32.mrb[52].mxu0 }
 0x5d7   :  { %v23291_v53 = vadd.f32 %v10740_v25, %v10701_v34  ;;  %v15944_v5 = vpop.f32.mrb[53].mxu0  ;;  %v10834_v34 = vld [vmem:[%s24151_s5 + $0x2c0] sm:$0xff]  ;;  %v10835_v25 = vld [vmem:[%s24151_s5 + $0x2c8] sm:$0xff] }
 0x5d8   :  { %v10743_v20 = vpop.f32.mrb[54].mxu0  ;;  %v23304_v61 = vpack.c.bf16 %v10835_v25, %v10834_v34  ;;  %v23322_v5 = vpack.c.bf16 %v10837_v58, %v10836_v40  ;;  %v10841_v40 = vld [vmem:[%s24151_s5 + $0x2f8] sm:$0xff]  ;;  %v10824_v58 = vld [vmem:[%s24151_s5 + $0x270] sm:$0xff] }
 0x5d9   :  { %24191 = vst [vmem:[#allocation15_spill] sm:$0xff] %v23291_v53  ;;  %v11199_v29 = vmul.f32 %v23291_v53, %v23291_v53  ;;  %v15945_v55 = vpop.f32.mrb[55].mxu0  ;;  %v10820_v20 = vld [vmem:[%s24151_s5 + $0x250] sm:$0xff] }
 0x5da   :  { %24193 = vst [vmem:[#allocation16_spill] sm:$0xff] %v23304_v61  ;;  %v10819_v55 = vld [vmem:[%s24151_s5 + $0x248] sm:$0xff]  ;;  %16089 = vmatprep.subr.bf16.mxu0 %v23304_v61  ;;  %24195 = vst [vmem:[#allocation18_spill] sm:$0xff] %v23322_v5 }
 0x5db   :  { %v11242_v49 = vsel %vm10901_vm4, %v11199_v29, 0.0  ;;  %v23312_v29 = vpack.c.bf16 %v10819_v55, %v10818_v33  ;;  %v10840_v55 = vld [vmem:[%s24151_s5 + $0x2f0] sm:$0xff] }
 0x5dc   :  { %v11243_v44 = vrot.slane %v11242_v49, 4 }
 0x5dd   :  { %24194 = vst [vmem:[#allocation17_spill] sm:$0xff] %v23312_v29  ;;  %16091 = vmatpush3.bf16.msra.mxu0 %v23312_v29 }
 0x5de   :  { %v11244_v48 = vadd.f32 %v11243_v44, %v11242_v49  ;;  %v10821_v49 = vld [vmem:[%s24151_s5 + $0x258] sm:$0xff]  ;;  %16093 = vmatprep.subr.bf16.mxu0 %v23322_v5 }
 0x5df   :  { %v23330_v44 = vpack.c.bf16 %v10821_v49, %v10820_v20  ;;  %v23361_v49 = vpack.c.bf16 %v10841_v40, %v10840_v55  ;;  %v10902_v55 = vsel %vm10901_vm4, %v23291_v53, 0.0  ;;  %v6057_v40 = vrot.slane %v22560_v36, %v21162_v14 }
 0x5e0   :  { %v11245_v13 = vrot.slane %v11244_v48, 2 }
 0x5e1   :  { %24196 = vst [vmem:[#allocation19_spill] sm:$0xff] %v23330_v44  ;;  %16095 = vmatpush3.bf16.msra.mxu0 %v23330_v44  ;;  %24199 = vst [vmem:[#allocation22_spill] sm:$0xff] %v23361_v49 }
 0x5e2   :  { %v11246_v35 = vadd.f32 %v11245_v13, %v11244_v48  ;;  %v10838_v48 = vld [vmem:[%s24151_s5 + $0x2e0] sm:$0xff]  ;;  %v10839_v13 = vld [vmem:[%s24151_s5 + $0x2e8] sm:$0xff] }
 0x5e4   :  { %v11247_v39 = vrot.slane %v11246_v35, 1 }
 0x5e6   :  { %v11248_v11 = vadd.f32 %v11247_v39, %v11246_v35  ;;  %v23340_v35 = vpack.c.bf16 %v10839_v13, %v10838_v48  ;;  %v10822_v39 = vld [vmem:[%s24151_s5 + $0x260] sm:$0xff]  ;;  %v10825_v48 = vld [vmem:[%s24151_s5 + $0x278] sm:$0xff] }
 0x5e7   :  { %v23366_v13 = vpack.c.bf16 %v10825_v48, %v10824_v58  ;;  %v24203_v48 = vsub.s32 5, %v18734_v42 }
 0x5e8   :  { %15958 = vmatmul.mubr.msk.f32.vlgmr.msra.gmra.mrb[28].mxu1 %vm4075_vm0, %v11248_v11  ;;  %24197 = vst [vmem:[#allocation20_spill] sm:$0xff] %v23340_v35  ;;  %v10823_v11 = vld [vmem:[%s24151_s5 + $0x268] sm:$0xff]  ;;  %16097 = vmatprep.subr.bf16.mxu0 %v23340_v35 }
 0x5e9   :  { %11609 = vmatprep.mubr.f32.mxu1 %v24192_v63  ;;  %v23348_v25 = vpack.c.bf16 %v10823_v11, %v10822_v39  ;;  %24200 = vst [vmem:[#allocation23_spill] sm:$0xff] %v23366_v13  ;;  %v24201_v39 = vmov 0.0|0.0  }
 0x5eb   :  { %24198 = vst [vmem:[#allocation21_spill] sm:$0xff] %v23348_v25  ;;  %16099 = vmatpush3.bf16.msra.mxu0 %v23348_v25 }
 0x5ec   :  { %16101 = vmatprep.subr.bf16.mxu0 %v23361_v49 }
 0x5ef   :  { %16103 = vmatpush3.bf16.msra.mxu0 %v23366_v13  ;;  %v10903_v13 = vrot.slane %v10902_v55, 4 }
 0x5f0   :  { %16104 = vmatprep.subr.bf16.mxu0 %v24201_v39  ;;  %v6061_v39 = vrot.slane %v22560_v36, %v24203_v48 }
 0x5f1   :  { %v10904_v14 = vadd.f32 %v10903_v13, %v10902_v55 }
 0x5f3   :  { %v10905_v29 = vrot.slane %v10904_v14, 2 }
 0x5f6   :  { %v15640_v34 = vpop.f32.mrb[56].mxu0 }
 0x5f7   :  { %v15641_v33 = vpop.f32.mrb[57].mxu0 }
 0x5f8   :  { %v15642_v20 = vadd.f32 %v15641_v33, %v15640_v34  ;;  %v11194_v33 = vmul.f32 %v22590_v22, %v22590_v22 }
 0x5fa   :  { %v11207_v58 = vsel %vm10858_vm3, %v11194_v33, 0.0 }
 0x616   :  { %v15675_v11 = vpop.f32.mrb[58].mxu0 }
 0x617   :  { %v15676_v35 = vpop.f32.mrb[59].mxu0 }
 0x618   :  { %v15677_v44 = vadd.f32 %v15676_v35, %v15675_v11  ;;  %v11208_v35 = vrot.slane %v11207_v58, 4 }
 0x61a   :  { %v23371_v34 = vadd.f32 %v15677_v44, %v15642_v20  ;;  %v11209_v36 = vadd.f32 %v11208_v35, %v11207_v58  ;;  %v24207_v58 = vld [vmem:[#allocation10_spill] sm:$0xff] }
 0x61c   :  { %24202 = vst [vmem:[#allocation24_spill] sm:$0xff] %v23371_v34  ;;  %v11210_v61 = vrot.slane %v11209_v36, 2 }
 0x66d   :  { %v10459_v49 = vpop.f32.mrb[24].mxu1 }
 0x66e   :  { %v23383_v44 = vadd.f32 %v10459_v49, %v6057_v40  ;;  %v10461_v20 = vpop.f32.mrb[25].mxu1 }
 0x66f   :  { %v23385_v11 = vadd.f32 %v10461_v20, %v6061_v39  ;;  %v10463_v22 = vpop.f32.mrb[26].mxu1 }
 0x670   :  { %24204 = vst [vmem:[#allocation25_spill] sm:$0xff] %v23383_v44  ;;  %v10887_v53 = vsel %vm10858_vm3, %v23383_v44, 0.0  ;;  %v10464_v34 = vpop.f32.mrb[27].mxu1  ;;  %v10906_v22 = vadd.f32 %v10905_v29, %v10904_v14  ;;  %v11211_v44 = vadd.f32 %v11210_v61, %v11209_v36  ;;  %v24211_v14 = vld [vmem:[#allocation14_spill] sm:$0xff] }
 0x671   :  { %v10888_v25 = vrot.slane %v10887_v53, 4  ;;  %v10894_v42 = vsel %vm10858_vm3, %v23385_v11, 0.0 }
 0x672   :  { %v10895_v33 = vrot.slane %v10894_v42, 4  ;;  %v10907_v13 = vrot.slane %v10906_v22, 1  ;;  %v11212_v8 = vrot.slane %v11211_v44, 1 }
 0x673   :  { %v10889_v48 = vadd.f32 %v10888_v25, %v10887_v53 }
 0x674   :  { %v10896_v5 = vadd.f32 %v10895_v33, %v10894_v42  ;;  %v10908_v53 = vadd.f32 %v10907_v13, %v10906_v22  ;;  %v11213_v25 = vadd.f32 %v11212_v8, %v11211_v44  ;;  %v24212_v42 = vld [vmem:[#allocation16_spill] sm:$0xff]  ;;  %v24213_v33 = vld [vmem:[#allocation17_spill] sm:$0xff]  ;;  %v24218_v22 = vld [vmem:[#allocation22_spill] sm:$0xff] }
 0x675   :  { %v10890_v49 = vrot.slane %v10889_v48, 2  ;;  %v24219_v13 = vld [vmem:[#allocation23_spill] sm:$0xff] }
 0x676   :  { %v10897_v40 = vrot.slane %v10896_v5, 2 }
 0x677   :  { %v10891_v39 = vadd.f32 %v10890_v49, %v10889_v48  ;;  %v24214_v48 = vld [vmem:[#allocation18_spill] sm:$0xff]  ;;  %v24215_v49 = vld [vmem:[#allocation19_spill] sm:$0xff] }
 0x678   :  { %v10898_v20 = vadd.f32 %v10897_v40, %v10896_v5  ;;  %v24216_v40 = vld [vmem:[#allocation20_spill] sm:$0xff] }
 0x679   :  { %v10892_v32 = vrot.slane %v10891_v39, 1 }
 0x67a   :  { %v10899_v47 = vrot.slane %v10898_v20, 1 }
 0x67b   :  { %v10893_v55 = vadd.f32 %v10892_v32, %v10891_v39 }
 0x67c   :  { %v10900_v34 = vadd.f32 %v10899_v47, %v10898_v20  ;;  %v11193_v47 = vmul.f32 %v22728_v56, %v22728_v56  ;;  %v24217_v20 = vld [vmem:[#allocation21_spill] sm:$0xff] }
 0x67e   :  { %11116 = vmatprep.mubr.f32.mxu0 %v10900_v34 }
 0x67f   :  { %11117 = vmatmul.mubr.f32.vlgmr.msra.gmra.mrb[60].mxu0 %v10893_v55 }
 0x680   :  { %16106 = vmatpush3.bf16.msra.mxu0 %v23212_v18  ;;  %15950 = vmatprep.mubr.msk.f32.mxu0 %vm18579_vm1, %v24192_v63  ;;  %v11196_v18 = vmul.f32 %v22795_v31, %v22795_v31 }
 0x681   :  { %16108 = vmatprep.subr.bf16.mxu0 %v22668_v30  ;;  %v11200_v30 = vsel %vm10858_vm3, %v11193_v47, 0.0  ;;  %v10844_v47 = vld [vmem:[%s24150_s4 + $0x68] sm:$0xff] }
 0x682   :  { %v11221_v8 = vsel %vm10858_vm3, %v11196_v18, 0.0 }
 0x683   :  { %15951 = vmatmul.mubr.msk.f32.vlgmr.msra.gmra.mrb[62].mxu0 %vm4075_vm0, %v10908_v53  ;;  %v10845_v53 = vld [vmem:[%s24150_s4 + $0x70] sm:$0xff] }
 0x684   :  { %16110 = vmatpush3.bf16.msra.mxu0 %v22685_v45  ;;  %11316 = vmatprep.mubr.f32.mxu0 %v11213_v25  ;;  %v11201_v45 = vrot.slane %v11200_v30, 4  ;;  %v10852_v25 = vld [vmem:[%s24150_s4 + $0xd8] sm:$0xff] }
 0x685   :  { %16112 = vmatprep.subr.bf16.mxu0 %v22691_v50  ;;  %v11222_v50 = vrot.slane %v11221_v8, 4  ;;  %v23470_v18 = vpack.c.bf16 %v10852_v25, %v10845_v53  ;;  %v18328_v53 = vld [vmem:[%s24149_s3] ss:$12 sps:$4 sm:$0xff]   ;;  %v18333_v25 = vld [vmem:[%s24149_s3 + $0x1c] ss:$12 sps:$4 sm:$0xff]  }
 0x686   :  { %v11202_v32 = vadd.f32 %v11201_v45, %v11200_v30  ;;  %v10851_v30 = vld [vmem:[%s24150_s4 + $0xd0] sm:$0xff]  ;;  %v10847_v45 = vld [vmem:[%s24150_s4 + $0x80] sm:$0xff] }
 0x687   :  { %v11223_v61 = vadd.f32 %v11222_v50, %v11221_v8  ;;  %v23475_v8 = vpack.c.bf16 %v10851_v30, %v10844_v47  ;;  %16207 = vmatprep.subr.bf16.mxu1 %v23470_v18  ;;  %v10854_v50 = vld [vmem:[%s24150_s4 + $0xe8] sm:$0xff]  ;;  %v18331_v47 = vld [vmem:[%s24149_s3 + $0x18] ss:$12 sps:$4 sm:$0xff]   ;;  %v18334_v30 = vld [vmem:[%s24149_s3 + $0x30] ss:$12 sps:$4 sm:$0xff]  }
 0x688   :  { %16114 = vmatpush3.bf16.msra.mxu0 %v22713_v12  ;;  %v11203_v12 = vrot.slane %v11202_v32, 2 }
 0x689   :  { %16116 = vmatprep.subr.bf16.mxu0 %v22719_v54  ;;  %v11224_v54 = vrot.slane %v11223_v61, 2  ;;  %16209 = vmatpush1.bf16.msra.mxu1 %v23475_v8 }
 0x68b   :  { %v11225_v29 = vadd.f32 %v11224_v54, %v11223_v61  ;;  %v10846_v61 = vld [vmem:[%s24150_s4 + $0x78] sm:$0xff] }
 0x68c   :  { %16118 = vmatpush3.bf16.msra.mxu0 %v22740_v59  ;;  %v11204_v59 = vadd.f32 %v11203_v12, %v11202_v32  ;;  %v16210_v32 = vpack.c.bf16 %v10854_v50, %v10847_v45  ;;  %v10853_v12 = vld [vmem:[%s24150_s4 + $0xe0] sm:$0xff]  ;;  %v18337_v45 = vld [vmem:[%s24149_s3 + $0x48] ss:$12 sps:$4 sm:$0xff]  }
 0x68d   :  { %16120 = vmatprep.subr.bf16.mxu0 %v22746_v62  ;;  %v16212_v54 = vpack.c.bf16 %v10853_v12, %v10846_v61  ;;  %v18342_v50 = vld [vmem:[%s24149_s3 + $0x64] ss:$12 sps:$4 sm:$0xff]   ;;  %v18345_v61 = vld [vmem:[%s24149_s3 + $0x7c] ss:$12 sps:$4 sm:$0xff]  }
 0x68e   :  { %v11205_v62 = vrot.slane %v11204_v59, 1  ;;  %16211 = vmatprep.subr.bf16.mxu1 %v16210_v32  ;;  %v18343_v12 = vld [vmem:[%s24149_s3 + $0x78] ss:$12 sps:$4 sm:$0xff]  }
 0x690   :  { %16122 = vmatpush3.bf16.msra.mxu0 %v22768_v0  ;;  %v11226_v0 = vrot.slane %v11225_v29, 1 }
 0x691   :  { %16124 = vmatprep.subr.bf16.mxu0 %v22774_v38  ;;  %v11206_v38 = vadd.f32 %v11205_v62, %v11204_v59  ;;  %v24220_v62 = vmov 0.0|0.0  }
 0x694   :  { %16126 = vmatpush3.bf16.msra.mxu0 %v22798_v37  ;;  %v11227_v37 = vadd.f32 %v11226_v0, %v11225_v29 }
 0x695   :  { %16128 = vmatprep.subr.bf16.mxu0 %v22804_v15  ;;  %v11195_v15 = vmul.f32 %v22937_v1, %v22937_v1 }
 0x698   :  { %16130 = vmatpush3.bf16.msra.mxu0 %v22824_v41  ;;  %v11198_v41 = vmul.f32 %v23385_v11, %v23385_v11 }
 0x699   :  { %16132 = vmatprep.subr.bf16.mxu0 %v22830_v4  ;;  %v11214_v4 = vsel %vm10858_vm3, %v11195_v15, 0.0 }
 0x69c   :  { %16134 = vmatpush3.bf16.msra.mxu0 %v22848_v3  ;;  %v11235_v3 = vsel %vm10858_vm3, %v11198_v41, 0.0 }
 0x69d   :  { %16136 = vmatprep.subr.bf16.mxu0 %v22854_v57  ;;  %v11215_v57 = vrot.slane %v11214_v4, 4 }
 0x6a0   :  { %16138 = vmatpush3.bf16.msra.mxu0 %v22872_v27  ;;  %v11236_v27 = vrot.slane %v11235_v3, 4 }
 0x6a1   :  { %16140 = vmatprep.subr.bf16.mxu0 %v22878_v10  ;;  %v11216_v10 = vadd.f32 %v11215_v57, %v11214_v4 }
 0x6a3   :  { %11317 = vmatmul.mubr.f32.vlgmr.msra.gmra.mrb[64].mxu0 %v11206_v38  ;;  %v24221_v38 = vld [vmem:[#allocation24_spill] sm:$0xff] }
 0x6a4   :  { %16142 = vmatpush3.bf16.msra.mxu0 %v22896_v16  ;;  %11386 = vmatprep.mubr.f32.mxu0 %v11227_v37  ;;  %v11237_v16 = vadd.f32 %v11236_v27, %v11235_v3 }
 0x6a5   :  { %16144 = vmatprep.subr.bf16.mxu0 %v22902_v6  ;;  %v11217_v6 = vrot.slane %v11216_v10, 2 }
 0x6a8   :  { %16146 = vmatpush3.bf16.msra.mxu0 %v22922_v2  ;;  %v11238_v2 = vrot.slane %v11237_v16, 2 }
 0x6a9   :  { %16148 = vmatprep.subr.bf16.mxu0 %v22928_v7  ;;  %v11218_v7 = vadd.f32 %v11217_v6, %v11216_v10 }
 0x6ac   :  { %16150 = vmatpush3.bf16.msra.mxu0 %v22949_v23  ;;  %v11239_v23 = vadd.f32 %v11238_v2, %v11237_v16 }
 0x6ad   :  { %16152 = vmatprep.subr.bf16.mxu0 %v22955_v28 }
 0x6ae   :  { %v11240_v5 = vrot.slane %v11239_v23, 1 }
 0x6b0   :  { %16154 = vmatpush3.bf16.msra.mxu0 %v22975_v51 }
 0x6b1   :  { %16156 = vmatprep.subr.bf16.mxu0 %v22981_v19  ;;  %v11219_v19 = vrot.slane %v11218_v7, 1 }
 0x6b4   :  { %16158 = vmatpush3.bf16.msra.mxu0 %v23001_v17  ;;  %v11220_v17 = vadd.f32 %v11219_v19, %v11218_v7 }
 0x6b5   :  { %16160 = vmatprep.subr.bf16.mxu0 %v23007_v43  ;;  %v11241_v43 = vadd.f32 %v11240_v5, %v11239_v23 }
 0x6b8   :  { %16162 = vmatpush3.bf16.msra.mxu0 %v23025_v52  ;;  %v24205_v52 = vld [vmem:[#allocation9_spill] sm:$0xff] }
 0x6b9   :  { %16164 = vmatprep.subr.bf16.mxu0 %v23031_v46  ;;  %v24206_v46 = vld [vmem:[#allocation25_spill] sm:$0xff] }
 0x6bb   :  { %v23436_v28 = vpop.f32.mrb[28].mxu1 }
 0x6bc   :  { %16166 = vmatpush3.bf16.msra.mxu0 %v23049_v9  ;;  %v15959_v51 = vpop.f32.mrb[29].mxu1  ;;  %v11197_v9 = vmul.f32 %v24206_v46, %v24206_v46 }
 0x6bd   :  { %16168 = vmatprep.subr.bf16.mxu0 %v23055_v26  ;;  %v24208_v26 = vld [vmem:[#allocation11_spill] sm:$0xff] }
 0x6be   :  { %v11228_v35 = vsel %vm10858_vm3, %v11197_v9, 0.0 }
 0x6bf   :  { %v11229_v44 = vrot.slane %v11228_v35, 4 }
 0x6c0   :  { %16170 = vmatpush3.bf16.msra.mxu0 %v23067_v21  ;;  %v24209_v21 = vld [vmem:[#allocation12_spill] sm:$0xff] }
 0x6c1   :  { %16172 = vmatprep.subr.bf16.mxu0 %v23228_v24  ;;  %v24210_v24 = vld [vmem:[#allocation13_spill] sm:$0xff] }
 0x6c3   :  { %11387 = vmatmul.mubr.f32.vlgmr.msra.gmra.mrb[66].mxu0 %v11220_v17 }
 0x6c4   :  { %16174 = vmatpush3.bf16.msra.mxu0 %v23239_v60  ;;  %11456 = vmatprep.mubr.f32.mxu0 %v11241_v43  ;;  %v11230_v60 = vadd.f32 %v11229_v44, %v11228_v35  ;;  %v10849_v35 = vld [vmem:[%s24150_s4 + $0x90] sm:$0xff] }
 0x6c5   :  { %16176 = vmatprep.subr.bf16.mxu0 %v24205_v52 }
 0x6c6   :  { %v11231_v36 = vrot.slane %v11230_v60, 2 }
 0x6c8   :  { %16178 = vmatpush3.bf16.msra.mxu0 %v24207_v58  ;;  %v11232_v39 = vadd.f32 %v11231_v36, %v11230_v60  ;;  %v10855_v60 = vld [vmem:[%s24150_s4 + $0xf0] sm:$0xff]  ;;  %v11539_v36 = vld [vmem:[%s24150_s4 + $0x6] ss:$0 sm:$0xff] }
 0x6c9   :  { %16180 = vmatprep.subr.bf16.mxu0 %v24208_v26  ;;  %v11535_v26 = vld [vmem:[%s24150_s4 + $0x5] ss:$0 sm:$0xff] }
 0x6ca   :  { %v11233_v34 = vrot.slane %v11232_v39, 1 }
 0x6cc   :  { %16182 = vmatpush3.bf16.msra.mxu0 %v24209_v21  ;;  %v11234_v55 = vadd.f32 %v11233_v34, %v11232_v39  ;;  %v10856_v21 = vld [vmem:[%s24150_s4 + $0xf8] sm:$0xff]  ;;  %v18360_v34 = vld [vmem:[%s24149_s3 + $0xe0] ss:$12 sps:$4 sm:$0xff]  }
 0x6cd   :  { %16184 = vmatprep.subr.bf16.mxu0 %v24210_v24 }
 0x6d0   :  { %16186 = vmatpush3.bf16.msra.mxu0 %v24211_v14  ;;  %v16214_v14 = vpack.c.bf16 %v10856_v21, %v10849_v35  ;;  %v18389_v35 = vld [vmem:[%s24149_s3 + $0x16c] ss:$12 sps:$4 sm:$0xff]   ;;  %v18390_v21 = vld [vmem:[%s24149_s3 + $0x170] ss:$12 sps:$4 sm:$0xff]  }
 0x6d1   :  { %16188 = vmatprep.subr.bf16.mxu0 %v24212_v42  ;;  %v10850_v42 = vld [vmem:[%s24150_s4 + $0x98] sm:$0xff] }
 0x6d4   :  { %16190 = vmatpush3.bf16.msra.mxu0 %v24213_v33  ;;  %v10857_v33 = vld [vmem:[%s24150_s4 + $0x100] sm:$0xff] }
 0x6d5   :  { %16192 = vmatprep.subr.bf16.mxu0 %v24214_v48 }
 0x6d8   :  { %16194 = vmatpush3.bf16.msra.mxu0 %v24215_v49 }
 0x6d9   :  { %16196 = vmatprep.subr.bf16.mxu0 %v24216_v40  ;;  %v16219_v40 = vpack.c.bf16 %v10857_v33, %v10850_v42 }
 0x6dc   :  { %16198 = vmatpush3.bf16.msra.mxu0 %v24217_v20  ;;  %v18355_v20 = vld [vmem:[%s24149_s3 + $0xc8] ss:$12 sps:$4 sm:$0xff]  }
 0x6dd   :  { %16200 = vmatprep.subr.bf16.mxu0 %v24218_v22  ;;  %v18356_v22 = vld [vmem:[%s24149_s3 + $0x8] ss:$12 sps:$4 sm:$0xff]  }
 0x6e0   :  { %16202 = vmatpush3.bf16.msra.mxu0 %v24219_v13  ;;  %v18361_v13 = vld [vmem:[%s24149_s3 + $0x20] ss:$12 sps:$4 sm:$0xff]  }
 0x6e1   :  { %16226 = vmatprep.subr.bf16.mxu0 %v16210_v32  ;;  %v18340_v32 = vld [vmem:[%s24149_s3 + $0x60] ss:$12 sps:$4 sm:$0xff]  }
 0x6e3   :  { %11457 = vmatmul.mubr.f32.vlgmr.msra.gmra.mrb[68].mxu0 %v11234_v55  ;;  %v18330_v55 = vld [vmem:[%s24149_s3 + $0x4] ss:$12 sps:$4 sm:$0xff]  }
 0x6e4   :  { %11966 = vmatprep.mubr.f32.mxu0 %v24192_v63  ;;  %16228 = vmatpush1.bf16.msra.mxu0 %v16212_v54 }
 0x6e5   :  { %16233 = vmatprep.subr.bf16.mxu0 %v24220_v62 }
 0x752   :  { %v15710_v59 = vpop.f32.mrb[60].mxu0 }
 0x753   :  { %v15711_v29 = vpop.f32.mrb[61].mxu0 }
 0x754   :  { %v15712_v0 = vadd.f32 %v15711_v29, %v15710_v59  ;;  %v18346_v59 = vld [vmem:[%s24149_s3 + $0x90] ss:$12 sps:$4 sm:$0xff]   ;;  %v18351_v29 = vld [vmem:[%s24149_s3 + $0xac] ss:$12 sps:$4 sm:$0xff]  }
 0x756   :  { %v11119_v37 = vadd.f32 %v15712_v0, %v24221_v38  ;;  %v11188_v15 = vpop.f32.mrb[62].mxu0  ;;  %v18354_v0 = vld [vmem:[%s24149_s3 + $0xc4] ss:$12 sps:$4 sm:$0xff]   ;;  %v18352_v38 = vld [vmem:[%s24149_s3 + $0xc0] ss:$12 sps:$4 sm:$0xff]  }
 0x757   :  { %v15952_v41 = vpop.f32.mrb[63].mxu0 }
 0x758   :  { %v11189_v4 = vadd.f32 %v11188_v15, %v11119_v37  ;;  %v18359_v37 = vld [vmem:[%s24149_s3 + $0xdc] ss:$12 sps:$4 sm:$0xff]   ;;  %v18357_v15 = vld [vmem:[%s24149_s3 + $0xd8] ss:$12 sps:$4 sm:$0xff]   ;;  %v18364_v41 = vld [vmem:[%s24149_s3 + $0xf4] ss:$12 sps:$4 sm:$0xff]  }
 0x75a   :  { %v11192_v19 = vmul.f32 0.010204081, %v11189_v4  ;;  %v18365_v4 = vld [vmem:[%s24149_s3 + $0xf8] ss:$12 sps:$4 sm:$0xff]  }
 0x75c   :  { %v11533_v43 = vmul.f32 %v11192_v19, %v11192_v19 }
 0x776   :  { %v15748_v3 = vpop.f32.mrb[64].mxu0 }
 0x777   :  { %v15749_v57 = vpop.f32.mrb[65].mxu0 }
 0x778   :  { %v15750_v27 = vadd.f32 %v15749_v57, %v15748_v3  ;;  %v18362_v3 = vld [vmem:[%s24149_s3 + $0xf0] ss:$12 sps:$4 sm:$0xff]   ;;  %v18366_v57 = vld [vmem:[%s24149_s3 + $0x38] ss:$12 sps:$4 sm:$0xff]  }
 0x796   :  { %v15783_v10 = vpop.f32.mrb[66].mxu0 }
 0x797   :  { %v15784_v16 = vpop.f32.mrb[67].mxu0 }
 0x798   :  { %v15785_v6 = vadd.f32 %v15784_v16, %v15783_v10  ;;  %v18370_v10 = vld [vmem:[%s24149_s3 + $0x110] ss:$12 sps:$4 sm:$0xff]   ;;  %v18367_v16 = vld [vmem:[%s24149_s3 + $0x108] ss:$12 sps:$4 sm:$0xff]  }
 0x79a   :  { %v11389_v2 = vadd.f32 %v15785_v6, %v15750_v27  ;;  %v18369_v27 = vld [vmem:[%s24149_s3 + $0x10c] ss:$12 sps:$4 sm:$0xff]   ;;  %v18371_v6 = vld [vmem:[%s24149_s3 + $0x50] ss:$12 sps:$4 sm:$0xff]  }
 0x7b6   :  { %v15818_v7 = vpop.f32.mrb[68].mxu0 }
 0x7b7   :  { %v15819_v23 = vpop.f32.mrb[69].mxu0 }
 0x7b8   :  { %v15820_v51 = vadd.f32 %v15819_v23, %v15818_v7  ;;  %v18375_v7 = vld [vmem:[%s24149_s3 + $0x128] ss:$12 sps:$4 sm:$0xff]   ;;  %v18372_v23 = vld [vmem:[%s24149_s3 + $0x120] ss:$12 sps:$4 sm:$0xff]  }
 0x7ba   :  { %v11459_v5 = vadd.f32 %v15820_v51, %v11389_v2  ;;  %v18374_v2 = vld [vmem:[%s24149_s3 + $0x124] ss:$12 sps:$4 sm:$0xff]   ;;  %v18376_v51 = vld [vmem:[%s24149_s3 + $0x68] ss:$12 sps:$4 sm:$0xff]  }
 0x7bc   :  { %v11529_v17 = vadd.f32 %v23436_v28, %v11459_v5  ;;  %v10848_v28 = vld [vmem:[%s24150_s4 + $0x88] sm:$0xff] }
 0x7bd   :  { %v16216_v49 = vpack.c.bf16 %v10855_v60, %v10848_v28  ;;  %v18380_v5 = vld [vmem:[%s24149_s3 + $0x140] ss:$12 sps:$4 sm:$0xff]   ;;  %v18391_v28 = vld [vmem:[%s24149_s3 + $0xb0] ss:$12 sps:$4 sm:$0xff]  }
 0x7be   :  { %v11532_v52 = vmul.f32 0.010204081, %v11529_v17  ;;  %v18377_v17 = vld [vmem:[%s24149_s3 + $0x138] ss:$12 sps:$4 sm:$0xff]  }
 0x7c0   :  { %v11534_v9 = vsub.f32 %v11532_v52, %v11533_v43  ;;  %v18381_v43 = vld [vmem:[%s24149_s3 + $0x80] ss:$12 sps:$4 sm:$0xff]  }
 0x7c1   :  { %v18384_v52 = vld [vmem:[%s24149_s3 + $0x154] ss:$12 sps:$4 sm:$0xff]  }
 0x7c2   :  { %v11536_v58 = vadd.f32 1e-05, %v11534_v9  ;;  %v18385_v9 = vld [vmem:[%s24149_s3 + $0x158] ss:$12 sps:$4 sm:$0xff]  }
 0x7c4   :  { %18550 = vrsqrt.f32 %v11536_v58  ;;  %v18382_v58 = vld [vmem:[%s24149_s3 + $0x150] ss:$12 sps:$4 sm:$0xff]  }
 0x7ce   :  { %v18551_v44 = vpop.eup %18550 }
 0x7cf   :  { %v11538_v24 = vmul.f32 %v18551_v44, %v11535_v26  ;;  %v18386_v26 = vld [vmem:[%s24149_s3 + $0x98] ss:$12 sps:$4 sm:$0xff]   ;;  %v18387_v44 = vld [vmem:[%s24149_s3 + $0x168] ss:$12 sps:$4 sm:$0xff]  }
 0x7d1   :  { %15220 = vmatmul.mubr.msk.f32.vlgmr.msra.gmra.mrb[30].mxu1 %vm4075_vm0, %v11538_v24  ;;  %v11540_v48 = vmul.f32 %v11538_v24, %v11192_v19  ;;  %v18379_v19 = vld [vmem:[%s24149_s3 + $0x13c] ss:$12 sps:$4 sm:$0xff]  }
 0x7d2   :  { %16213 = vmatpush1.bf16.msra.mxu1 %v16212_v54  ;;  %11680 = vmatprep.mubr.f32.mxu1 %v24192_v63  ;;  %v18348_v54 = vld [vmem:[%s24149_s3 + $0x94] ss:$12 sps:$4 sm:$0xff]  }
 0x7d3   :  { %16215 = vmatprep.subr.bf16.mxu1 %v16214_v14  ;;  %v11541_v39 = vsub.f32 %v11539_v36, %v11540_v48  ;;  %v24222_v48 = vld [vmem:[#allocation7_spill] sm:$0xff] }
 0x7d5   :  { %15221 = vmatmul.mubr.msk.f32.vlgmr.msra.gmra.mrb[32].mxu1 %vm4075_vm0, %v11538_v24  ;;  %15225 = vmatmul.mubr.msk.f32.vlgmr.msra.gmra.mrb[70].mxu0 %vm4075_vm0, %v11541_v39 }
 0x7d6   :  { %16217 = vmatpush1.bf16.msra.mxu1 %v16216_v49  ;;  %16235 = vmatpush3.bf16.msra.mxu0 %v16219_v40 }
 0x7d7   :  { %11751 = vmatprep.mubr.f32.mxu1 %v24192_v63  ;;  %15971 = vmatprep.mubr.msk.f32.mxu0 %vm18579_vm1, %v24192_v63 }
 0x7d8   :  { %16218 = vmatprep.subr.bf16.mxu1 %v24220_v62  ;;  %15830 = vmatprep.subr.bf16.mxu0 %v18355_v20  ;;  %v18349_v62 = vld [vmem:[%s24149_s3 + $0xa8] ss:$12 sps:$4 sm:$0xff]  }
 0x7d9   :  { %15222 = vmatmul.mubr.msk.f32.vlgmr.msra.gmra.mrb[34].mxu1 %vm4075_vm0, %v11538_v24  ;;  %15972 = vmatmul.mubr.msk.f32.vlgmr.msra.gmra.mrb[72].mxu0 %vm4075_vm0, %v11541_v39 }
 0x7da   :  { %16220 = vmatpush3.bf16.msra.mxu1 %v16219_v40  ;;  %15964 = vmatprep.mubr.msk.f32.mxu1 %vm18579_vm1, %v24192_v63 }
 0x7db   :  { %16222 = vmatprep.subr.bf16.mxu1 %v23470_v18  ;;  %15831 = vmatpush3.bf16.msra.mxu0 %v18356_v22  ;;  %v18336_v18 = vld [vmem:[%s24149_s3 + $0x34] ss:$12 sps:$4 sm:$0xff]  }
 0x7dc   :  { %15832 = vmatprep.subr.bf16.mxu0 %v18360_v34 }
 0x7dd   :  { %15965 = vmatmul.mubr.msk.f32.vlgmr.msra.gmra.mrb[36].mxu1 %vm4075_vm0, %v11538_v24  ;;  %v18394_v24 = vld [vmem:[%s24149_s3 + $0x184] ss:$12 sps:$4 sm:$0xff]  }
 0x7de   :  { %16224 = vmatpush1.bf16.msra.mxu1 %v23475_v8  ;;  %11895 = vmatprep.mubr.f32.mxu1 %v24192_v63  ;;  %v18339_v8 = vld [vmem:[%s24149_s3 + $0x4c] ss:$12 sps:$4 sm:$0xff]  }
 0x7df   :  { %16230 = vmatprep.subr.bf16.mxu1 %v16214_v14  ;;  %15833 = vmatpush3.bf16.msra.mxu0 %v18361_v13  ;;  %v18395_v14 = vld [vmem:[%s24149_s3 + $0x248] ss:$12 sps:$4 sm:$0xff]  }
 0x7e0   :  { %15834 = vmatprep.subr.bf16.mxu0 %v18365_v4 }
 0x7e1   :  { %15224 = vmatmul.mubr.msk.f32.vlgmr.msra.gmra.mrb[38].mxu1 %vm4075_vm0, %v11541_v39 }
 0x7e2   :  { %16232 = vmatpush1.bf16.msra.mxu1 %v16216_v49  ;;  %12037 = vmatprep.mubr.f32.mxu1 %v24192_v63 }
 0x7e3   :  { %13199 = vmatprep.subr.bf16.mxu1 %v18330_v55  ;;  %15835 = vmatpush3.bf16.msra.mxu0 %v18366_v57 }
 0x7e4   :  { %15836 = vmatprep.subr.bf16.mxu0 %v18370_v10 }
 0x7e5   :  { %15226 = vmatmul.mubr.msk.f32.vlgmr.msra.gmra.mrb[40].mxu1 %vm4075_vm0, %v11541_v39 }
 0x7e6   :  { %13200 = vmatpush1.bf16.msra.mxu1 %v18328_v53 }
 0x7e7   :  { %13201 = vmatprep.subr.bf16.mxu1 %v18333_v25  ;;  %15837 = vmatpush3.bf16.msra.mxu0 %v18371_v6 }
 0x7e8   :  { %15838 = vmatprep.subr.bf16.mxu0 %v18375_v7 }
 0x7ea   :  { %13202 = vmatpush1.bf16.msra.mxu1 %v18331_v47 }
 0x7eb   :  { %13203 = vmatprep.subr.bf16.mxu1 %v18336_v18  ;;  %15839 = vmatpush3.bf16.msra.mxu0 %v18376_v51 }
 0x7ec   :  { %15840 = vmatprep.subr.bf16.mxu0 %v18380_v5 }
 0x7ee   :  { %13204 = vmatpush1.bf16.msra.mxu1 %v18334_v30 }
 0x7ef   :  { %13205 = vmatprep.subr.bf16.mxu1 %v18339_v8  ;;  %15841 = vmatpush3.bf16.msra.mxu0 %v18381_v43 }
 0x7f0   :  { %15842 = vmatprep.subr.bf16.mxu0 %v18385_v9 }
 0x7f2   :  { %13206 = vmatpush1.bf16.msra.mxu1 %v18337_v45 }
 0x7f3   :  { %13207 = vmatprep.subr.bf16.mxu1 %v18342_v50  ;;  %15843 = vmatpush3.bf16.msra.mxu0 %v18386_v26 }
 0x7f4   :  { %15844 = vmatprep.subr.bf16.mxu0 %v18390_v21  ;;  %v18401_v21 = vld [vmem:[%s24149_s3 + $0x1a0] ss:$12 sps:$4 sm:$0xff]  }
 0x7f6   :  { %13208 = vmatpush1.bf16.msra.mxu1 %v18340_v32 }
 0x7f7   :  { %13209 = vmatprep.subr.bf16.mxu1 %v18345_v61  ;;  %15845 = vmatpush3.bf16.msra.mxu0 %v18391_v28  ;;  %v18405_v28 = vld [vmem:[%s24149_s3 + $0x278] ss:$12 sps:$4 sm:$0xff]  }
 0x7f8   :  { %15852 = vmatprep.subr.bf16.mxu0 %v18395_v14  ;;  %v18406_v14 = vld [vmem:[%s24149_s3 + $0x1b8] ss:$12 sps:$4 sm:$0xff]  }
 0x7fa   :  { %13210 = vmatpush1.bf16.msra.mxu1 %v18343_v12 }
 0x7fb   :  { %13211 = vmatprep.subr.bf16.mxu1 %v18348_v54 }
 0x7fe   :  { %13212 = vmatpush1.bf16.msra.mxu1 %v18346_v59 }
 0x7ff   :  { %13213 = vmatprep.subr.bf16.mxu1 %v18351_v29 }
 0x802   :  { %13214 = vmatpush1.bf16.msra.mxu1 %v18349_v62 }
 0x803   :  { %13215 = vmatprep.subr.bf16.mxu1 %v18354_v0 }
 0x806   :  { %13216 = vmatpush1.bf16.msra.mxu1 %v18352_v38 }
 0x807   :  { %13217 = vmatprep.subr.bf16.mxu1 %v18359_v37 }
 0x80a   :  { %13218 = vmatpush1.bf16.msra.mxu1 %v18357_v15  ;;  %v24224_v15 = vld [vmem:[#allocation8_spill] sm:$0xff] }
 0x80b   :  { %13219 = vmatprep.subr.bf16.mxu1 %v18364_v41 }
 0x80e   :  { %13220 = vmatpush1.bf16.msra.mxu1 %v18362_v3 }
 0x80f   :  { %13221 = vmatprep.subr.bf16.mxu1 %v18369_v27 }
 0x812   :  { %13222 = vmatpush1.bf16.msra.mxu1 %v18367_v16 }
 0x813   :  { %13223 = vmatprep.subr.bf16.mxu1 %v18374_v2 }
 0x816   :  { %13224 = vmatpush1.bf16.msra.mxu1 %v18372_v23 }
 0x817   :  { %13225 = vmatprep.subr.bf16.mxu1 %v18379_v19 }
 0x81a   :  { %13226 = vmatpush1.bf16.msra.mxu1 %v18377_v17 }
 0x81b   :  { %13227 = vmatprep.subr.bf16.mxu1 %v18384_v52  ;;  %v18392_v52 = vld [vmem:[%s24149_s3 + $0x180] ss:$12 sps:$4 sm:$0xff]  }
 0x81e   :  { %13228 = vmatpush1.bf16.msra.mxu1 %v18382_v58  ;;  %v18400_v58 = vld [vmem:[%s24149_s3 + $0x260] ss:$12 sps:$4 sm:$0xff]  }
 0x81f   :  { %13229 = vmatprep.subr.bf16.mxu1 %v18389_v35  ;;  %v18397_v35 = vld [vmem:[%s24149_s3 + $0x198] ss:$12 sps:$4 sm:$0xff]  }
 0x822   :  { %13230 = vmatpush1.bf16.msra.mxu1 %v18387_v44  ;;  %v18404_v44 = vld [vmem:[%s24149_s3 + $0x1b4] ss:$12 sps:$4 sm:$0xff]  }
 0x823   :  { %13240 = vmatprep.subr.bf16.mxu1 %v18394_v24  ;;  %v18402_v24 = vld [vmem:[%s24149_s3 + $0x1b0] ss:$12 sps:$4 sm:$0xff]  }
 0x8a4   :  { %v11611_v60 = vpop.f32.mrb[30].mxu1 }
 0x8a5   :  { %v11613_v42 = vpop.f32.mrb[31].mxu1  ;;  %v12117_v50 = vrot.slane %v11611_v60, %v24222_v48  ;;  %v18409_v60 = vld [vmem:[%s24149_s3 + $0x1cc] ss:$12 sps:$4 sm:$0xff]  }
 0x8a7   :  { %v12142_v29 = vmul.f32 %v22728_v56, %v12117_v50  ;;  %v18427_v50 = vld [vmem:[%s24149_s3 + $0x228] ss:$12 sps:$4 sm:$0xff]  }
 0x8a8   :  { %v11682_v33 = vpop.f32.mrb[32].mxu1  ;;  %v11968_v36 = vpop.f32.mrb[70].mxu0 }
 0x8a9   :  { %v12125_v49 = vrot.slane %v11682_v33, %v24222_v48  ;;  %v11684_v40 = vpop.f32.mrb[33].mxu1  ;;  %v11970_v39 = vpop.f32.mrb[71].mxu0  ;;  %v12160_v34 = vrot.slane %v11968_v36, %v24222_v48  ;;  %v18407_v33 = vld [vmem:[%s24149_s3 + $0x1c8] ss:$12 sps:$4 sm:$0xff]   ;;  %v18411_v36 = vld [vmem:[%s24149_s3 + $0x1d0] ss:$12 sps:$4 sm:$0xff]  }
 0x8aa   :  { %v12129_v20 = vrot.slane %v11684_v40, %v24222_v48  ;;  %v12164_v55 = vrot.slane %v11970_v39, %v24222_v48  ;;  %v18415_v40 = vld [vmem:[%s24149_s3 + $0x2a8] ss:$12 sps:$4 sm:$0xff]   ;;  %v18412_v39 = vld [vmem:[%s24149_s3 + $0x1e0] ss:$12 sps:$4 sm:$0xff]  }
 0x8ab   :  { %v12144_v22 = vmul.f32 %v22937_v1, %v12125_v49  ;;  %v12121_v1 = vrot.slane %v11613_v42, %v24222_v48  ;;  %v18410_v42 = vld [vmem:[%s24149_s3 + $0x290] ss:$12 sps:$4 sm:$0xff]  }
 0x8ac   :  { %v12145_v13 = vmul.f32 %v22795_v31, %v12129_v20  ;;  %v11753_v53 = vpop.f32.mrb[34].mxu1  ;;  %v12110_v25 = vpop.f32.mrb[72].mxu0  ;;  %v24223_v31 = vld [vmem:[#allocation15_spill] sm:$0xff] }
 0x8ad   :  { %v23693_v47 = vadd.f32 %v12160_v34, %v12144_v22  ;;  %v11755_v18 = vpop.f32.mrb[35].mxu1  ;;  %v15973_v30 = vpop.f32.mrb[73].mxu0  ;;  %v12176_v12 = vrot.slane %v12110_v25, %v24222_v48  ;;  %v12133_v62 = vrot.slane %v11753_v53, %v24222_v48  ;;  %v12143_v41 = vmul.f32 %v24224_v15, %v12121_v1  ;;  %v18414_v49 = vld [vmem:[%s24149_s3 + $0x1e4] ss:$12 sps:$4 sm:$0xff]   ;;  %v18416_v20 = vld [vmem:[%s24149_s3 + $0x1e8] ss:$12 sps:$4 sm:$0xff]  }
 0x8ae   :  { %v12180_v8 = vadd.f32 %v12164_v55, %v12145_v13  ;;  %v12137_v4 = vrot.slane %v11755_v18, %v24222_v48  ;;  %v18419_v22 = vld [vmem:[%s24149_s3 + $0x1fc] ss:$12 sps:$4 sm:$0xff]   ;;  %v18420_v34 = vld [vmem:[%s24149_s3 + $0x2c0] ss:$12 sps:$4 sm:$0xff]   ;;  %v18417_v13 = vld [vmem:[%s24149_s3 + $0x1f8] ss:$12 sps:$4 sm:$0xff]  }
 0x8af   :  { %v12146_v16 = vmul.f32 %v24206_v46, %v12133_v62  ;;  %v18396_v46 = vld [vmem:[%s24149_s3 + $0x188] ss:$12 sps:$4 sm:$0xff]   ;;  %v18421_v55 = vld [vmem:[%s24149_s3 + $0x200] ss:$12 sps:$4 sm:$0xff]   ;;  %v18425_v25 = vld [vmem:[%s24149_s3 + $0x2d8] ss:$12 sps:$4 sm:$0xff]  }
 0x8b0   :  { %v11824_v45 = vpop.f32.mrb[36].mxu1  ;;  %v12147_v7 = vmul.f32 %v23385_v11, %v12137_v4  ;;  %v12187_v19 = vmax.f32 %v12180_v8, 0.0  ;;  %v18399_v11 = vld [vmem:[%s24149_s3 + $0x19c] ss:$12 sps:$4 sm:$0xff]   ;;  %v18424_v53 = vld [vmem:[%s24149_s3 + $0x214] ss:$12 sps:$4 sm:$0xff]  }
 0x8b1   :  { %v12141_v32 = vrot.slane %v11824_v45, %v24222_v48  ;;  %v15966_v61 = vpop.f32.mrb[37].mxu1  ;;  %v18422_v18 = vld [vmem:[%s24149_s3 + $0x210] ss:$12 sps:$4 sm:$0xff]   ;;  %v18426_v30 = vld [vmem:[%s24149_s3 + $0x218] ss:$12 sps:$4 sm:$0xff]  }
 0x8b2   :  { %v12194_v26 = vpack.c.bf16 %v12187_v19, %v12187_v19  ;;  %v18429_v8 = vld [vmem:[%s24149_s3 + $0x22c] ss:$12 sps:$4 sm:$0xff]   ;;  %v18430_v45 = vld [vmem:[%s24149_s3 + $0x2f0] ss:$12 sps:$4 sm:$0xff]   ;;  %v12186_v61 = vmax.f32 %v23693_v47, 0.0 }
 0x8b3   :  { %v12148_v54 = vmul.f32 %v12141_v32, %v24223_v31  ;;  %v18431_v32 = vld [vmem:[%s24149_s3 + $0x230] ss:$12 sps:$4 sm:$0xff]   ;;  %v18436_v47 = vld [vmem:[%s24149_s3 + $0x308] ss:$12 sps:$4 sm:$0xff]   ;;  %v18440_v62 = vld [vmem:[%s24149_s3 + $0x3e0] ss:$12 sps:$4 sm:$0xff]  }
 0x8b4   :  { %v11897_v59 = vpop.f32.mrb[38].mxu1  ;;  %v18434_v1 = vld [vmem:[%s24149_s3 + $0x244] ss:$12 sps:$4 sm:$0xff]   ;;  %v18441_v15 = vld [vmem:[%s24149_s3 + $0x320] ss:$12 sps:$4 sm:$0xff]  }
 0x8b5   :  { %v23702_v0 = vadd.f32 %v12176_v12, %v12148_v54  ;;  %v12152_v38 = vrot.slane %v11897_v59, %v24222_v48  ;;  %v11899_v37 = vpop.f32.mrb[39].mxu1  ;;  %v18435_v12 = vld [vmem:[%s24149_s3 + $0x3c8] ss:$12 sps:$4 sm:$0xff]   ;;  %v18432_v54 = vld [vmem:[%s24149_s3 + $0x240] ss:$12 sps:$4 sm:$0xff]   ;;  %v23820_v59 = vpack.c.bf16 %v12186_v61, %v12186_v61 }
 0x8b6   :  { %v12156_v3 = vrot.slane %v11899_v37, %v24222_v48  ;;  %v18437_v37 = vld [vmem:[%s24149_s3 + $0x258] ss:$12 sps:$4 sm:$0xff]   ;;  %v18460_v19 = vld [vmem:[%s24149_s3 + $0x440] ss:$12 sps:$4 sm:$0xff]   ;;  %v18503_v61 = vld [vmem:[%s24149_s3 + $0x3f0] ss:$12 sps:$4 sm:$0xff]  }
 0x8b7   :  { %v12177_v57 = vadd.f32 %v12152_v38, %v12142_v29  ;;  %v18439_v29 = vld [vmem:[%s24149_s3 + $0x25c] ss:$12 sps:$4 sm:$0xff]   ;;  %v18445_v4 = vld [vmem:[%s24149_s3 + $0x3f8] ss:$12 sps:$4 sm:$0xff]  }
 0x8b8   :  { %v12178_v27 = vadd.f32 %v12156_v3, %v12143_v41  ;;  %v12039_v10 = vpop.f32.mrb[40].mxu1  ;;  %v18444_v41 = vld [vmem:[%s24149_s3 + $0x274] ss:$12 sps:$4 sm:$0xff]   ;;  %v18442_v3 = vld [vmem:[%s24149_s3 + $0x270] ss:$12 sps:$4 sm:$0xff]  }
 0x8b9   :  { %v12184_v6 = vmax.f32 %v12177_v57, 0.0  ;;  %v12168_v56 = vrot.slane %v12039_v10, %v24222_v48  ;;  %v12041_v2 = vpop.f32.mrb[41].mxu1  ;;  %v18446_v57 = vld [vmem:[%s24149_s3 + $0x338] ss:$12 sps:$4 sm:$0xff]   ;;  %v18450_v10 = vld [vmem:[%s24149_s3 + $0x410] ss:$12 sps:$4 sm:$0xff]  }
 0x8ba   :  { %v12185_v23 = vmax.f32 %v12178_v27, 0.0  ;;  %v12172_v51 = vrot.slane %v12041_v2, %v24222_v48  ;;  %v18449_v27 = vld [vmem:[%s24149_s3 + $0x28c] ss:$12 sps:$4 sm:$0xff]   ;;  %v18455_v2 = vld [vmem:[%s24149_s3 + $0x428] ss:$12 sps:$4 sm:$0xff]  }
 0x8bb   :  { %v23712_v5 = vadd.f32 %v12168_v56, %v12146_v16  ;;  %v12191_v9 = vpack.c.bf16 %v12184_v6, %v12184_v6  ;;  %v18447_v16 = vld [vmem:[%s24149_s3 + $0x288] ss:$12 sps:$4 sm:$0xff]   ;;  %v18451_v6 = vld [vmem:[%s24149_s3 + $0x350] ss:$12 sps:$4 sm:$0xff]  }
 0x8bc   :  { %v12192_v17 = vpack.c.bf16 %v12185_v23, %v12185_v23  ;;  %v23714_v43 = vadd.f32 %v12172_v51, %v12147_v7  ;;  %v18454_v56 = vld [vmem:[%s24149_s3 + $0x2a4] ss:$12 sps:$4 sm:$0xff]   ;;  %v18452_v7 = vld [vmem:[%s24149_s3 + $0x2a0] ss:$12 sps:$4 sm:$0xff]   ;;  %v18456_v23 = vld [vmem:[%s24149_s3 + $0x368] ss:$12 sps:$4 sm:$0xff]  }
 0x8bd   :  { %v18459_v51 = vld [vmem:[%s24149_s3 + $0x2bc] ss:$12 sps:$4 sm:$0xff]  }
 0x8be   :  { %13231 = vmatprep.mubr.bf16.mxu1 %v12192_v17  ;;  %13395 = vmatprep.mubr.bf16.mxu0 %v12192_v17  ;;  %v12189_v31 = vmax.f32 %v23714_v43, 0.0  ;;  %v18457_v17 = vld [vmem:[%s24149_s3 + $0x2b8] ss:$12 sps:$4 sm:$0xff]   ;;  %v18461_v43 = vld [vmem:[%s24149_s3 + $0x380] ss:$12 sps:$4 sm:$0xff]  }
 0x8bf   :  { %13232 = vmatmul.mubr.bf16.vlgmr.msra.gmra.mrb[44].mxu1 %v12191_v9  ;;  %13396 = vmatmul.mubr.bf16.vlgmr.msra.gmra.mrb[76].mxu0 %v12191_v9  ;;  %v18462_v9 = vld [vmem:[%s24149_s3 + $0x2d0] ss:$12 sps:$4 sm:$0xff]  }
 0x8c0   :  { %13241 = vmatpush1.bf16.msra.mxu1 %v18392_v52  ;;  %15853 = vmatpush3.bf16.msra.mxu0 %v18396_v46  ;;  %v23828_v38 = vpack.c.bf16 %v12189_v31, %v12189_v31  ;;  %v18464_v52 = vld [vmem:[%s24149_s3 + $0x2d4] ss:$12 sps:$4 sm:$0xff]   ;;  %v18465_v46 = vld [vmem:[%s24149_s3 + $0x458] ss:$12 sps:$4 sm:$0xff]  }
 0x8c1   :  { %13272 = vmatprep.mubr.bf16.mxu1 %v12194_v26  ;;  %13435 = vmatprep.mubr.bf16.mxu0 %v12194_v26  ;;  %v18470_v26 = vld [vmem:[%s24149_s3 + $0x470] ss:$12 sps:$4 sm:$0xff]  }
 0x8c2   :  { %13242 = vmatprep.subr.bf16.mxu1 %v18399_v11  ;;  %15854 = vmatprep.subr.bf16.mxu0 %v18400_v58  ;;  %v18466_v11 = vld [vmem:[%s24149_s3 + $0x398] ss:$12 sps:$4 sm:$0xff]  }
 0x8c3   :  { %v18469_v58 = vld [vmem:[%s24149_s3 + $0x2ec] ss:$12 sps:$4 sm:$0xff]   ;;  %v18511_v31 = vld [vmem:[%s24149_s3 + $0x424] ss:$12 sps:$4 sm:$0xff]  }
 0x8c4   :  { %13243 = vmatpush1.bf16.msra.mxu1 %v18397_v35  ;;  %15855 = vmatpush3.bf16.msra.mxu0 %v18401_v21  ;;  %v18467_v35 = vld [vmem:[%s24149_s3 + $0x2e8] ss:$12 sps:$4 sm:$0xff]   ;;  %v18471_v21 = vld [vmem:[%s24149_s3 + $0x3b0] ss:$12 sps:$4 sm:$0xff]  }
 0x8c5   :  { %13244 = vmatprep.subr.bf16.mxu1 %v18404_v44  ;;  %15856 = vmatprep.subr.bf16.mxu0 %v18405_v28  ;;  %v12188_v44 = vmax.f32 %v23712_v5, 0.0  ;;  %v18474_v28 = vld [vmem:[%s24149_s3 + $0x304] ss:$12 sps:$4 sm:$0xff]   ;;  %v18478_v5 = vld [vmem:[%s24149_s3 + $0x488] ss:$12 sps:$4 sm:$0xff]  }
 0x8c8   :  { %13245 = vmatpush1.bf16.msra.mxu1 %v18402_v24  ;;  %15857 = vmatpush3.bf16.msra.mxu0 %v18406_v14  ;;  %v18472_v24 = vld [vmem:[%s24149_s3 + $0x300] ss:$12 sps:$4 sm:$0xff]   ;;  %v23917_v14 = vpack.c.bf16 %v12188_v44, %v12188_v44 }
 0x8c9   :  { %13246 = vmatprep.subr.bf16.mxu1 %v18409_v60  ;;  %15858 = vmatprep.subr.bf16.mxu0 %v18410_v42  ;;  %v18477_v60 = vld [vmem:[%s24149_s3 + $0x31c] ss:$12 sps:$4 sm:$0xff]   ;;  %v18475_v42 = vld [vmem:[%s24149_s3 + $0x318] ss:$12 sps:$4 sm:$0xff]  }
 0x8ca   :  { %v24226_v44 = vld [vmem:[#allocation5_spill] sm:$0xff] }
 0x8cc   :  { %13247 = vmatpush1.bf16.msra.mxu1 %v18407_v33  ;;  %15859 = vmatpush3.bf16.msra.mxu0 %v18411_v36  ;;  %v12190_v33 = vmax.f32 %v23702_v0, 0.0  ;;  %v18481_v36 = vld [vmem:[%s24149_s3 + $0x334] ss:$12 sps:$4 sm:$0xff]   ;;  %v18484_v0 = vld [vmem:[%s24149_s3 + $0x34c] ss:$12 sps:$4 sm:$0xff]  }
 0x8cd   :  { %13248 = vmatprep.subr.bf16.mxu1 %v18414_v49  ;;  %15860 = vmatprep.subr.bf16.mxu0 %v18415_v40  ;;  %v18479_v49 = vld [vmem:[%s24149_s3 + $0x330] ss:$12 sps:$4 sm:$0xff]  }
 0x8ce   :  { %v12197_v40 = vpack.c.bf16 %v12190_v33, %v12190_v33 }
 0x8d0   :  { %13249 = vmatpush1.bf16.msra.mxu1 %v18412_v39  ;;  %15861 = vmatpush3.bf16.msra.mxu0 %v18416_v20  ;;  %v18482_v39 = vld [vmem:[%s24149_s3 + $0x348] ss:$12 sps:$4 sm:$0xff]   ;;  %v18487_v20 = vld [vmem:[%s24149_s3 + $0x364] ss:$12 sps:$4 sm:$0xff]  }
 0x8d1   :  { %13250 = vmatprep.subr.bf16.mxu1 %v18419_v22  ;;  %15862 = vmatprep.subr.bf16.mxu0 %v18420_v34  ;;  %v18485_v22 = vld [vmem:[%s24149_s3 + $0x360] ss:$12 sps:$4 sm:$0xff]   ;;  %v18490_v34 = vld [vmem:[%s24149_s3 + $0x37c] ss:$12 sps:$4 sm:$0xff]  }
 0x8d4   :  { %13251 = vmatpush1.bf16.msra.mxu1 %v18417_v13  ;;  %15863 = vmatpush3.bf16.msra.mxu0 %v18421_v55  ;;  %v18488_v13 = vld [vmem:[%s24149_s3 + $0x378] ss:$12 sps:$4 sm:$0xff]   ;;  %v18493_v55 = vld [vmem:[%s24149_s3 + $0x394] ss:$12 sps:$4 sm:$0xff]  }
 0x8d5   :  { %13252 = vmatprep.subr.bf16.mxu1 %v18424_v53  ;;  %15864 = vmatprep.subr.bf16.mxu0 %v18425_v25  ;;  %v18491_v53 = vld [vmem:[%s24149_s3 + $0x390] ss:$12 sps:$4 sm:$0xff]   ;;  %v18496_v25 = vld [vmem:[%s24149_s3 + $0x3ac] ss:$12 sps:$4 sm:$0xff]  }
 0x8d8   :  { %13253 = vmatpush1.bf16.msra.mxu1 %v18422_v18  ;;  %15865 = vmatpush3.bf16.msra.mxu0 %v18426_v30  ;;  %v18494_v18 = vld [vmem:[%s24149_s3 + $0x3a8] ss:$12 sps:$4 sm:$0xff]   ;;  %v18499_v30 = vld [vmem:[%s24149_s3 + $0x3c4] ss:$12 sps:$4 sm:$0xff]  }
 0x8d9   :  { %13254 = vmatprep.subr.bf16.mxu1 %v18429_v8  ;;  %15866 = vmatprep.subr.bf16.mxu0 %v18430_v45  ;;  %v18497_v8 = vld [vmem:[%s24149_s3 + $0x3c0] ss:$12 sps:$4 sm:$0xff]   ;;  %v18502_v45 = vld [vmem:[%s24149_s3 + $0x3dc] ss:$12 sps:$4 sm:$0xff]  }
 0x8dc   :  { %13255 = vmatpush1.bf16.msra.mxu1 %v18427_v50  ;;  %15867 = vmatpush3.bf16.msra.mxu0 %v18431_v32  ;;  %v18500_v50 = vld [vmem:[%s24149_s3 + $0x3d8] ss:$12 sps:$4 sm:$0xff]   ;;  %v18505_v32 = vld [vmem:[%s24149_s3 + $0x3f4] ss:$12 sps:$4 sm:$0xff]  }
 0x8dd   :  { %13256 = vmatprep.subr.bf16.mxu1 %v18434_v1  ;;  %15874 = vmatprep.subr.bf16.mxu0 %v18435_v12  ;;  %v18508_v1 = vld [vmem:[%s24149_s3 + $0x40c] ss:$12 sps:$4 sm:$0xff]   ;;  %v18506_v12 = vld [vmem:[%s24149_s3 + $0x408] ss:$12 sps:$4 sm:$0xff]  }
 0x8df   :  { %13436 = vmatmul.mubr.bf16.vlgmr.msra.gmra.mrb[80].mxu0 %v23820_v59 }
 0x8e0   :  { %13257 = vmatpush1.bf16.msra.mxu1 %v18432_v54  ;;  %15875 = vmatpush3.bf16.msra.mxu0 %v18436_v47  ;;  %v18509_v54 = vld [vmem:[%s24149_s3 + $0x420] ss:$12 sps:$4 sm:$0xff]   ;;  %v18514_v47 = vld [vmem:[%s24149_s3 + $0x43c] ss:$12 sps:$4 sm:$0xff]  }
 0x8e1   :  { %13475 = vmatprep.mubr.bf16.mxu0 %v23828_v38  ;;  %13258 = vmatprep.subr.bf16.mxu1 %v18439_v29  ;;  %v18517_v29 = vld [vmem:[%s24149_s3 + $0x454] ss:$12 sps:$4 sm:$0xff]  }
 0x8e2   :  { %15876 = vmatprep.subr.bf16.mxu0 %v18440_v62  ;;  %v18515_v62 = vld [vmem:[%s24149_s3 + $0x450] ss:$12 sps:$4 sm:$0xff]  }
 0x8e4   :  { %13259 = vmatpush1.bf16.msra.mxu1 %v18437_v37  ;;  %15877 = vmatpush3.bf16.msra.mxu0 %v18441_v15  ;;  %v18518_v37 = vld [vmem:[%s24149_s3 + $0x468] ss:$12 sps:$4 sm:$0xff]   ;;  %v18523_v15 = vld [vmem:[%s24149_s3 + $0x484] ss:$12 sps:$4 sm:$0xff]  }
 0x8e5   :  { %13260 = vmatprep.subr.bf16.mxu1 %v18444_v41  ;;  %15878 = vmatprep.subr.bf16.mxu0 %v18445_v4  ;;  %v18521_v41 = vld [vmem:[%s24149_s3 + $0x480] ss:$12 sps:$4 sm:$0xff]   ;;  %v24225_v4 = vmov 0  }
 0x8e8   :  { %13261 = vmatpush1.bf16.msra.mxu1 %v18442_v3  ;;  %15879 = vmatpush3.bf16.msra.mxu0 %v18446_v57  ;;  %v18524_v3 = vld [vmem:[%s24149_s3 + $0x558] ss:$12 sps:$4 sm:$0xff]  }
 0x8e9   :  { %13262 = vmatprep.subr.bf16.mxu1 %v18449_v27  ;;  %15880 = vmatprep.subr.bf16.mxu0 %v18450_v10  ;;  %v18525_v57 = vld [vmem:[%s24149_s3 + $0x498] ss:$12 sps:$4 sm:$0xff]   ;;  %v18526_v27 = vld [vmem:[%s24149_s3 + $0x570] ss:$12 sps:$4 sm:$0xff]  }
 0x8ea   :  { %v18527_v10 = vld [vmem:[%s24149_s3 + $0x4b0] ss:$12 sps:$4 sm:$0xff]  }
 0x8ec   :  { %13263 = vmatpush1.bf16.msra.mxu1 %v18447_v16  ;;  %15881 = vmatpush3.bf16.msra.mxu0 %v18451_v6  ;;  %v18528_v16 = vld [vmem:[%s24149_s3 + $0x588] ss:$12 sps:$4 sm:$0xff]  }
 0x8ed   :  { %13264 = vmatprep.subr.bf16.mxu1 %v18454_v56  ;;  %15882 = vmatprep.subr.bf16.mxu0 %v18455_v2  ;;  %v18529_v6 = vld [vmem:[%s24149_s3 + $0x4c8] ss:$12 sps:$4 sm:$0xff]   ;;  %v18530_v56 = vld [vmem:[%s24149_s3 + $0x5a0] ss:$12 sps:$4 sm:$0xff]  }
 0x8ee   :  { %v18531_v2 = vld [vmem:[%s24149_s3 + $0x4e0] ss:$12 sps:$4 sm:$0xff]  }
 0x8f0   :  { %13265 = vmatpush1.bf16.msra.mxu1 %v18452_v7  ;;  %15883 = vmatpush3.bf16.msra.mxu0 %v18456_v23  ;;  %v18532_v7 = vld [vmem:[%s24149_s3 + $0x5b8] ss:$12 sps:$4 sm:$0xff]  }
 0x8f1   :  { %13266 = vmatprep.subr.bf16.mxu1 %v18459_v51  ;;  %15884 = vmatprep.subr.bf16.mxu0 %v18460_v19  ;;  %v18533_v23 = vld [vmem:[%s24149_s3 + $0x4f8] ss:$12 sps:$4 sm:$0xff]   ;;  %v18534_v51 = vld [vmem:[%s24149_s3 + $0x5d0] ss:$12 sps:$4 sm:$0xff]  }
 0x8f2   :  { %v18535_v19 = vld [vmem:[%s24149_s3 + $0x510] ss:$12 sps:$4 sm:$0xff]  }
 0x8f4   :  { %13267 = vmatpush1.bf16.msra.mxu1 %v18457_v17  ;;  %15885 = vmatpush3.bf16.msra.mxu0 %v18461_v43 }
 0x8f5   :  { %13268 = vmatprep.subr.bf16.mxu1 %v18464_v52  ;;  %15886 = vmatprep.subr.bf16.mxu0 %v18465_v46 }
 0x8f8   :  { %13269 = vmatpush1.bf16.msra.mxu1 %v18462_v9  ;;  %15887 = vmatpush3.bf16.msra.mxu0 %v18466_v11  ;;  %v18536_v11 = vld [vmem:[%s24149_s3 + $0x5e8] ss:$12 sps:$4 sm:$0xff]  }
 0x8f9   :  { %13270 = vmatprep.subr.bf16.mxu1 %v18469_v58  ;;  %15888 = vmatprep.subr.bf16.mxu0 %v18470_v26  ;;  %v18537_v58 = vld [vmem:[%s24149_s3 + $0x528] ss:$12 sps:$4 sm:$0xff]   ;;  %v18538_v26 = vld [vmem:[%s24149_s3 + $0x600] ss:$12 sps:$4 sm:$0xff]  }
 0x8fc   :  { %13271 = vmatpush1.bf16.msra.mxu1 %v18467_v35  ;;  %15889 = vmatpush3.bf16.msra.mxu0 %v18471_v21  ;;  %v18539_v35 = vld [vmem:[%s24149_s3 + $0x540] ss:$12 sps:$4 sm:$0xff]  }
 0x8fd   :  { %13281 = vmatprep.subr.bf16.mxu1 %v18474_v28  ;;  %15974 = vmatprep.subr.bf16.mxu0 %v24192_v63  ;;  %v15228_v21 = vld [vmem:[%s24150_s4 + $0x2] ss:$8 sm:$0x7] }
 0x8fe   :  { %v12408_v28 = vrot.slane %v15228_v21, %v24226_v44 }
 0x8ff   :  { %13273 = vmatmul.mubr.bf16.vlgmr.msra.gmra.mrb[44].mxu1 %v23820_v59  ;;  %13476 = vmatmul.mubr.bf16.vlgmr.msra.gmra.mrb[84].mxu0 %v23917_v14  ;;  %v18512_v59 = vld [vmem:[%s24149_s3 + $0x438] ss:$12 sps:$4 sm:$0xff]  }
 0x900   :  { %13282 = vmatpush1.bf16.msra.mxu1 %v18472_v24  ;;  %13313 = vmatprep.mubr.bf16.mxu1 %v23828_v38  ;;  %v18520_v38 = vld [vmem:[%s24149_s3 + $0x46c] ss:$12 sps:$4 sm:$0xff]  }
 0x901   :  { %13283 = vmatprep.subr.bf16.mxu1 %v18477_v60  ;;  %15975 = vmatpush3.bf16.msra.mxu0 %v18478_v5 }
 0x902   :  { %15976 = vmatprep.mubr.msk.bf16.mxu0 %vm18579_vm1, %v24192_v63  ;;  %15898 = vmatprep.subr.bf16.mxu0 %v18524_v3  ;;  %v18546_v3 = vld [vmem:[%s24149_s3 + $0x6a8] ss:$12 sps:$4 sm:$0xff]  }
 0x904   :  { %13284 = vmatpush1.bf16.msra.mxu1 %v18475_v42 }
 0x905   :  { %13285 = vmatprep.subr.bf16.mxu1 %v18481_v36 }
 0x907   :  { %15977 = vmatmul.mubr.msk.bf16.vlgmr.msra.gmra.mrb[88].mxu0 %vm4075_vm0, %v12197_v40 }
 0x908   :  { %13286 = vmatpush1.bf16.msra.mxu1 %v18479_v49  ;;  %15899 = vmatpush3.bf16.msra.mxu0 %v18525_v57  ;;  %v18547_v57 = vld [vmem:[%s24149_s3 + $0x6c0] ss:$12 sps:$4 sm:$0xff]  }
 0x909   :  { %13287 = vmatprep.subr.bf16.mxu1 %v18484_v0  ;;  %15900 = vmatprep.subr.bf16.mxu0 %v18526_v27  ;;  %v18548_v27 = vld [vmem:[%s24149_s3 + $0x6d8] ss:$12 sps:$4 sm:$0xff]  }
 0x90c   :  { %13288 = vmatpush1.bf16.msra.mxu1 %v18482_v39  ;;  %15901 = vmatpush3.bf16.msra.mxu0 %v18527_v10  ;;  %v18549_v10 = vld [vmem:[%s24149_s3 + $0x6f0] ss:$12 sps:$4 sm:$0xff]  }
 0x90d   :  { %13289 = vmatprep.subr.bf16.mxu1 %v18487_v20  ;;  %15902 = vmatprep.subr.bf16.mxu0 %v18528_v16 }
 0x910   :  { %13290 = vmatpush1.bf16.msra.mxu1 %v18485_v22  ;;  %15903 = vmatpush3.bf16.msra.mxu0 %v18529_v6 }
 0x911   :  { %13291 = vmatprep.subr.bf16.mxu1 %v18490_v34  ;;  %15904 = vmatprep.subr.bf16.mxu0 %v18530_v56 }
 0x914   :  { %13292 = vmatpush1.bf16.msra.mxu1 %v18488_v13  ;;  %15905 = vmatpush3.bf16.msra.mxu0 %v18531_v2 }
 0x915   :  { %13293 = vmatprep.subr.bf16.mxu1 %v18493_v55  ;;  %15906 = vmatprep.subr.bf16.mxu0 %v18532_v7 }
 0x918   :  { %13294 = vmatpush1.bf16.msra.mxu1 %v18491_v53  ;;  %15907 = vmatpush3.bf16.msra.mxu0 %v18533_v23  ;;  %v13565_v23 = vld [vmem:[%s24150_s4 + $0x3] ss:$0 sm:$0xff] }
 0x919   :  { %13295 = vmatprep.subr.bf16.mxu1 %v18496_v25  ;;  %15908 = vmatprep.subr.bf16.mxu0 %v18534_v51 }
 0x91c   :  { %13296 = vmatpush1.bf16.msra.mxu1 %v18494_v18  ;;  %15909 = vmatpush3.bf16.msra.mxu0 %v18535_v19  ;;  %v12400_v18 = vrot.slane %v15228_v21, %v24222_v48  ;;  %v18541_v48 = vld [vmem:[%s24149_s3 + $0x630] ss:$12 sps:$4 sm:$0xff]  }
 0x91d   :  { %13297 = vmatprep.subr.bf16.mxu1 %v18499_v30  ;;  %15910 = vmatprep.subr.bf16.mxu0 %v18536_v11  ;;  %v24227_v30 = vld [vmem:[#allocation6_spill] sm:$0xff]  ;;  %v13775_v11 = vld [vmem:[%s24150_s4 + $0x4] ss:$0 sm:$0xff] }
 0x920   :  { %13298 = vmatpush1.bf16.msra.mxu1 %v18497_v8  ;;  %15911 = vmatpush3.bf16.msra.mxu0 %v18537_v58  ;;  %v12404_v8 = vrot.slane %v15228_v21, %v24227_v30 }
 0x921   :  { %13299 = vmatprep.subr.bf16.mxu1 %v18502_v45  ;;  %15912 = vmatprep.subr.bf16.mxu0 %v18538_v26 }
 0x924   :  { %13300 = vmatpush1.bf16.msra.mxu1 %v18500_v50  ;;  %15913 = vmatpush3.bf16.msra.mxu0 %v18539_v35 }
 0x925   :  { %13301 = vmatprep.subr.bf16.mxu1 %v18505_v32  ;;  %15980 = vmatprep.subr.bf16.mxu0 %v24192_v63 }
 0x928   :  { %13302 = vmatpush1.bf16.msra.mxu1 %v18503_v61 }
 0x929   :  { %13303 = vmatprep.subr.bf16.mxu1 %v18508_v1 }
 0x92c   :  { %13304 = vmatpush1.bf16.msra.mxu1 %v18506_v12 }
 0x92d   :  { %13305 = vmatprep.subr.bf16.mxu1 %v18511_v31 }
 0x930   :  { %13306 = vmatpush1.bf16.msra.mxu1 %v18509_v54 }
 0x931   :  { %13307 = vmatprep.subr.bf16.mxu1 %v18514_v47 }
 0x934   :  { %13308 = vmatpush1.bf16.msra.mxu1 %v18512_v59  ;;  %v18540_v59 = vld [vmem:[%s24149_s3 + $0x618] ss:$12 sps:$4 sm:$0xff]  }
 0x935   :  { %13309 = vmatprep.subr.bf16.mxu1 %v18517_v29 }
 0x938   :  { %13310 = vmatpush1.bf16.msra.mxu1 %v18515_v62 }
 0x939   :  { %13311 = vmatprep.subr.bf16.mxu1 %v18520_v38  ;;  %v18542_v38 = vld [vmem:[%s24149_s3 + $0x648] ss:$12 sps:$4 sm:$0xff]  }
 0x93c   :  { %13312 = vmatpush1.bf16.msra.mxu1 %v18518_v37 }
 0x93d   :  { %13322 = vmatprep.subr.bf16.mxu1 %v18523_v15  ;;  %v18543_v15 = vld [vmem:[%s24149_s3 + $0x660] ss:$12 sps:$4 sm:$0xff]  }
 0x93f   :  { %13314 = vmatmul.mubr.bf16.vlgmr.msra.gmra.mrb[44].mxu1 %v23917_v14 }
 0x940   :  { %13323 = vmatpush1.bf16.msra.mxu1 %v18521_v41  ;;  %13354 = vmatprep.mubr.bf16.mxu1 %v24225_v4  ;;  %v18544_v41 = vld [vmem:[%s24149_s3 + $0x678] ss:$12 sps:$4 sm:$0xff]   ;;  %v18545_v4 = vld [vmem:[%s24149_s3 + $0x690] ss:$12 sps:$4 sm:$0xff]  }
 0x94b   :  { %15376 = vmatmul.mubr.msk.bf16.vlgmr.msra.gmra.mrb[44].mxu1 %vm4075_vm0, %v12197_v40 }
 0x992   :  { %v15846_v17 = vpop.f32.mrb[76].mxu0 }
 0x993   :  { %v15847_v43 = vpop.f32.mrb[77].mxu0 }
 0x994   :  { %v15848_v52 = vadd.f32 %v15847_v43, %v15846_v17  ;;  %v15849_v46 = vpop.f32.mrb[78].mxu0 }
 0x995   :  { %v15850_v9 = vpop.f32.mrb[79].mxu0 }
 0x996   :  { %v13398_v60 = vadd.f32 %v15848_v52, %v12408_v28 }
 0x9b2   :  { %v15868_v24 = vpop.f32.mrb[80].mxu0 }
 0x9b3   :  { %v15869_v14 = vpop.f32.mrb[81].mxu0 }
 0x9b4   :  { %v15870_v5 = vadd.f32 %v15869_v14, %v15868_v24  ;;  %v15871_v42 = vpop.f32.mrb[82].mxu0 }
 0x9b5   :  { %v15872_v33 = vpop.f32.mrb[83].mxu0 }
 0x9b6   :  { %v13438_v36 = vadd.f32 %v15870_v5, %v13398_v60 }
 0x9d2   :  { %v15890_v49 = vpop.f32.mrb[84].mxu0 }
 0x9d3   :  { %v15891_v40 = vpop.f32.mrb[85].mxu0 }
 0x9d4   :  { %v15892_v0 = vadd.f32 %v15891_v40, %v15890_v49  ;;  %v15893_v39 = vpop.f32.mrb[86].mxu0 }
 0x9d5   :  { %v15894_v20 = vpop.f32.mrb[87].mxu0 }
 0x9d6   :  { %v13478_v22 = vadd.f32 %v15892_v0, %v13438_v36 }
 0x9da   :  { %v13517_v34 = vpop.f32.mrb[88].mxu0 }
 0x9db   :  { %v13518_v13 = vadd.f32 %v13517_v34, %v13478_v22  ;;  %v15978_v55 = vpop.f32.mrb[89].mxu0 }
 0x9dc   :  { %v13520_v53 = vpop.f32.mrb[90].mxu0 }
 0x9dd   :  { %v15979_v25 = vpop.f32.mrb[91].mxu0  ;;  %v13525_v62 = vmax.f32 %v13518_v13, 0.0 }
 0x9df   :  { %v13528_v37 = vpack.c.bf16 %v13525_v62, %v13525_v62 }
 0xa1e   :  { %v13356_v45 = vpop.f32.mrb[44].mxu1 }
 0xa1f   :  { %v16256_v50 = vadd.f32 %v13356_v45, %v12400_v18  ;;  %v13358_v32 = vpop.f32.mrb[45].mxu1 }
 0xa20   :  { %v16257_v61 = vadd.f32 %v13358_v32, %v12404_v8  ;;  %v13360_v1 = vpop.f32.mrb[46].mxu1 }
 0xa21   :  { %v13523_v12 = vmax.f32 %v16256_v50, 0.0  ;;  %v13361_v31 = vpop.f32.mrb[47].mxu1 }
 0xa22   :  { %v13524_v54 = vmax.f32 %v16257_v61, 0.0 }
 0xa23   :  { %v13526_v29 = vpack.c.bf16 %v13523_v12, %v13523_v12 }
 0xa24   :  { %v13527_v47 = vpack.c.bf16 %v13524_v54, %v13524_v54 }
 0xa26   :  { %13709 = vmatprep.mubr.bf16.mxu0 %v13527_v47 }
 0xa27   :  { %13710 = vmatmul.mubr.bf16.vlgmr.msra.gmra.mrb[92].mxu0 %v13526_v29 }
 0xa28   :  { %15981 = vmatpush3.bf16.msra.mxu0 %v18540_v59  ;;  %15984 = vmatprep.mubr.msk.bf16.mxu0 %vm18579_vm1, %v24192_v63 }
 0xa29   :  { %15982 = vmatprep.subr.bf16.mxu0 %v24192_v63 }
 0xa2c   :  { %15983 = vmatpush3.bf16.msra.mxu0 %v18541_v48 }
 0xa2d   :  { %15988 = vmatprep.subr.bf16.mxu0 %v24192_v63 }
 0xa2f   :  { %15985 = vmatmul.mubr.msk.bf16.vlgmr.msra.gmra.mrb[96].mxu0 %vm9601_vm2, %v13528_v37 }
 0xa30   :  { %15989 = vmatpush3.bf16.msra.mxu0 %v18542_v38  ;;  %16004 = vmatprep.mubr.msk.bf16.mxu0 %vm18579_vm1, %v24192_v63 }
 0xa31   :  { %15990 = vmatprep.subr.bf16.mxu0 %v24192_v63 }
 0xa34   :  { %15991 = vmatpush3.bf16.msra.mxu0 %v18543_v15 }
 0xa35   :  { %15992 = vmatprep.subr.bf16.mxu0 %v24192_v63 }
 0xa38   :  { %15993 = vmatpush3.bf16.msra.mxu0 %v18544_v41 }
 0xa39   :  { %15994 = vmatprep.subr.bf16.mxu0 %v24192_v63 }
 0xa3c   :  { %15995 = vmatpush3.bf16.msra.mxu0 %v18545_v4 }
 0xa3d   :  { %15996 = vmatprep.subr.bf16.mxu0 %v24192_v63 }
 0xa40   :  { %15997 = vmatpush3.bf16.msra.mxu0 %v18546_v3 }
 0xa41   :  { %15998 = vmatprep.subr.bf16.mxu0 %v24192_v63 }
 0xa44   :  { %15999 = vmatpush3.bf16.msra.mxu0 %v18547_v57 }
 0xa45   :  { %16000 = vmatprep.subr.bf16.mxu0 %v24192_v63 }
 0xa48   :  { %16001 = vmatpush3.bf16.msra.mxu0 %v18548_v27 }
 0xa49   :  { %16002 = vmatprep.subr.bf16.mxu0 %v24192_v63 }
 0xa4c   :  { %16003 = vmatpush3.bf16.msra.mxu0 %v18549_v10 }
 0xafa   :  { %v15914_v16 = vpop.f32.mrb[92].mxu0 }
 0xafb   :  { %v15915_v6 = vpop.f32.mrb[93].mxu0 }
 0xafc   :  { %v15916_v56 = vadd.f32 %v15915_v6, %v15914_v16  ;;  %v15917_v2 = vpop.f32.mrb[94].mxu0 }
 0xafd   :  { %v15918_v7 = vpop.f32.mrb[95].mxu0 }
 0xafe   :  { %v13712_v51 = vadd.f32 %v15916_v56, %v13565_v23 }
 0xb02   :  { %v13751_v19 = vpop.f32.mrb[96].mxu0 }
 0xb03   :  { %v13752_v17 = vadd.f32 %v13751_v19, %v13712_v51  ;;  %v15986_v43 = vpop.f32.mrb[97].mxu0 }
 0xb04   :  { %v13754_v52 = vpop.f32.mrb[98].mxu0 }
 0xb05   :  { %v13757_v63 = vmax.f32 %v13752_v17, 0.0  ;;  %v15987_v46 = vpop.f32.mrb[99].mxu0 }
 0xb07   :  { %v13758_v9 = vpack.c.bf16 %v13757_v63, %v13757_v63 }
 0xb09   :  { %16005 = vmatmul.mubr.bf16.vlgmr.msra.gmra.mrb[100].mxu0 %v13758_v9 }
 0xbdc   :  { %v13858_v58 = vpop.f32.mrb[100].mxu0 }
 0xbdd   :  { %v13859_v26 = vadd.f32 %v13858_v58, %v13775_v11  ;;  %v16006_v35 = vpop.f32.mrb[101].mxu0 }
 0xbde   :  { %v13861_v21 = vpop.f32.mrb[102].mxu0 }
 0xbdf   :  { %v16007_v44 = vpop.f32.mrb[103].mxu0  ;;  %13865 = vst.msk [vmem:[#allocation2] sm:$0x3] %vm13864_vm5, %v13859_v26 }
 0xbe0   :  { %18563 = shalt.err (!%p18560_p4)
}
 0xbe1   :  { %s18564_s4 = scalar_lea.hbm %s24152_s6, 32 }
 0xbe2   :  { %p18565_p5 = scmp.ne.s32.totalorder %s24152_s6, %s18564_s4  ;;  %p18568_p6 = scmp.lt.u32.totalorder %s18564_s4, %s24152_s6 }
 0xbe4   :  { %p18570_p7 = pnand %p18568_p6, %p18565_p5 }
 0xbe6   :  { %18573 = shalt.err (!%p18570_p7)
}
 0xbe7   :  { %13875 = dma.vmem_to_hbm [thread:$0]  %s13873_s11, 32, %s24152_s6, [#allocation3]  }
 0xbe8   :  { %18574 = dma.done.wait [#allocation3], 32  }
 0xbe9   :  { %18575 = vsyncadd [#allocation3], 4294967264 }
 0xbea   :  { %13879 = vsyncpa [#allocation3], 1 }

</bundles_post_ra>
